<compile_context>
chip_gen: v7x
topology: tpu7x:2x2x1
jax: 0.10.0
libtpu: 0.0.40
codegen_flags: <defaults>
</compile_context>

<pallas_src>
import functools
import math

import jax
import jax.numpy as jnp
from jax.experimental import pallas as pl
from jax.experimental.pallas import tpu as pltpu


# ----------------------------------------------------------------------------
# Small helpers
# ----------------------------------------------------------------------------

def _round_up(x, m):
    return (x + m - 1) // m * m


def _pick_lout_tile(lout):
    """Choose (TL, lout_pad).

    TL is a multiple of 128.  Prefer >= 2 lane tiles (so both v7x TensorCores get work
    even at batch 1) while keeping TL large (<= 1024) so the fixed 128-lane halo DMA
    and per-grid-step overhead stay amortized.
    """
    lp = _round_up(lout, 128)
    for tl in (1024, 512, 256, 128):
        if lp % tl == 0 and lp // tl >= 2:
            return tl, lp
    if lp <= 1024:
        return lp, lp
    return 1024, _round_up(lout, 1024)


def _pad_last(a, target):
    cur = a.shape[-1]
    if cur == target:
        return a
    return jnp.pad(a, ((0, 0),) * (a.ndim - 1) + ((0, target - cur),))


# ----------------------------------------------------------------------------
# Pallas kernels
# ----------------------------------------------------------------------------

def _conv_kernel(*refs, keff, tl, relu, res_mode):
    """Fused conv1d tile:  out = [relu]( (W2d @ im2col(x)) * scale + shift ) [+ residual].

    refs = (x_cur, x_halo, w2d, scale, shift, [res, [up_w, up_b]], out)
      x_cur : (Cin_eff, TL)           bf16   current input tile
      x_halo: (Cin_eff, 128)          bf16   next 128 lanes (halo for the tail taps)
      w2d   : (Cout, keff*Cin_eff)    bf16   taps flattened into the contraction dim
      scale : (Cout, 1)               f32    folded BN scale (or 1)
      shift : (Cout, 1)               f32    folded conv-bias + BN shift
      res   : "add" : (Cout, TL) bf16
              "pool": (Cout, TL) uint32 — each lane packs the (even, odd) pre-pool bf16 pair
              "up"  : (Cin_r, TL) bf16, plus up_w (Cout, Cin_r) bf16, up_b (Cout, 1) f32
      out   : (Cout, TL)              bf16

    Note: the residual is added after the ReLU; current call sites never set both
    relu=True and a residual, matching the reference model's ordering.
    """
    x_ref, halo_ref, w_ref, sc_ref, sh_ref = refs[:5]
    o_ref = refs[-1]

    cur = x_ref[...]                                            # (Cin_eff, TL)
    if keff > 1:
        # Aligned-width (TL + 128) concat, then keff shifted views stacked along the
        # channel axis -> one deep contraction instead of keff small dots + VPU adds.
        xfull = jnp.concatenate([cur, halo_ref[...]], axis=1)   # (Cin_eff, TL+128)
        stacked = jnp.concatenate([xfull[:, k:k + tl] for k in range(keff)], axis=0)
    else:
        stacked = cur                                           # (Cin_eff, TL)

    y = jnp.dot(w_ref[...], stacked, preferred_element_type=jnp.float32)
    y = y * sc_ref[...] + sh_ref[...]                           # bias/BN folded affine (f32)
    if relu:
        y = jnp.maximum(y, 0.0)

    if res_mode == "add":
        y = y + refs[5][...].astype(jnp.float32)
    elif res_mode == "pool":
        # MaxPool1d(2,2) of the residual, fused: each uint32 lane holds the two bf16
        # pre-pool samples; unpack with per-lane bit ops (VPU only, no lane shuffles).
        r = refs[5][...]                                        # (Cout, TL) uint32
        even = pltpu.bitcast(r << 16, jnp.float32)              # low 16 bits -> bf16 value
        odd = pltpu.bitcast(r & jnp.uint32(0xFFFF0000), jnp.float32)
        y = y + jnp.maximum(even, odd)
    elif res_mode == "up":
        # 1x1 channel-upsampling conv fused as a second small matmul on the residual.
        r_ref, uw_ref, ub_ref = refs[5], refs[6], refs[7]
        up = jnp.dot(uw_ref[...], r_ref[...], preferred_element_type=jnp.float32)
        y = y + (up + ub_ref[...])

    o_ref[...] = y.astype(o_ref.dtype)


def _head_kernel(x_ref, sc_ref, sh_ref, w_ref, b_ref, o_ref, *, apply_softmax):
    # Fused: BN + ReLU + AdaptiveAvgPool1d(1) + Linear (+ softmax).
    # x_ref: (C, L)  sc/sh: (C, 1)  w_ref: (F, C)  b_ref: (F, 1)  o_ref: (F, 1)
    y = x_ref[...].astype(jnp.float32) * sc_ref[...] + sh_ref[...]
    y = jnp.maximum(y, 0.0)
    pooled = jnp.mean(y, axis=-1, keepdims=True)                      # (C, 1)
    logits = jnp.dot(w_ref[...], pooled,
                     preferred_element_type=jnp.float32) + b_ref[...]  # (F, 1)
    if apply_softmax:
        m = jnp.max(logits, axis=0, keepdims=True)
        e = jnp.exp(logits - m)
        logits = e / jnp.sum(e, axis=0, keepdims=True)
    o_ref[...] = logits


# ----------------------------------------------------------------------------
# pallas_call wrappers
# ----------------------------------------------------------------------------

def conv_fused(x, w, b, *, stride, padding, pre_bn=None, post_bn=None, relu=False,
               residual=None, res_mode=None, up=None):
    """Conv1d (NCL) with fused prologue/epilogue.

    Prologue (single XLA fusion over x): optional inference BatchNorm+ReLU (pre_bn),
    zero padding, and stride-2 even/odd phase split.
    Kernel: K-tap conv as one MXU contraction + bias/BN affine + optional ReLU +
    optional residual (add / fused MaxPool1d(2,2) / fused 1x1 channel upsampling).

    x: (N, Cin, L)  w: (Cout, Cin, K)  b: (Cout,)   ->  (N, Cout, Lout) bf16
    """
    N, Cin, L = x.shape
    Cout, _, K = w.shape
    Lout = (L + 2 * padding - K) // stride + 1
    if residual is None:
        res_mode = None

    TL, lout_pad = _pick_lout_tile(Lout)
    n_lt = lout_pad // TL
    lin_pad = lout_pad + 128            # extra 128-lane granule feeds the halo view

    # ---- prologue glue (BN+ReLU folded into the padding/phase-split pass) ----
    xf = x.astype(jnp.float32)
    if pre_bn is not None:
        xf = xf * pre_bn["scale"].reshape(1, Cin, 1) + pre_bn["shift"].reshape(1, Cin, 1)
        xf = jnp.maximum(xf, 0.0)       # dropout: identity (inference)
    xp = jnp.pad(xf.astype(jnp.bfloat16), ((0, 0), (0, 0), (padding, padding)))

    if stride == 1:
        keff = K
        x_eff, w_eff = xp, w
    elif stride == 2:
        # Fold stride-2 into a stride-1 conv over even/odd phases (2*Cin channels).
        keff = (K + 1) // 2
        xe, xo = xp[:, :, 0::2], xp[:, :, 1::2]
        x_eff = jnp.concatenate([_pad_last(xe, lin_pad), _pad_last(xo, lin_pad)], axis=1)
        we, wo = w[:, :, 0::2], w[:, :, 1::2]
        wo = jnp.pad(wo, ((0, 0), (0, 0), (0, keff - wo.shape[-1])))
        w_eff = jnp.concatenate([we, wo], axis=1)               # (Cout, 2*Cin, keff)
    else:
        raise NotImplementedError("only stride 1 and 2 are used by ConvResNet")

    x_eff = _pad_last(x_eff, lin_pad)
    Cin_eff = x_eff.shape[1]
    # (Cout, keff*Cin_eff): column k*Cin_eff + ci multiplies input tap k, channel ci,
    # matching the in-kernel tap stacking order.
    w2d = jnp.transpose(w_eff, (0, 2, 1)).reshape(Cout, keff * Cin_eff).astype(jnp.bfloat16)

    # Fold conv bias (and BN) into one per-channel affine applied to the f32 accumulator.
    if post_bn is not None:
        scale = post_bn["scale"].astype(jnp.float32)
        shift = b.reshape(Cout, 1).astype(jnp.float32) * scale + post_bn["shift"]
    else:
        scale = jnp.ones((Cout, 1), jnp.float32)
        shift = b.reshape(Cout, 1).astype(jnp.float32)

    inputs = [x_eff, x_eff, w2d, scale, shift]
    in_specs = [
        pl.BlockSpec((None, Cin_eff, TL), lambda n, j: (n, 0, j)),
        pl.BlockSpec((None, Cin_eff, 128),
                     lambda n, j: (n, 0, (j + 1) * (TL // 128))),
        pl.BlockSpec((Cout, keff * Cin_eff), lambda n, j: (0, 0)),
        pl.BlockSpec((Cout, 1), lambda n, j: (0, 0)),
        pl.BlockSpec((Cout, 1), lambda n, j: (0, 0)),
    ]
    res_bytes = 0
    if res_mode == "add":
        assert residual.shape[1] == Cout
        inputs.append(_pad_last(residual.astype(jnp.bfloat16), lout_pad))
        in_specs.append(pl.BlockSpec((None, Cout, TL), lambda n, j: (n, 0, j)))
        res_bytes = Cout * TL * 2
    elif res_mode == "pool":
        assert residual.shape[1] == Cout
        # TODO(synk): odd pre-pool lengths need true adaptive pooling (uneven windows).
        assert residual.shape[-1] == 2 * Lout, "fused pooling needs an even pre-pool length"
        # Pack each (even, odd) pre-pool pair into one uint32 lane (free bitcast view),
        # so the kernel pools in place without an extra HBM pass over the residual.
        r32 = jax.lax.bitcast_convert_type(
            residual.astype(jnp.bfloat16).reshape(N, Cout, Lout, 2), jnp.uint32)
        inputs.append(_pad_last(r32, lout_pad))
        in_specs.append(pl.BlockSpec((None, Cout, TL), lambda n, j: (n, 0, j)))
        res_bytes = Cout * TL * 4
    elif res_mode == "up":
        up_w, up_b = up
        Cin_r = residual.shape[1]
        inputs.extend([
            _pad_last(residual.astype(jnp.bfloat16), lout_pad),
            up_w.reshape(Cout, Cin_r).astype(jnp.bfloat16),
            up_b.reshape(Cout, 1).astype(jnp.float32),
        ])
        in_specs.extend([
            pl.BlockSpec((None, Cin_r, TL), lambda n, j: (n, 0, j)),
            pl.BlockSpec((Cout, Cin_r), lambda n, j: (0, 0)),
            pl.BlockSpec((Cout, 1), lambda n, j: (0, 0)),
        ])
        res_bytes = Cin_r * TL * 2 + Cout * Cin_r * 2

    # Explicit VMEM budget: double-buffered operands + in-kernel im2col stack + f32 acc,
    # clamped to v7x's 64 MiB physical VMEM (v5e/v6e have more headroom but a smaller
    # scoped default, so setting it explicitly helps there too).
    est = 2 * (Cin_eff * (TL + 128) * 2 + Cout * keff * Cin_eff * 2
               + Cout * TL * 2 + res_bytes)
    est += keff * Cin_eff * TL * 2 + Cin_eff * (TL + 128) * 2 + Cout * TL * 4
    vmem_limit = min(max(int(est * 1.5) + (4 << 20), 32 << 20), 64 << 20)

    out = pl.pallas_call(
        functools.partial(_conv_kernel, keff=keff, tl=TL, relu=relu, res_mode=res_mode),
        out_shape=jax.ShapeDtypeStruct((N, Cout, lout_pad), jnp.bfloat16),
        grid=(N, n_lt),
        in_specs=in_specs,
        out_specs=pl.BlockSpec((None, Cout, TL), lambda n, j: (n, 0, j)),
        compiler_params=pltpu.CompilerParams(
            dimension_semantics=("parallel", "parallel"),
            vmem_limit_bytes=vmem_limit),
    )(*inputs)
    return out if lout_pad == Lout else out[:, :, :Lout]


def maxpool_half(x):
    """Fallback XLA pooling (only used if pooling + channel upsampling ever co-occur)."""
    assert x.shape[-1] % 2 == 0
    return jnp.maximum(x[:, :, 0::2], x[:, :, 1::2])


def head(x, bn, fc_w, fc_b, apply_softmax=True):
    """Fused BatchNorm + ReLU + AdaptiveAvgPool1d(1) + Linear (+ softmax)."""
    N, C, L = x.shape
    F = fc_w.shape[0]
    out = pl.pallas_call(
        functools.partial(_head_kernel, apply_softmax=apply_softmax),
        out_shape=jax.ShapeDtypeStruct((N, F, 1), jnp.float32),
        grid=(N,),
        in_specs=[
            pl.BlockSpec((None, C, L), lambda n: (n, 0, 0)),
            pl.BlockSpec((C, 1), lambda n: (0, 0)),
            pl.BlockSpec((C, 1), lambda n: (0, 0)),
            pl.BlockSpec((F, C), lambda n: (0, 0)),
            pl.BlockSpec((F, 1), lambda n: (0, 0)),
        ],
        out_specs=pl.BlockSpec((None, F, 1), lambda n: (n, 0, 0)),
        compiler_params=pltpu.CompilerParams(dimension_semantics=("parallel",)),
    )(x, bn["scale"], bn["shift"], fc_w.astype(jnp.float32),
      fc_b.reshape(F, 1).astype(jnp.float32))
    return out[:, :, 0]


# ----------------------------------------------------------------------------
# Parameters (deterministic init mirroring the torch module shapes)
# ----------------------------------------------------------------------------

def fold_bn_params(gamma, beta, running_mean, running_var, eps=1e-5):
    """Fold BatchNorm1d inference statistics into per-channel scale/shift."""
    scale = gamma / jnp.sqrt(running_var + eps)
    shift = beta - running_mean * scale
    return {"scale": scale.reshape(-1, 1).astype(jnp.float32),
            "shift": shift.reshape(-1, 1).astype(jnp.float32)}


def _init_bn(c, eps=1e-5):
    # PyTorch defaults: gamma=1, beta=0, running_mean=0, running_var=1.
    ones, zeros = jnp.ones((c,), jnp.float32), jnp.zeros((c,), jnp.float32)
    return fold_bn_params(ones, zeros, zeros, ones, eps)


def _init_conv(key, cout, cin, k):
    kw, kb = jax.random.split(key)
    bound = 1.0 / math.sqrt(cin * k)
    w = jax.random.uniform(kw, (cout, cin, k), jnp.float32, -bound, bound)
    b = jax.random.uniform(kb, (cout,), jnp.float32, -bound, bound)
    return w, b


def build_params(key, *, in_channels, h0_channels, out_features, num_blocks):
    keys = iter(jax.random.split(key, 8 + 4 * num_blocks))
    p = {}
    h = h0_channels
    p["conv0"] = _init_conv(next(keys), h, in_channels, 15)
    p["conv1"] = _init_conv(next(keys), h, h, 15)
    p["conv2"] = _init_conv(next(keys), h, h, 15)
    p["bn0"] = _init_bn(h)
    p["bn1"] = _init_bn(h)

    blocks = []
    k = 2
    hidden = h
    for i in range(num_blocks):
        subsample = (i + 1) % 2 == 0
        if i % 4 == 0 and i > 0:
            out_c = 64 * k
            k += 1
        else:
            out_c = hidden
        blk = {
            "stride1": 2 if subsample else 1,
            "bn1": _init_bn(hidden),
            "bn2": _init_bn(out_c),
            "conv1": _init_conv(next(keys), out_c, hidden, 15),
            "conv2": _init_conv(next(keys), out_c, out_c, 15),
        }
        if hidden != out_c:
            blk["up"] = _init_conv(next(keys), out_c, hidden, 1)
        blocks.append(blk)
        hidden = out_c
    p["blocks"] = blocks

    p["bn2"] = _init_bn(hidden)
    kw, kb = jax.random.split(next(keys))
    bound = 1.0 / math.sqrt(hidden)
    p["fc_w"] = jax.random.uniform(kw, (out_features, hidden), jnp.float32, -bound, bound)
    p["fc_b"] = jax.random.uniform(kb, (out_features,), jnp.float32, -bound, bound)
    return p


# ----------------------------------------------------------------------------
# Forward pass (mirrors ConvResNet.forward / ConvResNetBlock.forward, eval mode)
# ----------------------------------------------------------------------------

def block_forward(blk, x):
    res = x
    # bn1 + relu (+ identity dropout) fused into conv1's input glue;
    # conv-bias + bn2 + relu fused into conv1's epilogue.
    h = conv_fused(x, *blk["conv1"], stride=blk["stride1"], padding=7,
                   pre_bn=blk["bn1"], post_bn=blk["bn2"], relu=True)
    pooled = h.shape[-1] != res.shape[-1]
    if "up" in blk:
        if pooled:
            # TODO(synk): pooling and channel upsampling never co-occur in this
            # architecture; fall back to a separate XLA pooling pass if they do.
            res = maxpool_half(res)
        # conv2 + bias + fused 1x1 channel upsampling of the residual + add.
        return conv_fused(h, *blk["conv2"], stride=1, padding=7,
                          residual=res, res_mode="up", up=blk["up"])
    # conv2 + bias + (optionally fused MaxPool1d(2,2) of the) residual add.
    return conv_fused(h, *blk["conv2"], stride=1, padding=7,
                      residual=res, res_mode="pool" if pooled else "add")


def convresnet_forward(params, x, raw=False):
    x = x.astype(jnp.bfloat16)
    a = conv_fused(x, *params["conv0"], stride=1, padding=7,
                   post_bn=params["bn0"], relu=True)         # conv0 + bn0 + relu
    h = conv_fused(a, *params["conv1"], stride=2, padding=7,
                   post_bn=params["bn1"], relu=True)         # conv1 + bn1 + relu (+dropout=id)
    mode = "pool" if h.shape[-1] != a.shape[-1] else "add"
    # top-level channel_upsampling is nn.Identity; conv2 + bias + pooled residual fused.
    y = conv_fused(h, *params["conv2"], stride=1, padding=7, residual=a, res_mode=mode)
    for blk in params["blocks"]:
        y = block_forward(blk, y)
    # bn2 + relu + avgpool + fc (+ softmax unless raw) fused in the head kernel.
    return head(y, params["bn2"], params["fc_w"], params["fc_b"],
                apply_softmax=not raw)


# ----------------------------------------------------------------------------
# Demo
# ----------------------------------------------------------------------------

if __name__ == "__main__":
    key = jax.random.PRNGKey(0)
    kx, kp = jax.random.split(key)

    # Small, shape-consistent config exercising add / pooled / channel-upsampled
    # residual paths: batch=2, in_channels=4, length=16, h0_channels=8,
    # out_features=5, num_blocks=5.
    N, C_IN, L = 2, 4, 16
    H0, OUT_F, NUM_BLOCKS = 8, 5, 5

    x = jax.random.normal(kx, (N, C_IN, L), jnp.float32)
    params = build_params(kp, in_channels=C_IN, h0_channels=H0,
                          out_features=OUT_F, num_blocks=NUM_BLOCKS)

    forward = jax.jit(functools.partial(convresnet_forward, params))
    probs = jax.block_until_ready(forward(x))

    assert probs.shape == (N, OUT_F)
    assert bool(jnp.all(jnp.isfinite(probs)))
    assert bool(jnp.allclose(jnp.sum(probs, axis=-1), 1.0, atol=1e-5))
    print("KERNEL_OK")
</pallas_src>

<mosaic_0001>
module attributes {stable_mosaic.version = 11 : i64} {
  func.func @_conv_kernel(%arg0: i32, %arg1: i32, %arg2: memref<1x4x128xbf16, #tpu.memory_space<vmem>>, %arg3: memref<1x4x128xbf16, #tpu.memory_space<vmem>>, %arg4: memref<8x60xbf16, #tpu.memory_space<vmem>>, %arg5: memref<8x1xf32, #tpu.memory_space<vmem>>, %arg6: memref<8x1xf32, #tpu.memory_space<vmem>>, %arg7: memref<1x8x128xbf16, #tpu.memory_space<vmem>>) attributes {dimension_semantics = [#tpu.dimension_semantics<parallel>, #tpu.dimension_semantics<parallel>], iteration_bounds = array<i64: 2, 1>, scalar_prefetch = 0 : i64, scratch_operands = 0 : i64, tpu.core_type = #tpu.core_type<tc>, window_params = [{transform_indices = @transform_0, window_bounds = array<i64: 1, 4, 128>}, {transform_indices = @transform_1, window_bounds = array<i64: 1, 4, 128>}, {pipeline_mode = #tpu.pipeline_mode<synchronous>, transform_indices = @transform_2, window_bounds = array<i64: 8, 60>}, {pipeline_mode = #tpu.pipeline_mode<synchronous>, transform_indices = @transform_3, window_bounds = array<i64: 8, 1>}, {pipeline_mode = #tpu.pipeline_mode<synchronous>, transform_indices = @transform_4, window_bounds = array<i64: 8, 1>}, {transform_indices = @transform_5, window_bounds = array<i64: 1, 8, 128>}]} {
    %c0 = arith.constant 0 : index
    %c0_0 = arith.constant 0 : index
    %c0_1 = arith.constant 0 : index
    %0 = vector.load %arg2[%c0, %c0_0, %c0_1] : memref<1x4x128xbf16, #tpu.memory_space<vmem>>, vector<1x4x128xbf16>
    %1 = vector.shape_cast %0 : vector<1x4x128xbf16> to vector<4x128xbf16>
    %c0_2 = arith.constant 0 : index
    %c0_3 = arith.constant 0 : index
    %c0_4 = arith.constant 0 : index
    %2 = vector.load %arg3[%c0_2, %c0_3, %c0_4] : memref<1x4x128xbf16, #tpu.memory_space<vmem>>, vector<1x4x128xbf16>
    %3 = vector.shape_cast %2 : vector<1x4x128xbf16> to vector<4x128xbf16>
    %4 = tpu.concatenate %1, %3 in 1 : vector<4x128xbf16>, vector<4x128xbf16> -> vector<4x256xbf16>
    %5 = vector.extract_strided_slice %4 {offsets = [0, 0], sizes = [4, 128], strides = [1, 1]} : vector<4x256xbf16> to vector<4x128xbf16>
    %6 = vector.extract_strided_slice %4 {offsets = [0, 1], sizes = [4, 128], strides = [1, 1]} : vector<4x256xbf16> to vector<4x128xbf16>
    %7 = vector.extract_strided_slice %4 {offsets = [0, 2], sizes = [4, 128], strides = [1, 1]} : vector<4x256xbf16> to vector<4x128xbf16>
    %8 = vector.extract_strided_slice %4 {offsets = [0, 3], sizes = [4, 128], strides = [1, 1]} : vector<4x256xbf16> to vector<4x128xbf16>
    %9 = vector.extract_strided_slice %4 {offsets = [0, 4], sizes = [4, 128], strides = [1, 1]} : vector<4x256xbf16> to vector<4x128xbf16>
    %10 = vector.extract_strided_slice %4 {offsets = [0, 5], sizes = [4, 128], strides = [1, 1]} : vector<4x256xbf16> to vector<4x128xbf16>
    %11 = vector.extract_strided_slice %4 {offsets = [0, 6], sizes = [4, 128], strides = [1, 1]} : vector<4x256xbf16> to vector<4x128xbf16>
    %12 = vector.extract_strided_slice %4 {offsets = [0, 7], sizes = [4, 128], strides = [1, 1]} : vector<4x256xbf16> to vector<4x128xbf16>
    %13 = vector.extract_strided_slice %4 {offsets = [0, 8], sizes = [4, 128], strides = [1, 1]} : vector<4x256xbf16> to vector<4x128xbf16>
    %14 = vector.extract_strided_slice %4 {offsets = [0, 9], sizes = [4, 128], strides = [1, 1]} : vector<4x256xbf16> to vector<4x128xbf16>
    %15 = vector.extract_strided_slice %4 {offsets = [0, 10], sizes = [4, 128], strides = [1, 1]} : vector<4x256xbf16> to vector<4x128xbf16>
    %16 = vector.extract_strided_slice %4 {offsets = [0, 11], sizes = [4, 128], strides = [1, 1]} : vector<4x256xbf16> to vector<4x128xbf16>
    %17 = vector.extract_strided_slice %4 {offsets = [0, 12], sizes = [4, 128], strides = [1, 1]} : vector<4x256xbf16> to vector<4x128xbf16>
    %18 = vector.extract_strided_slice %4 {offsets = [0, 13], sizes = [4, 128], strides = [1, 1]} : vector<4x256xbf16> to vector<4x128xbf16>
    %19 = vector.extract_strided_slice %4 {offsets = [0, 14], sizes = [4, 128], strides = [1, 1]} : vector<4x256xbf16> to vector<4x128xbf16>
    %20 = tpu.concatenate %5, %6, %7, %8, %9, %10, %11, %12, %13, %14, %15, %16, %17, %18, %19 in 0 : vector<4x128xbf16>, vector<4x128xbf16>, vector<4x128xbf16>, vector<4x128xbf16>, vector<4x128xbf16>, vector<4x128xbf16>, vector<4x128xbf16>, vector<4x128xbf16>, vector<4x128xbf16>, vector<4x128xbf16>, vector<4x128xbf16>, vector<4x128xbf16>, vector<4x128xbf16>, vector<4x128xbf16>, vector<4x128xbf16> -> vector<60x128xbf16>
    %c0_5 = arith.constant 0 : index
    %c0_6 = arith.constant 0 : index
    %21 = vector.load %arg4[%c0_5, %c0_6] : memref<8x60xbf16, #tpu.memory_space<vmem>>, vector<8x60xbf16>
    %cst = arith.constant dense<0.000000e+00> : vector<8x128xf32>
    %22 = tpu.matmul %21, %20, %cst {dimension_numbers = #tpu.dot_dimension_numbers<[1], [0], [0], [1], [0, 0, 1, 1], [], []>} : vector<8x60xbf16>, vector<60x128xbf16>, vector<8x128xf32> -> vector<8x128xf32>
    %c0_7 = arith.constant 0 : index
    %c0_8 = arith.constant 0 : index
    %23 = vector.load %arg5[%c0_7, %c0_8] : memref<8x1xf32, #tpu.memory_space<vmem>>, vector<8x1xf32>
    %24 = vector.broadcast %23 : vector<8x1xf32> to vector<8x128xf32>
    %25 = arith.mulf %22, %24 : vector<8x128xf32>
    %c0_9 = arith.constant 0 : index
    %c0_10 = arith.constant 0 : index
    %26 = vector.load %arg6[%c0_9, %c0_10] : memref<8x1xf32, #tpu.memory_space<vmem>>, vector<8x1xf32>
    %27 = vector.broadcast %26 : vector<8x1xf32> to vector<8x128xf32>
    %28 = arith.addf %25, %27 : vector<8x128xf32>
    %cst_11 = arith.constant 0.000000e+00 : f32
    %29 = vector.broadcast %cst_11 : f32 to vector<8x128xf32>
    %30 = arith.maximumf %28, %29 : vector<8x128xf32>
    %31 = arith.truncf %30 : vector<8x128xf32> to vector<8x128xbf16>
    %c0_12 = arith.constant 0 : index
    %c0_13 = arith.constant 0 : index
    %c0_14 = arith.constant 0 : index
    %32 = vector.load %arg7[%c0_12, %c0_13, %c0_14] : memref<1x8x128xbf16, #tpu.memory_space<vmem>>, vector<1x8x128xbf16>
    %33 = vector.shape_cast %32 : vector<1x8x128xbf16> to vector<8x128xbf16>
    %34 = vector.shape_cast %31 : vector<8x128xbf16> to vector<1x8x128xbf16>
    tpu.vector_store %arg7[%c0_12, %c0_13, %c0_14], %34 {strides = array<i32>} : memref<1x8x128xbf16, #tpu.memory_space<vmem>>, vector<1x8x128xbf16>,
    return
  }
  func.func @transform_0(%arg0: i32, %arg1: i32) -> (i32, i32, i32) {
    %c0_i32 = arith.constant 0 : i32
    %c0_i32_0 = arith.constant 0 : i32
    return %arg0, %c0_i32, %arg1 : i32, i32, i32
  }
  func.func @transform_1(%arg0: i32, %arg1: i32) -> (i32, i32, i32) {
    %c1_i32 = arith.constant 1 : i32
    %0 = arith.addi %arg1, %c1_i32 : i32
    %c1_i32_0 = arith.constant 1 : i32
    %1 = arith.muli %0, %c1_i32_0 : i32
    %c0_i32 = arith.constant 0 : i32
    %c0_i32_1 = arith.constant 0 : i32
    return %arg0, %c0_i32, %1 : i32, i32, i32
  }
  func.func @transform_2(%arg0: i32, %arg1: i32) -> (i32, i32) {
    %c0_i32 = arith.constant 0 : i32
    %c0_i32_0 = arith.constant 0 : i32
    %c0_i32_1 = arith.constant 0 : i32
    return %c0_i32, %c0_i32_0 : i32, i32
  }
  func.func @transform_3(%arg0: i32, %arg1: i32) -> (i32, i32) {
    %c0_i32 = arith.constant 0 : i32
    %c0_i32_0 = arith.constant 0 : i32
    %c0_i32_1 = arith.constant 0 : i32
    return %c0_i32, %c0_i32_0 : i32, i32
  }
  func.func @transform_4(%arg0: i32, %arg1: i32) -> (i32, i32) {
    %c0_i32 = arith.constant 0 : i32
    %c0_i32_0 = arith.constant 0 : i32
    %c0_i32_1 = arith.constant 0 : i32
    return %c0_i32, %c0_i32_0 : i32, i32
  }
  func.func @transform_5(%arg0: i32, %arg1: i32) -> (i32, i32, i32) {
    %c0_i32 = arith.constant 0 : i32
    %c0_i32_0 = arith.constant 0 : i32
    return %arg0, %c0_i32, %arg1 : i32, i32, i32
  }
}

module attributes {stable_mosaic.version = 11 : i64} {
  func.func @_conv_kernel(%arg0: i32, %arg1: i32, %arg2: memref<1x16x128xbf16, #tpu.memory_space<vmem>>, %arg3: memref<1x16x128xbf16, #tpu.memory_space<vmem>>, %arg4: memref<8x128xbf16, #tpu.memory_space<vmem>>, %arg5: memref<8x1xf32, #tpu.memory_space<vmem>>, %arg6: memref<8x1xf32, #tpu.memory_space<vmem>>, %arg7: memref<1x8x128xbf16, #tpu.memory_space<vmem>>) attributes {dimension_semantics = [#tpu.dimension_semantics<parallel>, #tpu.dimension_semantics<parallel>], iteration_bounds = array<i64: 2, 1>, scalar_prefetch = 0 : i64, scratch_operands = 0 : i64, tpu.core_type = #tpu.core_type<tc>, window_params = [{transform_indices = @transform_0, window_bounds = array<i64: 1, 16, 128>}, {transform_indices = @transform_1, window_bounds = array<i64: 1, 16, 128>}, {pipeline_mode = #tpu.pipeline_mode<synchronous>, transform_indices = @transform_2, window_bounds = array<i64: 8, 128>}, {pipeline_mode = #tpu.pipeline_mode<synchronous>, transform_indices = @transform_3, window_bounds = array<i64: 8, 1>}, {pipeline_mode = #tpu.pipeline_mode<synchronous>, transform_indices = @transform_4, window_bounds = array<i64: 8, 1>}, {transform_indices = @transform_5, window_bounds = array<i64: 1, 8, 128>}]} {
    %c0 = arith.constant 0 : index
    %c0_0 = arith.constant 0 : index
    %c0_1 = arith.constant 0 : index
    %0 = vector.load %arg2[%c0, %c0_0, %c0_1] : memref<1x16x128xbf16, #tpu.memory_space<vmem>>, vector<1x16x128xbf16>
    %1 = vector.shape_cast %0 : vector<1x16x128xbf16> to vector<16x128xbf16>
    %c0_2 = arith.constant 0 : index
    %c0_3 = arith.constant 0 : index
    %c0_4 = arith.constant 0 : index
    %2 = vector.load %arg3[%c0_2, %c0_3, %c0_4] : memref<1x16x128xbf16, #tpu.memory_space<vmem>>, vector<1x16x128xbf16>
    %3 = vector.shape_cast %2 : vector<1x16x128xbf16> to vector<16x128xbf16>
    %4 = tpu.concatenate %1, %3 in 1 : vector<16x128xbf16>, vector<16x128xbf16> -> vector<16x256xbf16>
    %5 = vector.extract_strided_slice %4 {offsets = [0, 0], sizes = [16, 128], strides = [1, 1]} : vector<16x256xbf16> to vector<16x128xbf16>
    %6 = vector.extract_strided_slice %4 {offsets = [0, 1], sizes = [16, 128], strides = [1, 1]} : vector<16x256xbf16> to vector<16x128xbf16>
    %7 = vector.extract_strided_slice %4 {offsets = [0, 2], sizes = [16, 128], strides = [1, 1]} : vector<16x256xbf16> to vector<16x128xbf16>
    %8 = vector.extract_strided_slice %4 {offsets = [0, 3], sizes = [16, 128], strides = [1, 1]} : vector<16x256xbf16> to vector<16x128xbf16>
    %9 = vector.extract_strided_slice %4 {offsets = [0, 4], sizes = [16, 128], strides = [1, 1]} : vector<16x256xbf16> to vector<16x128xbf16>
    %10 = vector.extract_strided_slice %4 {offsets = [0, 5], sizes = [16, 128], strides = [1, 1]} : vector<16x256xbf16> to vector<16x128xbf16>
    %11 = vector.extract_strided_slice %4 {offsets = [0, 6], sizes = [16, 128], strides = [1, 1]} : vector<16x256xbf16> to vector<16x128xbf16>
    %12 = vector.extract_strided_slice %4 {offsets = [0, 7], sizes = [16, 128], strides = [1, 1]} : vector<16x256xbf16> to vector<16x128xbf16>
    %13 = tpu.concatenate %5, %6, %7, %8, %9, %10, %11, %12 in 0 : vector<16x128xbf16>, vector<16x128xbf16>, vector<16x128xbf16>, vector<16x128xbf16>, vector<16x128xbf16>, vector<16x128xbf16>, vector<16x128xbf16>, vector<16x128xbf16> -> vector<128x128xbf16>
    %c0_5 = arith.constant 0 : index
    %c0_6 = arith.constant 0 : index
    %14 = vector.load %arg4[%c0_5, %c0_6] : memref<8x128xbf16, #tpu.memory_space<vmem>>, vector<8x128xbf16>
    %cst = arith.constant dense<0.000000e+00> : vector<8x128xf32>
    %15 = tpu.matmul %14, %13, %cst {dimension_numbers = #tpu.dot_dimension_numbers<[1], [0], [0], [1], [0, 0, 1, 1], [], []>} : vector<8x128xbf16>, vector<128x128xbf16>, vector<8x128xf32> -> vector<8x128xf32>
    %c0_7 = arith.constant 0 : index
    %c0_8 = arith.constant 0 : index
    %16 = vector.load %arg5[%c0_7, %c0_8] : memref<8x1xf32, #tpu.memory_space<vmem>>, vector<8x1xf32>
    %17 = vector.broadcast %16 : vector<8x1xf32> to vector<8x128xf32>
    %18 = arith.mulf %15, %17 : vector<8x128xf32>
    %c0_9 = arith.constant 0 : index
    %c0_10 = arith.constant 0 : index
    %19 = vector.load %arg6[%c0_9, %c0_10] : memref<8x1xf32, #tpu.memory_space<vmem>>, vector<8x1xf32>
    %20 = vector.broadcast %19 : vector<8x1xf32> to vector<8x128xf32>
    %21 = arith.addf %18, %20 : vector<8x128xf32>
    %cst_11 = arith.constant 0.000000e+00 : f32
    %22 = vector.broadcast %cst_11 : f32 to vector<8x128xf32>
    %23 = arith.maximumf %21, %22 : vector<8x128xf32>
    %24 = arith.truncf %23 : vector<8x128xf32> to vector<8x128xbf16>
    %c0_12 = arith.constant 0 : index
    %c0_13 = arith.constant 0 : index
    %c0_14 = arith.constant 0 : index
    %25 = vector.load %arg7[%c0_12, %c0_13, %c0_14] : memref<1x8x128xbf16, #tpu.memory_space<vmem>>, vector<1x8x128xbf16>
    %26 = vector.shape_cast %25 : vector<1x8x128xbf16> to vector<8x128xbf16>
    %27 = vector.shape_cast %24 : vector<8x128xbf16> to vector<1x8x128xbf16>
    tpu.vector_store %arg7[%c0_12, %c0_13, %c0_14], %27 {strides = array<i32>} : memref<1x8x128xbf16, #tpu.memory_space<vmem>>, vector<1x8x128xbf16>,
    return
  }
  func.func @transform_0(%arg0: i32, %arg1: i32) -> (i32, i32, i32) {
    %c0_i32 = arith.constant 0 : i32
    %c0_i32_0 = arith.constant 0 : i32
    return %arg0, %c0_i32, %arg1 : i32, i32, i32
  }
  func.func @transform_1(%arg0: i32, %arg1: i32) -> (i32, i32, i32) {
    %c1_i32 = arith.constant 1 : i32
    %0 = arith.addi %arg1, %c1_i32 : i32
    %c1_i32_0 = arith.constant 1 : i32
    %1 = arith.muli %0, %c1_i32_0 : i32
    %c0_i32 = arith.constant 0 : i32
    %c0_i32_1 = arith.constant 0 : i32
    return %arg0, %c0_i32, %1 : i32, i32, i32
  }
  func.func @transform_2(%arg0: i32, %arg1: i32) -> (i32, i32) {
    %c0_i32 = arith.constant 0 : i32
    %c0_i32_0 = arith.constant 0 : i32
    %c0_i32_1 = arith.constant 0 : i32
    return %c0_i32, %c0_i32_0 : i32, i32
  }
  func.func @transform_3(%arg0: i32, %arg1: i32) -> (i32, i32) {
    %c0_i32 = arith.constant 0 : i32
    %c0_i32_0 = arith.constant 0 : i32
    %c0_i32_1 = arith.constant 0 : i32
    return %c0_i32, %c0_i32_0 : i32, i32
  }
  func.func @transform_4(%arg0: i32, %arg1: i32) -> (i32, i32) {
    %c0_i32 = arith.constant 0 : i32
    %c0_i32_0 = arith.constant 0 : i32
    %c0_i32_1 = arith.constant 0 : i32
    return %c0_i32, %c0_i32_0 : i32, i32
  }
  func.func @transform_5(%arg0: i32, %arg1: i32) -> (i32, i32, i32) {
    %c0_i32 = arith.constant 0 : i32
    %c0_i32_0 = arith.constant 0 : i32
    return %arg0, %c0_i32, %arg1 : i32, i32, i32
  }
}

module attributes {stable_mosaic.version = 11 : i64} {
  func.func @_conv_kernel(%arg0: i32, %arg1: i32, %arg2: memref<1x8x128xbf16, #tpu.memory_space<vmem>>, %arg3: memref<1x8x128xbf16, #tpu.memory_space<vmem>>, %arg4: memref<8x120xbf16, #tpu.memory_space<vmem>>, %arg5: memref<8x1xf32, #tpu.memory_space<vmem>>, %arg6: memref<8x1xf32, #tpu.memory_space<vmem>>, %arg7: memref<1x8x128xi32, #tpu.memory_space<vmem>>, %arg8: memref<1x8x128xbf16, #tpu.memory_space<vmem>>) attributes {dimension_semantics = [#tpu.dimension_semantics<parallel>, #tpu.dimension_semantics<parallel>], iteration_bounds = array<i64: 2, 1>, scalar_prefetch = 0 : i64, scratch_operands = 0 : i64, tpu.core_type = #tpu.core_type<tc>, window_params = [{transform_indices = @transform_0, window_bounds = array<i64: 1, 8, 128>}, {transform_indices = @transform_1, window_bounds = array<i64: 1, 8, 128>}, {pipeline_mode = #tpu.pipeline_mode<synchronous>, transform_indices = @transform_2, window_bounds = array<i64: 8, 120>}, {pipeline_mode = #tpu.pipeline_mode<synchronous>, transform_indices = @transform_3, window_bounds = array<i64: 8, 1>}, {pipeline_mode = #tpu.pipeline_mode<synchronous>, transform_indices = @transform_4, window_bounds = array<i64: 8, 1>}, {transform_indices = @transform_5, window_bounds = array<i64: 1, 8, 128>}, {transform_indices = @transform_6, window_bounds = array<i64: 1, 8, 128>}]} {
    %c0 = arith.constant 0 : index
    %c0_0 = arith.constant 0 : index
    %c0_1 = arith.constant 0 : index
    %0 = vector.load %arg2[%c0, %c0_0, %c0_1] : memref<1x8x128xbf16, #tpu.memory_space<vmem>>, vector<1x8x128xbf16>
    %1 = vector.shape_cast %0 : vector<1x8x128xbf16> to vector<8x128xbf16>
    %c0_2 = arith.constant 0 : index
    %c0_3 = arith.constant 0 : index
    %c0_4 = arith.constant 0 : index
    %2 = vector.load %arg3[%c0_2, %c0_3, %c0_4] : memref<1x8x128xbf16, #tpu.memory_space<vmem>>, vector<1x8x128xbf16>
    %3 = vector.shape_cast %2 : vector<1x8x128xbf16> to vector<8x128xbf16>
    %4 = tpu.concatenate %1, %3 in 1 : vector<8x128xbf16>, vector<8x128xbf16> -> vector<8x256xbf16>
    %5 = vector.extract_strided_slice %4 {offsets = [0, 0], sizes = [8, 128], strides = [1, 1]} : vector<8x256xbf16> to vector<8x128xbf16>
    %6 = vector.extract_strided_slice %4 {offsets = [0, 1], sizes = [8, 128], strides = [1, 1]} : vector<8x256xbf16> to vector<8x128xbf16>
    %7 = vector.extract_strided_slice %4 {offsets = [0, 2], sizes = [8, 128], strides = [1, 1]} : vector<8x256xbf16> to vector<8x128xbf16>
    %8 = vector.extract_strided_slice %4 {offsets = [0, 3], sizes = [8, 128], strides = [1, 1]} : vector<8x256xbf16> to vector<8x128xbf16>
    %9 = vector.extract_strided_slice %4 {offsets = [0, 4], sizes = [8, 128], strides = [1, 1]} : vector<8x256xbf16> to vector<8x128xbf16>
    %10 = vector.extract_strided_slice %4 {offsets = [0, 5], sizes = [8, 128], strides = [1, 1]} : vector<8x256xbf16> to vector<8x128xbf16>
    %11 = vector.extract_strided_slice %4 {offsets = [0, 6], sizes = [8, 128], strides = [1, 1]} : vector<8x256xbf16> to vector<8x128xbf16>
    %12 = vector.extract_strided_slice %4 {offsets = [0, 7], sizes = [8, 128], strides = [1, 1]} : vector<8x256xbf16> to vector<8x128xbf16>
    %13 = vector.extract_strided_slice %4 {offsets = [0, 8], sizes = [8, 128], strides = [1, 1]} : vector<8x256xbf16> to vector<8x128xbf16>
    %14 = vector.extract_strided_slice %4 {offsets = [0, 9], sizes = [8, 128], strides = [1, 1]} : vector<8x256xbf16> to vector<8x128xbf16>
    %15 = vector.extract_strided_slice %4 {offsets = [0, 10], sizes = [8, 128], strides = [1, 1]} : vector<8x256xbf16> to vector<8x128xbf16>
    %16 = vector.extract_strided_slice %4 {offsets = [0, 11], sizes = [8, 128], strides = [1, 1]} : vector<8x256xbf16> to vector<8x128xbf16>
    %17 = vector.extract_strided_slice %4 {offsets = [0, 12], sizes = [8, 128], strides = [1, 1]} : vector<8x256xbf16> to vector<8x128xbf16>
    %18 = vector.extract_strided_slice %4 {offsets = [0, 13], sizes = [8, 128], strides = [1, 1]} : vector<8x256xbf16> to vector<8x128xbf16>
    %19 = vector.extract_strided_slice %4 {offsets = [0, 14], sizes = [8, 128], strides = [1, 1]} : vector<8x256xbf16> to vector<8x128xbf16>
    %20 = tpu.concatenate %5, %6, %7, %8, %9, %10, %11, %12, %13, %14, %15, %16, %17, %18, %19 in 0 : vector<8x128xbf16>, vector<8x128xbf16>, vector<8x128xbf16>, vector<8x128xbf16>, vector<8x128xbf16>, vector<8x128xbf16>, vector<8x128xbf16>, vector<8x128xbf16>, vector<8x128xbf16>, vector<8x128xbf16>, vector<8x128xbf16>, vector<8x128xbf16>, vector<8x128xbf16>, vector<8x128xbf16>, vector<8x128xbf16> -> vector<120x128xbf16>
    %c0_5 = arith.constant 0 : index
    %c0_6 = arith.constant 0 : index
    %21 = vector.load %arg4[%c0_5, %c0_6] : memref<8x120xbf16, #tpu.memory_space<vmem>>, vector<8x120xbf16>
    %cst = arith.constant dense<0.000000e+00> : vector<8x128xf32>
    %22 = tpu.matmul %21, %20, %cst {dimension_numbers = #tpu.dot_dimension_numbers<[1], [0], [0], [1], [0, 0, 1, 1], [], []>} : vector<8x120xbf16>, vector<120x128xbf16>, vector<8x128xf32> -> vector<8x128xf32>
    %c0_7 = arith.constant 0 : index
    %c0_8 = arith.constant 0 : index
    %23 = vector.load %arg5[%c0_7, %c0_8] : memref<8x1xf32, #tpu.memory_space<vmem>>, vector<8x1xf32>
    %24 = vector.broadcast %23 : vector<8x1xf32> to vector<8x128xf32>
    %25 = arith.mulf %22, %24 : vector<8x128xf32>
    %c0_9 = arith.constant 0 : index
    %c0_10 = arith.constant 0 : index
    %26 = vector.load %arg6[%c0_9, %c0_10] : memref<8x1xf32, #tpu.memory_space<vmem>>, vector<8x1xf32>
    %27 = vector.broadcast %26 : vector<8x1xf32> to vector<8x128xf32>
    %28 = arith.addf %25, %27 : vector<8x128xf32>
    %c0_11 = arith.constant 0 : index
    %c0_12 = arith.constant 0 : index
    %c0_13 = arith.constant 0 : index
    %29 = vector.load %arg7[%c0_11, %c0_12, %c0_13] : memref<1x8x128xi32, #tpu.memory_space<vmem>>, vector<1x8x128xi32>
    %30 = vector.shape_cast %29 : vector<1x8x128xi32> to vector<8x128xi32>
    %c16_i32 = arith.constant 16 : i32
    %31 = vector.broadcast %c16_i32 : i32 to vector<8x128xi32>
    %32 = arith.shli %30, %31 : vector<8x128xi32>
    %33 = tpu.bitcast %32 : vector<8x128xi32> -> vector<8x128xf32>
    %c-65536_i32 = arith.constant -65536 : i32
    %34 = vector.broadcast %c-65536_i32 : i32 to vector<8x128xi32>
    %35 = arith.andi %30, %34 : vector<8x128xi32>
    %36 = tpu.bitcast %35 : vector<8x128xi32> -> vector<8x128xf32>
    %37 = arith.maximumf %33, %36 : vector<8x128xf32>
    %38 = arith.addf %28, %37 : vector<8x128xf32>
    %39 = arith.truncf %38 : vector<8x128xf32> to vector<8x128xbf16>
    %c0_14 = arith.constant 0 : index
    %c0_15 = arith.constant 0 : index
    %c0_16 = arith.constant 0 : index
    %40 = vector.load %arg8[%c0_14, %c0_15, %c0_16] : memref<1x8x128xbf16, #tpu.memory_space<vmem>>, vector<1x8x128xbf16>
    %41 = vector.shape_cast %40 : vector<1x8x128xbf16> to vector<8x128xbf16>
    %42 = vector.shape_cast %39 : vector<8x128xbf16> to vector<1x8x128xbf16>
    tpu.vector_store %arg8[%c0_14, %c0_15, %c0_16], %42 {strides = array<i32>} : memref<1x8x128xbf16, #tpu.memory_space<vmem>>, vector<1x8x128xbf16>,
    return
  }
  func.func @transform_0(%arg0: i32, %arg1: i32) -> (i32, i32, i32) {
    %c0_i32 = arith.constant 0 : i32
    %c0_i32_0 = arith.constant 0 : i32
    return %arg0, %c0_i32, %arg1 : i32, i32, i32
  }
  func.func @transform_1(%arg0: i32, %arg1: i32) -> (i32, i32, i32) {
    %c1_i32 = arith.constant 1 : i32
    %0 = arith.addi %arg1, %c1_i32 : i32
    %c1_i32_0 = arith.constant 1 : i32
    %1 = arith.muli %0, %c1_i32_0 : i32
    %c0_i32 = arith.constant 0 : i32
    %c0_i32_1 = arith.constant 0 : i32
    return %arg0, %c0_i32, %1 : i32, i32, i32
  }
  func.func @transform_2(%arg0: i32, %arg1: i32) -> (i32, i32) {
    %c0_i32 = arith.constant 0 : i32
    %c0_i32_0 = arith.constant 0 : i32
    %c0_i32_1 = arith.constant 0 : i32
    return %c0_i32, %c0_i32_0 : i32, i32
  }
  func.func @transform_3(%arg0: i32, %arg1: i32) -> (i32, i32) {
    %c0_i32 = arith.constant 0 : i32
    %c0_i32_0 = arith.constant 0 : i32
    %c0_i32_1 = arith.constant 0 : i32
    return %c0_i32, %c0_i32_0 : i32, i32
  }
  func.func @transform_4(%arg0: i32, %arg1: i32) -> (i32, i32) {
    %c0_i32 = arith.constant 0 : i32
    %c0_i32_0 = arith.constant 0 : i32
    %c0_i32_1 = arith.constant 0 : i32
    return %c0_i32, %c0_i32_0 : i32, i32
  }
  func.func @transform_5(%arg0: i32, %arg1: i32) -> (i32, i32, i32) {
    %c0_i32 = arith.constant 0 : i32
    %c0_i32_0 = arith.constant 0 : i32
    return %arg0, %c0_i32, %arg1 : i32, i32, i32
  }
  func.func @transform_6(%arg0: i32, %arg1: i32) -> (i32, i32, i32) {
    %c0_i32 = arith.constant 0 : i32
    %c0_i32_0 = arith.constant 0 : i32
    return %arg0, %c0_i32, %arg1 : i32, i32, i32
  }
}

module attributes {stable_mosaic.version = 11 : i64} {
  func.func @_conv_kernel(%arg0: i32, %arg1: i32, %arg2: memref<1x8x128xbf16, #tpu.memory_space<vmem>>, %arg3: memref<1x8x128xbf16, #tpu.memory_space<vmem>>, %arg4: memref<8x120xbf16, #tpu.memory_space<vmem>>, %arg5: memref<8x1xf32, #tpu.memory_space<vmem>>, %arg6: memref<8x1xf32, #tpu.memory_space<vmem>>, %arg7: memref<1x8x128xbf16, #tpu.memory_space<vmem>>) attributes {dimension_semantics = [#tpu.dimension_semantics<parallel>, #tpu.dimension_semantics<parallel>], iteration_bounds = array<i64: 2, 1>, scalar_prefetch = 0 : i64, scratch_operands = 0 : i64, tpu.core_type = #tpu.core_type<tc>, window_params = [{transform_indices = @transform_0, window_bounds = array<i64: 1, 8, 128>}, {transform_indices = @transform_1, window_bounds = array<i64: 1, 8, 128>}, {pipeline_mode = #tpu.pipeline_mode<synchronous>, transform_indices = @transform_2, window_bounds = array<i64: 8, 120>}, {pipeline_mode = #tpu.pipeline_mode<synchronous>, transform_indices = @transform_3, window_bounds = array<i64: 8, 1>}, {pipeline_mode = #tpu.pipeline_mode<synchronous>, transform_indices = @transform_4, window_bounds = array<i64: 8, 1>}, {transform_indices = @transform_5, window_bounds = array<i64: 1, 8, 128>}]} {
    %c0 = arith.constant 0 : index
    %c0_0 = arith.constant 0 : index
    %c0_1 = arith.constant 0 : index
    %0 = vector.load %arg2[%c0, %c0_0, %c0_1] : memref<1x8x128xbf16, #tpu.memory_space<vmem>>, vector<1x8x128xbf16>
    %1 = vector.shape_cast %0 : vector<1x8x128xbf16> to vector<8x128xbf16>
    %c0_2 = arith.constant 0 : index
    %c0_3 = arith.constant 0 : index
    %c0_4 = arith.constant 0 : index
    %2 = vector.load %arg3[%c0_2, %c0_3, %c0_4] : memref<1x8x128xbf16, #tpu.memory_space<vmem>>, vector<1x8x128xbf16>
    %3 = vector.shape_cast %2 : vector<1x8x128xbf16> to vector<8x128xbf16>
    %4 = tpu.concatenate %1, %3 in 1 : vector<8x128xbf16>, vector<8x128xbf16> -> vector<8x256xbf16>
    %5 = vector.extract_strided_slice %4 {offsets = [0, 0], sizes = [8, 128], strides = [1, 1]} : vector<8x256xbf16> to vector<8x128xbf16>
    %6 = vector.extract_strided_slice %4 {offsets = [0, 1], sizes = [8, 128], strides = [1, 1]} : vector<8x256xbf16> to vector<8x128xbf16>
    %7 = vector.extract_strided_slice %4 {offsets = [0, 2], sizes = [8, 128], strides = [1, 1]} : vector<8x256xbf16> to vector<8x128xbf16>
    %8 = vector.extract_strided_slice %4 {offsets = [0, 3], sizes = [8, 128], strides = [1, 1]} : vector<8x256xbf16> to vector<8x128xbf16>
    %9 = vector.extract_strided_slice %4 {offsets = [0, 4], sizes = [8, 128], strides = [1, 1]} : vector<8x256xbf16> to vector<8x128xbf16>
    %10 = vector.extract_strided_slice %4 {offsets = [0, 5], sizes = [8, 128], strides = [1, 1]} : vector<8x256xbf16> to vector<8x128xbf16>
    %11 = vector.extract_strided_slice %4 {offsets = [0, 6], sizes = [8, 128], strides = [1, 1]} : vector<8x256xbf16> to vector<8x128xbf16>
    %12 = vector.extract_strided_slice %4 {offsets = [0, 7], sizes = [8, 128], strides = [1, 1]} : vector<8x256xbf16> to vector<8x128xbf16>
    %13 = vector.extract_strided_slice %4 {offsets = [0, 8], sizes = [8, 128], strides = [1, 1]} : vector<8x256xbf16> to vector<8x128xbf16>
    %14 = vector.extract_strided_slice %4 {offsets = [0, 9], sizes = [8, 128], strides = [1, 1]} : vector<8x256xbf16> to vector<8x128xbf16>
    %15 = vector.extract_strided_slice %4 {offsets = [0, 10], sizes = [8, 128], strides = [1, 1]} : vector<8x256xbf16> to vector<8x128xbf16>
    %16 = vector.extract_strided_slice %4 {offsets = [0, 11], sizes = [8, 128], strides = [1, 1]} : vector<8x256xbf16> to vector<8x128xbf16>
    %17 = vector.extract_strided_slice %4 {offsets = [0, 12], sizes = [8, 128], strides = [1, 1]} : vector<8x256xbf16> to vector<8x128xbf16>
    %18 = vector.extract_strided_slice %4 {offsets = [0, 13], sizes = [8, 128], strides = [1, 1]} : vector<8x256xbf16> to vector<8x128xbf16>
    %19 = vector.extract_strided_slice %4 {offsets = [0, 14], sizes = [8, 128], strides = [1, 1]} : vector<8x256xbf16> to vector<8x128xbf16>
    %20 = tpu.concatenate %5, %6, %7, %8, %9, %10, %11, %12, %13, %14, %15, %16, %17, %18, %19 in 0 : vector<8x128xbf16>, vector<8x128xbf16>, vector<8x128xbf16>, vector<8x128xbf16>, vector<8x128xbf16>, vector<8x128xbf16>, vector<8x128xbf16>, vector<8x128xbf16>, vector<8x128xbf16>, vector<8x128xbf16>, vector<8x128xbf16>, vector<8x128xbf16>, vector<8x128xbf16>, vector<8x128xbf16>, vector<8x128xbf16> -> vector<120x128xbf16>
    %c0_5 = arith.constant 0 : index
    %c0_6 = arith.constant 0 : index
    %21 = vector.load %arg4[%c0_5, %c0_6] : memref<8x120xbf16, #tpu.memory_space<vmem>>, vector<8x120xbf16>
    %cst = arith.constant dense<0.000000e+00> : vector<8x128xf32>
    %22 = tpu.matmul %21, %20, %cst {dimension_numbers = #tpu.dot_dimension_numbers<[1], [0], [0], [1], [0, 0, 1, 1], [], []>} : vector<8x120xbf16>, vector<120x128xbf16>, vector<8x128xf32> -> vector<8x128xf32>
    %c0_7 = arith.constant 0 : index
    %c0_8 = arith.constant 0 : index
    %23 = vector.load %arg5[%c0_7, %c0_8] : memref<8x1xf32, #tpu.memory_space<vmem>>, vector<8x1xf32>
    %24 = vector.broadcast %23 : vector<8x1xf32> to vector<8x128xf32>
    %25 = arith.mulf %22, %24 : vector<8x128xf32>
    %c0_9 = arith.constant 0 : index
    %c0_10 = arith.constant 0 : index
    %26 = vector.load %arg6[%c0_9, %c0_10] : memref<8x1xf32, #tpu.memory_space<vmem>>, vector<8x1xf32>
    %27 = vector.broadcast %26 : vector<8x1xf32> to vector<8x128xf32>
    %28 = arith.addf %25, %27 : vector<8x128xf32>
    %cst_11 = arith.constant 0.000000e+00 : f32
    %29 = vector.broadcast %cst_11 : f32 to vector<8x128xf32>
    %30 = arith.maximumf %28, %29 : vector<8x128xf32>
    %31 = arith.truncf %30 : vector<8x128xf32> to vector<8x128xbf16>
    %c0_12 = arith.constant 0 : index
    %c0_13 = arith.constant 0 : index
    %c0_14 = arith.constant 0 : index
    %32 = vector.load %arg7[%c0_12, %c0_13, %c0_14] : memref<1x8x128xbf16, #tpu.memory_space<vmem>>, vector<1x8x128xbf16>
    %33 = vector.shape_cast %32 : vector<1x8x128xbf16> to vector<8x128xbf16>
    %34 = vector.shape_cast %31 : vector<8x128xbf16> to vector<1x8x128xbf16>
    tpu.vector_store %arg7[%c0_12, %c0_13, %c0_14], %34 {strides = array<i32>} : memref<1x8x128xbf16, #tpu.memory_space<vmem>>, vector<1x8x128xbf16>,
    return
  }
  func.func @transform_0(%arg0: i32, %arg1: i32) -> (i32, i32, i32) {
    %c0_i32 = arith.constant 0 : i32
    %c0_i32_0 = arith.constant 0 : i32
    return %arg0, %c0_i32, %arg1 : i32, i32, i32
  }
  func.func @transform_1(%arg0: i32, %arg1: i32) -> (i32, i32, i32) {
    %c1_i32 = arith.constant 1 : i32
    %0 = arith.addi %arg1, %c1_i32 : i32
    %c1_i32_0 = arith.constant 1 : i32
    %1 = arith.muli %0, %c1_i32_0 : i32
    %c0_i32 = arith.constant 0 : i32
    %c0_i32_1 = arith.constant 0 : i32
    return %arg0, %c0_i32, %1 : i32, i32, i32
  }
  func.func @transform_2(%arg0: i32, %arg1: i32) -> (i32, i32) {
    %c0_i32 = arith.constant 0 : i32
    %c0_i32_0 = arith.constant 0 : i32
    %c0_i32_1 = arith.constant 0 : i32
    return %c0_i32, %c0_i32_0 : i32, i32
  }
  func.func @transform_3(%arg0: i32, %arg1: i32) -> (i32, i32) {
    %c0_i32 = arith.constant 0 : i32
    %c0_i32_0 = arith.constant 0 : i32
    %c0_i32_1 = arith.constant 0 : i32
    return %c0_i32, %c0_i32_0 : i32, i32
  }
  func.func @transform_4(%arg0: i32, %arg1: i32) -> (i32, i32) {
    %c0_i32 = arith.constant 0 : i32
    %c0_i32_0 = arith.constant 0 : i32
    %c0_i32_1 = arith.constant 0 : i32
    return %c0_i32, %c0_i32_0 : i32, i32
  }
  func.func @transform_5(%arg0: i32, %arg1: i32) -> (i32, i32, i32) {
    %c0_i32 = arith.constant 0 : i32
    %c0_i32_0 = arith.constant 0 : i32
    return %arg0, %c0_i32, %arg1 : i32, i32, i32
  }
}

module attributes {stable_mosaic.version = 11 : i64} {
  func.func @_conv_kernel(%arg0: i32, %arg1: i32, %arg2: memref<1x8x128xbf16, #tpu.memory_space<vmem>>, %arg3: memref<1x8x128xbf16, #tpu.memory_space<vmem>>, %arg4: memref<8x120xbf16, #tpu.memory_space<vmem>>, %arg5: memref<8x1xf32, #tpu.memory_space<vmem>>, %arg6: memref<8x1xf32, #tpu.memory_space<vmem>>, %arg7: memref<1x8x128xbf16, #tpu.memory_space<vmem>>, %arg8: memref<1x8x128xbf16, #tpu.memory_space<vmem>>) attributes {dimension_semantics = [#tpu.dimension_semantics<parallel>, #tpu.dimension_semantics<parallel>], iteration_bounds = array<i64: 2, 1>, scalar_prefetch = 0 : i64, scratch_operands = 0 : i64, tpu.core_type = #tpu.core_type<tc>, window_params = [{transform_indices = @transform_0, window_bounds = array<i64: 1, 8, 128>}, {transform_indices = @transform_1, window_bounds = array<i64: 1, 8, 128>}, {pipeline_mode = #tpu.pipeline_mode<synchronous>, transform_indices = @transform_2, window_bounds = array<i64: 8, 120>}, {pipeline_mode = #tpu.pipeline_mode<synchronous>, transform_indices = @transform_3, window_bounds = array<i64: 8, 1>}, {pipeline_mode = #tpu.pipeline_mode<synchronous>, transform_indices = @transform_4, window_bounds = array<i64: 8, 1>}, {transform_indices = @transform_5, window_bounds = array<i64: 1, 8, 128>}, {transform_indices = @transform_6, window_bounds = array<i64: 1, 8, 128>}]} {
    %c0 = arith.constant 0 : index
    %c0_0 = arith.constant 0 : index
    %c0_1 = arith.constant 0 : index
    %0 = vector.load %arg2[%c0, %c0_0, %c0_1] : memref<1x8x128xbf16, #tpu.memory_space<vmem>>, vector<1x8x128xbf16>
    %1 = vector.shape_cast %0 : vector<1x8x128xbf16> to vector<8x128xbf16>
    %c0_2 = arith.constant 0 : index
    %c0_3 = arith.constant 0 : index
    %c0_4 = arith.constant 0 : index
    %2 = vector.load %arg3[%c0_2, %c0_3, %c0_4] : memref<1x8x128xbf16, #tpu.memory_space<vmem>>, vector<1x8x128xbf16>
    %3 = vector.shape_cast %2 : vector<1x8x128xbf16> to vector<8x128xbf16>
    %4 = tpu.concatenate %1, %3 in 1 : vector<8x128xbf16>, vector<8x128xbf16> -> vector<8x256xbf16>
    %5 = vector.extract_strided_slice %4 {offsets = [0, 0], sizes = [8, 128], strides = [1, 1]} : vector<8x256xbf16> to vector<8x128xbf16>
    %6 = vector.extract_strided_slice %4 {offsets = [0, 1], sizes = [8, 128], strides = [1, 1]} : vector<8x256xbf16> to vector<8x128xbf16>
    %7 = vector.extract_strided_slice %4 {offsets = [0, 2], sizes = [8, 128], strides = [1, 1]} : vector<8x256xbf16> to vector<8x128xbf16>
    %8 = vector.extract_strided_slice %4 {offsets = [0, 3], sizes = [8, 128], strides = [1, 1]} : vector<8x256xbf16> to vector<8x128xbf16>
    %9 = vector.extract_strided_slice %4 {offsets = [0, 4], sizes = [8, 128], strides = [1, 1]} : vector<8x256xbf16> to vector<8x128xbf16>
    %10 = vector.extract_strided_slice %4 {offsets = [0, 5], sizes = [8, 128], strides = [1, 1]} : vector<8x256xbf16> to vector<8x128xbf16>
    %11 = vector.extract_strided_slice %4 {offsets = [0, 6], sizes = [8, 128], strides = [1, 1]} : vector<8x256xbf16> to vector<8x128xbf16>
    %12 = vector.extract_strided_slice %4 {offsets = [0, 7], sizes = [8, 128], strides = [1, 1]} : vector<8x256xbf16> to vector<8x128xbf16>
    %13 = vector.extract_strided_slice %4 {offsets = [0, 8], sizes = [8, 128], strides = [1, 1]} : vector<8x256xbf16> to vector<8x128xbf16>
    %14 = vector.extract_strided_slice %4 {offsets = [0, 9], sizes = [8, 128], strides = [1, 1]} : vector<8x256xbf16> to vector<8x128xbf16>
    %15 = vector.extract_strided_slice %4 {offsets = [0, 10], sizes = [8, 128], strides = [1, 1]} : vector<8x256xbf16> to vector<8x128xbf16>
    %16 = vector.extract_strided_slice %4 {offsets = [0, 11], sizes = [8, 128], strides = [1, 1]} : vector<8x256xbf16> to vector<8x128xbf16>
    %17 = vector.extract_strided_slice %4 {offsets = [0, 12], sizes = [8, 128], strides = [1, 1]} : vector<8x256xbf16> to vector<8x128xbf16>
    %18 = vector.extract_strided_slice %4 {offsets = [0, 13], sizes = [8, 128], strides = [1, 1]} : vector<8x256xbf16> to vector<8x128xbf16>
    %19 = vector.extract_strided_slice %4 {offsets = [0, 14], sizes = [8, 128], strides = [1, 1]} : vector<8x256xbf16> to vector<8x128xbf16>
    %20 = tpu.concatenate %5, %6, %7, %8, %9, %10, %11, %12, %13, %14, %15, %16, %17, %18, %19 in 0 : vector<8x128xbf16>, vector<8x128xbf16>, vector<8x128xbf16>, vector<8x128xbf16>, vector<8x128xbf16>, vector<8x128xbf16>, vector<8x128xbf16>, vector<8x128xbf16>, vector<8x128xbf16>, vector<8x128xbf16>, vector<8x128xbf16>, vector<8x128xbf16>, vector<8x128xbf16>, vector<8x128xbf16>, vector<8x128xbf16> -> vector<120x128xbf16>
    %c0_5 = arith.constant 0 : index
    %c0_6 = arith.constant 0 : index
    %21 = vector.load %arg4[%c0_5, %c0_6] : memref<8x120xbf16, #tpu.memory_space<vmem>>, vector<8x120xbf16>
    %cst = arith.constant dense<0.000000e+00> : vector<8x128xf32>
    %22 = tpu.matmul %21, %20, %cst {dimension_numbers = #tpu.dot_dimension_numbers<[1], [0], [0], [1], [0, 0, 1, 1], [], []>} : vector<8x120xbf16>, vector<120x128xbf16>, vector<8x128xf32> -> vector<8x128xf32>
    %c0_7 = arith.constant 0 : index
    %c0_8 = arith.constant 0 : index
    %23 = vector.load %arg5[%c0_7, %c0_8] : memref<8x1xf32, #tpu.memory_space<vmem>>, vector<8x1xf32>
    %24 = vector.broadcast %23 : vector<8x1xf32> to vector<8x128xf32>
    %25 = arith.mulf %22, %24 : vector<8x128xf32>
    %c0_9 = arith.constant 0 : index
    %c0_10 = arith.constant 0 : index
    %26 = vector.load %arg6[%c0_9, %c0_10] : memref<8x1xf32, #tpu.memory_space<vmem>>, vector<8x1xf32>
    %27 = vector.broadcast %26 : vector<8x1xf32> to vector<8x128xf32>
    %28 = arith.addf %25, %27 : vector<8x128xf32>
    %c0_11 = arith.constant 0 : index
    %c0_12 = arith.constant 0 : index
    %c0_13 = arith.constant 0 : index
    %29 = vector.load %arg7[%c0_11, %c0_12, %c0_13] : memref<1x8x128xbf16, #tpu.memory_space<vmem>>, vector<1x8x128xbf16>
    %30 = vector.shape_cast %29 : vector<1x8x128xbf16> to vector<8x128xbf16>
    %31 = arith.extf %30 : vector<8x128xbf16> to vector<8x128xf32>
    %32 = arith.addf %28, %31 : vector<8x128xf32>
    %33 = arith.truncf %32 : vector<8x128xf32> to vector<8x128xbf16>
    %c0_14 = arith.constant 0 : index
    %c0_15 = arith.constant 0 : index
    %c0_16 = arith.constant 0 : index
    %34 = vector.load %arg8[%c0_14, %c0_15, %c0_16] : memref<1x8x128xbf16, #tpu.memory_space<vmem>>, vector<1x8x128xbf16>
    %35 = vector.shape_cast %34 : vector<1x8x128xbf16> to vector<8x128xbf16>
    %36 = vector.shape_cast %33 : vector<8x128xbf16> to vector<1x8x128xbf16>
    tpu.vector_store %arg8[%c0_14, %c0_15, %c0_16], %36 {strides = array<i32>} : memref<1x8x128xbf16, #tpu.memory_space<vmem>>, vector<1x8x128xbf16>,
    return
  }
  func.func @transform_0(%arg0: i32, %arg1: i32) -> (i32, i32, i32) {
    %c0_i32 = arith.constant 0 : i32
    %c0_i32_0 = arith.constant 0 : i32
    return %arg0, %c0_i32, %arg1 : i32, i32, i32
  }
  func.func @transform_1(%arg0: i32, %arg1: i32) -> (i32, i32, i32) {
    %c1_i32 = arith.constant 1 : i32
    %0 = arith.addi %arg1, %c1_i32 : i32
    %c1_i32_0 = arith.constant 1 : i32
    %1 = arith.muli %0, %c1_i32_0 : i32
    %c0_i32 = arith.constant 0 : i32
    %c0_i32_1 = arith.constant 0 : i32
    return %arg0, %c0_i32, %1 : i32, i32, i32
  }
  func.func @transform_2(%arg0: i32, %arg1: i32) -> (i32, i32) {
    %c0_i32 = arith.constant 0 : i32
    %c0_i32_0 = arith.constant 0 : i32
    %c0_i32_1 = arith.constant 0 : i32
    return %c0_i32, %c0_i32_0 : i32, i32
  }
  func.func @transform_3(%arg0: i32, %arg1: i32) -> (i32, i32) {
    %c0_i32 = arith.constant 0 : i32
    %c0_i32_0 = arith.constant 0 : i32
    %c0_i32_1 = arith.constant 0 : i32
    return %c0_i32, %c0_i32_0 : i32, i32
  }
  func.func @transform_4(%arg0: i32, %arg1: i32) -> (i32, i32) {
    %c0_i32 = arith.constant 0 : i32
    %c0_i32_0 = arith.constant 0 : i32
    %c0_i32_1 = arith.constant 0 : i32
    return %c0_i32, %c0_i32_0 : i32, i32
  }
  func.func @transform_5(%arg0: i32, %arg1: i32) -> (i32, i32, i32) {
    %c0_i32 = arith.constant 0 : i32
    %c0_i32_0 = arith.constant 0 : i32
    return %arg0, %c0_i32, %arg1 : i32, i32, i32
  }
  func.func @transform_6(%arg0: i32, %arg1: i32) -> (i32, i32, i32) {
    %c0_i32 = arith.constant 0 : i32
    %c0_i32_0 = arith.constant 0 : i32
    return %arg0, %c0_i32, %arg1 : i32, i32, i32
  }
}

module attributes {stable_mosaic.version = 11 : i64} {
  func.func @_conv_kernel(%arg0: i32, %arg1: i32, %arg2: memref<1x8x128xbf16, #tpu.memory_space<vmem>>, %arg3: memref<1x8x128xbf16, #tpu.memory_space<vmem>>, %arg4: memref<128x120xbf16, #tpu.memory_space<vmem>>, %arg5: memref<128x1xf32, #tpu.memory_space<vmem>>, %arg6: memref<128x1xf32, #tpu.memory_space<vmem>>, %arg7: memref<1x128x128xbf16, #tpu.memory_space<vmem>>) attributes {dimension_semantics = [#tpu.dimension_semantics<parallel>, #tpu.dimension_semantics<parallel>], iteration_bounds = array<i64: 2, 1>, scalar_prefetch = 0 : i64, scratch_operands = 0 : i64, tpu.core_type = #tpu.core_type<tc>, window_params = [{transform_indices = @transform_0, window_bounds = array<i64: 1, 8, 128>}, {transform_indices = @transform_1, window_bounds = array<i64: 1, 8, 128>}, {pipeline_mode = #tpu.pipeline_mode<synchronous>, transform_indices = @transform_2, window_bounds = array<i64: 128, 120>}, {pipeline_mode = #tpu.pipeline_mode<synchronous>, transform_indices = @transform_3, window_bounds = array<i64: 128, 1>}, {pipeline_mode = #tpu.pipeline_mode<synchronous>, transform_indices = @transform_4, window_bounds = array<i64: 128, 1>}, {transform_indices = @transform_5, window_bounds = array<i64: 1, 128, 128>}]} {
    %c0 = arith.constant 0 : index
    %c0_0 = arith.constant 0 : index
    %c0_1 = arith.constant 0 : index
    %0 = vector.load %arg2[%c0, %c0_0, %c0_1] : memref<1x8x128xbf16, #tpu.memory_space<vmem>>, vector<1x8x128xbf16>
    %1 = vector.shape_cast %0 : vector<1x8x128xbf16> to vector<8x128xbf16>
    %c0_2 = arith.constant 0 : index
    %c0_3 = arith.constant 0 : index
    %c0_4 = arith.constant 0 : index
    %2 = vector.load %arg3[%c0_2, %c0_3, %c0_4] : memref<1x8x128xbf16, #tpu.memory_space<vmem>>, vector<1x8x128xbf16>
    %3 = vector.shape_cast %2 : vector<1x8x128xbf16> to vector<8x128xbf16>
    %4 = tpu.concatenate %1, %3 in 1 : vector<8x128xbf16>, vector<8x128xbf16> -> vector<8x256xbf16>
    %5 = vector.extract_strided_slice %4 {offsets = [0, 0], sizes = [8, 128], strides = [1, 1]} : vector<8x256xbf16> to vector<8x128xbf16>
    %6 = vector.extract_strided_slice %4 {offsets = [0, 1], sizes = [8, 128], strides = [1, 1]} : vector<8x256xbf16> to vector<8x128xbf16>
    %7 = vector.extract_strided_slice %4 {offsets = [0, 2], sizes = [8, 128], strides = [1, 1]} : vector<8x256xbf16> to vector<8x128xbf16>
    %8 = vector.extract_strided_slice %4 {offsets = [0, 3], sizes = [8, 128], strides = [1, 1]} : vector<8x256xbf16> to vector<8x128xbf16>
    %9 = vector.extract_strided_slice %4 {offsets = [0, 4], sizes = [8, 128], strides = [1, 1]} : vector<8x256xbf16> to vector<8x128xbf16>
    %10 = vector.extract_strided_slice %4 {offsets = [0, 5], sizes = [8, 128], strides = [1, 1]} : vector<8x256xbf16> to vector<8x128xbf16>
    %11 = vector.extract_strided_slice %4 {offsets = [0, 6], sizes = [8, 128], strides = [1, 1]} : vector<8x256xbf16> to vector<8x128xbf16>
    %12 = vector.extract_strided_slice %4 {offsets = [0, 7], sizes = [8, 128], strides = [1, 1]} : vector<8x256xbf16> to vector<8x128xbf16>
    %13 = vector.extract_strided_slice %4 {offsets = [0, 8], sizes = [8, 128], strides = [1, 1]} : vector<8x256xbf16> to vector<8x128xbf16>
    %14 = vector.extract_strided_slice %4 {offsets = [0, 9], sizes = [8, 128], strides = [1, 1]} : vector<8x256xbf16> to vector<8x128xbf16>
    %15 = vector.extract_strided_slice %4 {offsets = [0, 10], sizes = [8, 128], strides = [1, 1]} : vector<8x256xbf16> to vector<8x128xbf16>
    %16 = vector.extract_strided_slice %4 {offsets = [0, 11], sizes = [8, 128], strides = [1, 1]} : vector<8x256xbf16> to vector<8x128xbf16>
    %17 = vector.extract_strided_slice %4 {offsets = [0, 12], sizes = [8, 128], strides = [1, 1]} : vector<8x256xbf16> to vector<8x128xbf16>
    %18 = vector.extract_strided_slice %4 {offsets = [0, 13], sizes = [8, 128], strides = [1, 1]} : vector<8x256xbf16> to vector<8x128xbf16>
    %19 = vector.extract_strided_slice %4 {offsets = [0, 14], sizes = [8, 128], strides = [1, 1]} : vector<8x256xbf16> to vector<8x128xbf16>
    %20 = tpu.concatenate %5, %6, %7, %8, %9, %10, %11, %12, %13, %14, %15, %16, %17, %18, %19 in 0 : vector<8x128xbf16>, vector<8x128xbf16>, vector<8x128xbf16>, vector<8x128xbf16>, vector<8x128xbf16>, vector<8x128xbf16>, vector<8x128xbf16>, vector<8x128xbf16>, vector<8x128xbf16>, vector<8x128xbf16>, vector<8x128xbf16>, vector<8x128xbf16>, vector<8x128xbf16>, vector<8x128xbf16>, vector<8x128xbf16> -> vector<120x128xbf16>
    %c0_5 = arith.constant 0 : index
    %c0_6 = arith.constant 0 : index
    %21 = vector.load %arg4[%c0_5, %c0_6] : memref<128x120xbf16, #tpu.memory_space<vmem>>, vector<128x120xbf16>
    %cst = arith.constant dense<0.000000e+00> : vector<128x128xf32>
    %22 = tpu.matmul %21, %20, %cst {dimension_numbers = #tpu.dot_dimension_numbers<[1], [0], [0], [1], [0, 0, 1, 1], [], []>} : vector<128x120xbf16>, vector<120x128xbf16>, vector<128x128xf32> -> vector<128x128xf32>
    %c0_7 = arith.constant 0 : index
    %c0_8 = arith.constant 0 : index
    %23 = vector.load %arg5[%c0_7, %c0_8] : memref<128x1xf32, #tpu.memory_space<vmem>>, vector<128x1xf32>
    %24 = vector.broadcast %23 : vector<128x1xf32> to vector<128x128xf32>
    %25 = arith.mulf %22, %24 : vector<128x128xf32>
    %c0_9 = arith.constant 0 : index
    %c0_10 = arith.constant 0 : index
    %26 = vector.load %arg6[%c0_9, %c0_10] : memref<128x1xf32, #tpu.memory_space<vmem>>, vector<128x1xf32>
    %27 = vector.broadcast %26 : vector<128x1xf32> to vector<128x128xf32>
    %28 = arith.addf %25, %27 : vector<128x128xf32>
    %cst_11 = arith.constant 0.000000e+00 : f32
    %29 = vector.broadcast %cst_11 : f32 to vector<128x128xf32>
    %30 = arith.maximumf %28, %29 : vector<128x128xf32>
    %31 = arith.truncf %30 : vector<128x128xf32> to vector<128x128xbf16>
    %c0_12 = arith.constant 0 : index
    %c0_13 = arith.constant 0 : index
    %c0_14 = arith.constant 0 : index
    %32 = vector.load %arg7[%c0_12, %c0_13, %c0_14] : memref<1x128x128xbf16, #tpu.memory_space<vmem>>, vector<1x128x128xbf16>
    %33 = vector.shape_cast %32 : vector<1x128x128xbf16> to vector<128x128xbf16>
    %34 = vector.shape_cast %31 : vector<128x128xbf16> to vector<1x128x128xbf16>
    tpu.vector_store %arg7[%c0_12, %c0_13, %c0_14], %34 {strides = array<i32>} : memref<1x128x128xbf16, #tpu.memory_space<vmem>>, vector<1x128x128xbf16>,
    return
  }
  func.func @transform_0(%arg0: i32, %arg1: i32) -> (i32, i32, i32) {
    %c0_i32 = arith.constant 0 : i32
    %c0_i32_0 = arith.constant 0 : i32
    return %arg0, %c0_i32, %arg1 : i32, i32, i32
  }
  func.func @transform_1(%arg0: i32, %arg1: i32) -> (i32, i32, i32) {
    %c1_i32 = arith.constant 1 : i32
    %0 = arith.addi %arg1, %c1_i32 : i32
    %c1_i32_0 = arith.constant 1 : i32
    %1 = arith.muli %0, %c1_i32_0 : i32
    %c0_i32 = arith.constant 0 : i32
    %c0_i32_1 = arith.constant 0 : i32
    return %arg0, %c0_i32, %1 : i32, i32, i32
  }
  func.func @transform_2(%arg0: i32, %arg1: i32) -> (i32, i32) {
    %c0_i32 = arith.constant 0 : i32
    %c0_i32_0 = arith.constant 0 : i32
    %c0_i32_1 = arith.constant 0 : i32
    return %c0_i32, %c0_i32_0 : i32, i32
  }
  func.func @transform_3(%arg0: i32, %arg1: i32) -> (i32, i32) {
    %c0_i32 = arith.constant 0 : i32
    %c0_i32_0 = arith.constant 0 : i32
    %c0_i32_1 = arith.constant 0 : i32
    return %c0_i32, %c0_i32_0 : i32, i32
  }
  func.func @transform_4(%arg0: i32, %arg1: i32) -> (i32, i32) {
    %c0_i32 = arith.constant 0 : i32
    %c0_i32_0 = arith.constant 0 : i32
    %c0_i32_1 = arith.constant 0 : i32
    return %c0_i32, %c0_i32_0 : i32, i32
  }
  func.func @transform_5(%arg0: i32, %arg1: i32) -> (i32, i32, i32) {
    %c0_i32 = arith.constant 0 : i32
    %c0_i32_0 = arith.constant 0 : i32
    return %arg0, %c0_i32, %arg1 : i32, i32, i32
  }
}

module attributes {stable_mosaic.version = 11 : i64} {
  func.func @_head_kernel(%arg0: i32, %arg1: memref<1x128x2xbf16, #tpu.memory_space<vmem>>, %arg2: memref<128x1xf32, #tpu.memory_space<vmem>>, %arg3: memref<128x1xf32, #tpu.memory_space<vmem>>, %arg4: memref<5x128xf32, #tpu.memory_space<vmem>>, %arg5: memref<5x1xf32, #tpu.memory_space<vmem>>, %arg6: memref<1x5x1xf32, #tpu.memory_space<vmem>>) attributes {dimension_semantics = [#tpu.dimension_semantics<parallel>], iteration_bounds = array<i64: 2>, scalar_prefetch = 0 : i64, scratch_operands = 0 : i64, tpu.core_type = #tpu.core_type<tc>, window_params = [{transform_indices = @transform_0, window_bounds = array<i64: 1, 128, 2>}, {pipeline_mode = #tpu.pipeline_mode<synchronous>, transform_indices = @transform_1, window_bounds = array<i64: 128, 1>}, {pipeline_mode = #tpu.pipeline_mode<synchronous>, transform_indices = @transform_2, window_bounds = array<i64: 128, 1>}, {pipeline_mode = #tpu.pipeline_mode<synchronous>, transform_indices = @transform_3, window_bounds = array<i64: 5, 128>}, {pipeline_mode = #tpu.pipeline_mode<synchronous>, transform_indices = @transform_4, window_bounds = array<i64: 5, 1>}, {transform_indices = @transform_5, window_bounds = array<i64: 1, 5, 1>}]} {
    %c0 = arith.constant 0 : index
    %c0_0 = arith.constant 0 : index
    %c0_1 = arith.constant 0 : index
    %0 = vector.load %arg1[%c0, %c0_0, %c0_1] : memref<1x128x2xbf16, #tpu.memory_space<vmem>>, vector<1x128x2xbf16>
    %1 = vector.shape_cast %0 : vector<1x128x2xbf16> to vector<128x2xbf16>
    %2 = arith.extf %1 : vector<128x2xbf16> to vector<128x2xf32>
    %c0_2 = arith.constant 0 : index
    %c0_3 = arith.constant 0 : index
    %3 = vector.load %arg2[%c0_2, %c0_3] : memref<128x1xf32, #tpu.memory_space<vmem>>, vector<128x1xf32>
    %4 = vector.broadcast %3 : vector<128x1xf32> to vector<128x2xf32>
    %5 = arith.mulf %2, %4 : vector<128x2xf32>
    %c0_4 = arith.constant 0 : index
    %c0_5 = arith.constant 0 : index
    %6 = vector.load %arg3[%c0_4, %c0_5] : memref<128x1xf32, #tpu.memory_space<vmem>>, vector<128x1xf32>
    %7 = vector.broadcast %6 : vector<128x1xf32> to vector<128x2xf32>
    %8 = arith.addf %5, %7 : vector<128x2xf32>
    %cst = arith.constant 0.000000e+00 : f32
    %9 = vector.broadcast %cst : f32 to vector<128x2xf32>
    %10 = arith.maximumf %8, %9 : vector<128x2xf32>
    %cst_6 = arith.constant dense<0.000000e+00> : vector<128xf32>
    %11 = vector.multi_reduction <add>, %10, %cst_6 [1] : vector<128x2xf32> to vector<128xf32>
    %12 = vector.shape_cast %11 : vector<128xf32> to vector<128x1xf32>
    %cst_7 = arith.constant 2.000000e+00 : f32
    %13 = vector.broadcast %cst_7 : f32 to vector<128x1xf32>
    %14 = arith.divf %12, %13 : vector<128x1xf32>
    %c0_8 = arith.constant 0 : index
    %c0_9 = arith.constant 0 : index
    %15 = vector.load %arg4[%c0_8, %c0_9] : memref<5x128xf32, #tpu.memory_space<vmem>>, vector<5x128xf32>
    %cst_10 = arith.constant dense<0.000000e+00> : vector<5x1xf32>
    %16 = tpu.matmul %15, %14, %cst_10 {dimension_numbers = #tpu.dot_dimension_numbers<[1], [0], [0], [1], [0, 0, 1, 1], [], []>} : vector<5x128xf32>, vector<128x1xf32>, vector<5x1xf32> -> vector<5x1xf32>
    %c0_11 = arith.constant 0 : index
    %c0_12 = arith.constant 0 : index
    %17 = vector.load %arg5[%c0_11, %c0_12] : memref<5x1xf32, #tpu.memory_space<vmem>>, vector<5x1xf32>
    %18 = arith.addf %16, %17 : vector<5x1xf32>
    %cst_13 = arith.constant dense<0xFF800000> : vector<1xf32>
    %19 = vector.multi_reduction <maximumf>, %18, %cst_13 [0] : vector<5x1xf32> to vector<1xf32>
    %20 = vector.shape_cast %19 : vector<1xf32> to vector<1x1xf32>
    %21 = vector.broadcast %20 : vector<1x1xf32> to vector<5x1xf32>
    %22 = arith.subf %18, %21 : vector<5x1xf32>
    %23 = math.exp %22 : vector<5x1xf32>
    %cst_14 = arith.constant dense<0.000000e+00> : vector<1xf32>
    %24 = vector.multi_reduction <add>, %23, %cst_14 [0] : vector<5x1xf32> to vector<1xf32>
    %25 = vector.shape_cast %24 : vector<1xf32> to vector<1x1xf32>
    %26 = vector.broadcast %25 : vector<1x1xf32> to vector<5x1xf32>
    %27 = arith.divf %23, %26 : vector<5x1xf32>
    %c0_15 = arith.constant 0 : index
    %c0_16 = arith.constant 0 : index
    %c0_17 = arith.constant 0 : index
    %28 = vector.load %arg6[%c0_15, %c0_16, %c0_17] : memref<1x5x1xf32, #tpu.memory_space<vmem>>, vector<1x5x1xf32>
    %29 = vector.shape_cast %28 : vector<1x5x1xf32> to vector<5x1xf32>
    %30 = vector.shape_cast %27 : vector<5x1xf32> to vector<1x5x1xf32>
    tpu.vector_store %arg6[%c0_15, %c0_16, %c0_17], %30 {strides = array<i32>} : memref<1x5x1xf32, #tpu.memory_space<vmem>>, vector<1x5x1xf32>,
    return
  }
  func.func @transform_0(%arg0: i32) -> (i32, i32, i32) {
    %c0_i32 = arith.constant 0 : i32
    %c0_i32_0 = arith.constant 0 : i32
    %c0_i32_1 = arith.constant 0 : i32
    return %arg0, %c0_i32, %c0_i32_0 : i32, i32, i32
  }
  func.func @transform_1(%arg0: i32) -> (i32, i32) {
    %c0_i32 = arith.constant 0 : i32
    %c0_i32_0 = arith.constant 0 : i32
    %c0_i32_1 = arith.constant 0 : i32
    return %c0_i32, %c0_i32_0 : i32, i32
  }
  func.func @transform_2(%arg0: i32) -> (i32, i32) {
    %c0_i32 = arith.constant 0 : i32
    %c0_i32_0 = arith.constant 0 : i32
    %c0_i32_1 = arith.constant 0 : i32
    return %c0_i32, %c0_i32_0 : i32, i32
  }
  func.func @transform_3(%arg0: i32) -> (i32, i32) {
    %c0_i32 = arith.constant 0 : i32
    %c0_i32_0 = arith.constant 0 : i32
    %c0_i32_1 = arith.constant 0 : i32
    return %c0_i32, %c0_i32_0 : i32, i32
  }
  func.func @transform_4(%arg0: i32) -> (i32, i32) {
    %c0_i32 = arith.constant 0 : i32
    %c0_i32_0 = arith.constant 0 : i32
    %c0_i32_1 = arith.constant 0 : i32
    return %c0_i32, %c0_i32_0 : i32, i32
  }
  func.func @transform_5(%arg0: i32) -> (i32, i32, i32) {
    %c0_i32 = arith.constant 0 : i32
    %c0_i32_0 = arith.constant 0 : i32
    %c0_i32_1 = arith.constant 0 : i32
    return %arg0, %c0_i32, %c0_i32_0 : i32, i32, i32
  }
}

module attributes {stable_mosaic.version = 11 : i64} {
  func.func @_conv_kernel(%arg0: i32, %arg1: i32, %arg2: memref<1x128x128xbf16, #tpu.memory_space<vmem>>, %arg3: memref<1x128x128xbf16, #tpu.memory_space<vmem>>, %arg4: memref<128x1920xbf16, #tpu.memory_space<vmem>>, %arg5: memref<128x1xf32, #tpu.memory_space<vmem>>, %arg6: memref<128x1xf32, #tpu.memory_space<vmem>>, %arg7: memref<1x8x128xbf16, #tpu.memory_space<vmem>>, %arg8: memref<128x8xbf16, #tpu.memory_space<vmem>>, %arg9: memref<128x1xf32, #tpu.memory_space<vmem>>, %arg10: memref<1x128x128xbf16, #tpu.memory_space<vmem>>) attributes {dimension_semantics = [#tpu.dimension_semantics<parallel>, #tpu.dimension_semantics<parallel>], iteration_bounds = array<i64: 2, 1>, scalar_prefetch = 0 : i64, scratch_operands = 0 : i64, tpu.core_type = #tpu.core_type<tc>, window_params = [{transform_indices = @transform_0, window_bounds = array<i64: 1, 128, 128>}, {transform_indices = @transform_1, window_bounds = array<i64: 1, 128, 128>}, {pipeline_mode = #tpu.pipeline_mode<synchronous>, transform_indices = @transform_2, window_bounds = array<i64: 128, 1920>}, {pipeline_mode = #tpu.pipeline_mode<synchronous>, transform_indices = @transform_3, window_bounds = array<i64: 128, 1>}, {pipeline_mode = #tpu.pipeline_mode<synchronous>, transform_indices = @transform_4, window_bounds = array<i64: 128, 1>}, {transform_indices = @transform_5, window_bounds = array<i64: 1, 8, 128>}, {pipeline_mode = #tpu.pipeline_mode<synchronous>, transform_indices = @transform_6, window_bounds = array<i64: 128, 8>}, {pipeline_mode = #tpu.pipeline_mode<synchronous>, transform_indices = @transform_7, window_bounds = array<i64: 128, 1>}, {transform_indices = @transform_8, window_bounds = array<i64: 1, 128, 128>}]} {
    %c0 = arith.constant 0 : index
    %c0_0 = arith.constant 0 : index
    %c0_1 = arith.constant 0 : index
    %0 = vector.load %arg2[%c0, %c0_0, %c0_1] : memref<1x128x128xbf16, #tpu.memory_space<vmem>>, vector<1x128x128xbf16>
    %1 = vector.shape_cast %0 : vector<1x128x128xbf16> to vector<128x128xbf16>
    %c0_2 = arith.constant 0 : index
    %c0_3 = arith.constant 0 : index
    %c0_4 = arith.constant 0 : index
    %2 = vector.load %arg3[%c0_2, %c0_3, %c0_4] : memref<1x128x128xbf16, #tpu.memory_space<vmem>>, vector<1x128x128xbf16>
    %3 = vector.shape_cast %2 : vector<1x128x128xbf16> to vector<128x128xbf16>
    %4 = tpu.concatenate %1, %3 in 1 : vector<128x128xbf16>, vector<128x128xbf16> -> vector<128x256xbf16>
    %5 = vector.extract_strided_slice %4 {offsets = [0, 0], sizes = [128, 128], strides = [1, 1]} : vector<128x256xbf16> to vector<128x128xbf16>
    %6 = vector.extract_strided_slice %4 {offsets = [0, 1], sizes = [128, 128], strides = [1, 1]} : vector<128x256xbf16> to vector<128x128xbf16>
    %7 = vector.extract_strided_slice %4 {offsets = [0, 2], sizes = [128, 128], strides = [1, 1]} : vector<128x256xbf16> to vector<128x128xbf16>
    %8 = vector.extract_strided_slice %4 {offsets = [0, 3], sizes = [128, 128], strides = [1, 1]} : vector<128x256xbf16> to vector<128x128xbf16>
    %9 = vector.extract_strided_slice %4 {offsets = [0, 4], sizes = [128, 128], strides = [1, 1]} : vector<128x256xbf16> to vector<128x128xbf16>
    %10 = vector.extract_strided_slice %4 {offsets = [0, 5], sizes = [128, 128], strides = [1, 1]} : vector<128x256xbf16> to vector<128x128xbf16>
    %11 = vector.extract_strided_slice %4 {offsets = [0, 6], sizes = [128, 128], strides = [1, 1]} : vector<128x256xbf16> to vector<128x128xbf16>
    %12 = vector.extract_strided_slice %4 {offsets = [0, 7], sizes = [128, 128], strides = [1, 1]} : vector<128x256xbf16> to vector<128x128xbf16>
    %13 = vector.extract_strided_slice %4 {offsets = [0, 8], sizes = [128, 128], strides = [1, 1]} : vector<128x256xbf16> to vector<128x128xbf16>
    %14 = vector.extract_strided_slice %4 {offsets = [0, 9], sizes = [128, 128], strides = [1, 1]} : vector<128x256xbf16> to vector<128x128xbf16>
    %15 = vector.extract_strided_slice %4 {offsets = [0, 10], sizes = [128, 128], strides = [1, 1]} : vector<128x256xbf16> to vector<128x128xbf16>
    %16 = vector.extract_strided_slice %4 {offsets = [0, 11], sizes = [128, 128], strides = [1, 1]} : vector<128x256xbf16> to vector<128x128xbf16>
    %17 = vector.extract_strided_slice %4 {offsets = [0, 12], sizes = [128, 128], strides = [1, 1]} : vector<128x256xbf16> to vector<128x128xbf16>
    %18 = vector.extract_strided_slice %4 {offsets = [0, 13], sizes = [128, 128], strides = [1, 1]} : vector<128x256xbf16> to vector<128x128xbf16>
    %19 = vector.extract_strided_slice %4 {offsets = [0, 14], sizes = [128, 128], strides = [1, 1]} : vector<128x256xbf16> to vector<128x128xbf16>
    %20 = tpu.concatenate %5, %6, %7, %8, %9, %10, %11, %12, %13, %14, %15, %16, %17, %18, %19 in 0 : vector<128x128xbf16>, vector<128x128xbf16>, vector<128x128xbf16>, vector<128x128xbf16>, vector<128x128xbf16>, vector<128x128xbf16>, vector<128x128xbf16>, vector<128x128xbf16>, vector<128x128xbf16>, vector<128x128xbf16>, vector<128x128xbf16>, vector<128x128xbf16>, vector<128x128xbf16>, vector<128x128xbf16>, vector<128x128xbf16> -> vector<1920x128xbf16>
    %c0_5 = arith.constant 0 : index
    %c0_6 = arith.constant 0 : index
    %21 = vector.load %arg4[%c0_5, %c0_6] : memref<128x1920xbf16, #tpu.memory_space<vmem>>, vector<128x1920xbf16>
    %cst = arith.constant dense<0.000000e+00> : vector<128x128xf32>
    %22 = tpu.matmul %21, %20, %cst {dimension_numbers = #tpu.dot_dimension_numbers<[1], [0], [0], [1], [0, 0, 1, 1], [], []>} : vector<128x1920xbf16>, vector<1920x128xbf16>, vector<128x128xf32> -> vector<128x128xf32>
    %c0_7 = arith.constant 0 : index
    %c0_8 = arith.constant 0 : index
    %23 = vector.load %arg5[%c0_7, %c0_8] : memref<128x1xf32, #tpu.memory_space<vmem>>, vector<128x1xf32>
    %24 = vector.broadcast %23 : vector<128x1xf32> to vector<128x128xf32>
    %25 = arith.mulf %22, %24 : vector<128x128xf32>
    %c0_9 = arith.constant 0 : index
    %c0_10 = arith.constant 0 : index
    %26 = vector.load %arg6[%c0_9, %c0_10] : memref<128x1xf32, #tpu.memory_space<vmem>>, vector<128x1xf32>
    %27 = vector.broadcast %26 : vector<128x1xf32> to vector<128x128xf32>
    %28 = arith.addf %25, %27 : vector<128x128xf32>
    %c0_11 = arith.constant 0 : index
    %c0_12 = arith.constant 0 : index
    %29 = vector.load %arg8[%c0_11, %c0_12] : memref<128x8xbf16, #tpu.memory_space<vmem>>, vector<128x8xbf16>
    %c0_13 = arith.constant 0 : index
    %c0_14 = arith.constant 0 : index
    %c0_15 = arith.constant 0 : index
    %30 = vector.load %arg7[%c0_13, %c0_14, %c0_15] : memref<1x8x128xbf16, #tpu.memory_space<vmem>>, vector<1x8x128xbf16>
    %31 = vector.shape_cast %30 : vector<1x8x128xbf16> to vector<8x128xbf16>
    %cst_16 = arith.constant dense<0.000000e+00> : vector<128x128xf32>
    %32 = tpu.matmul %29, %31, %cst_16 {dimension_numbers = #tpu.dot_dimension_numbers<[1], [0], [0], [1], [0, 0, 1, 1], [], []>} : vector<128x8xbf16>, vector<8x128xbf16>, vector<128x128xf32> -> vector<128x128xf32>
    %c0_17 = arith.constant 0 : index
    %c0_18 = arith.constant 0 : index
    %33 = vector.load %arg9[%c0_17, %c0_18] : memref<128x1xf32, #tpu.memory_space<vmem>>, vector<128x1xf32>
    %34 = vector.broadcast %33 : vector<128x1xf32> to vector<128x128xf32>
    %35 = arith.addf %32, %34 : vector<128x128xf32>
    %36 = arith.addf %28, %35 : vector<128x128xf32>
    %37 = arith.truncf %36 : vector<128x128xf32> to vector<128x128xbf16>
    %c0_19 = arith.constant 0 : index
    %c0_20 = arith.constant 0 : index
    %c0_21 = arith.constant 0 : index
    %38 = vector.load %arg10[%c0_19, %c0_20, %c0_21] : memref<1x128x128xbf16, #tpu.memory_space<vmem>>, vector<1x128x128xbf16>
    %39 = vector.shape_cast %38 : vector<1x128x128xbf16> to vector<128x128xbf16>
    %40 = vector.shape_cast %37 : vector<128x128xbf16> to vector<1x128x128xbf16>
    tpu.vector_store %arg10[%c0_19, %c0_20, %c0_21], %40 {strides = array<i32>} : memref<1x128x128xbf16, #tpu.memory_space<vmem>>, vector<1x128x128xbf16>,
    return
  }
  func.func @transform_0(%arg0: i32, %arg1: i32) -> (i32, i32, i32) {
    %c0_i32 = arith.constant 0 : i32
    %c0_i32_0 = arith.constant 0 : i32
    return %arg0, %c0_i32, %arg1 : i32, i32, i32
  }
  func.func @transform_1(%arg0: i32, %arg1: i32) -> (i32, i32, i32) {
    %c1_i32 = arith.constant 1 : i32
    %0 = arith.addi %arg1, %c1_i32 : i32
    %c1_i32_0 = arith.constant 1 : i32
    %1 = arith.muli %0, %c1_i32_0 : i32
    %c0_i32 = arith.constant 0 : i32
    %c0_i32_1 = arith.constant 0 : i32
    return %arg0, %c0_i32, %1 : i32, i32, i32
  }
  func.func @transform_2(%arg0: i32, %arg1: i32) -> (i32, i32) {
    %c0_i32 = arith.constant 0 : i32
    %c0_i32_0 = arith.constant 0 : i32
    %c0_i32_1 = arith.constant 0 : i32
    return %c0_i32, %c0_i32_0 : i32, i32
  }
  func.func @transform_3(%arg0: i32, %arg1: i32) -> (i32, i32) {
    %c0_i32 = arith.constant 0 : i32
    %c0_i32_0 = arith.constant 0 : i32
    %c0_i32_1 = arith.constant 0 : i32
    return %c0_i32, %c0_i32_0 : i32, i32
  }
  func.func @transform_4(%arg0: i32, %arg1: i32) -> (i32, i32) {
    %c0_i32 = arith.constant 0 : i32
    %c0_i32_0 = arith.constant 0 : i32
    %c0_i32_1 = arith.constant 0 : i32
    return %c0_i32, %c0_i32_0 : i32, i32
  }
  func.func @transform_5(%arg0: i32, %arg1: i32) -> (i32, i32, i32) {
    %c0_i32 = arith.constant 0 : i32
    %c0_i32_0 = arith.constant 0 : i32
    return %arg0, %c0_i32, %arg1 : i32, i32, i32
  }
  func.func @transform_6(%arg0: i32, %arg1: i32) -> (i32, i32) {
    %c0_i32 = arith.constant 0 : i32
    %c0_i32_0 = arith.constant 0 : i32
    %c0_i32_1 = arith.constant 0 : i32
    return %c0_i32, %c0_i32_0 : i32, i32
  }
  func.func @transform_7(%arg0: i32, %arg1: i32) -> (i32, i32) {
    %c0_i32 = arith.constant 0 : i32
    %c0_i32_0 = arith.constant 0 : i32
    %c0_i32_1 = arith.constant 0 : i32
    return %c0_i32, %c0_i32_0 : i32, i32
  }
  func.func @transform_8(%arg0: i32, %arg1: i32) -> (i32, i32, i32) {
    %c0_i32 = arith.constant 0 : i32
    %c0_i32_0 = arith.constant 0 : i32
    return %arg0, %c0_i32, %arg1 : i32, i32, i32
  }
}

</mosaic_0001>

<bundles_post_ra>
// kernel: convresnet_forward.14
= control target key start
LH: loop header
LB: loop body
LE: loop exit
PB: predicated region body
PF: predicated region fallthrough
CT: control target
= control target key end

     0   :  { %s726_s18 = smov 0   ;;  %s728_s19 = smov 0   ;;  %s802_s0 = inlined_call_operand.vmem [shape: bf16[2,4,256], index: 0, kind: input, shape index: {}, may-alias: {0,1}]   ;;  %s803_s1 = inlined_call_operand.vmem [shape: bf16[2,4,256], index: 1, kind: input, shape index: {}, may-alias: {0,1}]   ;;  %s804_s2 = inlined_call_operand.vmem [shape: bf16[8,60], index: 2, kind: input, shape index: {}]   ;;  %s805_s3 = inlined_call_operand.vmem [shape: f32[8,1], index: 3, kind: input, shape index: {}]   ;;  %s806_s4 = inlined_call_operand.vmem [shape: f32[8,1], index: 4, kind: input, shape index: {}]   ;;  %s807_s5 = inlined_call_operand.vmem [shape: bf16[2,8,128], index: 5, kind: output, shape index: {}]  }
   0x1   :  { %s730_s20 = smov 0  }
   0x2 LB: > { %s27_s21 = sadd.s32 1, %s673_s19  ;;  %p582_p0 = scmp.ge.s32.totalorder %s677_s20, 1  ;;  %s677_s20 = sphi %s730_s20, %s15_s20   ;;  %s673_s19 = sphi %s728_s19, %s809_s19   ;;  %s669_s18 = sphi %s726_s18, %s808_s18  }
   0x3   : > { %p29_p1 = scmp.ge.s32.totalorder %s27_s21, 2  ;;  %p225_p2 = scmp.lt.s32.totalorder %s677_s20, 3 }
   0x5   : > { %s811_s21 = smov (%p29_p1, %s27_s21), 0  ;;  %p226_p3 = pnand %p582_p0, %p225_p2 }
   0x6   : > { %p267_p4 = scmp.lt.s32.totalorder (!%p226_p3), %s669_s18, 1  ;;  %v679_v1 = vmov (!%p226_p3), 0.0   ;;  %s680_s30 = smov (!%p226_p3), 126   ;;  %vm691_vm0 = vmmov (!%p226_p3), 0   ;;  %v693_v9 = vmov (!%p226_p3), 0   ;;  %v466_v10 = vld [vmem:[%s805_s3] sm:$0xff] (!%p226_p3) }
   0x7   : > { %229 = sbr.rel (%p226_p3) target bundleno = 414 (0x19e), region = 40  ;;  %600 = vmatprep.subr.bf16.mxu0 (!%p226_p3), %v679_v1  ;;  %s681_s6 = smov (!%p226_p3), 127   ;;  %608 = vmatprep.mubr.msk.bf16.mxu0 (!%p226_p3), %vm691_vm0, %v679_v1  ;;  %v473_v11 = vld [vmem:[%s806_s4] sm:$0xff] (!%p226_p3)  ;;  %vm303_vm1 = vcmask (!%p226_p3), 1039360   ;;  %vm311_vm2 = vcmask (!%p226_p3), 1031168   ;;  %vm387_vm3 = vcmask (!%p226_p3), 1041408  }
   0x8   : > { %s682_s7 = smov (!%p226_p3), 125   ;;  %s683_s8 = smov (!%p226_p3), 124   ;;  %653 = vset.pattern.permute.xlu0 (!%p226_p3), %v693_v9  ;;  %654 = vset.pattern.permute.xlu1 (!%p226_p3), %v693_v9  ;;  %vm319_vm4 = vcmask (!%p226_p3), 1022976   ;;  %vm391_vm5 = vcmask (!%p226_p3), 1043456   ;;  %vm394_vm6 = vcmask (!%p226_p3), 1045504   ;;  %vm331_vm7 = vcmask (!%p226_p3), 1006592  }
   0x9   : > { %s684_s9 = smov (!%p226_p3), 123   ;;  %s685_s10 = smov (!%p226_p3), 122   ;;  %vm337_vm8 = vcmask (!%p226_p3), 998400   ;;  %vm325_vm9 = vcmask (!%p226_p3), 1014784   ;;  %vm343_vm10 = vcmask (!%p226_p3), 990208   ;;  %vm355_vm11 = vcmask (!%p226_p3), 973824  }
   0xa   : > { %s686_s11 = smov (!%p226_p3), 121   ;;  %s687_s12 = smov (!%p226_p3), 120   ;;  %vm361_vm12 = vcmask (!%p226_p3), 965632   ;;  %vm349_vm13 = vcmask (!%p226_p3), 982016   ;;  %vm367_vm14 = vcmask (!%p226_p3), 957440   ;;  %vm379_vm15 = vcmask (!%p226_p3), 941056  }
   0xb   : > { %s688_s13 = smov (!%p226_p3), 119   ;;  %s689_s14 = smov (!%p226_p3), 118   ;;  %vm373_vm0 = vcmask (!%p226_p3), 949248  }
   0xc   : > { %s690_s15 = smov (!%p226_p3), 117   ;;  %s692_s16 = smov (!%p226_p3), 116  }
   0xd   : > { %s694_s17 = smov (!%p226_p3), 115  }
   0xe   : > { %s813_s18 = smov (!%p267_p4, %s669_s18), 1 }
   0xf   : > { %s744_s22 = sshll.u32 %s813_s18, 2  ;;  %s695_s18 = smov 114  }
  0x10   : > { %s274_s25 = scalar_lea.vmem %s802_s0, %s744_s22  ;;  %s593_s26 = sadd.s32 2, %s744_s22 }
  0x11   : > { %v751_v0 = vld [vmem:[%s274_s25] sm:$0x3]  ;;  %s283_s29 = scalar_lea.vmem %s803_s1, %s593_s26 }
  0x12   : > { %v305_v2 = vrot.slane %v751_v0, 4  ;;  %v297_v3 = vrot.slane %v751_v0, 6  ;;  %v294_v4 = vld [vmem:[%s283_s29] sm:$0x3]  ;;  %v313_v6 = vrot.slane %v751_v0, 2 }
  0x13   : > { %v306_v5 = vrot.slane %v294_v4, 4  ;;  %v314_v7 = vrot.slane %v294_v4, 2  ;;  %v298_v8 = vrot.slane %v294_v4, 6 }
  0x14   : > { %307 = vrot.lane.b32.xlu1 %v305_v2, %s680_s30  ;;  %299 = vrot.lane.b32.xlu0 %v297_v3, %s681_s6 }
  0x18   : > { %309 = vrot.lane.b32.xlu1 %v306_v5, %s680_s30  ;;  %315 = vrot.lane.b32.xlu0 %v313_v6, %s682_s7 }
  0x1c   : > { %317 = vrot.lane.b32.xlu1 %v314_v7, %s682_s7  ;;  %301 = vrot.lane.b32.xlu0 %v298_v8, %s681_s6  ;;  %s291_s6 = scalar_lea.vmem %s807_s5, %s744_s22 }
  0x20   : > { %323 = vrot.lane.b32.xlu1 %v294_v4, %s683_s8  ;;  %321 = vrot.lane.b32.xlu0 %v751_v0, %s683_s8 }
  0x24   : > { %329 = vrot.lane.b32.xlu1 %v298_v8, %s684_s9  ;;  %327 = vrot.lane.b32.xlu0 %v297_v3, %s684_s9 }
  0x28   : > { %335 = vrot.lane.b32.xlu1 %v306_v5, %s685_s10  ;;  %333 = vrot.lane.b32.xlu0 %v305_v2, %s685_s10 }
  0x2c   : > { %341 = vrot.lane.b32.xlu1 %v314_v7, %s686_s11  ;;  %339 = vrot.lane.b32.xlu0 %v313_v6, %s686_s11 }
  0x30   : > { %347 = vrot.lane.b32.xlu1 %v294_v4, %s687_s12  ;;  %345 = vrot.lane.b32.xlu0 %v751_v0, %s687_s12 }
  0x34   : > { %353 = vrot.lane.b32.xlu1 %v298_v8, %s688_s13  ;;  %351 = vrot.lane.b32.xlu0 %v297_v3, %s688_s13 }
  0x38   : > { %359 = vrot.lane.b32.xlu1 %v306_v5, %s689_s14  ;;  %357 = vrot.lane.b32.xlu0 %v305_v2, %s689_s14 }
  0x3c   : > { %365 = vrot.lane.b32.xlu1 %v314_v7, %s690_s15  ;;  %363 = vrot.lane.b32.xlu0 %v313_v6, %s690_s15 }
  0x40   : > { %371 = vrot.lane.b32.xlu1 %v294_v4, %s692_s16  ;;  %369 = vrot.lane.b32.xlu0 %v751_v0, %s692_s16 }
  0x44   : > { %377 = vrot.lane.b32.xlu1 %v298_v8, %s694_s17  ;;  %375 = vrot.lane.b32.xlu0 %v297_v3, %s694_s17 }
  0x48   : > { %383 = vrot.lane.b32.xlu1 %v306_v5, %s695_s18  ;;  %381 = vrot.lane.b32.xlu0 %v305_v2, %s695_s18 }
  0x4c   : > { %469 = vperm.xlu0 %653, %v466_v10   ;;  %476 = vperm.xlu1 %654, %v473_v11  }
  0x86   : > { %v308_v12 = vpop.permute.xlu1 %307  ;;  %v300_v13 = vpop.permute.xlu0 %299 }
  0x8a   : > { %v310_v14 = vpop.permute.xlu1 %309  ;;  %v316_v15 = vpop.permute.xlu0 %315 }
  0x8b   : > { %v312_v19 = vsel %vm311_vm2, %v308_v12, %v310_v14  ;;  %vm420_vm2 = vcmask 490496  }
  0x8e   : > { %v318_v16 = vpop.permute.xlu1 %317  ;;  %v302_v17 = vpop.permute.xlu0 %301 }
  0x8f   : > { %v304_v18 = vsel %vm303_vm1, %v300_v13, %v302_v17  ;;  %v320_v21 = vsel %vm319_vm4, %v316_v15, %v318_v16  ;;  %vm385_vm1 = vcmask 932864  }
  0x90   : > { %v390_v20 = vsel %vm387_vm3, %v751_v0, %v304_v18 }
  0x91   : > { %v393_v22 = vsel %vm391_vm5, %v390_v20, %v312_v19 }
  0x92   : > { %v324_v23 = vpop.permute.xlu1 %323  ;;  %v322_v24 = vpop.permute.xlu0 %321  ;;  %v396_v25 = vsel %vm394_vm6, %v393_v22, %v320_v21 }
  0x93   : > { %601 = vmatpush3.bf16.msra.mxu0 %v396_v25  ;;  %v326_v32 = vsel %vm325_vm9, %v322_v24, %v324_v23 }
  0x94   : > { %602 = vmatprep.subr.bf16.mxu0 %v679_v1 }
  0x96   : > { %v330_v26 = vpop.permute.xlu1 %329  ;;  %v328_v27 = vpop.permute.xlu0 %327 }
  0x97   : > { %v332_v30 = vsel %vm331_vm7, %v328_v27, %v330_v26 }
  0x98   : > { %v400_v33 = vsel %vm387_vm3, %v326_v32, %v332_v30 }
  0x9a   : > { %v336_v28 = vpop.permute.xlu1 %335  ;;  %v334_v29 = vpop.permute.xlu0 %333 }
  0x9b   : > { %v338_v31 = vsel %vm337_vm8, %v334_v29, %v336_v28 }
  0x9c   : > { %v402_v37 = vsel %vm391_vm5, %v400_v33, %v338_v31 }
  0x9e   : > { %v342_v34 = vpop.permute.xlu1 %341  ;;  %v340_v35 = vpop.permute.xlu0 %339 }
  0x9f   : > { %v344_v36 = vsel %vm343_vm10, %v340_v35, %v342_v34 }
  0xa0   : > { %v404_v38 = vsel %vm394_vm6, %v402_v37, %v344_v36 }
  0xa1   : > { %603 = vmatpush3.bf16.msra.mxu0 %v404_v38 }
  0xa2   : > { %v348_v39 = vpop.permute.xlu1 %347  ;;  %v346_v40 = vpop.permute.xlu0 %345  ;;  %604 = vmatprep.subr.bf16.mxu0 %v679_v1 }
  0xa3   : > { %v350_v47 = vsel %vm349_vm13, %v346_v40, %v348_v39 }
  0xa6   : > { %v354_v41 = vpop.permute.xlu1 %353  ;;  %v352_v42 = vpop.permute.xlu0 %351 }
  0xa7   : > { %v356_v45 = vsel %vm355_vm11, %v352_v42, %v354_v41 }
  0xa8   : > { %v408_v48 = vsel %vm387_vm3, %v350_v47, %v356_v45 }
  0xaa   : > { %v360_v43 = vpop.permute.xlu1 %359  ;;  %v358_v44 = vpop.permute.xlu0 %357 }
  0xab   : > { %v362_v46 = vsel %vm361_vm12, %v358_v44, %v360_v43 }
  0xac   : > { %v410_v52 = vsel %vm391_vm5, %v408_v48, %v362_v46 }
  0xae   : > { %v366_v49 = vpop.permute.xlu1 %365  ;;  %v364_v50 = vpop.permute.xlu0 %363 }
  0xaf   : > { %v368_v51 = vsel %vm367_vm14, %v364_v50, %v366_v49 }
  0xb0   : > { %v412_v53 = vsel %vm394_vm6, %v410_v52, %v368_v51 }
  0xb1   : > { %605 = vmatpush3.bf16.msra.mxu0 %v412_v53 }
  0xb2   : > { %v372_v54 = vpop.permute.xlu1 %371  ;;  %v370_v55 = vpop.permute.xlu0 %369  ;;  %606 = vmatprep.subr.bf16.mxu0 %v679_v1  ;;  %v419_v1 = vld [vmem:[%s804_s2] sm:$0xf] }
  0xb3   : > { %v374_v59 = vsel %vm373_vm0, %v370_v55, %v372_v54 }
  0xb6   : > { %v378_v56 = vpop.permute.xlu1 %377  ;;  %v376_v57 = vpop.permute.xlu0 %375 }
  0xb7   : > { %v380_v58 = vsel %vm379_vm15, %v376_v57, %v378_v56 }
  0xb8   : > { %v416_v62 = vsel %vm387_vm3, %v374_v59, %v380_v58 }
  0xba   : > { %v384_v60 = vpop.permute.xlu1 %383  ;;  %v382_v61 = vpop.permute.xlu0 %381 }
  0xbb   : > { %v386_v63 = vsel %vm385_vm1, %v382_v61, %v384_v60 }
  0xbc   : > { %v418_v0 = vsel %vm391_vm5, %v416_v62, %v386_v63 }
  0xbd   : > { %v424_v2 = vsel %vm394_vm6, %v418_v0, 0 }
  0xbe   : > { %607 = vmatpush3.bf16.msra.mxu0 %v424_v2 }
  0xc1   : > { %609 = vmatmul.mubr.msk.bf16.vlgmr.msra.gmra.mrb[0].mxu0 %vm420_vm2, %v419_v1 }
  0xcb   : > { %v470_v3 = vpop.permute.xlu0 %469  ;;  %v477_v5 = vpop.permute.xlu1 %476 }
 0x194   : > { %v460_v4 = vpop.f32.mrb[0].mxu0 }
 0x195   : > { %v472_v6 = vmul.f32 %v470_v3, %v460_v4  ;;  %v610_v7 = vpop.f32.mrb[1].mxu0 }
 0x196   : > { %v463_v8 = vpop.f32.mrb[2].mxu0 }
 0x197   : > { %v479_v9 = vadd.f32 %v477_v5, %v472_v6  ;;  %v611_v10 = vpop.f32.mrb[3].mxu0 }
 0x199   : > { %v480_v11 = vmax.f32 %v479_v9, 0.0 }
 0x19b   : > { %v481_v12 = vpack.c.bf16 %v480_v11, %v480_v11 }
 0x19d   : > { %482 = vst [vmem:[%s291_s6] sm:$0xf] %v481_v12 }
 0x19e PF: > { %s15_s20 = sadd.s32 1, %s677_s20   ;;  %s808_s18 = smov %s673_s19 }
 0x19f   : > { %p12_p5 = scmp.ge.s32.totalorder %s15_s20, 4   ;;  %s809_s19 = smov %s811_s21 }
 0x1a1   :  { %14 = sbr.rel (!%p12_p5) target bundleno = 2 (0x2), region = 73 }

// kernel: convresnet_forward.15
= control target key start
LH: loop header
LB: loop body
LE: loop exit
PB: predicated region body
PF: predicated region fallthrough
CT: control target
= control target key end

     0   :  { %s773_s18 = smov 0   ;;  %s775_s19 = smov 0   ;;  %s870_s0 = inlined_call_operand.vmem [shape: bf16[2,16,256], index: 0, kind: input, shape index: {}, may-alias: {0,1}]   ;;  %s871_s1 = inlined_call_operand.vmem [shape: bf16[2,16,256], index: 1, kind: input, shape index: {}, may-alias: {0,1}]   ;;  %s872_s2 = inlined_call_operand.vmem [shape: bf16[8,128], index: 2, kind: input, shape index: {}]   ;;  %s873_s3 = inlined_call_operand.vmem [shape: f32[8,1], index: 3, kind: input, shape index: {}]   ;;  %s874_s4 = inlined_call_operand.vmem [shape: f32[8,1], index: 4, kind: input, shape index: {}]   ;;  %s875_s5 = inlined_call_operand.vmem [shape: bf16[2,8,128], index: 5, kind: output, shape index: {}]  }
   0x1   :  { %s777_s20 = smov 0   ;;  %s779_s21 = smov 0  }
   0x2   :  { %s781_s22 = smov 0  }
   0x3 LB: > { %s27_s23 = sadd.s32 1, %s727_s21  ;;  %p43_p1 = scmp.ne.s32.totalorder %s719_s19, %s715_s18  ;;  %s731_s22 = sphi %s781_s22, %s15_s22   ;;  %s727_s21 = sphi %s779_s21, %s880_s21   ;;  %s723_s20 = sphi %s777_s20, %s879_s20   ;;  %s719_s19 = sphi %s775_s19, %s878_s19   ;;  %s715_s18 = sphi %s773_s18, %s877_s18  }
   0x4   : > { %p29_p0 = scmp.ge.s32.totalorder %s27_s23, 2  ;;  %p44_p2 = scmp.eq.s32.totalorder %s731_s22, 0 }
   0x5   : > { %s36_s26 = sadd.s32 1, %s719_s19  ;;  %p591_p5 = scmp.ge.s32.totalorder %s731_s22, 2 }
   0x6   : > { %s882_s23 = smov (%p29_p0, %s27_s23), 0  ;;  %p804_p3 = por %p44_p2, %p43_p1 }
   0x7   : > { %s31_s25 = ssub.s32 %s727_s21, %s882_s23  ;;  %199 = sbr.rel (%p591_p5) target bundleno = 28 (0x1c), region = 28 }
   0x8   : > { %p34_p4 = scmp.eq.s32.totalorder %s31_s25, 0 }
   0xa   : > { %s812_s27 = scalar_select %p34_p4, %s719_s19, %s36_s26  }
   0xe   : > { %202 = sbr.rel (!%p804_p3) target bundleno = 21 (0x15), region = 32  ;;  %s204_s28 = sand.u32 (%p804_p3), 1, %s719_s19  }
   0xf   : > { %s608_s29 = sshll.u32 (%p804_p3), %s727_s21, 4  ;;  %s592_s30 = sshll.u32 (%p804_p3), %s204_s28, 3 }
  0x10   : > { %s210_s8 = scalar_lea.vmem (%p804_p3), %s870_s0, %s608_s29  ;;  %s206_s9 = scalar_lea.vmem (%p804_p3), [#allocation2], %s592_s30 }
  0x11   : > { %v226_v0 = vld [vmem:[%s210_s8] sm:$0xf] (%p804_p3)  ;;  %v228_v1 = vld [vmem:[%s210_s8 + $0x8] sm:$0xf] (%p804_p3) }
  0x12   : > { %227 = vst [vmem:[%s206_s9] sm:$0xf] (%p804_p3), %v226_v0  ;;  %229 = vst [vmem:[%s206_s9 + $0x4] sm:$0xf] (%p804_p3), %v228_v1 }
  0x15 PF: > { %256 = sbr.rel (!%p804_p3) target bundleno = 28 (0x1c), region = 73  ;;  %s258_s10 = sand.u32 (%p804_p3), 1, %s719_s19  }
  0x16   : > { %s609_s11 = sshll.u32 (%p804_p3), %s727_s21, 4  ;;  %s595_s12 = sshll.u32 (%p804_p3), %s258_s10, 3 }
  0x17   : > { %s524_s15 = scalar_lea.vmem (%p804_p3), %s871_s1, %s609_s11  ;;  %s260_s16 = scalar_lea.vmem (%p804_p3), [#allocation3], %s595_s12 }
  0x18   : > { %v598_v2 = vld [vmem:[%s524_s15 + $0x4] sm:$0xf] (%p804_p3)  ;;  %v599_v3 = vld [vmem:[%s524_s15 + $0xc] sm:$0xf] (%p804_p3) }
  0x19   : > { %282 = vst [vmem:[%s260_s16] sm:$0xf] (%p804_p3), %v598_v2  ;;  %284 = vst [vmem:[%s260_s16 + $0x4] sm:$0xf] (%p804_p3), %v599_v3 }
  0x1c PF: > { %p600_p6 = scmp.ge.s32.totalorder %s731_s22, 1  ;;  %p310_p7 = scmp.lt.s32.totalorder %s731_s22, 3 }
  0x1e   : > { %p311_p8 = pnand %p600_p6, %p310_p7 }
  0x1f   : > { %s317_s17 = sand.u32 (!%p311_p8), 1, %s715_s18   ;;  %v733_v4 = vmov (!%p311_p8), 0.0   ;;  %s734_s28 = smov (!%p311_p8), 126   ;;  %vm739_vm0 = vmmov (!%p311_p8), 0   ;;  %v741_v7 = vmov (!%p311_p8), 0   ;;  %v471_v8 = vld [vmem:[%s873_s3] sm:$0xff] (!%p311_p8) }
  0x20   : > { %314 = sbr.rel (%p311_p8) target bundleno = 403 (0x193), region = 114  ;;  %s601_s24 = sshll.u32 (!%p311_p8), %s317_s17, 3  ;;  %619 = vmatprep.subr.bf16.mxu0 (!%p311_p8), %v733_v4  ;;  %635 = vmatprep.mubr.msk.bf16.mxu0 (!%p311_p8), %vm739_vm0, %v733_v4  ;;  %v478_v9 = vld [vmem:[%s874_s4] sm:$0xff] (!%p311_p8)  ;;  %vm385_vm1 = vcmask (!%p311_p8), 1039360   ;;  %vm392_vm2 = vcmask (!%p311_p8), 1031168   ;;  %vm399_vm3 = vcmask (!%p311_p8), 1022976  }
  0x21   : > { %s319_s25 = scalar_lea.vmem (!%p311_p8), [#allocation2], %s601_s24  ;;  %s326_s26 = scalar_lea.vmem (!%p311_p8), [#allocation3], %s601_s24  ;;  %689 = vset.pattern.permute.xlu0 (!%p311_p8), %v741_v7  ;;  %690 = vset.pattern.permute.xlu1 (!%p311_p8), %v741_v7  ;;  %vm406_vm4 = vcmask (!%p311_p8), 1014784   ;;  %vm413_vm5 = vcmask (!%p311_p8), 1006592   ;;  %vm420_vm6 = vcmask (!%p311_p8), 998400   ;;  %vm427_vm7 = vcmask (!%p311_p8), 990208  }
  0x22   : > { %v691_v5 = vld [vmem:[%s319_s25] sm:$0xff] (!%p311_p8)   ;;  %s735_s29 = smov (!%p311_p8), 127   ;;  %v692_v6 = vld [vmem:[%s326_s26] sm:$0xff] (!%p311_p8)   ;;  %s736_s30 = smov (!%p311_p8), 125  }
  0x23   : > { %388 = vrot.lane.b32.xlu1 (!%p311_p8), %v691_v5, %s734_s28  ;;  %381 = vrot.lane.b32.xlu0 (!%p311_p8), %v691_v5, %s735_s29  ;;  %s737_s18 = smov (!%p311_p8), 124   ;;  %s738_s6 = smov (!%p311_p8), 123   ;;  %v430_v31 = vld [vmem:[%s872_s2] sm:$0xf] (!%p311_p8) }
  0x24   : > { %620 = vmatpush3.bf16.msra.mxu0 (!%p311_p8), %v691_v5  ;;  %s740_s7 = smov (!%p311_p8), 122   ;;  %s742_s8 = smov (!%p311_p8), 121  }
  0x25   : > { %621 = vmatprep.subr.bf16.mxu0 (!%p311_p8), %v733_v4  ;;  %p358_p9 = scmp.lt.s32.totalorder (!%p311_p8), %s723_s20, 1 }
  0x27   : > { %390 = vrot.lane.b32.xlu1 %v692_v6, %s734_s28  ;;  %383 = vrot.lane.b32.xlu0 %v692_v6, %s735_s29  ;;  %s884_s20 = smov (!%p358_p9, %s723_s20), 1 }
  0x28   : > { %s603_s15 = sshll.u32 %s884_s20, 2 }
  0x29   : > { %s364_s24 = scalar_lea.vmem %s875_s5, %s603_s15 }
  0x2b   : > { %397 = vrot.lane.b32.xlu1 %v692_v6, %s736_s30  ;;  %395 = vrot.lane.b32.xlu0 %v691_v5, %s736_s30 }
  0x2f   : > { %404 = vrot.lane.b32.xlu1 %v692_v6, %s737_s18  ;;  %402 = vrot.lane.b32.xlu0 %v691_v5, %s737_s18 }
  0x33   : > { %411 = vrot.lane.b32.xlu1 %v692_v6, %s738_s6  ;;  %409 = vrot.lane.b32.xlu0 %v691_v5, %s738_s6 }
  0x37   : > { %418 = vrot.lane.b32.xlu1 %v692_v6, %s740_s7  ;;  %416 = vrot.lane.b32.xlu0 %v691_v5, %s740_s7 }
  0x3b   : > { %425 = vrot.lane.b32.xlu1 %v692_v6, %s742_s8  ;;  %423 = vrot.lane.b32.xlu0 %v691_v5, %s742_s8 }
  0x3f   : > { %474 = vperm.xlu0 %689, %v471_v8   ;;  %481 = vperm.xlu1 %690, %v478_v9  }
  0x95   : > { %v389_v10 = vpop.permute.xlu1 %388  ;;  %v382_v11 = vpop.permute.xlu0 %381 }
  0x99   : > { %v391_v12 = vpop.permute.xlu1 %390  ;;  %v384_v13 = vpop.permute.xlu0 %383 }
  0x9a   : > { %v386_v14 = vsel %vm385_vm1, %v382_v11, %v384_v13  ;;  %v393_v17 = vsel %vm392_vm2, %v389_v10, %v391_v12 }
  0x9b   : > { %622 = vmatpush3.bf16.msra.mxu0 %v386_v14 }
  0x9c   : > { %623 = vmatprep.subr.bf16.mxu0 %v733_v4 }
  0x9d   : > { %v398_v15 = vpop.permute.xlu1 %397  ;;  %v396_v16 = vpop.permute.xlu0 %395 }
  0x9e   : > { %v400_v18 = vsel %vm399_vm3, %v396_v16, %v398_v15 }
  0x9f   : > { %624 = vmatpush3.bf16.msra.mxu0 %v393_v17 }
  0xa0   : > { %625 = vmatprep.subr.bf16.mxu0 %v733_v4 }
  0xa1   : > { %v405_v19 = vpop.permute.xlu1 %404  ;;  %v403_v20 = vpop.permute.xlu0 %402 }
  0xa2   : > { %v407_v21 = vsel %vm406_vm4, %v403_v20, %v405_v19 }
  0xa3   : > { %626 = vmatpush3.bf16.msra.mxu0 %v400_v18 }
  0xa4   : > { %627 = vmatprep.subr.bf16.mxu0 %v733_v4 }
  0xa5   : > { %v412_v22 = vpop.permute.xlu1 %411  ;;  %v410_v23 = vpop.permute.xlu0 %409 }
  0xa6   : > { %v414_v24 = vsel %vm413_vm5, %v410_v23, %v412_v22 }
  0xa7   : > { %628 = vmatpush3.bf16.msra.mxu0 %v407_v21 }
  0xa8   : > { %629 = vmatprep.subr.bf16.mxu0 %v733_v4 }
  0xa9   : > { %v419_v25 = vpop.permute.xlu1 %418  ;;  %v417_v26 = vpop.permute.xlu0 %416 }
  0xaa   : > { %v421_v27 = vsel %vm420_vm6, %v417_v26, %v419_v25 }
  0xab   : > { %630 = vmatpush3.bf16.msra.mxu0 %v414_v24 }
  0xac   : > { %631 = vmatprep.subr.bf16.mxu0 %v733_v4 }
  0xad   : > { %v426_v28 = vpop.permute.xlu1 %425  ;;  %v424_v29 = vpop.permute.xlu0 %423 }
  0xae   : > { %v428_v30 = vsel %vm427_vm7, %v424_v29, %v426_v28 }
  0xaf   : > { %632 = vmatpush3.bf16.msra.mxu0 %v421_v27 }
  0xb0   : > { %633 = vmatprep.subr.bf16.mxu0 %v733_v4 }
  0xb3   : > { %634 = vmatpush3.bf16.msra.mxu0 %v428_v30 }
  0xb6   : > { %636 = vmatmul.mubr.bf16.vlgmr.msra.gmra.mrb[0].mxu0 %v430_v31 }
  0xbe   : > { %v475_v32 = vpop.permute.xlu0 %474  ;;  %v482_v34 = vpop.permute.xlu1 %481 }
 0x189   : > { %v465_v33 = vpop.f32.mrb[0].mxu0 }
 0x18a   : > { %v477_v35 = vmul.f32 %v475_v32, %v465_v33  ;;  %v637_v36 = vpop.f32.mrb[1].mxu0 }
 0x18b   : > { %v468_v37 = vpop.f32.mrb[2].mxu0 }
 0x18c   : > { %v484_v38 = vadd.f32 %v482_v34, %v477_v35  ;;  %v638_v39 = vpop.f32.mrb[3].mxu0 }
 0x18e   : > { %v485_v40 = vmax.f32 %v484_v38, 0.0 }
 0x190   : > { %v486_v41 = vpack.c.bf16 %v485_v40, %v485_v40 }
 0x192   : > { %487 = vst [vmem:[%s364_s24] sm:$0xf] %v486_v41 }
 0x193 PF: > { %s15_s22 = sadd.s32 1, %s731_s22   ;;  %s877_s18 = smov %s719_s19 }
 0x194   : > { %p12_p10 = scmp.ge.s32.totalorder %s15_s22, 4   ;;  %s878_s19 = smov %s812_s27 }
 0x195   : > { %s879_s20 = smov %s727_s21  ;;  %s880_s21 = smov %s882_s23 }
 0x196   :  { %14 = sbr.rel (!%p12_p10) target bundleno = 3 (0x3), region = 165 }

// kernel: convresnet_forward.16
= control target key start
LH: loop header
LB: loop body
LE: loop exit
PB: predicated region body
PF: predicated region fallthrough
CT: control target
= control target key end

     0   :  { %s814_s21 = smov 0   ;;  %s816_s22 = smov 0   ;;  %s901_s0 = inlined_call_operand.vmem [shape: bf16[2,8,256], index: 0, kind: input, shape index: {}, may-alias: {0,1}]   ;;  %s902_s1 = inlined_call_operand.vmem [shape: bf16[2,8,256], index: 1, kind: input, shape index: {}, may-alias: {0,1}]   ;;  %s903_s2 = inlined_call_operand.vmem [shape: bf16[8,120], index: 2, kind: input, shape index: {}]   ;;  %s904_s3 = inlined_call_operand.vmem [shape: f32[8,1], index: 3, kind: input, shape index: {}]   ;;  %s905_s4 = inlined_call_operand.vmem [shape: f32[8,1], index: 4, kind: input, shape index: {}]   ;;  %s906_s5 = inlined_call_operand.vmem [shape: u32[2,8,128], index: 5, kind: input, shape index: {}]   ;;  %s907_s6 = inlined_call_operand.vmem [shape: bf16[2,8,128], index: 6, kind: output, shape index: {}]  }
   0x1   :  { %s818_s23 = smov 0  }
   0x2 LB: > { %s28_s24 = sadd.s32 1, %s756_s22  ;;  %p652_p0 = scmp.ge.s32.totalorder %s760_s23, 1  ;;  %s760_s23 = sphi %s818_s23, %s16_s23   ;;  %s756_s22 = sphi %s816_s22, %s909_s22   ;;  %s752_s21 = sphi %s814_s21, %s908_s21  }
   0x3   : > { %p30_p1 = scmp.ge.s32.totalorder %s28_s24, 2  ;;  %p264_p2 = scmp.lt.s32.totalorder %s760_s23, 3 }
   0x5   : > { %s911_s24 = smov (%p30_p1, %s28_s24), 0  ;;  %p265_p3 = pnand %p652_p0, %p264_p2 }
   0x6   : > { %p315_p4 = scmp.lt.s32.totalorder (!%p265_p3), %s752_s21, 1  ;;  %v762_v0 = vmov (!%p265_p3), 0.0   ;;  %s763_s9 = smov (!%p265_p3), 126   ;;  %vm775_vm0 = vmmov (!%p265_p3), 0   ;;  %v776_v5 = vmov (!%p265_p3), 0   ;;  %v522_v6 = vld [vmem:[%s905_s4] sm:$0xff] (!%p265_p3) }
   0x7   : > { %268 = sbr.rel (%p265_p3) target bundleno = 413 (0x19d), region = 44  ;;  %675 = vmatprep.subr.bf16.mxu0 (!%p265_p3), %v762_v0  ;;  %s764_s10 = smov (!%p265_p3), 127   ;;  %691 = vmatprep.mubr.msk.bf16.mxu0 (!%p265_p3), %vm775_vm0, %v762_v0  ;;  %v515_v7 = vld [vmem:[%s904_s3] sm:$0xff] (!%p265_p3)  ;;  %vm358_vm1 = vcmask (!%p265_p3), 1039360   ;;  %vm370_vm2 = vcmask (!%p265_p3), 1022976   ;;  %vm438_vm3 = vcmask (!%p265_p3), 1043456  }
   0x8   : > { %s765_s11 = smov (!%p265_p3), 125   ;;  %s766_s12 = smov (!%p265_p3), 124   ;;  %736 = vset.pattern.permute.xlu0 (!%p265_p3), %v776_v5  ;;  %737 = vset.pattern.permute.xlu1 (!%p265_p3), %v776_v5  ;;  %vm364_vm4 = vcmask (!%p265_p3), 1031168   ;;  %vm376_vm5 = vcmask (!%p265_p3), 1014784   ;;  %vm382_vm6 = vcmask (!%p265_p3), 1006592   ;;  %vm388_vm7 = vcmask (!%p265_p3), 998400  }
   0x9   : > { %s767_s13 = smov (!%p265_p3), 123   ;;  %s768_s14 = smov (!%p265_p3), 122   ;;  %vm394_vm8 = vcmask (!%p265_p3), 990208   ;;  %vm400_vm9 = vcmask (!%p265_p3), 982016   ;;  %vm406_vm10 = vcmask (!%p265_p3), 973824   ;;  %vm412_vm11 = vcmask (!%p265_p3), 965632  }
   0xa   : > { %s769_s15 = smov (!%p265_p3), 121   ;;  %s770_s16 = smov (!%p265_p3), 120   ;;  %vm418_vm12 = vcmask (!%p265_p3), 957440   ;;  %vm424_vm13 = vcmask (!%p265_p3), 949248   ;;  %vm430_vm14 = vcmask (!%p265_p3), 941056   ;;  %vm436_vm15 = vcmask (!%p265_p3), 932864  }
   0xb   : > { %s771_s17 = smov (!%p265_p3), 119   ;;  %s772_s18 = smov (!%p265_p3), 118   ;;  %v467_v58 = vld [vmem:[%s903_s2] sm:$0xf] (!%p265_p3) }
   0xc   : > { %s773_s19 = smov (!%p265_p3), 117   ;;  %s774_s20 = smov (!%p265_p3), 116  }
   0xd   : > { %s777_s26 = smov (!%p265_p3), 115   ;;  %s778_s27 = smov (!%p265_p3), 114  }
   0xe   : > { %s913_s21 = smov (!%p315_p4, %s752_s21), 1 }
   0xf   : > { %s835_s25 = sshll.u32 %s913_s21, 3 }
  0x10   : > { %s322_s28 = scalar_lea.vmem %s901_s0, %s835_s25  ;;  %s664_s29 = sadd.s32 4, %s835_s25 }
  0x11   : > { %v843_v1 = vld [vmem:[%s322_s28] sm:$0xf]  ;;  %s331_s8 = scalar_lea.vmem %s902_s1, %s664_s29 }
  0x12   : > { %360 = vrot.lane.b32.xlu1 %v843_v1, %s763_s9  ;;  %v352_v2 = vrot.slane %v843_v1, 4  ;;  %v349_v3 = vld [vmem:[%s331_s8] sm:$0xf] }
  0x13   : > { %v353_v4 = vrot.slane %v349_v3, 4 }
  0x14   : > { %354 = vrot.lane.b32.xlu0 %v352_v2, %s764_s10 }
  0x16   : > { %362 = vrot.lane.b32.xlu1 %v349_v3, %s763_s9 }
  0x18   : > { %366 = vrot.lane.b32.xlu0 %v352_v2, %s765_s11 }
  0x1a   : > { %368 = vrot.lane.b32.xlu1 %v353_v4, %s765_s11 }
  0x1c   : > { %356 = vrot.lane.b32.xlu0 %v353_v4, %s764_s10 }
  0x1e   : > { %374 = vrot.lane.b32.xlu1 %v349_v3, %s766_s12 }
  0x20   : > { %372 = vrot.lane.b32.xlu0 %v843_v1, %s766_s12  ;;  %s339_s12 = scalar_lea.vmem %s906_s5, %s835_s25 }
  0x21   : > { %v529_v59 = vld [vmem:[%s339_s12] sm:$0xff] }
  0x22   : > { %380 = vrot.lane.b32.xlu1 %v353_v4, %s767_s13  ;;  %v530_v60 = vshll.u32 %v529_v59, 16  ;;  %v532_v61 = vand.u32 4294901760, %v529_v59 }
  0x24   : > { %378 = vrot.lane.b32.xlu0 %v352_v2, %s767_s13  ;;  %s658_s13 = sshll.u32 %s913_s21, 2 }
  0x26   : > { %386 = vrot.lane.b32.xlu1 %v349_v3, %s768_s14 }
  0x28   : > { %384 = vrot.lane.b32.xlu0 %v843_v1, %s768_s14 }
  0x2a   : > { %392 = vrot.lane.b32.xlu1 %v353_v4, %s769_s15 }
  0x2c   : > { %390 = vrot.lane.b32.xlu0 %v352_v2, %s769_s15 }
  0x2e   : > { %398 = vrot.lane.b32.xlu1 %v349_v3, %s770_s16 }
  0x30   : > { %396 = vrot.lane.b32.xlu0 %v843_v1, %s770_s16  ;;  %s346_s16 = scalar_lea.vmem %s907_s6, %s658_s13 }
  0x32   : > { %404 = vrot.lane.b32.xlu1 %v353_v4, %s771_s17 }
  0x34   : > { %402 = vrot.lane.b32.xlu0 %v352_v2, %s771_s17 }
  0x36   : > { %410 = vrot.lane.b32.xlu1 %v349_v3, %s772_s18 }
  0x38   : > { %408 = vrot.lane.b32.xlu0 %v843_v1, %s772_s18 }
  0x3a   : > { %416 = vrot.lane.b32.xlu1 %v353_v4, %s773_s19 }
  0x3c   : > { %414 = vrot.lane.b32.xlu0 %v352_v2, %s773_s19 }
  0x3e   : > { %422 = vrot.lane.b32.xlu1 %v349_v3, %s774_s20 }
  0x40   : > { %420 = vrot.lane.b32.xlu0 %v843_v1, %s774_s20 }
  0x42   : > { %428 = vrot.lane.b32.xlu1 %v353_v4, %s777_s26 }
  0x44   : > { %426 = vrot.lane.b32.xlu0 %v352_v2, %s777_s26 }
  0x46   : > { %434 = vrot.lane.b32.xlu1 %v349_v3, %s778_s27  ;;  %v534_v3 = vmax.f32 %v530_v60, %v532_v61 }
  0x48   : > { %432 = vrot.lane.b32.xlu0 %v843_v1, %s778_s27 }
  0x4a   : > { %525 = vperm.xlu1 %737, %v522_v6  }
  0x4c   : > { %518 = vperm.xlu0 %736, %v515_v7  }
  0x84   : > { %v361_v8 = vpop.permute.xlu1 %360 }
  0x86   : > { %v355_v9 = vpop.permute.xlu0 %354 }
  0x88   : > { %v363_v10 = vpop.permute.xlu1 %362 }
  0x89   : > { %v365_v19 = vsel %vm364_vm4, %v361_v8, %v363_v10 }
  0x8a   : > { %v367_v11 = vpop.permute.xlu0 %366 }
  0x8c   : > { %v369_v12 = vpop.permute.xlu1 %368 }
  0x8d   : > { %v371_v17 = vsel %vm370_vm2, %v367_v11, %v369_v12 }
  0x8e   : > { %v357_v13 = vpop.permute.xlu0 %356  ;;  %v445_v20 = vsel %vm438_vm3, %v365_v19, %v371_v17 }
  0x8f   : > { %v359_v14 = vsel %vm358_vm1, %v355_v9, %v357_v13 }
  0x90   : > { %v441_v15 = vsel %vm438_vm3, %v843_v1, %v359_v14  ;;  %v375_v16 = vpop.permute.xlu1 %374 }
  0x91   : > { %676 = vmatpush3.bf16.msra.mxu0 %v441_v15 }
  0x92   : > { %v373_v18 = vpop.permute.xlu0 %372  ;;  %677 = vmatprep.subr.bf16.mxu0 %v762_v0 }
  0x93   : > { %v377_v23 = vsel %vm376_vm5, %v373_v18, %v375_v16 }
  0x94   : > { %v381_v21 = vpop.permute.xlu1 %380 }
  0x95   : > { %678 = vmatpush3.bf16.msra.mxu0 %v445_v20 }
  0x96   : > { %v379_v22 = vpop.permute.xlu0 %378  ;;  %679 = vmatprep.subr.bf16.mxu0 %v762_v0 }
  0x97   : > { %v383_v24 = vsel %vm382_vm6, %v379_v22, %v381_v21 }
  0x98   : > { %v449_v25 = vsel %vm438_vm3, %v377_v23, %v383_v24  ;;  %v387_v26 = vpop.permute.xlu1 %386 }
  0x99   : > { %680 = vmatpush3.bf16.msra.mxu0 %v449_v25 }
  0x9a   : > { %v385_v27 = vpop.permute.xlu0 %384  ;;  %681 = vmatprep.subr.bf16.mxu0 %v762_v0 }
  0x9b   : > { %v389_v30 = vsel %vm388_vm7, %v385_v27, %v387_v26 }
  0x9c   : > { %v393_v28 = vpop.permute.xlu1 %392 }
  0x9e   : > { %v391_v29 = vpop.permute.xlu0 %390 }
  0x9f   : > { %v395_v31 = vsel %vm394_vm8, %v391_v29, %v393_v28 }
  0xa0   : > { %v453_v32 = vsel %vm438_vm3, %v389_v30, %v395_v31  ;;  %v399_v33 = vpop.permute.xlu1 %398 }
  0xa1   : > { %682 = vmatpush3.bf16.msra.mxu0 %v453_v32 }
  0xa2   : > { %v397_v34 = vpop.permute.xlu0 %396  ;;  %683 = vmatprep.subr.bf16.mxu0 %v762_v0 }
  0xa3   : > { %v401_v37 = vsel %vm400_vm9, %v397_v34, %v399_v33 }
  0xa4   : > { %v405_v35 = vpop.permute.xlu1 %404 }
  0xa6   : > { %v403_v36 = vpop.permute.xlu0 %402 }
  0xa7   : > { %v407_v38 = vsel %vm406_vm10, %v403_v36, %v405_v35 }
  0xa8   : > { %v457_v39 = vsel %vm438_vm3, %v401_v37, %v407_v38  ;;  %v411_v40 = vpop.permute.xlu1 %410 }
  0xa9   : > { %684 = vmatpush3.bf16.msra.mxu0 %v457_v39 }
  0xaa   : > { %v409_v41 = vpop.permute.xlu0 %408  ;;  %685 = vmatprep.subr.bf16.mxu0 %v762_v0 }
  0xab   : > { %v413_v44 = vsel %vm412_vm11, %v409_v41, %v411_v40 }
  0xac   : > { %v417_v42 = vpop.permute.xlu1 %416 }
  0xae   : > { %v415_v43 = vpop.permute.xlu0 %414 }
  0xaf   : > { %v419_v45 = vsel %vm418_vm12, %v415_v43, %v417_v42 }
  0xb0   : > { %v461_v46 = vsel %vm438_vm3, %v413_v44, %v419_v45  ;;  %v423_v47 = vpop.permute.xlu1 %422 }
  0xb1   : > { %686 = vmatpush3.bf16.msra.mxu0 %v461_v46 }
  0xb2   : > { %v421_v48 = vpop.permute.xlu0 %420  ;;  %687 = vmatprep.subr.bf16.mxu0 %v762_v0 }
  0xb3   : > { %v425_v51 = vsel %vm424_vm13, %v421_v48, %v423_v47 }
  0xb4   : > { %v429_v49 = vpop.permute.xlu1 %428 }
  0xb6   : > { %v427_v50 = vpop.permute.xlu0 %426 }
  0xb7   : > { %v431_v52 = vsel %vm430_vm14, %v427_v50, %v429_v49 }
  0xb8   : > { %v465_v53 = vsel %vm438_vm3, %v425_v51, %v431_v52  ;;  %v435_v54 = vpop.permute.xlu1 %434 }
  0xb9   : > { %688 = vmatpush3.bf16.msra.mxu0 %v465_v53 }
  0xba   : > { %v433_v55 = vpop.permute.xlu0 %432  ;;  %689 = vmatprep.subr.bf16.mxu0 %v762_v0 }
  0xbb   : > { %v437_v56 = vsel %vm436_vm15, %v433_v55, %v435_v54 }
  0xbc   : > { %v473_v57 = vsel %vm438_vm3, %v437_v56, 0 }
  0xbd   : > { %690 = vmatpush3.bf16.msra.mxu0 %v473_v57 }
  0xc0   : > { %692 = vmatmul.mubr.msk.bf16.vlgmr.msra.gmra.mrb[0].mxu0 %vm400_vm9, %v467_v58 }
  0xc9   : > { %v526_v0 = vpop.permute.xlu1 %525 }
  0xcb   : > { %v519_v62 = vpop.permute.xlu0 %518 }
 0x193   : > { %v509_v63 = vpop.f32.mrb[0].mxu0 }
 0x194   : > { %v521_v1 = vmul.f32 %v519_v62, %v509_v63  ;;  %v693_v2 = vpop.f32.mrb[1].mxu0 }
 0x195   : > { %v512_v4 = vpop.f32.mrb[2].mxu0 }
 0x196   : > { %v528_v5 = vadd.f32 %v526_v0, %v521_v1  ;;  %v694_v6 = vpop.f32.mrb[3].mxu0 }
 0x198   : > { %v535_v7 = vadd.f32 %v534_v3, %v528_v5 }
 0x19a   : > { %v536_v8 = vpack.c.bf16 %v535_v7, %v535_v7 }
 0x19c   : > { %537 = vst [vmem:[%s346_s16] sm:$0xf] %v536_v8 }
 0x19d PF: > { %s16_s23 = sadd.s32 1, %s760_s23   ;;  %s908_s21 = smov %s756_s22 }
 0x19e   : > { %p13_p5 = scmp.ge.s32.totalorder %s16_s23, 4   ;;  %s909_s22 = smov %s911_s24 }
 0x1a0   :  { %15 = sbr.rel (!%p13_p5) target bundleno = 2 (0x2), region = 80 }

// kernel: convresnet_forward.17
= control target key start
LH: loop header
LB: loop body
LE: loop exit
PB: predicated region body
PF: predicated region fallthrough
CT: control target
= control target key end

     0   :  { %s732_s18 = smov 0   ;;  %s734_s19 = smov 0   ;;  %s811_s0 = inlined_call_operand.vmem [shape: bf16[2,8,256], index: 0, kind: input, shape index: {}, may-alias: {0,1}]   ;;  %s812_s1 = inlined_call_operand.vmem [shape: bf16[2,8,256], index: 1, kind: input, shape index: {}, may-alias: {0,1}]   ;;  %s813_s2 = inlined_call_operand.vmem [shape: bf16[8,120], index: 2, kind: input, shape index: {}]   ;;  %s814_s3 = inlined_call_operand.vmem [shape: f32[8,1], index: 3, kind: input, shape index: {}]   ;;  %s815_s4 = inlined_call_operand.vmem [shape: f32[8,1], index: 4, kind: input, shape index: {}]   ;;  %s816_s5 = inlined_call_operand.vmem [shape: bf16[2,8,128], index: 5, kind: output, shape index: {}]  }
   0x1   :  { %s736_s20 = smov 0  }
   0x2 LB: > { %s27_s21 = sadd.s32 1, %s679_s19  ;;  %p576_p0 = scmp.ge.s32.totalorder %s683_s20, 1  ;;  %s683_s20 = sphi %s736_s20, %s15_s20   ;;  %s679_s19 = sphi %s734_s19, %s818_s19   ;;  %s675_s18 = sphi %s732_s18, %s817_s18  }
   0x3   : > { %p29_p1 = scmp.ge.s32.totalorder %s27_s21, 2  ;;  %p225_p2 = scmp.lt.s32.totalorder %s683_s20, 3 }
   0x5   : > { %s820_s21 = smov (%p29_p1, %s27_s21), 0  ;;  %p226_p3 = pnand %p576_p0, %p225_p2 }
   0x6   : > { %p267_p4 = scmp.lt.s32.totalorder (!%p226_p3), %s675_s18, 1  ;;  %v685_v0 = vmov (!%p226_p3), 0.0   ;;  %s686_s30 = smov (!%p226_p3), 126   ;;  %vm698_vm0 = vmmov (!%p226_p3), 0   ;;  %v699_v5 = vmov (!%p226_p3), 0   ;;  %v467_v6 = vld [vmem:[%s815_s4] sm:$0xff] (!%p226_p3) }
   0x7   : > { %229 = sbr.rel (%p226_p3) target bundleno = 413 (0x19d), region = 40  ;;  %598 = vmatprep.subr.bf16.mxu0 (!%p226_p3), %v685_v0  ;;  %s687_s6 = smov (!%p226_p3), 127   ;;  %614 = vmatprep.mubr.msk.bf16.mxu0 (!%p226_p3), %vm698_vm0, %v685_v0  ;;  %v460_v7 = vld [vmem:[%s814_s3] sm:$0xff] (!%p226_p3)  ;;  %vm303_vm1 = vcmask (!%p226_p3), 1039360   ;;  %vm315_vm2 = vcmask (!%p226_p3), 1022976   ;;  %vm383_vm3 = vcmask (!%p226_p3), 1043456  }
   0x8   : > { %s688_s7 = smov (!%p226_p3), 125   ;;  %s689_s8 = smov (!%p226_p3), 124   ;;  %659 = vset.pattern.permute.xlu0 (!%p226_p3), %v699_v5  ;;  %660 = vset.pattern.permute.xlu1 (!%p226_p3), %v699_v5  ;;  %vm309_vm4 = vcmask (!%p226_p3), 1031168   ;;  %vm321_vm5 = vcmask (!%p226_p3), 1014784   ;;  %vm327_vm6 = vcmask (!%p226_p3), 1006592   ;;  %vm333_vm7 = vcmask (!%p226_p3), 998400  }
   0x9   : > { %s690_s9 = smov (!%p226_p3), 123   ;;  %s691_s10 = smov (!%p226_p3), 122   ;;  %vm339_vm8 = vcmask (!%p226_p3), 990208   ;;  %vm345_vm9 = vcmask (!%p226_p3), 982016   ;;  %vm351_vm10 = vcmask (!%p226_p3), 973824   ;;  %vm357_vm11 = vcmask (!%p226_p3), 965632  }
   0xa   : > { %s692_s11 = smov (!%p226_p3), 121   ;;  %s693_s12 = smov (!%p226_p3), 120   ;;  %vm363_vm12 = vcmask (!%p226_p3), 957440   ;;  %vm369_vm13 = vcmask (!%p226_p3), 949248   ;;  %vm375_vm14 = vcmask (!%p226_p3), 941056   ;;  %vm381_vm15 = vcmask (!%p226_p3), 932864  }
   0xb   : > { %s694_s13 = smov (!%p226_p3), 119   ;;  %s695_s14 = smov (!%p226_p3), 118   ;;  %v412_v58 = vld [vmem:[%s813_s2] sm:$0xf] (!%p226_p3) }
   0xc   : > { %s696_s15 = smov (!%p226_p3), 117   ;;  %s697_s16 = smov (!%p226_p3), 116  }
   0xd   : > { %s700_s17 = smov (!%p226_p3), 115  }
   0xe   : > { %s822_s18 = smov (!%p267_p4, %s675_s18), 1 }
   0xf   : > { %s585_s22 = sshll.u32 %s822_s18, 3 }
  0x10   : > { %s274_s25 = scalar_lea.vmem %s811_s0, %s585_s22  ;;  %s587_s26 = sadd.s32 4, %s585_s22 }
  0x11   : > { %v757_v1 = vld [vmem:[%s274_s25] sm:$0xf]  ;;  %s283_s29 = scalar_lea.vmem %s812_s1, %s587_s26  ;;  %s701_s22 = smov 114  }
  0x12   : > { %305 = vrot.lane.b32.xlu1 %v757_v1, %s686_s30  ;;  %v297_v2 = vrot.slane %v757_v1, 4  ;;  %v294_v3 = vld [vmem:[%s283_s29] sm:$0xf]  ;;  %s581_s29 = sshll.u32 %s822_s18, 2 }
  0x13   : > { %v298_v4 = vrot.slane %v294_v3, 4 }
  0x14   : > { %299 = vrot.lane.b32.xlu0 %v297_v2, %s687_s6 }
  0x16   : > { %307 = vrot.lane.b32.xlu1 %v294_v3, %s686_s30 }
  0x18   : > { %311 = vrot.lane.b32.xlu0 %v297_v2, %s688_s7 }
  0x1a   : > { %313 = vrot.lane.b32.xlu1 %v298_v4, %s688_s7  ;;  %s291_s7 = scalar_lea.vmem %s816_s5, %s581_s29 }
  0x1c   : > { %301 = vrot.lane.b32.xlu0 %v298_v4, %s687_s6 }
  0x1e   : > { %319 = vrot.lane.b32.xlu1 %v294_v3, %s689_s8 }
  0x20   : > { %317 = vrot.lane.b32.xlu0 %v757_v1, %s689_s8 }
  0x22   : > { %325 = vrot.lane.b32.xlu1 %v298_v4, %s690_s9 }
  0x24   : > { %323 = vrot.lane.b32.xlu0 %v297_v2, %s690_s9 }
  0x26   : > { %331 = vrot.lane.b32.xlu1 %v294_v3, %s691_s10 }
  0x28   : > { %329 = vrot.lane.b32.xlu0 %v757_v1, %s691_s10 }
  0x2a   : > { %337 = vrot.lane.b32.xlu1 %v298_v4, %s692_s11 }
  0x2c   : > { %335 = vrot.lane.b32.xlu0 %v297_v2, %s692_s11 }
  0x2e   : > { %343 = vrot.lane.b32.xlu1 %v294_v3, %s693_s12 }
  0x30   : > { %341 = vrot.lane.b32.xlu0 %v757_v1, %s693_s12 }
  0x32   : > { %349 = vrot.lane.b32.xlu1 %v298_v4, %s694_s13 }
  0x34   : > { %347 = vrot.lane.b32.xlu0 %v297_v2, %s694_s13 }
  0x36   : > { %355 = vrot.lane.b32.xlu1 %v294_v3, %s695_s14 }
  0x38   : > { %353 = vrot.lane.b32.xlu0 %v757_v1, %s695_s14 }
  0x3a   : > { %361 = vrot.lane.b32.xlu1 %v298_v4, %s696_s15 }
  0x3c   : > { %359 = vrot.lane.b32.xlu0 %v297_v2, %s696_s15 }
  0x3e   : > { %367 = vrot.lane.b32.xlu1 %v294_v3, %s697_s16 }
  0x40   : > { %365 = vrot.lane.b32.xlu0 %v757_v1, %s697_s16 }
  0x42   : > { %373 = vrot.lane.b32.xlu1 %v298_v4, %s700_s17 }
  0x44   : > { %371 = vrot.lane.b32.xlu0 %v297_v2, %s700_s17 }
  0x46   : > { %379 = vrot.lane.b32.xlu1 %v294_v3, %s701_s22 }
  0x48   : > { %377 = vrot.lane.b32.xlu0 %v757_v1, %s701_s22 }
  0x4a   : > { %470 = vperm.xlu1 %660, %v467_v6  }
  0x4c   : > { %463 = vperm.xlu0 %659, %v460_v7  }
  0x84   : > { %v306_v8 = vpop.permute.xlu1 %305 }
  0x86   : > { %v300_v9 = vpop.permute.xlu0 %299 }
  0x88   : > { %v308_v10 = vpop.permute.xlu1 %307 }
  0x89   : > { %v310_v19 = vsel %vm309_vm4, %v306_v8, %v308_v10 }
  0x8a   : > { %v312_v11 = vpop.permute.xlu0 %311 }
  0x8c   : > { %v314_v12 = vpop.permute.xlu1 %313 }
  0x8d   : > { %v316_v17 = vsel %vm315_vm2, %v312_v11, %v314_v12 }
  0x8e   : > { %v302_v13 = vpop.permute.xlu0 %301  ;;  %v390_v20 = vsel %vm383_vm3, %v310_v19, %v316_v17 }
  0x8f   : > { %v304_v14 = vsel %vm303_vm1, %v300_v9, %v302_v13 }
  0x90   : > { %v386_v15 = vsel %vm383_vm3, %v757_v1, %v304_v14  ;;  %v320_v16 = vpop.permute.xlu1 %319 }
  0x91   : > { %599 = vmatpush3.bf16.msra.mxu0 %v386_v15 }
  0x92   : > { %v318_v18 = vpop.permute.xlu0 %317  ;;  %600 = vmatprep.subr.bf16.mxu0 %v685_v0 }
  0x93   : > { %v322_v23 = vsel %vm321_vm5, %v318_v18, %v320_v16 }
  0x94   : > { %v326_v21 = vpop.permute.xlu1 %325 }
  0x95   : > { %601 = vmatpush3.bf16.msra.mxu0 %v390_v20 }
  0x96   : > { %v324_v22 = vpop.permute.xlu0 %323  ;;  %602 = vmatprep.subr.bf16.mxu0 %v685_v0 }
  0x97   : > { %v328_v24 = vsel %vm327_vm6, %v324_v22, %v326_v21 }
  0x98   : > { %v394_v25 = vsel %vm383_vm3, %v322_v23, %v328_v24  ;;  %v332_v26 = vpop.permute.xlu1 %331 }
  0x99   : > { %603 = vmatpush3.bf16.msra.mxu0 %v394_v25 }
  0x9a   : > { %v330_v27 = vpop.permute.xlu0 %329  ;;  %604 = vmatprep.subr.bf16.mxu0 %v685_v0 }
  0x9b   : > { %v334_v30 = vsel %vm333_vm7, %v330_v27, %v332_v26 }
  0x9c   : > { %v338_v28 = vpop.permute.xlu1 %337 }
  0x9e   : > { %v336_v29 = vpop.permute.xlu0 %335 }
  0x9f   : > { %v340_v31 = vsel %vm339_vm8, %v336_v29, %v338_v28 }
  0xa0   : > { %v398_v32 = vsel %vm383_vm3, %v334_v30, %v340_v31  ;;  %v344_v33 = vpop.permute.xlu1 %343 }
  0xa1   : > { %605 = vmatpush3.bf16.msra.mxu0 %v398_v32 }
  0xa2   : > { %v342_v34 = vpop.permute.xlu0 %341  ;;  %606 = vmatprep.subr.bf16.mxu0 %v685_v0 }
  0xa3   : > { %v346_v37 = vsel %vm345_vm9, %v342_v34, %v344_v33 }
  0xa4   : > { %v350_v35 = vpop.permute.xlu1 %349 }
  0xa6   : > { %v348_v36 = vpop.permute.xlu0 %347 }
  0xa7   : > { %v352_v38 = vsel %vm351_vm10, %v348_v36, %v350_v35 }
  0xa8   : > { %v402_v39 = vsel %vm383_vm3, %v346_v37, %v352_v38  ;;  %v356_v40 = vpop.permute.xlu1 %355 }
  0xa9   : > { %607 = vmatpush3.bf16.msra.mxu0 %v402_v39 }
  0xaa   : > { %v354_v41 = vpop.permute.xlu0 %353  ;;  %608 = vmatprep.subr.bf16.mxu0 %v685_v0 }
  0xab   : > { %v358_v44 = vsel %vm357_vm11, %v354_v41, %v356_v40 }
  0xac   : > { %v362_v42 = vpop.permute.xlu1 %361 }
  0xae   : > { %v360_v43 = vpop.permute.xlu0 %359 }
  0xaf   : > { %v364_v45 = vsel %vm363_vm12, %v360_v43, %v362_v42 }
  0xb0   : > { %v406_v46 = vsel %vm383_vm3, %v358_v44, %v364_v45  ;;  %v368_v47 = vpop.permute.xlu1 %367 }
  0xb1   : > { %609 = vmatpush3.bf16.msra.mxu0 %v406_v46 }
  0xb2   : > { %v366_v48 = vpop.permute.xlu0 %365  ;;  %610 = vmatprep.subr.bf16.mxu0 %v685_v0 }
  0xb3   : > { %v370_v51 = vsel %vm369_vm13, %v366_v48, %v368_v47 }
  0xb4   : > { %v374_v49 = vpop.permute.xlu1 %373 }
  0xb6   : > { %v372_v50 = vpop.permute.xlu0 %371 }
  0xb7   : > { %v376_v52 = vsel %vm375_vm14, %v372_v50, %v374_v49 }
  0xb8   : > { %v410_v53 = vsel %vm383_vm3, %v370_v51, %v376_v52  ;;  %v380_v54 = vpop.permute.xlu1 %379 }
  0xb9   : > { %611 = vmatpush3.bf16.msra.mxu0 %v410_v53 }
  0xba   : > { %v378_v55 = vpop.permute.xlu0 %377  ;;  %612 = vmatprep.subr.bf16.mxu0 %v685_v0 }
  0xbb   : > { %v382_v56 = vsel %vm381_vm15, %v378_v55, %v380_v54 }
  0xbc   : > { %v418_v57 = vsel %vm383_vm3, %v382_v56, 0 }
  0xbd   : > { %613 = vmatpush3.bf16.msra.mxu0 %v418_v57 }
  0xc0   : > { %615 = vmatmul.mubr.msk.bf16.vlgmr.msra.gmra.mrb[0].mxu0 %vm345_vm9, %v412_v58 }
  0xc9   : > { %v471_v61 = vpop.permute.xlu1 %470 }
  0xcb   : > { %v464_v59 = vpop.permute.xlu0 %463 }
 0x193   : > { %v454_v60 = vpop.f32.mrb[0].mxu0 }
 0x194   : > { %v466_v62 = vmul.f32 %v464_v59, %v454_v60  ;;  %v616_v63 = vpop.f32.mrb[1].mxu0 }
 0x195   : > { %v457_v1 = vpop.f32.mrb[2].mxu0 }
 0x196   : > { %v473_v2 = vadd.f32 %v471_v61, %v466_v62  ;;  %v617_v3 = vpop.f32.mrb[3].mxu0 }
 0x198   : > { %v474_v0 = vmax.f32 %v473_v2, 0.0 }
 0x19a   : > { %v475_v4 = vpack.c.bf16 %v474_v0, %v474_v0 }
 0x19c   : > { %476 = vst [vmem:[%s291_s7] sm:$0xf] %v475_v4 }
 0x19d PF: > { %s15_s20 = sadd.s32 1, %s683_s20   ;;  %s817_s18 = smov %s679_s19 }
 0x19e   : > { %p12_p5 = scmp.ge.s32.totalorder %s15_s20, 4   ;;  %s818_s19 = smov %s820_s21 }
 0x1a0   :  { %14 = sbr.rel (!%p12_p5) target bundleno = 2 (0x2), region = 73 }

// kernel: convresnet_forward.18
= control target key start
LH: loop header
LB: loop body
LE: loop exit
PB: predicated region body
PF: predicated region fallthrough
CT: control target
= control target key end

     0   :  { %s810_s21 = smov 0   ;;  %s812_s22 = smov 0   ;;  %s892_s0 = inlined_call_operand.vmem [shape: bf16[2,8,256], index: 0, kind: input, shape index: {}, may-alias: {0,1}]   ;;  %s893_s1 = inlined_call_operand.vmem [shape: bf16[2,8,256], index: 1, kind: input, shape index: {}, may-alias: {0,1}]   ;;  %s894_s2 = inlined_call_operand.vmem [shape: bf16[8,120], index: 2, kind: input, shape index: {}]   ;;  %s895_s3 = inlined_call_operand.vmem [shape: f32[8,1], index: 3, kind: input, shape index: {}]   ;;  %s896_s4 = inlined_call_operand.vmem [shape: f32[8,1], index: 4, kind: input, shape index: {}]   ;;  %s897_s5 = inlined_call_operand.vmem [shape: bf16[2,8,128], index: 5, kind: input, shape index: {}]   ;;  %s898_s6 = inlined_call_operand.vmem [shape: bf16[2,8,128], index: 6, kind: output, shape index: {}]  }
   0x1   :  { %s814_s23 = smov 0  }
   0x2 LB: > { %s28_s24 = sadd.s32 1, %s752_s22  ;;  %p648_p0 = scmp.ge.s32.totalorder %s756_s23, 1  ;;  %s756_s23 = sphi %s814_s23, %s16_s23   ;;  %s752_s22 = sphi %s812_s22, %s900_s22   ;;  %s748_s21 = sphi %s810_s21, %s899_s21  }
   0x3   : > { %p30_p1 = scmp.ge.s32.totalorder %s28_s24, 2  ;;  %p264_p2 = scmp.lt.s32.totalorder %s756_s23, 3 }
   0x5   : > { %s902_s24 = smov (%p30_p1, %s28_s24), 0  ;;  %p265_p3 = pnand %p648_p0, %p264_p2 }
   0x6   : > { %p315_p4 = scmp.lt.s32.totalorder (!%p265_p3), %s748_s21, 1  ;;  %v758_v0 = vmov (!%p265_p3), 0.0   ;;  %s759_s9 = smov (!%p265_p3), 126   ;;  %vm771_vm0 = vmmov (!%p265_p3), 0   ;;  %v772_v5 = vmov (!%p265_p3), 0   ;;  %v522_v6 = vld [vmem:[%s896_s4] sm:$0xff] (!%p265_p3) }
   0x7   : > { %268 = sbr.rel (%p265_p3) target bundleno = 413 (0x19d), region = 44  ;;  %671 = vmatprep.subr.bf16.mxu0 (!%p265_p3), %v758_v0  ;;  %s760_s10 = smov (!%p265_p3), 127   ;;  %687 = vmatprep.mubr.msk.bf16.mxu0 (!%p265_p3), %vm771_vm0, %v758_v0  ;;  %v515_v7 = vld [vmem:[%s895_s3] sm:$0xff] (!%p265_p3)  ;;  %vm358_vm1 = vcmask (!%p265_p3), 1039360   ;;  %vm370_vm2 = vcmask (!%p265_p3), 1022976   ;;  %vm438_vm3 = vcmask (!%p265_p3), 1043456  }
   0x8   : > { %s761_s11 = smov (!%p265_p3), 125   ;;  %s762_s12 = smov (!%p265_p3), 124   ;;  %732 = vset.pattern.permute.xlu0 (!%p265_p3), %v772_v5  ;;  %733 = vset.pattern.permute.xlu1 (!%p265_p3), %v772_v5  ;;  %vm364_vm4 = vcmask (!%p265_p3), 1031168   ;;  %vm376_vm5 = vcmask (!%p265_p3), 1014784   ;;  %vm382_vm6 = vcmask (!%p265_p3), 1006592   ;;  %vm388_vm7 = vcmask (!%p265_p3), 998400  }
   0x9   : > { %s763_s13 = smov (!%p265_p3), 123   ;;  %s764_s14 = smov (!%p265_p3), 122   ;;  %vm394_vm8 = vcmask (!%p265_p3), 990208   ;;  %vm400_vm9 = vcmask (!%p265_p3), 982016   ;;  %vm406_vm10 = vcmask (!%p265_p3), 973824   ;;  %vm412_vm11 = vcmask (!%p265_p3), 965632  }
   0xa   : > { %s765_s15 = smov (!%p265_p3), 121   ;;  %s766_s16 = smov (!%p265_p3), 120   ;;  %vm418_vm12 = vcmask (!%p265_p3), 957440   ;;  %vm424_vm13 = vcmask (!%p265_p3), 949248   ;;  %vm430_vm14 = vcmask (!%p265_p3), 941056   ;;  %vm436_vm15 = vcmask (!%p265_p3), 932864  }
   0xb   : > { %s767_s17 = smov (!%p265_p3), 119   ;;  %s768_s18 = smov (!%p265_p3), 118   ;;  %v467_v58 = vld [vmem:[%s894_s2] sm:$0xf] (!%p265_p3) }
   0xc   : > { %s769_s19 = smov (!%p265_p3), 117   ;;  %s770_s20 = smov (!%p265_p3), 116  }
   0xd   : > { %s774_s26 = smov (!%p265_p3), 114  }
   0xe   : > { %s904_s21 = smov (!%p315_p4, %s748_s21), 1 }
   0xf   : > { %s658_s25 = sshll.u32 %s904_s21, 3 }
  0x10   : > { %s322_s28 = scalar_lea.vmem %s892_s0, %s658_s25  ;;  %s660_s29 = sadd.s32 4, %s658_s25 }
  0x11   : > { %v835_v1 = vld [vmem:[%s322_s28] sm:$0xf]  ;;  %s331_s8 = scalar_lea.vmem %s893_s1, %s660_s29  ;;  %s773_s25 = smov 115  }
  0x12   : > { %360 = vrot.lane.b32.xlu1 %v835_v1, %s759_s9  ;;  %v352_v2 = vrot.slane %v835_v1, 4  ;;  %v349_v3 = vld [vmem:[%s331_s8] sm:$0xf] }
  0x13   : > { %v353_v4 = vrot.slane %v349_v3, 4 }
  0x14   : > { %354 = vrot.lane.b32.xlu0 %v352_v2, %s760_s10 }
  0x16   : > { %362 = vrot.lane.b32.xlu1 %v349_v3, %s759_s9  ;;  %s653_s9 = sshll.u32 %s904_s21, 2 }
  0x18   : > { %366 = vrot.lane.b32.xlu0 %v352_v2, %s761_s11 }
  0x1a   : > { %368 = vrot.lane.b32.xlu1 %v353_v4, %s761_s11 }
  0x1c   : > { %356 = vrot.lane.b32.xlu0 %v353_v4, %s760_s10 }
  0x1e   : > { %374 = vrot.lane.b32.xlu1 %v349_v3, %s762_s12 }
  0x20   : > { %372 = vrot.lane.b32.xlu0 %v835_v1, %s762_s12  ;;  %s339_s12 = scalar_lea.vmem %s897_s5, %s653_s9 }
  0x21   : > { %v529_v60 = vld [vmem:[%s339_s12] sm:$0xf] }
  0x22   : > { %380 = vrot.lane.b32.xlu1 %v353_v4, %s763_s13 }
  0x24   : > { %378 = vrot.lane.b32.xlu0 %v352_v2, %s763_s13 }
  0x26   : > { %386 = vrot.lane.b32.xlu1 %v349_v3, %s764_s14 }
  0x28   : > { %384 = vrot.lane.b32.xlu0 %v835_v1, %s764_s14 }
  0x2a   : > { %392 = vrot.lane.b32.xlu1 %v353_v4, %s765_s15 }
  0x2c   : > { %390 = vrot.lane.b32.xlu0 %v352_v2, %s765_s15  ;;  %s346_s15 = scalar_lea.vmem %s898_s6, %s653_s9 }
  0x2e   : > { %398 = vrot.lane.b32.xlu1 %v349_v3, %s766_s16 }
  0x30   : > { %396 = vrot.lane.b32.xlu0 %v835_v1, %s766_s16 }
  0x32   : > { %404 = vrot.lane.b32.xlu1 %v353_v4, %s767_s17 }
  0x34   : > { %402 = vrot.lane.b32.xlu0 %v352_v2, %s767_s17 }
  0x36   : > { %410 = vrot.lane.b32.xlu1 %v349_v3, %s768_s18 }
  0x38   : > { %408 = vrot.lane.b32.xlu0 %v835_v1, %s768_s18 }
  0x3a   : > { %416 = vrot.lane.b32.xlu1 %v353_v4, %s769_s19 }
  0x3c   : > { %414 = vrot.lane.b32.xlu0 %v352_v2, %s769_s19 }
  0x3e   : > { %422 = vrot.lane.b32.xlu1 %v349_v3, %s770_s20 }
  0x40   : > { %420 = vrot.lane.b32.xlu0 %v835_v1, %s770_s20 }
  0x42   : > { %428 = vrot.lane.b32.xlu1 %v353_v4, %s773_s25 }
  0x44   : > { %426 = vrot.lane.b32.xlu0 %v352_v2, %s773_s25 }
  0x46   : > { %434 = vrot.lane.b32.xlu1 %v349_v3, %s774_s26 }
  0x48   : > { %432 = vrot.lane.b32.xlu0 %v835_v1, %s774_s26 }
  0x4a   : > { %525 = vperm.xlu1 %733, %v522_v6  }
  0x4c   : > { %518 = vperm.xlu0 %732, %v515_v7  }
  0x84   : > { %v361_v8 = vpop.permute.xlu1 %360 }
  0x86   : > { %v355_v9 = vpop.permute.xlu0 %354 }
  0x88   : > { %v363_v10 = vpop.permute.xlu1 %362 }
  0x89   : > { %v365_v19 = vsel %vm364_vm4, %v361_v8, %v363_v10 }
  0x8a   : > { %v367_v11 = vpop.permute.xlu0 %366 }
  0x8c   : > { %v369_v12 = vpop.permute.xlu1 %368 }
  0x8d   : > { %v371_v17 = vsel %vm370_vm2, %v367_v11, %v369_v12 }
  0x8e   : > { %v357_v13 = vpop.permute.xlu0 %356  ;;  %v445_v20 = vsel %vm438_vm3, %v365_v19, %v371_v17 }
  0x8f   : > { %v359_v14 = vsel %vm358_vm1, %v355_v9, %v357_v13 }
  0x90   : > { %v441_v15 = vsel %vm438_vm3, %v835_v1, %v359_v14  ;;  %v375_v16 = vpop.permute.xlu1 %374  ;;  %v530_v1 = vunpack.c.l.bf16 %v529_v60 }
  0x91   : > { %672 = vmatpush3.bf16.msra.mxu0 %v441_v15 }
  0x92   : > { %v373_v18 = vpop.permute.xlu0 %372  ;;  %673 = vmatprep.subr.bf16.mxu0 %v758_v0 }
  0x93   : > { %v377_v23 = vsel %vm376_vm5, %v373_v18, %v375_v16 }
  0x94   : > { %v381_v21 = vpop.permute.xlu1 %380 }
  0x95   : > { %674 = vmatpush3.bf16.msra.mxu0 %v445_v20 }
  0x96   : > { %v379_v22 = vpop.permute.xlu0 %378  ;;  %675 = vmatprep.subr.bf16.mxu0 %v758_v0 }
  0x97   : > { %v383_v24 = vsel %vm382_vm6, %v379_v22, %v381_v21 }
  0x98   : > { %v449_v25 = vsel %vm438_vm3, %v377_v23, %v383_v24  ;;  %v387_v26 = vpop.permute.xlu1 %386 }
  0x99   : > { %676 = vmatpush3.bf16.msra.mxu0 %v449_v25 }
  0x9a   : > { %v385_v27 = vpop.permute.xlu0 %384  ;;  %677 = vmatprep.subr.bf16.mxu0 %v758_v0 }
  0x9b   : > { %v389_v30 = vsel %vm388_vm7, %v385_v27, %v387_v26 }
  0x9c   : > { %v393_v28 = vpop.permute.xlu1 %392 }
  0x9e   : > { %v391_v29 = vpop.permute.xlu0 %390 }
  0x9f   : > { %v395_v31 = vsel %vm394_vm8, %v391_v29, %v393_v28 }
  0xa0   : > { %v453_v32 = vsel %vm438_vm3, %v389_v30, %v395_v31  ;;  %v399_v33 = vpop.permute.xlu1 %398 }
  0xa1   : > { %678 = vmatpush3.bf16.msra.mxu0 %v453_v32 }
  0xa2   : > { %v397_v34 = vpop.permute.xlu0 %396  ;;  %679 = vmatprep.subr.bf16.mxu0 %v758_v0 }
  0xa3   : > { %v401_v37 = vsel %vm400_vm9, %v397_v34, %v399_v33 }
  0xa4   : > { %v405_v35 = vpop.permute.xlu1 %404 }
  0xa6   : > { %v403_v36 = vpop.permute.xlu0 %402 }
  0xa7   : > { %v407_v38 = vsel %vm406_vm10, %v403_v36, %v405_v35 }
  0xa8   : > { %v457_v39 = vsel %vm438_vm3, %v401_v37, %v407_v38  ;;  %v411_v40 = vpop.permute.xlu1 %410 }
  0xa9   : > { %680 = vmatpush3.bf16.msra.mxu0 %v457_v39 }
  0xaa   : > { %v409_v41 = vpop.permute.xlu0 %408  ;;  %681 = vmatprep.subr.bf16.mxu0 %v758_v0 }
  0xab   : > { %v413_v44 = vsel %vm412_vm11, %v409_v41, %v411_v40 }
  0xac   : > { %v417_v42 = vpop.permute.xlu1 %416 }
  0xae   : > { %v415_v43 = vpop.permute.xlu0 %414 }
  0xaf   : > { %v419_v45 = vsel %vm418_vm12, %v415_v43, %v417_v42 }
  0xb0   : > { %v461_v46 = vsel %vm438_vm3, %v413_v44, %v419_v45  ;;  %v423_v47 = vpop.permute.xlu1 %422 }
  0xb1   : > { %682 = vmatpush3.bf16.msra.mxu0 %v461_v46 }
  0xb2   : > { %v421_v48 = vpop.permute.xlu0 %420  ;;  %683 = vmatprep.subr.bf16.mxu0 %v758_v0 }
  0xb3   : > { %v425_v51 = vsel %vm424_vm13, %v421_v48, %v423_v47 }
  0xb4   : > { %v429_v49 = vpop.permute.xlu1 %428 }
  0xb6   : > { %v427_v50 = vpop.permute.xlu0 %426 }
  0xb7   : > { %v431_v52 = vsel %vm430_vm14, %v427_v50, %v429_v49 }
  0xb8   : > { %v465_v53 = vsel %vm438_vm3, %v425_v51, %v431_v52  ;;  %v435_v54 = vpop.permute.xlu1 %434 }
  0xb9   : > { %684 = vmatpush3.bf16.msra.mxu0 %v465_v53 }
  0xba   : > { %v433_v55 = vpop.permute.xlu0 %432  ;;  %685 = vmatprep.subr.bf16.mxu0 %v758_v0 }
  0xbb   : > { %v437_v56 = vsel %vm436_vm15, %v433_v55, %v435_v54 }
  0xbc   : > { %v473_v57 = vsel %vm438_vm3, %v437_v56, 0 }
  0xbd   : > { %686 = vmatpush3.bf16.msra.mxu0 %v473_v57 }
  0xc0   : > { %688 = vmatmul.mubr.msk.bf16.vlgmr.msra.gmra.mrb[0].mxu0 %vm400_vm9, %v467_v58 }
  0xc9   : > { %v526_v62 = vpop.permute.xlu1 %525 }
  0xcb   : > { %v519_v59 = vpop.permute.xlu0 %518 }
 0x193   : > { %v509_v61 = vpop.f32.mrb[0].mxu0 }
 0x194   : > { %v521_v63 = vmul.f32 %v519_v59, %v509_v61  ;;  %v689_v0 = vpop.f32.mrb[1].mxu0 }
 0x195   : > { %v512_v2 = vpop.f32.mrb[2].mxu0 }
 0x196   : > { %v528_v3 = vadd.f32 %v526_v62, %v521_v63  ;;  %v690_v4 = vpop.f32.mrb[3].mxu0 }
 0x198   : > { %v531_v5 = vadd.f32 %v530_v1, %v528_v3 }
 0x19a   : > { %v532_v6 = vpack.c.bf16 %v531_v5, %v531_v5 }
 0x19c   : > { %533 = vst [vmem:[%s346_s15] sm:$0xf] %v532_v6 }
 0x19d PF: > { %s16_s23 = sadd.s32 1, %s756_s23   ;;  %s899_s21 = smov %s752_s22 }
 0x19e   : > { %p13_p5 = scmp.ge.s32.totalorder %s16_s23, 4   ;;  %s900_s22 = smov %s902_s24 }
 0x1a0   :  { %15 = sbr.rel (!%p13_p5) target bundleno = 2 (0x2), region = 80 }

// kernel: convresnet_forward.27
= control target key start
LH: loop header
LB: loop body
LE: loop exit
PB: predicated region body
PF: predicated region fallthrough
CT: control target
= control target key end

     0   :  { %s893_s18 = smov 0   ;;  %s1057_s0 = inlined_call_operand.vmem [shape: bf16[2,128,2], index: 0, kind: input, shape index: {}]   ;;  %s1058_s1 = inlined_call_operand.vmem [shape: f32[128,1], index: 1, kind: input, shape index: {}]   ;;  %s1059_s2 = inlined_call_operand.vmem [shape: f32[128,1], index: 2, kind: input, shape index: {}]   ;;  %s1060_s3 = inlined_call_operand.vmem [shape: f32[5,128], index: 3, kind: input, shape index: {}]   ;;  %s1061_s4 = inlined_call_operand.vmem [shape: f32[5,1], index: 4, kind: input, shape index: {}]   ;;  %s1062_s5 = inlined_call_operand.vmem [shape: f32[2,5,1], index: 5, kind: output, shape index: {}]  }
   0x1 LB: > { %s707_s19 = sadd.s32 4294967295, %s857_s18   ;;  %p711_p0 = scmp.ge.s32.totalorder %s857_s18, 1  ;;  %s857_s18 = sphi %s893_s18, %s15_s18  }
   0x2   : > { %p187_p1 = scmp.lt.s32.totalorder %s857_s18, 3 }
   0x4   : > { %p188_p2 = pnand %p711_p0, %p187_p1 }
   0x5   : > { %v367_v0 = vld [vmem:[%s1059_s2] sm:$0xff] (!%p188_p2)  ;;  %v859_v2 = vmov (!%p188_p2), 0   ;;  %v368_v3 = vld [vmem:[%s1059_s2 + $0x8] sm:$0xff] (!%p188_p2)  ;;  %v258_v5 = vld [vmem:[%s1058_s1 + $0x18] sm:$0xff] (!%p188_p2)  ;;  %p214_p3 = scmp.lt.s32.totalorder (!%p188_p2), %s707_s19, 1  ;;  %vm495_vm0 = vcmask (!%p188_p2), 15360  }
   0x6   : > { %191 = sbr.rel (%p188_p2) target bundleno = 618 (0x26a), region = 40  ;;  %v255_v1 = vld [vmem:[%s1058_s1] sm:$0xff] (!%p188_p2)  ;;  %846 = vset.pattern.permute.xlu1 (!%p188_p2), %v859_v2  ;;  %845 = vset.pattern.permute.xlu0 (!%p188_p2), %v859_v2  ;;  %v256_v4 = vld [vmem:[%s1058_s1 + $0x8] sm:$0xff] (!%p188_p2)  ;;  %v257_v6 = vld [vmem:[%s1058_s1 + $0x10] sm:$0xff] (!%p188_p2)  ;;  %vm861_vm1 = vmmov (!%p188_p2), 0   ;;  %vm633_vm2 = vcmask (!%p188_p2), 4096  }
   0x7   : > { %385 = vperm.xlu1 (!%p188_p2), %846, %v367_v0   ;;  %273 = vperm.xlu0 (!%p188_p2), %845, %v255_v1   ;;  %v370_v7 = vld [vmem:[%s1059_s2 + $0x18] sm:$0xff] (!%p188_p2)  ;;  %v369_v8 = vld [vmem:[%s1059_s2 + $0x10] sm:$0xff] (!%p188_p2)  ;;  %v260_v9 = vld [vmem:[%s1058_s1 + $0x28] sm:$0xff] (!%p188_p2) }
   0x8   : > { %v259_v10 = vld [vmem:[%s1058_s1 + $0x20] sm:$0xff] (!%p188_p2)  ;;  %v372_v11 = vld [vmem:[%s1059_s2 + $0x28] sm:$0xff] (!%p188_p2)  ;;  %v262_v13 = vld [vmem:[%s1058_s1 + $0x38] sm:$0xff] (!%p188_p2) }
   0x9   : > { %v371_v12 = vld [vmem:[%s1059_s2 + $0x20] sm:$0xff] (!%p188_p2)  ;;  %v261_v14 = vld [vmem:[%s1058_s1 + $0x30] sm:$0xff] (!%p188_p2)  ;;  %v374_v15 = vld [vmem:[%s1059_s2 + $0x38] sm:$0xff] (!%p188_p2) }
   0xa   : > { %v373_v16 = vld [vmem:[%s1059_s2 + $0x30] sm:$0xff] (!%p188_p2)  ;;  %v264_v17 = vld [vmem:[%s1058_s1 + $0x48] sm:$0xff] (!%p188_p2)  ;;  %v263_v18 = vld [vmem:[%s1058_s1 + $0x40] sm:$0xff] (!%p188_p2) }
   0xb   : > { %390 = vperm.xlu1 (!%p188_p2), %846, %v368_v3   ;;  %278 = vperm.xlu0 (!%p188_p2), %845, %v256_v4   ;;  %v376_v19 = vld [vmem:[%s1059_s2 + $0x48] sm:$0xff] (!%p188_p2)  ;;  %v375_v20 = vld [vmem:[%s1059_s2 + $0x40] sm:$0xff] (!%p188_p2)  ;;  %v266_v21 = vld [vmem:[%s1058_s1 + $0x58] sm:$0xff] (!%p188_p2) }
   0xc   : > { %v265_v22 = vld [vmem:[%s1058_s1 + $0x50] sm:$0xff] (!%p188_p2)  ;;  %v378_v23 = vld [vmem:[%s1059_s2 + $0x58] sm:$0xff] (!%p188_p2)  ;;  %v268_v25 = vld [vmem:[%s1058_s1 + $0x68] sm:$0xff] (!%p188_p2) }
   0xd   : > { %v377_v24 = vld [vmem:[%s1059_s2 + $0x50] sm:$0xff]  ;;  %v267_v26 = vld [vmem:[%s1058_s1 + $0x60] sm:$0xff]  ;;  %v380_v27 = vld [vmem:[%s1059_s2 + $0x68] sm:$0xff]  ;;  %s1064_s19 = smov (!%p214_p3, %s707_s19), 1 }
   0xe   : > { %v379_v28 = vld [vmem:[%s1059_s2 + $0x60] sm:$0xff]  ;;  %v270_v29 = vld [vmem:[%s1058_s1 + $0x78] sm:$0xff]  ;;  %v269_v30 = vld [vmem:[%s1058_s1 + $0x70] sm:$0xff]  ;;  %s717_s13 = sshll.u32 %s1064_s19, 6  ;;  %s714_s23 = sshll.u32 %s1064_s19, 3 }
   0xf   : > { %288 = vperm.xlu1 %846, %v258_v5   ;;  %283 = vperm.xlu0 %845, %v257_v6   ;;  %v382_v31 = vld [vmem:[%s1059_s2 + $0x78] sm:$0xff]  ;;  %v381_v32 = vld [vmem:[%s1059_s2 + $0x70] sm:$0xff]  ;;  %s1007_s16 = scalar_lea.vmem %s1057_s0, %s717_s13  ;;  %s222_s26 = scalar_lea.vmem %s1062_s5, %s714_s23 }
  0x10   : > { %v719_v33 = vld [vmem:[%s1007_s16] sm:$0xff]   ;;  %v750_v42 = vld [vmem:[%s1007_s16 + $0x8] sm:$0xff]   ;;  %v751_v57 = vld [vmem:[%s1007_s16 + $0x10] sm:$0xff]  }
  0x11   : > { %v720_v34 = vunpack.c.l.bf16 %v719_v33  ;;  %v721_v38 = vunpack.c.h.bf16 %v719_v33  ;;  %v725_v46 = vunpack.c.h.bf16 %v750_v42  ;;  %v724_v47 = vunpack.c.l.bf16 %v750_v42 }
  0x12   : > { %v729_v61 = vunpack.c.h.bf16 %v751_v57  ;;  %v728_v62 = vunpack.c.l.bf16 %v751_v57 }
  0x13   : > { %400 = vperm.xlu1 %846, %v370_v7   ;;  %395 = vperm.xlu0 %845, %v369_v8   ;;  %v752_v7 = vld [vmem:[%s1007_s16 + $0x18] sm:$0xff]  }
  0x17   : > { %298 = vperm.xlu1 %846, %v260_v9   ;;  %293 = vperm.xlu0 %845, %v259_v10  }
  0x1b   : > { %410 = vperm.xlu1 %846, %v372_v11   ;;  %405 = vperm.xlu0 %845, %v371_v12  }
  0x1f   : > { %308 = vperm.xlu1 %846, %v262_v13   ;;  %303 = vperm.xlu0 %845, %v261_v14   ;;  %v733_v13 = vunpack.c.h.bf16 %v752_v7  ;;  %v732_v14 = vunpack.c.l.bf16 %v752_v7 }
  0x23   : > { %420 = vperm.xlu1 %846, %v374_v15   ;;  %415 = vperm.xlu0 %845, %v373_v16  }
  0x27   : > { %318 = vperm.xlu1 %846, %v264_v17   ;;  %313 = vperm.xlu0 %845, %v263_v18  }
  0x2b   : > { %430 = vperm.xlu1 %846, %v376_v19   ;;  %425 = vperm.xlu0 %845, %v375_v20  }
  0x2f   : > { %328 = vperm.xlu1 %846, %v266_v21   ;;  %323 = vperm.xlu0 %845, %v265_v22   ;;  %v860_v21 = vmov 0.0|0.0  }
  0x30   : > { %809 = vmatprep.subr.bf16.mxu0 %v860_v21 }
  0x33   : > { %440 = vperm.xlu1 %846, %v378_v23   ;;  %435 = vperm.xlu0 %845, %v377_v24   ;;  %v753_v24 = vld [vmem:[%s1007_s16 + $0x20] sm:$0xff]  }
  0x37   : > { %338 = vperm.xlu1 %846, %v268_v25   ;;  %333 = vperm.xlu0 %845, %v267_v26  }
  0x3b   : > { %450 = vperm.xlu1 %846, %v380_v27   ;;  %445 = vperm.xlu0 %845, %v379_v28  }
  0x3f   : > { %348 = vperm.xlu1 %846, %v270_v29   ;;  %343 = vperm.xlu0 %845, %v269_v30   ;;  %v737_v29 = vunpack.c.h.bf16 %v753_v24  ;;  %v736_v30 = vunpack.c.l.bf16 %v753_v24 }
  0x43   : > { %460 = vperm.xlu1 %846, %v382_v31   ;;  %455 = vperm.xlu0 %845, %v381_v32  }
  0x86   : > { %v386_v35 = vpop.permute.xlu1 %385  ;;  %v274_v36 = vpop.permute.xlu0 %273 }
  0x87   : > { %v351_v37 = vmul.f32 %v720_v34, %v274_v36 }
  0x89   : > { %v463_v39 = vadd.f32 %v386_v35, %v351_v37 }
  0x8a   : > { %v391_v40 = vpop.permute.xlu1 %390  ;;  %v279_v41 = vpop.permute.xlu0 %278 }
  0x8b   : > { %v352_v43 = vmul.f32 %v721_v38, %v279_v41  ;;  %v479_v44 = vmax.f32 %v463_v39, 0.0  ;;  %v754_v39 = vld [vmem:[%s1007_s16 + $0x28] sm:$0xff]  }
  0x8d   : > { %v464_v45 = vadd.f32 %v391_v40, %v352_v43  ;;  %v496_v48 = vsel %vm495_vm0, %v479_v44, 0.0  ;;  %v741_v44 = vunpack.c.h.bf16 %v754_v39 }
  0x8e   : > { %v289_v49 = vpop.permute.xlu1 %288  ;;  %v284_v50 = vpop.permute.xlu0 %283  ;;  %497 = vadd.xlane.f32.xlu0 %v496_v48 }
  0x8f   : > { %v480_v51 = vmax.f32 %v464_v45, 0.0  ;;  %v354_v52 = vmul.f32 %v725_v46, %v289_v49  ;;  %v353_v53 = vmul.f32 %v724_v47, %v284_v50  ;;  %v740_v45 = vunpack.c.l.bf16 %v754_v39 }
  0x91   : > { %v499_v54 = vsel %vm495_vm0, %v480_v51, 0.0 }
  0x92   : > { %v401_v55 = vpop.permute.xlu1 %400  ;;  %v396_v56 = vpop.permute.xlu0 %395  ;;  %500 = vadd.xlane.f32.xlu1 %v499_v54  ;;  %v755_v54 = vld [vmem:[%s1007_s16 + $0x30] sm:$0xff]  }
  0x93   : > { %v466_v58 = vadd.f32 %v401_v55, %v354_v52  ;;  %v465_v59 = vadd.f32 %v396_v56, %v353_v53 }
  0x95   : > { %v481_v60 = vmax.f32 %v465_v59, 0.0  ;;  %v482_v1 = vmax.f32 %v466_v58, 0.0  ;;  %v745_v59 = vunpack.c.h.bf16 %v755_v54 }
  0x96   : > { %v299_v63 = vpop.permute.xlu1 %298  ;;  %v294_v0 = vpop.permute.xlu0 %293 }
  0x97   : > { %v502_v2 = vsel %vm495_vm0, %v481_v60, 0.0  ;;  %v356_v3 = vmul.f32 %v729_v61, %v299_v63  ;;  %v355_v4 = vmul.f32 %v728_v62, %v294_v0  ;;  %v505_v10 = vsel %vm495_vm0, %v482_v1, 0.0 }
  0x98   : > { %503 = vadd.xlane.f32.xlu0 %v502_v2  ;;  %v744_v60 = vunpack.c.l.bf16 %v755_v54 }
  0x9a   : > { %v411_v5 = vpop.permute.xlu1 %410  ;;  %v406_v6 = vpop.permute.xlu0 %405 }
  0x9b   : > { %v468_v8 = vadd.f32 %v411_v5, %v356_v3  ;;  %v467_v9 = vadd.f32 %v406_v6, %v355_v4  ;;  %v756_v5 = vld [vmem:[%s1007_s16 + $0x38] sm:$0xff]  }
  0x9c   : > { %506 = vadd.xlane.f32.xlu0 %v505_v10  ;;  %v749_v10 = vunpack.c.h.bf16 %v756_v5 }
  0x9d   : > { %v484_v11 = vmax.f32 %v468_v8, 0.0  ;;  %v483_v12 = vmax.f32 %v467_v9, 0.0 }
  0x9e   : > { %v309_v15 = vpop.permute.xlu1 %308  ;;  %v304_v16 = vpop.permute.xlu0 %303 }
  0x9f   : > { %v508_v17 = vsel %vm495_vm0, %v483_v12, 0.0  ;;  %v511_v18 = vsel %vm495_vm0, %v484_v11, 0.0  ;;  %v358_v19 = vmul.f32 %v733_v13, %v309_v15  ;;  %v357_v20 = vmul.f32 %v732_v14, %v304_v16 }
  0xa0   : > { %509 = vadd.xlane.f32.xlu1 %v508_v17  ;;  %512 = vadd.xlane.f32.xlu0 %v511_v18  ;;  %v748_v11 = vunpack.c.l.bf16 %v756_v5  ;;  %v562_v5 = vld [vmem:[%s1061_s4] sm:$0x1f] }
  0xa2   : > { %v421_v22 = vpop.permute.xlu1 %420  ;;  %v416_v23 = vpop.permute.xlu0 %415 }
  0xa3   : > { %v470_v25 = vadd.f32 %v421_v22, %v358_v19  ;;  %v469_v26 = vadd.f32 %v416_v23, %v357_v20 }
  0xa5   : > { %v486_v27 = vmax.f32 %v470_v25, 0.0  ;;  %v485_v28 = vmax.f32 %v469_v26, 0.0 }
  0xa6   : > { %v319_v31 = vpop.permute.xlu1 %318  ;;  %v314_v32 = vpop.permute.xlu0 %313 }
  0xa7   : > { %v514_v33 = vsel %vm495_vm0, %v485_v28, 0.0  ;;  %v517_v34 = vsel %vm495_vm0, %v486_v27, 0.0  ;;  %v360_v35 = vmul.f32 %v737_v29, %v319_v31  ;;  %v359_v36 = vmul.f32 %v736_v30, %v314_v32 }
  0xa8   : > { %515 = vadd.xlane.f32.xlu1 %v514_v33  ;;  %518 = vadd.xlane.f32.xlu0 %v517_v34  ;;  %v862_v27 = vmov 0.0  }
  0xa9   : > { %806 = vmatprep.mubr.msk.f32.mxu0 %vm861_vm1, %v862_v27 }
  0xaa   : > { %v431_v37 = vpop.permute.xlu1 %430  ;;  %v426_v38 = vpop.permute.xlu0 %425 }
  0xab   : > { %v472_v40 = vadd.f32 %v431_v37, %v360_v35  ;;  %v471_v41 = vadd.f32 %v426_v38, %v359_v36 }
  0xad   : > { %v488_v42 = vmax.f32 %v472_v40, 0.0  ;;  %v487_v43 = vmax.f32 %v471_v41, 0.0 }
  0xae   : > { %v329_v46 = vpop.permute.xlu1 %328  ;;  %v324_v47 = vpop.permute.xlu0 %323 }
  0xaf   : > { %v520_v48 = vsel %vm495_vm0, %v487_v43, 0.0  ;;  %v523_v49 = vsel %vm495_vm0, %v488_v42, 0.0  ;;  %v362_v50 = vmul.f32 %v741_v44, %v329_v46  ;;  %v361_v51 = vmul.f32 %v740_v45, %v324_v47 }
  0xb0   : > { %521 = vadd.xlane.f32.xlu1 %v520_v48  ;;  %524 = vadd.xlane.f32.xlu0 %v523_v49 }
  0xb2   : > { %v441_v52 = vpop.permute.xlu1 %440  ;;  %v436_v53 = vpop.permute.xlu0 %435 }
  0xb3   : > { %v474_v55 = vadd.f32 %v441_v52, %v362_v50  ;;  %v473_v56 = vadd.f32 %v436_v53, %v361_v51 }
  0xb5   : > { %v490_v57 = vmax.f32 %v474_v55, 0.0  ;;  %v489_v58 = vmax.f32 %v473_v56, 0.0 }
  0xb6   : > { %v339_v61 = vpop.permute.xlu1 %338  ;;  %v334_v62 = vpop.permute.xlu0 %333 }
  0xb7   : > { %v526_v63 = vsel %vm495_vm0, %v489_v58, 0.0  ;;  %v529_v0 = vsel %vm495_vm0, %v490_v57, 0.0  ;;  %v364_v1 = vmul.f32 %v745_v59, %v339_v61  ;;  %v363_v2 = vmul.f32 %v744_v60, %v334_v62 }
  0xb8   : > { %527 = vadd.xlane.f32.xlu1 %v526_v63  ;;  %530 = vadd.xlane.f32.xlu0 %v529_v0 }
  0xba   : > { %v451_v3 = vpop.permute.xlu1 %450  ;;  %v446_v4 = vpop.permute.xlu0 %445 }
  0xbb   : > { %v476_v6 = vadd.f32 %v451_v3, %v364_v1  ;;  %v475_v7 = vadd.f32 %v446_v4, %v363_v2  ;;  %v561_v4 = vld [vmem:[%s1060_s3] sm:$0x1f] }
  0xbd   : > { %v492_v8 = vmax.f32 %v476_v6, 0.0  ;;  %v491_v9 = vmax.f32 %v475_v7, 0.0 }
  0xbe   : > { %v349_v12 = vpop.permute.xlu1 %348  ;;  %v344_v13 = vpop.permute.xlu0 %343 }
  0xbf   : > { %v532_v14 = vsel %vm495_vm0, %v491_v9, 0.0  ;;  %v535_v15 = vsel %vm495_vm0, %v492_v8, 0.0  ;;  %v366_v16 = vmul.f32 %v749_v10, %v349_v12  ;;  %v365_v17 = vmul.f32 %v748_v11, %v344_v13 }
  0xc0   : > { %533 = vadd.xlane.f32.xlu1 %v532_v14  ;;  %536 = vadd.xlane.f32.xlu0 %v535_v15 }
  0xc2   : > { %v461_v18 = vpop.permute.xlu1 %460  ;;  %v456_v19 = vpop.permute.xlu0 %455 }
  0xc3   : > { %v478_v20 = vadd.f32 %v461_v18, %v366_v16  ;;  %v477_v22 = vadd.f32 %v456_v19, %v365_v17 }
  0xc5   : > { %v494_v23 = vmax.f32 %v478_v20, 0.0  ;;  %v493_v24 = vmax.f32 %v477_v22, 0.0 }
  0xc7   : > { %v538_v25 = vsel %vm495_vm0, %v493_v24, 0.0  ;;  %v541_v26 = vsel %vm495_vm0, %v494_v23, 0.0 }
  0xc8   : > { %539 = vadd.xlane.f32.xlu1 %v538_v25  ;;  %542 = vadd.xlane.f32.xlu0 %v541_v26 }
 0x11b   : > { %v498_v28 = vpop.xlane.xlu0 %497 }
 0x11c   : > { %v545_v30 = vmul.f32 0.5, %v498_v28 }
 0x11f   : > { %v501_v29 = vpop.xlane.xlu1 %500 }
 0x120   : > { %v546_v31 = vmul.f32 0.5, %v501_v29 }
 0x122   : > { %v810_v32 = vpack.c.bf16 %v546_v31, %v545_v30 }
 0x124   : > { %811 = vmatpush3.bf16.msra.mxu0 %v810_v32 }
 0x125   : > { %v504_v33 = vpop.xlane.xlu0 %503  ;;  %812 = vmatprep.subr.bf16.mxu0 %v860_v21 }
 0x126   : > { %v547_v35 = vmul.f32 0.5, %v504_v33 }
 0x129   : > { %v507_v34 = vpop.xlane.xlu0 %506 }
 0x12a   : > { %v548_v36 = vmul.f32 0.5, %v507_v34 }
 0x12c   : > { %v813_v37 = vpack.c.bf16 %v548_v36, %v547_v35 }
 0x12d   : > { %v510_v38 = vpop.xlane.xlu1 %509  ;;  %v513_v39 = vpop.xlane.xlu0 %512 }
 0x12e   : > { %v549_v40 = vmul.f32 0.5, %v510_v38  ;;  %v550_v41 = vmul.f32 0.5, %v513_v39  ;;  %814 = vmatpush3.bf16.msra.mxu0 %v813_v37 }
 0x12f   : > { %815 = vmatprep.subr.bf16.mxu0 %v860_v21 }
 0x130   : > { %v816_v42 = vpack.c.bf16 %v550_v41, %v549_v40 }
 0x132   : > { %817 = vmatpush3.bf16.msra.mxu0 %v816_v42 }
 0x133   : > { %818 = vmatprep.subr.bf16.mxu0 %v860_v21 }
 0x135   : > { %v516_v43 = vpop.xlane.xlu1 %515  ;;  %v519_v44 = vpop.xlane.xlu0 %518 }
 0x136   : > { %v551_v45 = vmul.f32 0.5, %v516_v43  ;;  %v552_v46 = vmul.f32 0.5, %v519_v44 }
 0x138   : > { %v819_v47 = vpack.c.bf16 %v552_v46, %v551_v45 }
 0x13a   : > { %820 = vmatpush3.bf16.msra.mxu0 %v819_v47 }
 0x13b   : > { %821 = vmatprep.subr.bf16.mxu0 %v860_v21 }
 0x13d   : > { %v522_v48 = vpop.xlane.xlu1 %521  ;;  %v525_v49 = vpop.xlane.xlu0 %524 }
 0x13e   : > { %v553_v50 = vmul.f32 0.5, %v522_v48  ;;  %v554_v51 = vmul.f32 0.5, %v525_v49 }
 0x140   : > { %v822_v52 = vpack.c.bf16 %v554_v51, %v553_v50 }
 0x142   : > { %823 = vmatpush3.bf16.msra.mxu0 %v822_v52 }
 0x143   : > { %824 = vmatprep.subr.bf16.mxu0 %v860_v21 }
 0x145   : > { %v528_v53 = vpop.xlane.xlu1 %527  ;;  %v531_v54 = vpop.xlane.xlu0 %530 }
 0x146   : > { %v555_v55 = vmul.f32 0.5, %v528_v53  ;;  %v556_v56 = vmul.f32 0.5, %v531_v54 }
 0x148   : > { %v825_v57 = vpack.c.bf16 %v556_v56, %v555_v55 }
 0x14a   : > { %826 = vmatpush3.bf16.msra.mxu0 %v825_v57 }
 0x14b   : > { %827 = vmatprep.subr.bf16.mxu0 %v860_v21 }
 0x14d   : > { %v534_v58 = vpop.xlane.xlu1 %533  ;;  %v537_v59 = vpop.xlane.xlu0 %536 }
 0x14e   : > { %v557_v60 = vmul.f32 0.5, %v534_v58  ;;  %v558_v61 = vmul.f32 0.5, %v537_v59 }
 0x150   : > { %v828_v62 = vpack.c.bf16 %v558_v61, %v557_v60 }
 0x152   : > { %829 = vmatpush3.bf16.msra.mxu0 %v828_v62 }
 0x153   : > { %830 = vmatprep.subr.bf16.mxu0 %v860_v21 }
 0x155   : > { %v540_v63 = vpop.xlane.xlu1 %539  ;;  %v543_v0 = vpop.xlane.xlu0 %542 }
 0x156   : > { %v559_v1 = vmul.f32 0.5, %v540_v63  ;;  %v560_v2 = vmul.f32 0.5, %v543_v0 }
 0x158   : > { %v831_v3 = vpack.c.bf16 %v560_v2, %v559_v1 }
 0x15a   : > { %832 = vmatpush3.bf16.msra.mxu0 %v831_v3 }
 0x15d   : > { %807 = vmatmul.mubr.f32.vlgmr.msra.gmra.mrb[0].mxu0 %v561_v4 }
 0x230   : > { %v629_v6 = vpop.f32.mrb[0].mxu0 }
 0x231   : > { %v630_v7 = vadd.f32 %v629_v6, %v562_v5  ;;  %v808_v8 = vpop.f32.mrb[1].mxu0 }
 0x233   : > { %v634_v21 = vsel %vm633_vm2, %v630_v7, -inf }
 0x234   : > { %v635_v9 = vrot.slane %v634_v21, 4 }
 0x236   : > { %v636_v10 = vmax.f32 %v634_v21, %v635_v9 }
 0x238   : > { %v637_v11 = vrot.slane %v636_v10, 2 }
 0x23a   : > { %v638_v12 = vmax.f32 %v636_v10, %v637_v11 }
 0x23c   : > { %v639_v13 = vrot.slane %v638_v12, 1 }
 0x23e   : > { %v640_v14 = vmax.f32 %v638_v12, %v639_v13 }
 0x240   : > { %v641_v15 = vsub.f32 %v630_v7, %v640_v14 }
 0x242   : > { %v642_v16 = vmul.f32 1.442695, %v641_v15 }
 0x244   : > { %847 = vpow2.f32 %v642_v16 }
 0x24e   : > { %v848_v17 = vpop.eup %847 }
 0x24f   : > { %v644_v18 = vsel %vm633_vm2, %v848_v17, 0.0 }
 0x250   : > { %v645_v19 = vrot.slane %v644_v18, 4 }
 0x252   : > { %v646_v20 = vadd.f32 %v645_v19, %v644_v18 }
 0x254   : > { %v647_v22 = vrot.slane %v646_v20, 2 }
 0x256   : > { %v648_v23 = vadd.f32 %v647_v22, %v646_v20 }
 0x258   : > { %v649_v24 = vrot.slane %v648_v23, 1 }
 0x25a   : > { %v650_v25 = vadd.f32 %v649_v24, %v648_v23 }
 0x25c   : > { %849 = vrcp.f32 %v650_v25 }
 0x266   : > { %v850_v26 = vpop.eup %849 }
 0x267   : > { %v652_v27 = vmul.f32 %v850_v26, %v848_v17 }
 0x269   : > { %653 = vst.msk [vmem:[%s222_s26] sm:$0x1f] %vm633_vm2, %v652_v27 }
 0x26a PF: > { %s15_s18 = sadd.s32 1, %s857_s18  }
 0x26b   : > { %p12_p4 = scmp.ge.s32.totalorder %s15_s18, 4  }
 0x26d   :  { %14 = sbr.rel (!%p12_p4) target bundleno = 1 (0x1), region = 70 }

// kernel: convresnet_forward.25
= control target key start
LH: loop header
LB: loop body
LE: loop exit
PB: predicated region body
PF: predicated region fallthrough
CT: control target
= control target key end

     0   :  { %s1313_s18 = smov 0   ;;  %s1315_s19 = smov 0   ;;  %s1546_s0 = inlined_call_operand.vmem [shape: bf16[2,8,256], index: 0, kind: input, shape index: {}, may-alias: {0,1}]   ;;  %s1547_s1 = inlined_call_operand.vmem [shape: bf16[2,8,256], index: 1, kind: input, shape index: {}, may-alias: {0,1}]   ;;  %s1548_s2 = inlined_call_operand.vmem [shape: bf16[128,120], index: 2, kind: input, shape index: {}]   ;;  %s1549_s3 = inlined_call_operand.vmem [shape: f32[128,1], index: 3, kind: input, shape index: {}]   ;;  %s1550_s4 = inlined_call_operand.vmem [shape: f32[128,1], index: 4, kind: input, shape index: {}]   ;;  %s1551_s5 = inlined_call_operand.vmem [shape: bf16[2,128,128], index: 5, kind: output, shape index: {}]  }
   0x1   :  { %s1317_s20 = smov 0  }
   0x2 LB: > { %s27_s21 = sadd.s32 1, %s1262_s19  ;;  %p1020_p0 = scmp.ge.s32.totalorder %s1266_s20, 1  ;;  %s1266_s20 = sphi %s1317_s20, %s15_s20   ;;  %s1262_s19 = sphi %s1315_s19, %s1553_s19   ;;  %s1258_s18 = sphi %s1313_s18, %s1552_s18  }
   0x3   : > { %p29_p1 = scmp.ge.s32.totalorder %s27_s21, 2  ;;  %p225_p2 = scmp.lt.s32.totalorder %s1266_s20, 3 }
   0x5   : > { %s1555_s21 = smov (%p29_p1, %s27_s21), 0  ;;  %p226_p3 = pnand %p1020_p0, %p225_p2 }
   0x6   : > { %p268_p4 = scmp.lt.s32.totalorder (!%p226_p3), %s1258_s18, 1  ;;  %s1268_s30 = smov (!%p226_p3), 126   ;;  %v1274_v4 = vmov (!%p226_p3), 0   ;;  %v1236_v5 = vld [vmem:[%s1548_s2] sm:$0xff] (!%p226_p3)   ;;  %vm347_vm0 = vcmask (!%p226_p3), 982016   ;;  %v596_v7 = vld [vmem:[%s1549_s3 + $0x8] sm:$0xff] (!%p226_p3) }
   0x7   : > { %229 = sbr.rel (%p226_p3) target bundleno = 426 (0x1aa), region = 40  ;;  %s1269_s6 = smov (!%p226_p3), 127   ;;  %1235 = vset.pattern.permute.xlu1 (!%p226_p3), %v1274_v4  ;;  %1234 = vset.pattern.permute.xlu0 (!%p226_p3), %v1274_v4  ;;  %v1237_v6 = vld [vmem:[%s1548_s2 + $0x20] sm:$0xff] (!%p226_p3)   ;;  %v597_v9 = vld [vmem:[%s1549_s3 + $0x10] sm:$0xff] (!%p226_p3)  ;;  %v598_v10 = vld [vmem:[%s1549_s3 + $0x18] sm:$0xff] (!%p226_p3)  ;;  %vm317_vm1 = vcmask (!%p226_p3), 1022976  }
   0x8   : > { %s1270_s7 = smov (!%p226_p3), 125   ;;  %s1271_s8 = smov (!%p226_p3), 124   ;;  %1161 = vmatprep.mubr.msk.bf16.mxu0 (!%p226_p3), %vm347_vm0, %v1236_v5  ;;  %1169 = vmatprep.mubr.msk.bf16.mxu1 (!%p226_p3), %vm347_vm0, %v1237_v6  ;;  %v595_v8 = vld [vmem:[%s1549_s3] sm:$0xff] (!%p226_p3)  ;;  %v600_v12 = vld [vmem:[%s1549_s3 + $0x28] sm:$0xff] (!%p226_p3)  ;;  %v601_v13 = vld [vmem:[%s1549_s3 + $0x30] sm:$0xff] (!%p226_p3)  ;;  %vm305_vm2 = vcmask (!%p226_p3), 1039360  }
   0x9   : > { %s1272_s9 = smov (!%p226_p3), 123   ;;  %s1273_s10 = smov (!%p226_p3), 122   ;;  %v599_v11 = vld [vmem:[%s1549_s3 + $0x20] sm:$0xff] (!%p226_p3)  ;;  %v602_v14 = vld [vmem:[%s1549_s3 + $0x38] sm:$0xff] (!%p226_p3)  ;;  %v604_v16 = vld [vmem:[%s1549_s3 + $0x48] sm:$0xff] (!%p226_p3)  ;;  %vm311_vm3 = vcmask (!%p226_p3), 1031168  }
   0xa   : > { %s1275_s11 = smov (!%p226_p3), 121   ;;  %s1276_s12 = smov (!%p226_p3), 120   ;;  %v603_v15 = vld [vmem:[%s1549_s3 + $0x40] sm:$0xff] (!%p226_p3)  ;;  %v605_v17 = vld [vmem:[%s1549_s3 + $0x50] sm:$0xff] (!%p226_p3)  ;;  %v606_v18 = vld [vmem:[%s1549_s3 + $0x58] sm:$0xff] (!%p226_p3)  ;;  %vm385_vm4 = vcmask (!%p226_p3), 1043456  }
   0xb   : > { %s1277_s13 = smov (!%p226_p3), 119   ;;  %s1278_s14 = smov (!%p226_p3), 118   ;;  %v607_v19 = vld [vmem:[%s1549_s3 + $0x60] sm:$0xff] (!%p226_p3)  ;;  %v608_v20 = vld [vmem:[%s1549_s3 + $0x68] sm:$0xff] (!%p226_p3)  ;;  %v609_v21 = vld [vmem:[%s1549_s3 + $0x70] sm:$0xff] (!%p226_p3)  ;;  %vm323_vm5 = vcmask (!%p226_p3), 1014784  }
   0xc   : > { %s1279_s15 = smov (!%p226_p3), 117   ;;  %s1280_s16 = smov (!%p226_p3), 116   ;;  %v610_v22 = vld [vmem:[%s1549_s3 + $0x78] sm:$0xff] (!%p226_p3)  ;;  %v707_v23 = vld [vmem:[%s1550_s4] sm:$0xff] (!%p226_p3)  ;;  %v708_v24 = vld [vmem:[%s1550_s4 + $0x8] sm:$0xff] (!%p226_p3)  ;;  %vm329_vm6 = vcmask (!%p226_p3), 1006592  }
   0xd   : > { %v709_v25 = vld [vmem:[%s1550_s4 + $0x10] sm:$0xff] (!%p226_p3)  ;;  %v710_v26 = vld [vmem:[%s1550_s4 + $0x18] sm:$0xff] (!%p226_p3)  ;;  %v711_v27 = vld [vmem:[%s1550_s4 + $0x20] sm:$0xff] (!%p226_p3)  ;;  %vm335_vm7 = vcmask (!%p226_p3), 998400   ;;  %vm341_vm8 = vcmask (!%p226_p3), 990208   ;;  %vm353_vm9 = vcmask (!%p226_p3), 973824  }
   0xe   : > { %s1557_s18 = smov (!%p268_p4, %s1258_s18), 1  ;;  %v712_v28 = vld [vmem:[%s1550_s4 + $0x28] sm:$0xff]  ;;  %v713_v29 = vld [vmem:[%s1550_s4 + $0x30] sm:$0xff]  ;;  %v714_v30 = vld [vmem:[%s1550_s4 + $0x38] sm:$0xff]  ;;  %vm359_vm10 = vcmask 965632   ;;  %vm365_vm11 = vcmask 957440  }
   0xf   : > { %s1061_s22 = sshll.u32 %s1557_s18, 3  ;;  %v715_v31 = vld [vmem:[%s1550_s4 + $0x40] sm:$0xff]  ;;  %v716_v32 = vld [vmem:[%s1550_s4 + $0x48] sm:$0xff]  ;;  %v717_v33 = vld [vmem:[%s1550_s4 + $0x50] sm:$0xff]  ;;  %vm371_vm12 = vcmask 949248   ;;  %vm377_vm13 = vcmask 941056  }
  0x10   : > { %s275_s25 = scalar_lea.vmem %s1546_s0, %s1061_s22  ;;  %s1063_s26 = sadd.s32 4, %s1061_s22  ;;  %v718_v34 = vld [vmem:[%s1550_s4 + $0x58] sm:$0xff]  ;;  %v719_v35 = vld [vmem:[%s1550_s4 + $0x60] sm:$0xff]  ;;  %v720_v36 = vld [vmem:[%s1550_s4 + $0x68] sm:$0xff]  ;;  %vm383_vm14 = vcmask 932864  }
  0x11   : > { %v1337_v0 = vld [vmem:[%s275_s25] sm:$0xf]  ;;  %s284_s29 = scalar_lea.vmem %s1547_s1, %s1063_s26  ;;  %s1281_s25 = smov 115   ;;  %v721_v37 = vld [vmem:[%s1550_s4 + $0x70] sm:$0xff]  ;;  %v722_v39 = vld [vmem:[%s1550_s4 + $0x78] sm:$0xff] }
  0x12   : > { %307 = vrot.lane.b32.xlu1 %v1337_v0, %s1268_s30  ;;  %v299_v1 = vrot.slane %v1337_v0, 4  ;;  %v296_v2 = vld [vmem:[%s284_s29] sm:$0xf]  ;;  %s1282_s26 = smov 114  }
  0x13   : > { %v300_v3 = vrot.slane %v296_v2, 4 }
  0x14   : > { %301 = vrot.lane.b32.xlu0 %v299_v1, %s1269_s6 }
  0x16   : > { %309 = vrot.lane.b32.xlu1 %v296_v2, %s1268_s30 }
  0x18   : > { %313 = vrot.lane.b32.xlu0 %v299_v1, %s1270_s7 }
  0x1a   : > { %315 = vrot.lane.b32.xlu1 %v300_v3, %s1270_s7 }
  0x1c   : > { %303 = vrot.lane.b32.xlu0 %v300_v3, %s1269_s6 }
  0x1e   : > { %321 = vrot.lane.b32.xlu1 %v296_v2, %s1271_s8 }
  0x20   : > { %319 = vrot.lane.b32.xlu0 %v1337_v0, %s1271_s8 }
  0x22   : > { %327 = vrot.lane.b32.xlu1 %v300_v3, %s1272_s9 }
  0x24   : > { %325 = vrot.lane.b32.xlu0 %v299_v1, %s1272_s9 }
  0x26   : > { %333 = vrot.lane.b32.xlu1 %v296_v2, %s1273_s10 }
  0x28   : > { %331 = vrot.lane.b32.xlu0 %v1337_v0, %s1273_s10 }
  0x2a   : > { %339 = vrot.lane.b32.xlu1 %v300_v3, %s1275_s11 }
  0x2c   : > { %337 = vrot.lane.b32.xlu0 %v299_v1, %s1275_s11 }
  0x2e   : > { %345 = vrot.lane.b32.xlu1 %v296_v2, %s1276_s12 }
  0x30   : > { %343 = vrot.lane.b32.xlu0 %v1337_v0, %s1276_s12 }
  0x32   : > { %351 = vrot.lane.b32.xlu1 %v300_v3, %s1277_s13 }
  0x34   : > { %349 = vrot.lane.b32.xlu0 %v299_v1, %s1277_s13 }
  0x36   : > { %357 = vrot.lane.b32.xlu1 %v296_v2, %s1278_s14 }
  0x38   : > { %355 = vrot.lane.b32.xlu0 %v1337_v0, %s1278_s14 }
  0x3a   : > { %363 = vrot.lane.b32.xlu1 %v300_v3, %s1279_s15 }
  0x3c   : > { %361 = vrot.lane.b32.xlu0 %v299_v1, %s1279_s15  ;;  %s1064_s15 = sshll.u32 %s1557_s18, 6 }
  0x3d   : > { %s1516_s22 = scalar_lea.vmem %s1551_s5, %s1064_s15 }
  0x3e   : > { %369 = vrot.lane.b32.xlu1 %v296_v2, %s1280_s16 }
  0x40   : > { %367 = vrot.lane.b32.xlu0 %v1337_v0, %s1280_s16 }
  0x42   : > { %375 = vrot.lane.b32.xlu1 %v300_v3, %s1281_s25 }
  0x44   : > { %373 = vrot.lane.b32.xlu0 %v299_v1, %s1281_s25 }
  0x46   : > { %381 = vrot.lane.b32.xlu1 %v296_v2, %s1282_s26 }
  0x48   : > { %379 = vrot.lane.b32.xlu0 %v1337_v0, %s1282_s26 }
  0x4a   : > { %618 = vperm.xlu1 %1235, %v596_v7  }
  0x4c   : > { %613 = vperm.xlu0 %1234, %v595_v8  }
  0x4e   : > { %623 = vperm.xlu1 %1235, %v597_v9  }
  0x50   : > { %628 = vperm.xlu0 %1234, %v598_v10  }
  0x52   : > { %633 = vperm.xlu1 %1235, %v599_v11  }
  0x54   : > { %638 = vperm.xlu0 %1234, %v600_v12  }
  0x56   : > { %643 = vperm.xlu1 %1235, %v601_v13  }
  0x58   : > { %648 = vperm.xlu0 %1234, %v602_v14  }
  0x5a   : > { %653 = vperm.xlu1 %1235, %v603_v15  }
  0x5c   : > { %658 = vperm.xlu0 %1234, %v604_v16  }
  0x5e   : > { %663 = vperm.xlu1 %1235, %v605_v17  }
  0x60   : > { %668 = vperm.xlu0 %1234, %v606_v18  }
  0x62   : > { %673 = vperm.xlu1 %1235, %v607_v19  }
  0x64   : > { %678 = vperm.xlu0 %1234, %v608_v20  }
  0x66   : > { %683 = vperm.xlu1 %1235, %v609_v21  }
  0x68   : > { %688 = vperm.xlu0 %1234, %v610_v22  }
  0x6a   : > { %725 = vperm.xlu1 %1235, %v707_v23  }
  0x6c   : > { %730 = vperm.xlu0 %1234, %v708_v24  }
  0x6e   : > { %735 = vperm.xlu1 %1235, %v709_v25   ;;  %v1238_v25 = vld [vmem:[%s1548_s2 + $0x8] sm:$0xff]  }
  0x70   : > { %740 = vperm.xlu0 %1234, %v710_v26   ;;  %v1239_v26 = vld [vmem:[%s1548_s2 + $0x28] sm:$0xff]  }
  0x72   : > { %745 = vperm.xlu1 %1235, %v711_v27   ;;  %v1240_v27 = vld [vmem:[%s1548_s2 + $0x10] sm:$0xff]  }
  0x74   : > { %750 = vperm.xlu0 %1234, %v712_v28   ;;  %v1241_v28 = vld [vmem:[%s1548_s2 + $0x30] sm:$0xff]  }
  0x76   : > { %755 = vperm.xlu1 %1235, %v713_v29   ;;  %v1242_v29 = vld [vmem:[%s1548_s2 + $0x18] sm:$0xff]  }
  0x78   : > { %760 = vperm.xlu0 %1234, %v714_v30   ;;  %v1243_v30 = vld [vmem:[%s1548_s2 + $0x38] sm:$0xff]  }
  0x7a   : > { %765 = vperm.xlu1 %1235, %v715_v31  }
  0x7c   : > { %770 = vperm.xlu0 %1234, %v716_v32  }
  0x7e   : > { %775 = vperm.xlu1 %1235, %v717_v33  }
  0x80   : > { %780 = vperm.xlu0 %1234, %v718_v34  }
  0x82   : > { %785 = vperm.xlu1 %1235, %v719_v35  }
  0x84   : > { %v308_v38 = vpop.permute.xlu1 %307  ;;  %790 = vperm.xlu0 %1234, %v720_v36  }
  0x86   : > { %v302_v40 = vpop.permute.xlu0 %301  ;;  %795 = vperm.xlu1 %1235, %v721_v37  }
  0x88   : > { %v310_v41 = vpop.permute.xlu1 %309  ;;  %800 = vperm.xlu0 %1234, %v722_v39  }
  0x89   : > { %v312_v49 = vsel %vm311_vm3, %v308_v38, %v310_v41 }
  0x8a   : > { %v314_v42 = vpop.permute.xlu0 %313 }
  0x8c   : > { %v316_v43 = vpop.permute.xlu1 %315 }
  0x8d   : > { %v318_v45 = vsel %vm317_vm1, %v314_v42, %v316_v43 }
  0x8e   : > { %v304_v44 = vpop.permute.xlu0 %303  ;;  %v392_v51 = vsel %vm385_vm4, %v312_v49, %v318_v45 }
  0x8f   : > { %v306_v46 = vsel %vm305_vm2, %v302_v40, %v304_v44 }
  0x90   : > { %v388_v47 = vsel %vm385_vm4, %v1337_v0, %v306_v46  ;;  %v322_v48 = vpop.permute.xlu1 %321 }
  0x91   : > { %1145 = vmatprep.subr.bf16.mxu0 %v388_v47  ;;  %1177 = vmatprep.subr.bf16.mxu1 %v388_v47 }
  0x92   : > { %1146 = vmatpush3.bf16.msra.mxu0 %v388_v47  ;;  %1185 = vmatpush3.bf16.msra.mxu1 %v388_v47  ;;  %v320_v50 = vpop.permute.xlu0 %319 }
  0x93   : > { %1147 = vmatprep.subr.bf16.mxu0 %v392_v51  ;;  %1178 = vmatprep.subr.bf16.mxu1 %v392_v51  ;;  %v324_v54 = vsel %vm323_vm5, %v320_v50, %v322_v48 }
  0x94   : > { %v328_v52 = vpop.permute.xlu1 %327 }
  0x96   : > { %1148 = vmatpush3.bf16.msra.mxu0 %v392_v51  ;;  %1186 = vmatpush3.bf16.msra.mxu1 %v392_v51  ;;  %v326_v53 = vpop.permute.xlu0 %325 }
  0x97   : > { %v330_v55 = vsel %vm329_vm6, %v326_v53, %v328_v52 }
  0x98   : > { %v396_v56 = vsel %vm385_vm4, %v324_v54, %v330_v55  ;;  %v334_v57 = vpop.permute.xlu1 %333 }
  0x99   : > { %1149 = vmatprep.subr.bf16.mxu0 %v396_v56  ;;  %1179 = vmatprep.subr.bf16.mxu1 %v396_v56 }
  0x9a   : > { %1150 = vmatpush3.bf16.msra.mxu0 %v396_v56  ;;  %1187 = vmatpush3.bf16.msra.mxu1 %v396_v56  ;;  %v332_v58 = vpop.permute.xlu0 %331 }
  0x9b   : > { %v336_v61 = vsel %vm335_vm7, %v332_v58, %v334_v57 }
  0x9c   : > { %v340_v59 = vpop.permute.xlu1 %339 }
  0x9e   : > { %v338_v60 = vpop.permute.xlu0 %337 }
  0x9f   : > { %v342_v62 = vsel %vm341_vm8, %v338_v60, %v340_v59 }
  0xa0   : > { %v400_v63 = vsel %vm385_vm4, %v336_v61, %v342_v62  ;;  %v346_v0 = vpop.permute.xlu1 %345 }
  0xa1   : > { %1151 = vmatprep.subr.bf16.mxu0 %v400_v63  ;;  %1180 = vmatprep.subr.bf16.mxu1 %v400_v63 }
  0xa2   : > { %1152 = vmatpush3.bf16.msra.mxu0 %v400_v63  ;;  %1188 = vmatpush3.bf16.msra.mxu1 %v400_v63  ;;  %v344_v1 = vpop.permute.xlu0 %343 }
  0xa3   : > { %v348_v4 = vsel %vm347_vm0, %v344_v1, %v346_v0 }
  0xa4   : > { %v352_v2 = vpop.permute.xlu1 %351 }
  0xa6   : > { %v350_v3 = vpop.permute.xlu0 %349 }
  0xa7   : > { %v354_v5 = vsel %vm353_vm9, %v350_v3, %v352_v2 }
  0xa8   : > { %v404_v6 = vsel %vm385_vm4, %v348_v4, %v354_v5  ;;  %v358_v7 = vpop.permute.xlu1 %357 }
  0xa9   : > { %1153 = vmatprep.subr.bf16.mxu0 %v404_v6  ;;  %1181 = vmatprep.subr.bf16.mxu1 %v404_v6 }
  0xaa   : > { %1154 = vmatpush3.bf16.msra.mxu0 %v404_v6  ;;  %1189 = vmatpush3.bf16.msra.mxu1 %v404_v6  ;;  %v356_v8 = vpop.permute.xlu0 %355 }
  0xab   : > { %v360_v11 = vsel %vm359_vm10, %v356_v8, %v358_v7 }
  0xac   : > { %v364_v9 = vpop.permute.xlu1 %363 }
  0xae   : > { %v362_v10 = vpop.permute.xlu0 %361 }
  0xaf   : > { %v366_v12 = vsel %vm365_vm11, %v362_v10, %v364_v9 }
  0xb0   : > { %v408_v13 = vsel %vm385_vm4, %v360_v11, %v366_v12  ;;  %v370_v14 = vpop.permute.xlu1 %369 }
  0xb1   : > { %1155 = vmatprep.subr.bf16.mxu0 %v408_v13  ;;  %1182 = vmatprep.subr.bf16.mxu1 %v408_v13 }
  0xb2   : > { %1156 = vmatpush3.bf16.msra.mxu0 %v408_v13  ;;  %1190 = vmatpush3.bf16.msra.mxu1 %v408_v13  ;;  %v368_v15 = vpop.permute.xlu0 %367 }
  0xb3   : > { %v372_v18 = vsel %vm371_vm12, %v368_v15, %v370_v14 }
  0xb4   : > { %v376_v16 = vpop.permute.xlu1 %375 }
  0xb6   : > { %v374_v17 = vpop.permute.xlu0 %373 }
  0xb7   : > { %v378_v19 = vsel %vm377_vm13, %v374_v17, %v376_v16 }
  0xb8   : > { %v412_v20 = vsel %vm385_vm4, %v372_v18, %v378_v19  ;;  %v382_v21 = vpop.permute.xlu1 %381 }
  0xb9   : > { %1157 = vmatprep.subr.bf16.mxu0 %v412_v20  ;;  %1183 = vmatprep.subr.bf16.mxu1 %v412_v20 }
  0xba   : > { %1158 = vmatpush3.bf16.msra.mxu0 %v412_v20  ;;  %1191 = vmatpush3.bf16.msra.mxu1 %v412_v20  ;;  %v380_v22 = vpop.permute.xlu0 %379 }
  0xbb   : > { %v384_v23 = vsel %vm383_vm14, %v380_v22, %v382_v21 }
  0xbc   : > { %1193 = vmatprep.subr.msk.bf16.mxu0 %vm385_vm4, %v384_v23  ;;  %1194 = vmatprep.subr.msk.bf16.mxu1 %vm385_vm4, %v384_v23  ;;  %v496_v24 = vsel %vm385_vm4, %v384_v23, 0 }
  0xbe   : > { %1160 = vmatpush3.bf16.msra.mxu0 %v496_v24  ;;  %1192 = vmatpush3.bf16.msra.mxu1 %v496_v24 }
  0xc1   : > { %1162 = vmatmul.mubr.msk.bf16.vlgmr.msra.gmra.mrb[0].mxu0 %vm347_vm0, %v1238_v25  ;;  %1170 = vmatmul.mubr.msk.bf16.vlgmr.msra.gmra.mrb[0].mxu1 %vm347_vm0, %v1239_v26 }
  0xc2   : > { %1165 = vmatprep.mubr.msk.bf16.mxu0 %vm347_vm0, %v1240_v27  ;;  %1173 = vmatprep.mubr.msk.bf16.mxu1 %vm347_vm0, %v1241_v28 }
  0xc9   : > { %1166 = vmatmul.mubr.msk.bf16.gmra.mrb[4].mxu0 %vm347_vm0, %v1242_v29  ;;  %1174 = vmatmul.mubr.msk.bf16.gmra.mrb[4].mxu1 %vm347_vm0, %v1243_v30  ;;  %v619_v31 = vpop.permute.xlu1 %618 }
  0xcb   : > { %v614_v32 = vpop.permute.xlu0 %613 }
  0xcd   : > { %v624_v33 = vpop.permute.xlu1 %623 }
  0xcf   : > { %v629_v34 = vpop.permute.xlu0 %628 }
  0xd1   : > { %v1490_v35 = vpop.permute.xlu1 %633 }
  0xd3   : > { %v1492_v36 = vpop.permute.xlu0 %638 }
  0xd5   : > { %v1494_v37 = vpop.permute.xlu1 %643 }
  0xd7   : > { %v1496_v38 = vpop.permute.xlu0 %648 }
  0xd9   : > { %v654_v39 = vpop.permute.xlu1 %653 }
  0xdb   : > { %v659_v40 = vpop.permute.xlu0 %658 }
  0xdd   : > { %v664_v41 = vpop.permute.xlu1 %663 }
  0xdf   : > { %v669_v42 = vpop.permute.xlu0 %668 }
  0xe1   : > { %v1498_v43 = vpop.permute.xlu1 %673 }
  0xe3   : > { %v1500_v44 = vpop.permute.xlu0 %678 }
  0xe5   : > { %v684_v45 = vpop.permute.xlu1 %683 }
  0xe7   : > { %v1502_v46 = vpop.permute.xlu0 %688 }
  0xe9   : > { %v726_v47 = vpop.permute.xlu1 %725 }
  0xeb   : > { %v731_v48 = vpop.permute.xlu0 %730 }
  0xed   : > { %v736_v49 = vpop.permute.xlu1 %735 }
  0xef   : > { %v741_v50 = vpop.permute.xlu0 %740 }
  0xf1   : > { %v1504_v51 = vpop.permute.xlu1 %745 }
  0xf3   : > { %v1506_v52 = vpop.permute.xlu0 %750 }
  0xf5   : > { %v756_v53 = vpop.permute.xlu1 %755 }
  0xf7   : > { %v1508_v54 = vpop.permute.xlu0 %760 }
  0xf9   : > { %v766_v55 = vpop.permute.xlu1 %765 }
  0xfb   : > { %v771_v56 = vpop.permute.xlu0 %770 }
  0xfd   : > { %v776_v57 = vpop.permute.xlu1 %775 }
  0xff   : > { %v781_v58 = vpop.permute.xlu0 %780 }
 0x101   : > { %v1510_v59 = vpop.permute.xlu1 %785 }
 0x103   : > { %v791_v18 = vpop.permute.xlu0 %790 }
 0x105   : > { %v796_v21 = vpop.permute.xlu1 %795 }
 0x194   : > { %v1163_v60 = vpop.f32.mrb[0].mxu0  ;;  %v1171_v61 = vpop.f32.mrb[0].mxu1 }
 0x195   : > { %v693_v62 = vmul.f32 %v1163_v60, %v624_v33  ;;  %v701_v63 = vmul.f32 %v1171_v61, %v664_v41  ;;  %v532_v0 = vpop.f32.mrb[1].mxu0  ;;  %v564_v1 = vpop.f32.mrb[1].mxu1 }
 0x196   : > { %v691_v2 = vmul.f32 %v614_v32, %v532_v0  ;;  %v699_v3 = vmul.f32 %v654_v39, %v564_v1  ;;  %v1164_v4 = vpop.f32.mrb[2].mxu0  ;;  %v1172_v5 = vpop.f32.mrb[2].mxu1 }
 0x197   : > { %v805_v6 = vadd.f32 %v736_v49, %v693_v62  ;;  %v813_v7 = vadd.f32 %v776_v57, %v701_v63  ;;  %v694_v8 = vmul.f32 %v1164_v4, %v629_v34  ;;  %v702_v9 = vmul.f32 %v1172_v5, %v669_v42  ;;  %v535_v10 = vpop.f32.mrb[3].mxu0  ;;  %v567_v11 = vpop.f32.mrb[3].mxu1 }
 0x198   : > { %v803_v12 = vadd.f32 %v726_v47, %v691_v2  ;;  %v811_v13 = vadd.f32 %v766_v55, %v699_v3  ;;  %v692_v14 = vmul.f32 %v619_v31, %v535_v10  ;;  %v700_v15 = vmul.f32 %v659_v40, %v567_v11  ;;  %v801_v61 = vpop.permute.xlu0 %800 }
 0x199   : > { %v806_v16 = vadd.f32 %v741_v50, %v694_v8  ;;  %v814_v17 = vadd.f32 %v781_v58, %v702_v9  ;;  %v821_v22 = vmax.f32 %v805_v6, 0.0  ;;  %v829_v23 = vmax.f32 %v813_v7, 0.0 }
 0x19a   : > { %v804_v19 = vadd.f32 %v731_v48, %v692_v14  ;;  %v812_v20 = vadd.f32 %v771_v56, %v700_v15  ;;  %v819_v26 = vmax.f32 %v803_v12, 0.0  ;;  %v827_v27 = vmax.f32 %v811_v13, 0.0 }
 0x19b   : > { %v822_v24 = vmax.f32 %v806_v16, 0.0  ;;  %v830_v25 = vmax.f32 %v814_v17, 0.0 }
 0x19c   : > { %v820_v28 = vmax.f32 %v804_v19, 0.0  ;;  %v828_v29 = vmax.f32 %v812_v20, 0.0  ;;  %v1167_v30 = vpop.f32.mrb[4].mxu0  ;;  %v1175_v31 = vpop.f32.mrb[4].mxu1 }
 0x19d   : > { %v1089_v32 = vpack.c.bf16 %v822_v24, %v821_v22  ;;  %v1109_v33 = vpack.c.bf16 %v830_v25, %v829_v23  ;;  %v697_v34 = vmul.f32 %v1167_v30, %v1494_v37  ;;  %v705_v39 = vmul.f32 %v1175_v31, %v684_v45  ;;  %v548_v40 = vpop.f32.mrb[5].mxu0  ;;  %v580_v41 = vpop.f32.mrb[5].mxu1 }
 0x19e   : > { %v1084_v42 = vpack.c.bf16 %v820_v28, %v819_v26  ;;  %v1104_v47 = vpack.c.bf16 %v828_v29, %v827_v27  ;;  %v695_v48 = vmul.f32 %v1490_v35, %v548_v40  ;;  %v703_v49 = vmul.f32 %v1498_v43, %v580_v41  ;;  %v1168_v50 = vpop.f32.mrb[6].mxu0  ;;  %v1176_v55 = vpop.f32.mrb[6].mxu1 }
 0x19f   : > { %1122 = vst [vmem:[%s1516_s22 + $0x8] sm:$0xff] %v1089_v32   ;;  %1126 = vst [vmem:[%s1516_s22 + $0x28] sm:$0xff] %v1109_v33   ;;  %v809_v56 = vadd.f32 %v756_v53, %v697_v34  ;;  %v817_v57 = vadd.f32 %v796_v21, %v705_v39  ;;  %v698_v58 = vmul.f32 %v1168_v50, %v1496_v38  ;;  %v551_v45 = vpop.f32.mrb[7].mxu0  ;;  %v583_v60 = vpop.f32.mrb[7].mxu1 }
 0x1a0   : > { %v706_v37 = vmul.f32 %v1176_v55, %v1502_v46  ;;  %1085 = vst [vmem:[%s1516_s22] sm:$0xff] %v1084_v42   ;;  %1125 = vst [vmem:[%s1516_s22 + $0x20] sm:$0xff] %v1104_v47   ;;  %v807_v62 = vadd.f32 %v1504_v51, %v695_v48  ;;  %v815_v35 = vadd.f32 %v1510_v59, %v703_v49 }
 0x1a1   : > { %v696_v43 = vmul.f32 %v1492_v36, %v551_v45  ;;  %v704_v63 = vmul.f32 %v1500_v44, %v583_v60  ;;  %v810_v53 = vadd.f32 %v1508_v54, %v698_v58  ;;  %v825_v1 = vmax.f32 %v809_v56, 0.0 }
 0x1a2   : > { %v818_v0 = vadd.f32 %v801_v61, %v706_v37  ;;  %v833_v2 = vmax.f32 %v817_v57, 0.0  ;;  %v823_v4 = vmax.f32 %v807_v62, 0.0  ;;  %v831_v59 = vmax.f32 %v815_v35, 0.0 }
 0x1a3   : > { %v808_v38 = vadd.f32 %v1506_v52, %v696_v43  ;;  %v816_v46 = vadd.f32 %v791_v18, %v704_v63  ;;  %v826_v3 = vmax.f32 %v810_v53, 0.0 }
 0x1a4   : > { %v834_v51 = vmax.f32 %v818_v0, 0.0 }
 0x1a5   : > { %v824_v5 = vmax.f32 %v808_v38, 0.0  ;;  %v832_v36 = vmax.f32 %v816_v46, 0.0  ;;  %v1099_v6 = vpack.c.bf16 %v826_v3, %v825_v1 }
 0x1a6   : > { %v1119_v44 = vpack.c.bf16 %v834_v51, %v833_v2 }
 0x1a7   : > { %v1094_v7 = vpack.c.bf16 %v824_v5, %v823_v4  ;;  %v1114_v54 = vpack.c.bf16 %v832_v36, %v831_v59  ;;  %1124 = vst [vmem:[%s1516_s22 + $0x18] sm:$0xff] %v1099_v6  }
 0x1a8   : > { %1128 = vst [vmem:[%s1516_s22 + $0x38] sm:$0xff] %v1119_v44  }
 0x1a9   : > { %1123 = vst [vmem:[%s1516_s22 + $0x10] sm:$0xff] %v1094_v7   ;;  %1127 = vst [vmem:[%s1516_s22 + $0x30] sm:$0xff] %v1114_v54  }
 0x1aa PF: > { %s15_s20 = sadd.s32 1, %s1266_s20   ;;  %s1552_s18 = smov %s1262_s19 }
 0x1ab   : > { %p12_p5 = scmp.ge.s32.totalorder %s15_s20, 4   ;;  %s1553_s19 = smov %s1555_s21 }
 0x1ad   :  { %14 = sbr.rel (!%p12_p5) target bundleno = 2 (0x2), region = 73 }

// kernel: convresnet_forward.26
= control target key start
LH: loop header
LB: loop body
LE: loop exit
PB: predicated region body
PF: predicated region fallthrough
CT: control target
= control target key end

     0   :  { %s4792_s27 = smov 0   ;;  %s4794_s28 = smov 0   ;;  %s6501_s0 = inlined_call_operand.vmem [shape: bf16[2,128,256], index: 0, kind: input, shape index: {}, may-alias: {0,1}]   ;;  %s6502_s1 = inlined_call_operand.vmem [shape: bf16[2,128,256], index: 1, kind: input, shape index: {}, may-alias: {0,1}]   ;;  %s6503_s2 = inlined_call_operand.vmem [shape: bf16[128,1920], index: 2, kind: input, shape index: {}]   ;;  %s6504_s3 = inlined_call_operand.vmem [shape: f32[128,1], index: 3, kind: input, shape index: {}]   ;;  %s6505_s4 = inlined_call_operand.vmem [shape: f32[128,1], index: 4, kind: input, shape index: {}]   ;;  %s6506_s5 = inlined_call_operand.vmem [shape: bf16[2,8,128], index: 5, kind: input, shape index: {}]   ;;  %s6507_s6 = inlined_call_operand.vmem [shape: bf16[128,8], index: 6, kind: input, shape index: {}]   ;;  %s6508_s7 = inlined_call_operand.vmem [shape: f32[128,1], index: 7, kind: input, shape index: {}]   ;;  %s6509_s8 = inlined_call_operand.vmem [shape: bf16[2,128,128], index: 8, kind: output, shape index: {}]  }
   0x1   :  { %s4796_s29 = smov 0   ;;  %s4798_s30 = smov 0  }
   0x2   :  { %s4800_s9 = smov 0  }
   0x3 LB: > { %s30_s10 = sadd.s32 1, %s4726_s30  ;;  %p46_p1 = scmp.ne.s32.totalorder %s4718_s28, %s4714_s27  ;;  %s4730_s9 = sphi %s4800_s9, %s18_s9   ;;  %s4726_s30 = sphi %s4798_s30, %s6532_s30   ;;  %s4722_s29 = sphi %s4796_s29, %s6531_s29   ;;  %s4718_s28 = sphi %s4794_s28, %s6530_s28   ;;  %s4714_s27 = sphi %s4792_s27, %s6529_s27  }
   0x4   : > { %p32_p0 = scmp.ge.s32.totalorder %s30_s10, 2  ;;  %p47_p2 = scmp.eq.s32.totalorder %s4730_s9, 0 }
   0x5   : > { %s39_s13 = sadd.s32 1, %s4718_s28  ;;  %p3630_p5 = scmp.ge.s32.totalorder %s4730_s9, 2 }
   0x6   : > { %s6534_s10 = smov (%p32_p0, %s30_s10), 0  ;;  %p4823_p3 = por %p47_p2, %p46_p1 }
   0x7   : > { %s34_s12 = ssub.s32 %s4726_s30, %s6534_s10  ;;  %278 = sbr.rel (%p3630_p5) target bundleno = 42 (0x2a), region = 36 }
   0x8   : > { %p37_p4 = scmp.eq.s32.totalorder %s34_s12, 0 }
   0xa   : > { %s4831_s14 = scalar_select %p37_p4, %s4718_s28, %s39_s13  }
   0xe   : > { %281 = sbr.rel (!%p4823_p3) target bundleno = 28 (0x1c), region = 40  ;;  %s283_s15 = sand.u32 (%p4823_p3), 1, %s4718_s28  }
   0xf   : > { %s3829_s16 = sshll.u32 (%p4823_p3), %s4726_s30, 7  ;;  %s3631_s17 = sshll.u32 (%p4823_p3), %s283_s15, 6 }
  0x10   : > { %s4841_s20 = scalar_lea.vmem (%p4823_p3), %s6501_s0, %s3829_s16  ;;  %s285_s21 = scalar_lea.vmem (%p4823_p3), [#allocation2], %s3631_s17 }
  0x11   : > { %v305_v0 = vld [vmem:[%s4841_s20] sm:$0xf] (%p4823_p3)  ;;  %v307_v1 = vld [vmem:[%s4841_s20 + $0x8] sm:$0xf] (%p4823_p3)  ;;  %v309_v2 = vld [vmem:[%s4841_s20 + $0x10] sm:$0xf] (%p4823_p3) }
  0x12   : > { %306 = vst [vmem:[%s285_s21] sm:$0xf] (%p4823_p3), %v305_v0  ;;  %308 = vst [vmem:[%s285_s21 + $0x4] sm:$0xf] (%p4823_p3), %v307_v1  ;;  %v311_v3 = vld [vmem:[%s4841_s20 + $0x18] sm:$0xf] (%p4823_p3) }
  0x13   : > { %v313_v4 = vld [vmem:[%s4841_s20 + $0x20] sm:$0xf] (%p4823_p3)  ;;  %310 = vst [vmem:[%s285_s21 + $0x8] sm:$0xf] (%p4823_p3), %v309_v2  ;;  %312 = vst [vmem:[%s285_s21 + $0xc] sm:$0xf] (%p4823_p3), %v311_v3 }
  0x14   : > { %314 = vst [vmem:[%s285_s21 + $0x10] sm:$0xf] (%p4823_p3), %v313_v4  ;;  %v315_v5 = vld [vmem:[%s4841_s20 + $0x28] sm:$0xf] (%p4823_p3)  ;;  %v317_v6 = vld [vmem:[%s4841_s20 + $0x30] sm:$0xf] (%p4823_p3) }
  0x15   : > { %v319_v7 = vld [vmem:[%s4841_s20 + $0x38] sm:$0xf]  ;;  %316 = vst [vmem:[%s285_s21 + $0x14] sm:$0xf] %v315_v5  ;;  %318 = vst [vmem:[%s285_s21 + $0x18] sm:$0xf] %v317_v6 }
  0x16   : > { %320 = vst [vmem:[%s285_s21 + $0x1c] sm:$0xf] %v319_v7  ;;  %v321_v8 = vld [vmem:[%s4841_s20 + $0x40] sm:$0xf]  ;;  %v323_v9 = vld [vmem:[%s4841_s20 + $0x48] sm:$0xf] }
  0x17   : > { %v325_v10 = vld [vmem:[%s4841_s20 + $0x50] sm:$0xf]  ;;  %322 = vst [vmem:[%s285_s21 + $0x20] sm:$0xf] %v321_v8  ;;  %324 = vst [vmem:[%s285_s21 + $0x24] sm:$0xf] %v323_v9 }
  0x18   : > { %326 = vst [vmem:[%s285_s21 + $0x28] sm:$0xf] %v325_v10  ;;  %v327_v11 = vld [vmem:[%s4841_s20 + $0x58] sm:$0xf]  ;;  %v329_v12 = vld [vmem:[%s4841_s20 + $0x60] sm:$0xf] }
  0x19   : > { %v331_v13 = vld [vmem:[%s4841_s20 + $0x68] sm:$0xf]  ;;  %328 = vst [vmem:[%s285_s21 + $0x2c] sm:$0xf] %v327_v11  ;;  %330 = vst [vmem:[%s285_s21 + $0x30] sm:$0xf] %v329_v12 }
  0x1a   : > { %332 = vst [vmem:[%s285_s21 + $0x34] sm:$0xf] %v331_v13  ;;  %v333_v14 = vld [vmem:[%s4841_s20 + $0x70] sm:$0xf]  ;;  %v335_v15 = vld [vmem:[%s4841_s20 + $0x78] sm:$0xf] }
  0x1b   : > { %334 = vst [vmem:[%s285_s21 + $0x38] sm:$0xf] %v333_v14  ;;  %336 = vst [vmem:[%s285_s21 + $0x3c] sm:$0xf] %v335_v15 }
  0x1c PF: > { %391 = sbr.rel (!%p4823_p3) target bundleno = 42 (0x2a), region = 81  ;;  %s393_s22 = sand.u32 (%p4823_p3), 1, %s4718_s28  }
  0x1d   : > { %s3830_s23 = sshll.u32 (%p4823_p3), %s4726_s30, 7  ;;  %s3634_s24 = sshll.u32 (%p4823_p3), %s393_s22, 6 }
  0x1e   : > { %s4866_s12 = scalar_lea.vmem (%p4823_p3), %s6502_s1, %s3830_s23  ;;  %s395_s11 = scalar_lea.vmem (%p4823_p3), [#allocation3], %s3634_s24 }
  0x1f   : > { %v3637_v16 = vld [vmem:[%s4866_s12 + $0x4] sm:$0xf] (%p4823_p3)  ;;  %v3638_v17 = vld [vmem:[%s4866_s12 + $0xc] sm:$0xf] (%p4823_p3)  ;;  %v3639_v18 = vld [vmem:[%s4866_s12 + $0x14] sm:$0xf] (%p4823_p3) }
  0x20   : > { %417 = vst [vmem:[%s395_s11] sm:$0xf] (%p4823_p3), %v3637_v16  ;;  %419 = vst [vmem:[%s395_s11 + $0x4] sm:$0xf] (%p4823_p3), %v3638_v17  ;;  %v3640_v19 = vld [vmem:[%s4866_s12 + $0x1c] sm:$0xf] (%p4823_p3) }
  0x21   : > { %v3641_v20 = vld [vmem:[%s4866_s12 + $0x24] sm:$0xf] (%p4823_p3)  ;;  %421 = vst [vmem:[%s395_s11 + $0x8] sm:$0xf] (%p4823_p3), %v3639_v18  ;;  %423 = vst [vmem:[%s395_s11 + $0xc] sm:$0xf] (%p4823_p3), %v3640_v19 }
  0x22   : > { %425 = vst [vmem:[%s395_s11 + $0x10] sm:$0xf] (%p4823_p3), %v3641_v20  ;;  %v3642_v21 = vld [vmem:[%s4866_s12 + $0x2c] sm:$0xf] (%p4823_p3)  ;;  %v3643_v22 = vld [vmem:[%s4866_s12 + $0x34] sm:$0xf] (%p4823_p3) }
  0x23   : > { %v3644_v23 = vld [vmem:[%s4866_s12 + $0x3c] sm:$0xf]  ;;  %427 = vst [vmem:[%s395_s11 + $0x14] sm:$0xf] %v3642_v21  ;;  %429 = vst [vmem:[%s395_s11 + $0x18] sm:$0xf] %v3643_v22 }
  0x24   : > { %431 = vst [vmem:[%s395_s11 + $0x1c] sm:$0xf] %v3644_v23  ;;  %v3645_v24 = vld [vmem:[%s4866_s12 + $0x44] sm:$0xf]  ;;  %v3646_v25 = vld [vmem:[%s4866_s12 + $0x4c] sm:$0xf] }
  0x25   : > { %v3647_v26 = vld [vmem:[%s4866_s12 + $0x54] sm:$0xf]  ;;  %433 = vst [vmem:[%s395_s11 + $0x20] sm:$0xf] %v3645_v24  ;;  %435 = vst [vmem:[%s395_s11 + $0x24] sm:$0xf] %v3646_v25 }
  0x26   : > { %437 = vst [vmem:[%s395_s11 + $0x28] sm:$0xf] %v3647_v26  ;;  %v3648_v27 = vld [vmem:[%s4866_s12 + $0x5c] sm:$0xf]  ;;  %v3649_v28 = vld [vmem:[%s4866_s12 + $0x64] sm:$0xf] }
  0x27   : > { %v3650_v29 = vld [vmem:[%s4866_s12 + $0x6c] sm:$0xf]  ;;  %439 = vst [vmem:[%s395_s11 + $0x2c] sm:$0xf] %v3648_v27  ;;  %441 = vst [vmem:[%s395_s11 + $0x30] sm:$0xf] %v3649_v28 }
  0x28   : > { %443 = vst [vmem:[%s395_s11 + $0x34] sm:$0xf] %v3650_v29  ;;  %v3651_v30 = vld [vmem:[%s4866_s12 + $0x74] sm:$0xf]  ;;  %v3652_v31 = vld [vmem:[%s4866_s12 + $0x7c] sm:$0xf] }
  0x29   : > { %445 = vst [vmem:[%s395_s11 + $0x38] sm:$0xf] %v3651_v30  ;;  %447 = vst [vmem:[%s395_s11 + $0x3c] sm:$0xf] %v3652_v31 }
  0x2a PF: > { %p3653_p6 = scmp.ge.s32.totalorder %s4730_s9, 1  ;;  %p511_p7 = scmp.lt.s32.totalorder %s4730_s9, 3 }
  0x2c   : > { %p512_p8 = pnand %p3653_p6, %p511_p7 }
  0x2e   : > { %515 = sbr.rel (%p512_p8) target bundleno = 900 (0x384), region = 126 }
  0x35   : > { %s518_s13 = sand.u32 1, %s4714_s27   ;;  %s4732_s17 = smov 127   ;;  %v4494_v50 = vld [vmem:[%s6503_s2 + $0x4] ss:$60 sps:$4 sm:$0xff]   ;;  %vm741_vm0 = vcmask 1039360   ;;  %vm839_vm1 = vcmask 1022976  }
  0x36   : > { %s3654_s15 = sshll.u32 %s518_s13, 6  ;;  %s4733_s27 = smov 126   ;;  %2163 = vmatprep.mubr.bf16.mxu0 %v4494_v50  ;;  %v4497_v1 = vld [vmem:[%s6503_s2 + $0xc] ss:$60 sps:$4 sm:$0xff]   ;;  %v4492_v12 = vld [vmem:[%s6503_s2] ss:$60 sps:$4 sm:$0xff]  }
  0x37   : > { %s4887_s16 = scalar_lea.vmem [#allocation2], %s3654_s15  ;;  %s4897_s18 = scalar_lea.vmem [#allocation3], %s3654_s15  ;;  %2260 = vmatprep.mubr.bf16.mxu1 %v4497_v1  ;;  %v4498_v18 = vld [vmem:[%s6503_s2 + $0x7c] ss:$60 sps:$4 sm:$0xff]   ;;  %v4501_v24 = vld [vmem:[%s6503_s2 + $0xf4] ss:$60 sps:$4 sm:$0xff]  }
  0x38   : > { %v4890_v32 = vld [vmem:[%s4887_s16 + $0x8] sm:$0xff]   ;;  %v4893_v33 = vld [vmem:[%s4887_s16] sm:$0xff]   ;;  %v4910_v36 = vld [vmem:[%s4897_s18 + $0x10] sm:$0xff]   ;;  %s4734_s19 = smov 125   ;;  %s4735_s20 = smov 124   ;;  %vm790_vm2 = vcmask 1031168  }
  0x39   : > { %713 = vrot.lane.b32.xlu1 %v4890_v32, %s4732_s17  ;;  %v4900_v34 = vld [vmem:[%s4897_s18 + $0x8] sm:$0xff]   ;;  %709 = vrot.lane.b32.xlu0 %v4893_v33, %s4732_s17  ;;  %v4905_v35 = vld [vmem:[%s4897_s18] sm:$0xff]   ;;  %s4736_s23 = smov 123   ;;  %s4737_s26 = smov 121   ;;  %vm937_vm3 = vcmask 1006592   ;;  %vm888_vm4 = vcmask 1014784  }
  0x3a   : > { %v4915_v37 = vld [vmem:[%s4887_s16 + $0x10] sm:$0xff]   ;;  %v4920_v38 = vld [vmem:[%s4897_s18 + $0x18] sm:$0xff]   ;;  %v4930_v40 = vld [vmem:[%s4897_s18 + $0x20] sm:$0xff]   ;;  %s4738_s12 = smov 122   ;;  %s4740_s22 = smov 120   ;;  %vm1035_vm5 = vcmask 990208  }
  0x3b   : > { %v4925_v39 = vld [vmem:[%s4887_s16 + $0x18] sm:$0xff]   ;;  %v4935_v41 = vld [vmem:[%s4887_s16 + $0x20] sm:$0xff]   ;;  %v4938_v42 = vld [vmem:[%s4897_s18 + $0x28] sm:$0xff]   ;;  %s4742_s25 = smov 118   ;;  %vm986_vm6 = vcmask 998400   ;;  %vm1133_vm7 = vcmask 973824  }
  0x3c   : > { %v4941_v43 = vld [vmem:[%s4887_s16 + $0x28] sm:$0xff]   ;;  %v4948_v44 = vld [vmem:[%s4897_s18 + $0x30] sm:$0xff]   ;;  %v4958_v46 = vld [vmem:[%s4897_s18 + $0x38] sm:$0xff]   ;;  %vm1084_vm8 = vcmask 982016   ;;  %vm1231_vm9 = vcmask 957440   ;;  %vm1182_vm10 = vcmask 965632  }
  0x3d   : > { %715 = vrot.lane.b32.xlu1 %v4900_v34, %s4732_s17  ;;  %711 = vrot.lane.b32.xlu0 %v4905_v35, %s4732_s17  ;;  %v4951_v45 = vld [vmem:[%s4887_s16 + $0x30] sm:$0xff]   ;;  %v4961_v47 = vld [vmem:[%s4887_s16 + $0x38] sm:$0xff]   ;;  %vm1329_vm11 = vcmask 941056   ;;  %vm1280_vm12 = vcmask 949248   ;;  %vm1378_vm13 = vcmask 932864   ;;  %p573_p9 = scmp.lt.s32.totalorder %s4722_s29, 1 }
  0x3e   : > { %v4500_v20 = vld [vmem:[%s6503_s2 + $0x78] ss:$60 sps:$4 sm:$0xff]   ;;  %v4503_v26 = vld [vmem:[%s6503_s2 + $0xf0] ss:$60 sps:$4 sm:$0xff]   ;;  %vm3309_vm14 = vcmask 1043456   ;;  %vm3284_vm15 = vcmask 64512  }
  0x3f   : > { %v4504_v30 = vld [vmem:[%s6503_s2 + $0x16c] ss:$60 sps:$4 sm:$0xff]   ;;  %s6536_s29 = smov (!%p573_p9, %s4722_s29), 1 }
  0x40   : > { %s3656_s21 = sshll.u32 %s6536_s29, 2 }
  0x41   : > { %719 = vrot.lane.b32.xlu1 %v4910_v36, %s4732_s17  ;;  %717 = vrot.lane.b32.xlu0 %v4915_v37, %s4732_s17  ;;  %s579_s13 = scalar_lea.vmem %s6506_s5, %s3656_s21 }
  0x45   : > { %723 = vrot.lane.b32.xlu1 %v4920_v38, %s4732_s17  ;;  %721 = vrot.lane.b32.xlu0 %v4925_v39, %s4732_s17 }
  0x49   : > { %727 = vrot.lane.b32.xlu1 %v4930_v40, %s4732_s17  ;;  %725 = vrot.lane.b32.xlu0 %v4935_v41, %s4732_s17 }
  0x4d   : > { %731 = vrot.lane.b32.xlu1 %v4938_v42, %s4732_s17  ;;  %729 = vrot.lane.b32.xlu0 %v4941_v43, %s4732_s17 }
  0x51   : > { %735 = vrot.lane.b32.xlu1 %v4948_v44, %s4732_s17  ;;  %733 = vrot.lane.b32.xlu0 %v4951_v45, %s4732_s17 }
  0x55   : > { %739 = vrot.lane.b32.xlu1 %v4958_v46, %s4732_s17  ;;  %737 = vrot.lane.b32.xlu0 %v4961_v47, %s4732_s17 }
  0x59   : > { %760 = vrot.lane.b32.xlu1 %v4905_v35, %s4733_s27  ;;  %758 = vrot.lane.b32.xlu0 %v4893_v33, %s4733_s27 }
  0x5d   : > { %764 = vrot.lane.b32.xlu1 %v4900_v34, %s4733_s27  ;;  %762 = vrot.lane.b32.xlu0 %v4890_v32, %s4733_s27 }
  0x61   : > { %768 = vrot.lane.b32.xlu1 %v4910_v36, %s4733_s27  ;;  %766 = vrot.lane.b32.xlu0 %v4915_v37, %s4733_s27 }
  0x65   : > { %772 = vrot.lane.b32.xlu1 %v4920_v38, %s4733_s27  ;;  %770 = vrot.lane.b32.xlu0 %v4925_v39, %s4733_s27 }
  0x69   : > { %776 = vrot.lane.b32.xlu1 %v4930_v40, %s4733_s27  ;;  %774 = vrot.lane.b32.xlu0 %v4935_v41, %s4733_s27 }
  0x6d   : > { %780 = vrot.lane.b32.xlu1 %v4938_v42, %s4733_s27  ;;  %778 = vrot.lane.b32.xlu0 %v4941_v43, %s4733_s27 }
  0x71   : > { %784 = vrot.lane.b32.xlu1 %v4948_v44, %s4733_s27  ;;  %782 = vrot.lane.b32.xlu0 %v4951_v45, %s4733_s27 }
  0x75   : > { %788 = vrot.lane.b32.xlu1 %v4958_v46, %s4733_s27  ;;  %786 = vrot.lane.b32.xlu0 %v4961_v47, %s4733_s27 }
  0x79   : > { %809 = vrot.lane.b32.xlu1 %v4905_v35, %s4734_s19  ;;  %807 = vrot.lane.b32.xlu0 %v4893_v33, %s4734_s19 }
  0x7d   : > { %813 = vrot.lane.b32.xlu1 %v4900_v34, %s4734_s19  ;;  %811 = vrot.lane.b32.xlu0 %v4890_v32, %s4734_s19 }
  0x81   : > { %817 = vrot.lane.b32.xlu1 %v4910_v36, %s4734_s19  ;;  %815 = vrot.lane.b32.xlu0 %v4915_v37, %s4734_s19 }
  0x85   : > { %821 = vrot.lane.b32.xlu1 %v4920_v38, %s4734_s19  ;;  %819 = vrot.lane.b32.xlu0 %v4925_v39, %s4734_s19 }
  0x89   : > { %825 = vrot.lane.b32.xlu1 %v4930_v40, %s4734_s19  ;;  %823 = vrot.lane.b32.xlu0 %v4935_v41, %s4734_s19 }
  0x8d   : > { %829 = vrot.lane.b32.xlu1 %v4938_v42, %s4734_s19  ;;  %827 = vrot.lane.b32.xlu0 %v4941_v43, %s4734_s19 }
  0x91   : > { %833 = vrot.lane.b32.xlu1 %v4948_v44, %s4734_s19  ;;  %831 = vrot.lane.b32.xlu0 %v4951_v45, %s4734_s19 }
  0x95   : > { %837 = vrot.lane.b32.xlu1 %v4958_v46, %s4734_s19  ;;  %835 = vrot.lane.b32.xlu0 %v4961_v47, %s4734_s19  ;;  %s4741_s19 = smov 117  }
  0x99   : > { %858 = vrot.lane.b32.xlu1 %v4905_v35, %s4735_s20  ;;  %856 = vrot.lane.b32.xlu0 %v4893_v33, %s4735_s20 }
  0x9d   : > { %862 = vrot.lane.b32.xlu1 %v4900_v34, %s4735_s20  ;;  %860 = vrot.lane.b32.xlu0 %v4890_v32, %s4735_s20 }
  0xa1   : > { %866 = vrot.lane.b32.xlu1 %v4910_v36, %s4735_s20  ;;  %864 = vrot.lane.b32.xlu0 %v4915_v37, %s4735_s20 }
  0xa5   : > { %870 = vrot.lane.b32.xlu1 %v4920_v38, %s4735_s20  ;;  %868 = vrot.lane.b32.xlu0 %v4925_v39, %s4735_s20 }
  0xa9   : > { %874 = vrot.lane.b32.xlu1 %v4930_v40, %s4735_s20  ;;  %872 = vrot.lane.b32.xlu0 %v4935_v41, %s4735_s20 }
  0xab   : > { %v714_v48 = vpop.permute.xlu1 %713  ;;  %v710_v49 = vpop.permute.xlu0 %709 }
  0xad   : > { %878 = vrot.lane.b32.xlu1 %v4938_v42, %s4735_s20  ;;  %876 = vrot.lane.b32.xlu0 %v4941_v43, %s4735_s20 }
  0xaf   : > { %v716_v51 = vpop.permute.xlu1 %715  ;;  %v712_v52 = vpop.permute.xlu0 %711 }
  0xb0   : > { %v742_v53 = vsel %vm741_vm0, %v710_v49, %v712_v52  ;;  %v743_v55 = vsel %vm741_vm0, %v714_v48, %v716_v51  ;;  %v4506_v48 = vld [vmem:[%s6503_s2 + $0x168] ss:$60 sps:$4 sm:$0xff]  }
  0xb1   : > { %882 = vrot.lane.b32.xlu1 %v4948_v44, %s4735_s20  ;;  %880 = vrot.lane.b32.xlu0 %v4951_v45, %s4735_s20 }
  0xb2   : > { %3895 = vmatprep.subr.bf16.mxu0 %v742_v53 }
  0xb3   : > { %3896 = vmatpush3.bf16.msra.mxu0 %v4893_v33  ;;  %v720_v54 = vpop.permute.xlu1 %719  ;;  %v718_v56 = vpop.permute.xlu0 %717 }
  0xb4   : > { %3897 = vmatprep.subr.bf16.mxu0 %v743_v55  ;;  %v744_v58 = vsel %vm741_vm0, %v718_v56, %v720_v54  ;;  %v4507_v54 = vld [vmem:[%s6503_s2 + $0x1e4] ss:$60 sps:$4 sm:$0xff]  }
  0xb5   : > { %886 = vrot.lane.b32.xlu1 %v4958_v46, %s4735_s20  ;;  %884 = vrot.lane.b32.xlu0 %v4961_v47, %s4735_s20  ;;  %v4511_v56 = vld [vmem:[%s6503_s2 + $0x1e0] ss:$60 sps:$4 sm:$0xff]  }
  0xb7   : > { %3898 = vmatpush3.bf16.msra.mxu0 %v4890_v32  ;;  %v724_v57 = vpop.permute.xlu1 %723  ;;  %v722_v59 = vpop.permute.xlu0 %721 }
  0xb8   : > { %3899 = vmatprep.subr.bf16.mxu0 %v744_v58  ;;  %v745_v61 = vsel %vm741_vm0, %v722_v59, %v724_v57 }
  0xb9   : > { %907 = vrot.lane.b32.xlu1 %v4905_v35, %s4736_s23  ;;  %905 = vrot.lane.b32.xlu0 %v4893_v33, %s4736_s23 }
  0xbb   : > { %3900 = vmatpush3.bf16.msra.mxu0 %v4915_v37  ;;  %v728_v60 = vpop.permute.xlu1 %727  ;;  %v726_v62 = vpop.permute.xlu0 %725 }
  0xbc   : > { %3901 = vmatprep.subr.bf16.mxu0 %v745_v61  ;;  %v746_v0 = vsel %vm741_vm0, %v726_v62, %v728_v60 }
  0xbd   : > { %911 = vrot.lane.b32.xlu1 %v4900_v34, %s4736_s23  ;;  %909 = vrot.lane.b32.xlu0 %v4890_v32, %s4736_s23 }
  0xbf   : > { %3902 = vmatpush3.bf16.msra.mxu0 %v4925_v39  ;;  %v732_v63 = vpop.permute.xlu1 %731  ;;  %v730_v2 = vpop.permute.xlu0 %729 }
  0xc0   : > { %3903 = vmatprep.subr.bf16.mxu0 %v746_v0  ;;  %v747_v4 = vsel %vm741_vm0, %v730_v2, %v732_v63  ;;  %v4513_v0 = vld [vmem:[%s6503_s2 + $0x25c] ss:$60 sps:$4 sm:$0xff]  }
  0xc1   : > { %915 = vrot.lane.b32.xlu1 %v4910_v36, %s4736_s23  ;;  %913 = vrot.lane.b32.xlu0 %v4915_v37, %s4736_s23  ;;  %v4517_v2 = vld [vmem:[%s6503_s2 + $0x258] ss:$60 sps:$4 sm:$0xff]  }
  0xc3   : > { %3904 = vmatpush3.bf16.msra.mxu0 %v4935_v41  ;;  %v736_v3 = vpop.permute.xlu1 %735  ;;  %v734_v5 = vpop.permute.xlu0 %733 }
  0xc4   : > { %3905 = vmatprep.subr.bf16.mxu0 %v747_v4  ;;  %v748_v7 = vsel %vm741_vm0, %v734_v5, %v736_v3 }
  0xc5   : > { %919 = vrot.lane.b32.xlu1 %v4920_v38, %s4736_s23  ;;  %917 = vrot.lane.b32.xlu0 %v4925_v39, %s4736_s23 }
  0xc7   : > { %3906 = vmatpush3.bf16.msra.mxu0 %v4941_v43  ;;  %v740_v6 = vpop.permute.xlu1 %739  ;;  %v738_v8 = vpop.permute.xlu0 %737 }
  0xc8   : > { %3907 = vmatprep.subr.bf16.mxu0 %v748_v7  ;;  %v749_v10 = vsel %vm741_vm0, %v738_v8, %v740_v6  ;;  %v4519_v8 = vld [vmem:[%s6503_s2 + $0x2d4] ss:$60 sps:$4 sm:$0xff]  }
  0xc9   : > { %1005 = vrot.lane.b32.xlu1 %v4905_v35, %s4737_s26  ;;  %1003 = vrot.lane.b32.xlu0 %v4893_v33, %s4737_s26 }
  0xcb   : > { %3908 = vmatpush3.bf16.msra.mxu0 %v4951_v45  ;;  %v761_v9 = vpop.permute.xlu1 %760  ;;  %v759_v11 = vpop.permute.xlu0 %758 }
  0xcc   : > { %3909 = vmatprep.subr.bf16.mxu0 %v749_v10  ;;  %v791_v52 = vsel %vm790_vm2, %v759_v11, %v761_v9  ;;  %v4523_v10 = vld [vmem:[%s6503_s2 + $0x2d0] ss:$60 sps:$4 sm:$0xff]  }
  0xcd   : > { %956 = vrot.lane.b32.xlu1 %v4905_v35, %s4738_s12  ;;  %954 = vrot.lane.b32.xlu0 %v4893_v33, %s4738_s12 }
  0xcf   : > { %v765_v13 = vpop.permute.xlu1 %764  ;;  %3910 = vmatpush3.bf16.msra.mxu0 %v4961_v47  ;;  %v763_v14 = vpop.permute.xlu0 %762 }
  0xd0   : > { %v792_v58 = vsel %vm790_vm2, %v763_v14, %v765_v13 }
  0xd1   : > { %1009 = vrot.lane.b32.xlu1 %v4900_v34, %s4737_s26  ;;  %1007 = vrot.lane.b32.xlu0 %v4890_v32, %s4737_s26 }
  0xd2   : > { %2164 = vmatmul.mubr.bf16.vlgmr.msra.gmra.mrb[0].mxu0 %v4492_v12 }
  0xd3   : > { %v5072_v15 = vpop.permute.xlu1 %768  ;;  %v5074_v16 = vpop.permute.xlu0 %766  ;;  %2171 = vmatprep.mubr.bf16.mxu0 %v4498_v18  ;;  %v4525_v18 = vld [vmem:[%s6503_s2 + $0x34c] ss:$60 sps:$4 sm:$0xff]  }
  0xd4   : > { %v793_v62 = vsel %vm790_vm2, %v5074_v16, %v5072_v15 }
  0xd5   : > { %960 = vrot.lane.b32.xlu1 %v4900_v34, %s4738_s12  ;;  %958 = vrot.lane.b32.xlu0 %v4890_v32, %s4738_s12 }
  0xd7   : > { %v5080_v17 = vpop.permute.xlu1 %772  ;;  %v5085_v19 = vpop.permute.xlu0 %770 }
  0xd8   : > { %v794_v4 = vsel %vm790_vm2, %v5085_v19, %v5080_v17 }
  0xd9   : > { %923 = vrot.lane.b32.xlu1 %v4930_v40, %s4736_s23  ;;  %921 = vrot.lane.b32.xlu0 %v4935_v41, %s4736_s23 }
  0xda   : > { %2172 = vmatmul.mubr.bf16.gmra.mrb[4].mxu0 %v4500_v20 }
  0xdb   : > { %v5094_v21 = vpop.permute.xlu1 %776  ;;  %v5096_v22 = vpop.permute.xlu0 %774  ;;  %2179 = vmatprep.mubr.bf16.mxu0 %v4501_v24 }
  0xdd   : > { %1013 = vrot.lane.b32.xlu1 %v4910_v36, %s4737_s26  ;;  %1011 = vrot.lane.b32.xlu0 %v4915_v37, %s4737_s26 }
  0xdf   : > { %v5102_v23 = vpop.permute.xlu1 %780  ;;  %v5107_v25 = vpop.permute.xlu0 %778 }
  0xe0   : > { %v796_v12 = vsel %vm790_vm2, %v5107_v25, %v5102_v23  ;;  %v4509_v23 = vld [vmem:[%s6503_s2 + $0x84] ss:$60 sps:$4 sm:$0xff]  }
  0xe1   : > { %964 = vrot.lane.b32.xlu1 %v4910_v36, %s4738_s12  ;;  %962 = vrot.lane.b32.xlu0 %v4915_v37, %s4738_s12 }
  0xe2   : > { %2180 = vmatmul.mubr.bf16.gmra.mrb[8].mxu0 %v4503_v26  ;;  %v4535_v26 = vld [vmem:[%s6503_s2 + $0x14] ss:$60 sps:$4 sm:$0xff]  }
  0xe3   : > { %v5116_v27 = vpop.permute.xlu1 %784  ;;  %v5118_v28 = vpop.permute.xlu0 %782  ;;  %2187 = vmatprep.mubr.bf16.mxu0 %v4504_v30 }
  0xe4   : > { %v797_v16 = vsel %vm790_vm2, %v5118_v28, %v5116_v27  ;;  %v4515_v28 = vld [vmem:[%s6503_s2 + $0xfc] ss:$60 sps:$4 sm:$0xff]  }
  0xe5   : > { %927 = vrot.lane.b32.xlu1 %v4938_v42, %s4736_s23  ;;  %925 = vrot.lane.b32.xlu0 %v4941_v43, %s4736_s23 }
  0xe7   : > { %v5124_v29 = vpop.permute.xlu1 %788  ;;  %v5129_v31 = vpop.permute.xlu0 %786 }
  0xe8   : > { %v798_v20 = vsel %vm790_vm2, %v5129_v31, %v5124_v29 }
  0xe9   : > { %1017 = vrot.lane.b32.xlu1 %v4920_v38, %s4737_s26  ;;  %1015 = vrot.lane.b32.xlu0 %v4925_v39, %s4737_s26 }
  0xea   : > { %2188 = vmatmul.mubr.bf16.gmra.mrb[12].mxu0 %v4506_v48 }
  0xeb   : > { %v810_v49 = vpop.permute.xlu1 %809  ;;  %v808_v50 = vpop.permute.xlu0 %807  ;;  %2195 = vmatprep.mubr.bf16.mxu0 %v4507_v54  ;;  %v4527_v54 = vld [vmem:[%s6503_s2 + $0x1ec] ss:$60 sps:$4 sm:$0xff]  }
  0xec   : > { %v840_v51 = vsel %vm839_vm1, %v808_v50, %v810_v49 }
  0xed   : > { %968 = vrot.lane.b32.xlu1 %v4920_v38, %s4738_s12  ;;  %966 = vrot.lane.b32.xlu0 %v4925_v39, %s4738_s12 }
  0xee   : > { %3959 = vmatprep.subr.bf16.mxu1 %v840_v51 }
  0xef   : > { %3960 = vmatpush3.bf16.msra.mxu1 %v791_v52  ;;  %v814_v53 = vpop.permute.xlu1 %813  ;;  %v812_v55 = vpop.permute.xlu0 %811  ;;  %v4524_v52 = vld [vmem:[%s6503_s2 + $0x170] ss:$60 sps:$4 sm:$0xff]  }
  0xf0   : > { %v841_v57 = vsel %vm839_vm1, %v812_v55, %v814_v53 }
  0xf1   : > { %931 = vrot.lane.b32.xlu1 %v4948_v44, %s4736_s23  ;;  %929 = vrot.lane.b32.xlu0 %v4951_v45, %s4736_s23 }
  0xf2   : > { %3961 = vmatprep.subr.bf16.mxu1 %v841_v57  ;;  %2196 = vmatmul.mubr.bf16.gmra.mrb[16].mxu0 %v4511_v56 }
  0xf3   : > { %3962 = vmatpush3.bf16.msra.mxu1 %v792_v58  ;;  %v818_v59 = vpop.permute.xlu1 %817  ;;  %v816_v60 = vpop.permute.xlu0 %815  ;;  %2203 = vmatprep.mubr.bf16.mxu0 %v4513_v0 }
  0xf4   : > { %v842_v61 = vsel %vm839_vm1, %v816_v60, %v818_v59  ;;  %v4531_v59 = vld [vmem:[%s6503_s2 + $0x264] ss:$60 sps:$4 sm:$0xff]  }
  0xf5   : > { %1021 = vrot.lane.b32.xlu1 %v4930_v40, %s4737_s26  ;;  %1019 = vrot.lane.b32.xlu0 %v4935_v41, %s4737_s26 }
  0xf6   : > { %3963 = vmatprep.subr.bf16.mxu1 %v842_v61 }
  0xf7   : > { %3964 = vmatpush3.bf16.msra.mxu1 %v793_v62  ;;  %v822_v63 = vpop.permute.xlu1 %821  ;;  %v820_v1 = vpop.permute.xlu0 %819 }
  0xf8   : > { %v843_v3 = vsel %vm839_vm1, %v820_v1, %v822_v63 }
  0xf9   : > { %972 = vrot.lane.b32.xlu1 %v4930_v40, %s4738_s12  ;;  %970 = vrot.lane.b32.xlu0 %v4935_v41, %s4738_s12  ;;  %v795_v41 = vsel %vm790_vm2, %v5096_v22, %v5094_v21  ;;  %v4495_v21 = vld [vmem:[%s6503_s2 + $0x8] ss:$60 sps:$4 sm:$0xff]  }
  0xfa   : > { %3965 = vmatprep.subr.bf16.mxu1 %v843_v3  ;;  %2204 = vmatmul.mubr.bf16.gmra.mrb[20].mxu0 %v4517_v2  ;;  %v4536_v2 = vld [vmem:[%s6503_s2 + $0x260] ss:$60 sps:$4 sm:$0xff]  }
  0xfb   : > { %3966 = vmatpush3.bf16.msra.mxu1 %v794_v4  ;;  %v826_v5 = vpop.permute.xlu1 %825  ;;  %v824_v6 = vpop.permute.xlu0 %823  ;;  %2211 = vmatprep.mubr.bf16.mxu0 %v4519_v8  ;;  %v4539_v8 = vld [vmem:[%s6503_s2 + $0x2d8] ss:$60 sps:$4 sm:$0xff]  }
  0xfc   : > { %v844_v40 = vsel %vm839_vm1, %v824_v6, %v826_v5  ;;  %v5339_v5 = vld [vmem:[%s4887_s16] sm:$0xff]  }
  0xfd   : > { %935 = vrot.lane.b32.xlu1 %v4958_v46, %s4736_s23  ;;  %933 = vrot.lane.b32.xlu0 %v4961_v47, %s4736_s23 }
  0xfe   : > { %3967 = vmatprep.subr.bf16.mxu1 %v844_v40 }
  0xff   : > { %3968 = vmatpush3.bf16.msra.mxu1 %v795_v41  ;;  %v830_v7 = vpop.permute.xlu1 %829  ;;  %v828_v9 = vpop.permute.xlu0 %827 }
 0x100   : > { %v845_v11 = vsel %vm839_vm1, %v828_v9, %v830_v7 }
 0x101   : > { %1025 = vrot.lane.b32.xlu1 %v4938_v42, %s4737_s26  ;;  %1023 = vrot.lane.b32.xlu0 %v4941_v43, %s4737_s26 }
 0x102   : > { %3969 = vmatprep.subr.bf16.mxu1 %v845_v11  ;;  %2212 = vmatmul.mubr.bf16.gmra.mrb[24].mxu0 %v4523_v10  ;;  %v5358_v10 = vld [vmem:[%s4897_s18 + $0x8] sm:$0xff]  }
 0x103   : > { %3970 = vmatpush3.bf16.msra.mxu1 %v796_v12  ;;  %v834_v13 = vpop.permute.xlu1 %833  ;;  %v832_v14 = vpop.permute.xlu0 %831  ;;  %2219 = vmatprep.mubr.bf16.mxu0 %v4525_v18  ;;  %v5364_v11 = vld [vmem:[%s4887_s16 + $0x8] sm:$0xff]  }
 0x104   : > { %v846_v15 = vsel %vm839_vm1, %v832_v14, %v834_v13  ;;  %v4542_v18 = vld [vmem:[%s6503_s2 + $0x350] ss:$60 sps:$4 sm:$0xff]  }
 0x105   : > { %976 = vrot.lane.b32.xlu1 %v4938_v42, %s4738_s12  ;;  %974 = vrot.lane.b32.xlu0 %v4941_v43, %s4738_s12  ;;  %v4529_v42 = vld [vmem:[%s6503_s2 + $0x348] ss:$60 sps:$4 sm:$0xff]  }
 0x106   : > { %3971 = vmatprep.subr.bf16.mxu1 %v846_v15  ;;  %v5370_v15 = vld [vmem:[%s4897_s18 + $0x18] sm:$0xff]  }
 0x107   : > { %3972 = vmatpush3.bf16.msra.mxu1 %v797_v16  ;;  %v838_v17 = vpop.permute.xlu1 %837  ;;  %v836_v19 = vpop.permute.xlu0 %835  ;;  %v5375_v16 = vld [vmem:[%s4887_s16 + $0x18] sm:$0xff]  }
 0x108   : > { %v847_v43 = vsel %vm839_vm1, %v836_v19, %v838_v17 }
 0x109   : > { %1029 = vrot.lane.b32.xlu1 %v4948_v44, %s4737_s26  ;;  %1027 = vrot.lane.b32.xlu0 %v4951_v45, %s4737_s26 }
 0x10a   : > { %3973 = vmatprep.subr.bf16.mxu1 %v847_v43  ;;  %2220 = vmatmul.mubr.bf16.gmra.mrb[28].mxu0 %v4529_v42  ;;  %v4545_v42 = vld [vmem:[%s6503_s2 + $0x1c] ss:$60 sps:$4 sm:$0xff]  }
 0x10b   : > { %3974 = vmatpush3.bf16.msra.mxu1 %v798_v20  ;;  %v859_v22 = vpop.permute.xlu1 %858  ;;  %v857_v24 = vpop.permute.xlu0 %856  ;;  %2357 = vmatprep.mubr.bf16.mxu0 %v4535_v26 }
 0x10c   : > { %v889_v61 = vsel %vm888_vm4, %v857_v24, %v859_v22  ;;  %v5397_v24 = vld [vmem:[%s4887_s16 + $0x20] sm:$0xff]  }
 0x10d   : > { %980 = vrot.lane.b32.xlu1 %v4948_v44, %s4738_s12  ;;  %978 = vrot.lane.b32.xlu0 %v4951_v45, %s4738_s12  ;;  %v4512_v44 = vld [vmem:[%s6503_s2 + $0x80] ss:$60 sps:$4 sm:$0xff]  }
 0x10e   : > { %2261 = vmatmul.mubr.bf16.vlgmr.msra.gmra.mrb[0].mxu1 %v4495_v21 }
 0x10f   : > { %v5232_v25 = vpop.permute.xlu1 %862  ;;  %2268 = vmatprep.mubr.bf16.mxu1 %v4509_v23  ;;  %v861_v27 = vpop.permute.xlu0 %860  ;;  %v5392_v23 = vld [vmem:[%s4897_s18 + $0x20] sm:$0xff]  }
 0x110   : > { %v890_v1 = vsel %vm888_vm4, %v861_v27, %v5232_v25  ;;  %v5402_v27 = vld [vmem:[%s4897_s18 + $0x10] sm:$0xff]  }
 0x111   : > { %1033 = vrot.lane.b32.xlu1 %v4958_v46, %s4737_s26  ;;  %1031 = vrot.lane.b32.xlu0 %v4961_v47, %s4737_s26  ;;  %s4739_s26 = smov 119  }
 0x113   : > { %v5244_v45 = vpop.permute.xlu1 %866  ;;  %v5249_v29 = vpop.permute.xlu0 %864 }
 0x115   : > { %984 = vrot.lane.b32.xlu1 %v4958_v46, %s4738_s12  ;;  %982 = vrot.lane.b32.xlu0 %v4961_v47, %s4738_s12  ;;  %v4518_v46 = vld [vmem:[%s6503_s2 + $0xf8] ss:$60 sps:$4 sm:$0xff]   ;;  %s4745_s12 = smov 114  }
 0x116   : > { %2269 = vmatmul.mubr.bf16.gmra.mrb[4].mxu1 %v4512_v44  ;;  %v4521_v47 = vld [vmem:[%s6503_s2 + $0x174] ss:$60 sps:$4 sm:$0xff]  }
 0x117   : > { %v5255_v30 = vpop.permute.xlu1 %870  ;;  %2276 = vmatprep.mubr.bf16.mxu1 %v4515_v28  ;;  %v5257_v31 = vpop.permute.xlu0 %868  ;;  %v5411_v28 = vld [vmem:[%s4887_s16 + $0x10] sm:$0xff]  }
 0x118   : > { %v892_v41 = vsel %vm888_vm4, %v5257_v31, %v5255_v30 }
 0x119   : > { %1103 = vrot.lane.b32.xlu1 %v4905_v35, %s4739_s26  ;;  %1101 = vrot.lane.b32.xlu0 %v4893_v33, %s4739_s26 }
 0x11b   : > { %v5266_v48 = vpop.permute.xlu1 %874  ;;  %v5271_v49 = vpop.permute.xlu0 %872 }
 0x11d   : > { %1054 = vrot.lane.b32.xlu1 %v4905_v35, %s4740_s22  ;;  %1052 = vrot.lane.b32.xlu0 %v4893_v33, %s4740_s22 }
 0x11e   : > { %2277 = vmatmul.mubr.bf16.gmra.mrb[8].mxu1 %v4518_v46 }
 0x11f   : > { %v5277_v50 = vpop.permute.xlu1 %878  ;;  %2284 = vmatprep.mubr.bf16.mxu1 %v4521_v47  ;;  %v5279_v51 = vpop.permute.xlu0 %876 }
 0x121   : > { %1107 = vrot.lane.b32.xlu1 %v4900_v34, %s4739_s26  ;;  %1105 = vrot.lane.b32.xlu0 %v4890_v32, %s4739_s26 }
 0x123   : > { %v5288_v53 = vpop.permute.xlu1 %882  ;;  %v5293_v55 = vpop.permute.xlu0 %880 }
 0x125   : > { %1058 = vrot.lane.b32.xlu1 %v4900_v34, %s4740_s22  ;;  %1056 = vrot.lane.b32.xlu0 %v4890_v32, %s4740_s22  ;;  %v4530_v34 = vld [vmem:[%s6503_s2 + $0x1e8] ss:$60 sps:$4 sm:$0xff]  }
 0x126   : > { %2285 = vmatmul.mubr.bf16.gmra.mrb[12].mxu1 %v4524_v52 }
 0x127   : > { %v5299_v56 = vpop.permute.xlu1 %886  ;;  %2292 = vmatprep.mubr.bf16.mxu1 %v4527_v54  ;;  %v5301_v57 = vpop.permute.xlu0 %884  ;;  %v5426_v54 = vld [vmem:[%s4897_s18 + $0x28] sm:$0xff]  }
 0x129   : > { %1111 = vrot.lane.b32.xlu1 %v4910_v36, %s4739_s26  ;;  %1109 = vrot.lane.b32.xlu0 %v4915_v37, %s4739_s26 }
 0x12b   : > { %v908_v58 = vpop.permute.xlu1 %907  ;;  %v906_v32 = vpop.permute.xlu0 %905 }
 0x12c   : > { %v938_v60 = vsel %vm937_vm3, %v906_v32, %v908_v58  ;;  %v5435_v32 = vld [vmem:[%s4887_s16 + $0x28] sm:$0xff]  }
 0x12d   : > { %1201 = vrot.lane.b32.xlu1 %v4905_v35, %s4741_s19  ;;  %1199 = vrot.lane.b32.xlu0 %v4893_v33, %s4741_s19 }
 0x12e   : > { %4023 = vmatprep.subr.bf16.mxu0 %v938_v60  ;;  %2293 = vmatmul.mubr.bf16.gmra.mrb[16].mxu1 %v4530_v34  ;;  %v894_v34 = vsel %vm888_vm4, %v5279_v51, %v5277_v50 }
 0x12f   : > { %4024 = vmatpush3.bf16.msra.mxu0 %v889_v61  ;;  %v912_v62 = vpop.permute.xlu1 %911  ;;  %v910_v63 = vpop.permute.xlu0 %909  ;;  %2300 = vmatprep.mubr.bf16.mxu1 %v4531_v59 }
 0x130   : > { %v939_v0 = vsel %vm937_vm3, %v910_v63, %v912_v62 }
 0x131   : > { %1062 = vrot.lane.b32.xlu1 %v4910_v36, %s4740_s22  ;;  %1060 = vrot.lane.b32.xlu0 %v4915_v37, %s4740_s22  ;;  %v4537_v36 = vld [vmem:[%s6503_s2 + $0x2dc] ss:$60 sps:$4 sm:$0xff]   ;;  %v891_v37 = vsel %vm888_vm4, %v5249_v29, %v5244_v45  ;;  %v893_v45 = vsel %vm888_vm4, %v5271_v49, %v5266_v48 }
 0x132   : > { %4025 = vmatprep.subr.bf16.mxu0 %v939_v0 }
 0x133   : > { %4026 = vmatpush3.bf16.msra.mxu0 %v890_v1  ;;  %v916_v33 = vpop.permute.xlu1 %915  ;;  %v914_v3 = vpop.permute.xlu0 %913 }
 0x134   : > { %v940_v4 = vsel %vm937_vm3, %v914_v3, %v916_v33  ;;  %v895_v33 = vsel %vm888_vm4, %v5293_v55, %v5288_v53 }
 0x135   : > { %1152 = vrot.lane.b32.xlu1 %v4905_v35, %s4742_s25  ;;  %1150 = vrot.lane.b32.xlu0 %v5339_v5, %s4742_s25 }
 0x136   : > { %4027 = vmatprep.subr.bf16.mxu0 %v940_v4  ;;  %2301 = vmatmul.mubr.bf16.gmra.mrb[20].mxu1 %v4536_v2 }
 0x137   : > { %4028 = vmatpush3.bf16.msra.mxu0 %v891_v37  ;;  %v920_v6 = vpop.permute.xlu1 %919  ;;  %v918_v40 = vpop.permute.xlu0 %917  ;;  %2308 = vmatprep.mubr.bf16.mxu1 %v4537_v36  ;;  %v5458_v36 = vld [vmem:[%s4897_s18 + $0x30] sm:$0xff]  }
 0x138   : > { %v941_v35 = vsel %vm937_vm3, %v918_v40, %v920_v6  ;;  %v5464_v37 = vld [vmem:[%s4887_s16 + $0x30] sm:$0xff]  }
 0x139   : > { %1115 = vrot.lane.b32.xlu1 %v4920_v38, %s4739_s26  ;;  %1113 = vrot.lane.b32.xlu0 %v4925_v39, %s4739_s26  ;;  %v4540_v38 = vld [vmem:[%s6503_s2 + $0x354] ss:$60 sps:$4 sm:$0xff]  }
 0x13a   : > { %4029 = vmatprep.subr.bf16.mxu0 %v941_v35 }
 0x13b   : > { %4030 = vmatpush3.bf16.msra.mxu0 %v892_v41  ;;  %v1006_v7 = vpop.permute.xlu1 %1005  ;;  %v1004_v9 = vpop.permute.xlu0 %1003 }
 0x13c   : > { %v1036_v39 = vsel %vm1035_vm5, %v1004_v9, %v1006_v7  ;;  %v896_v7 = vsel %vm888_vm4, %v5301_v57, %v5299_v56  ;;  %v4533_v9 = vld [vmem:[%s6503_s2 + $0x10] ss:$60 sps:$4 sm:$0xff]  }
 0x13d   : > { %1205 = vrot.lane.b32.xlu1 %v5358_v10, %s4741_s19  ;;  %1203 = vrot.lane.b32.xlu0 %v5364_v11, %s4741_s19 }
 0x13e   : > { %4087 = vmatprep.subr.bf16.mxu1 %v1036_v39  ;;  %2309 = vmatmul.mubr.bf16.gmra.mrb[24].mxu1 %v4539_v8  ;;  %v4546_v39 = vld [vmem:[%s6503_s2 + $0x8c] ss:$60 sps:$4 sm:$0xff]  }
 0x13f   : > { %v957_v12 = vpop.permute.xlu1 %956  ;;  %v955_v13 = vpop.permute.xlu0 %954  ;;  %2316 = vmatprep.mubr.bf16.mxu1 %v4540_v38 }
 0x140   : > { %v987_v14 = vsel %vm986_vm6, %v955_v13, %v957_v12 }
 0x141   : > { %1066 = vrot.lane.b32.xlu1 %v5370_v15, %s4740_s22  ;;  %1064 = vrot.lane.b32.xlu0 %v5375_v16, %s4740_s22 }
 0x142   : > { %4088 = vmatpush3.bf16.msra.mxu1 %v987_v14  ;;  %v5494_v14 = vld [vmem:[%s4897_s18 + $0x38] sm:$0xff]  }
 0x143   : > { %v1010_v17 = vpop.permute.xlu1 %1009  ;;  %v1008_v19 = vpop.permute.xlu0 %1007 }
 0x144   : > { %v1037_v43 = vsel %vm1035_vm5, %v1008_v19, %v1010_v17  ;;  %v5499_v17 = vld [vmem:[%s4887_s16 + $0x38] sm:$0xff]   ;;  %v4548_v19 = vld [vmem:[%s6503_s2 + $0x88] ss:$60 sps:$4 sm:$0xff]   ;;  %s4744_s16 = smov 116  }
 0x145   : > { %1156 = vrot.lane.b32.xlu1 %v5358_v10, %s4742_s25  ;;  %1154 = vrot.lane.b32.xlu0 %v5364_v11, %s4742_s25 }
 0x146   : > { %4089 = vmatprep.subr.bf16.mxu1 %v1037_v43  ;;  %2317 = vmatmul.mubr.bf16.gmra.mrb[28].mxu1 %v4542_v18  ;;  %v4552_v43 = vld [vmem:[%s6503_s2 + $0x104] ss:$60 sps:$4 sm:$0xff]  }
 0x147   : > { %v961_v20 = vpop.permute.xlu1 %960  ;;  %v959_v21 = vpop.permute.xlu0 %958  ;;  %2454 = vmatprep.mubr.bf16.mxu1 %v4545_v42 }
 0x148   : > { %v988_v22 = vsel %vm986_vm6, %v959_v21, %v961_v20 }
 0x149   : > { %1119 = vrot.lane.b32.xlu1 %v5392_v23, %s4739_s26  ;;  %1117 = vrot.lane.b32.xlu0 %v5397_v24, %s4739_s26 }
 0x14a   : > { %4090 = vmatpush3.bf16.msra.mxu1 %v988_v22 }
 0x14b   : > { %v924_v25 = vpop.permute.xlu1 %923  ;;  %v922_v26 = vpop.permute.xlu0 %921 }
 0x14c   : > { %v942_v44 = vsel %vm937_vm3, %v922_v26, %v924_v25 }
 0x14d   : > { %1209 = vrot.lane.b32.xlu1 %v5402_v27, %s4741_s19  ;;  %1207 = vrot.lane.b32.xlu0 %v5411_v28, %s4741_s19 }
 0x14e   : > { %4031 = vmatprep.subr.bf16.mxu0 %v942_v44  ;;  %v4554_v44 = vld [vmem:[%s6503_s2 + $0x100] ss:$60 sps:$4 sm:$0xff]  }
 0x14f   : > { %4032 = vmatpush3.bf16.msra.mxu0 %v893_v45  ;;  %v1014_v29 = vpop.permute.xlu1 %1013  ;;  %v1012_v30 = vpop.permute.xlu0 %1011 }
 0x150   : > { %v1038_v31 = vsel %vm1035_vm5, %v1012_v30, %v1014_v29  ;;  %v4558_v29 = vld [vmem:[%s6503_s2 + $0x17c] ss:$60 sps:$4 sm:$0xff]  }
 0x151   : > { %1070 = vrot.lane.b32.xlu1 %v5392_v23, %s4740_s22  ;;  %1068 = vrot.lane.b32.xlu0 %v5397_v24, %s4740_s22 }
 0x152   : > { %4091 = vmatprep.subr.bf16.mxu1 %v1038_v31 }
 0x153   : > { %v965_v46 = vpop.permute.xlu1 %964  ;;  %v963_v48 = vpop.permute.xlu0 %962 }
 0x154   : > { %v989_v47 = vsel %vm986_vm6, %v963_v48, %v965_v46 }
 0x155   : > { %1160 = vrot.lane.b32.xlu1 %v5402_v27, %s4742_s25  ;;  %1158 = vrot.lane.b32.xlu0 %v5411_v28, %s4742_s25 }
 0x156   : > { %4092 = vmatpush3.bf16.msra.mxu1 %v989_v47  ;;  %v4543_v47 = vld [vmem:[%s6503_s2 + $0x18] ss:$60 sps:$4 sm:$0xff]  }
 0x157   : > { %v928_v49 = vpop.permute.xlu1 %927  ;;  %v926_v52 = vpop.permute.xlu0 %925 }
 0x158   : > { %v943_v58 = vsel %vm937_vm3, %v926_v52, %v928_v49  ;;  %v4549_v52 = vld [vmem:[%s6503_s2 + $0x94] ss:$60 sps:$4 sm:$0xff]  }
 0x159   : > { %1123 = vrot.lane.b32.xlu1 %v5426_v54, %s4739_s26  ;;  %1121 = vrot.lane.b32.xlu0 %v5435_v32, %s4739_s26 }
 0x15a   : > { %4033 = vmatprep.subr.bf16.mxu0 %v943_v58  ;;  %v4560_v58 = vld [vmem:[%s6503_s2 + $0x178] ss:$60 sps:$4 sm:$0xff]  }
 0x15b   : > { %4034 = vmatpush3.bf16.msra.mxu0 %v894_v34  ;;  %v1018_v59 = vpop.permute.xlu1 %1017  ;;  %v1016_v60 = vpop.permute.xlu0 %1015 }
 0x15c   : > { %v1039_v61 = vsel %vm1035_vm5, %v1016_v60, %v1018_v59  ;;  %v4564_v59 = vld [vmem:[%s6503_s2 + $0x1f4] ss:$60 sps:$4 sm:$0xff]  }
 0x15d   : > { %1213 = vrot.lane.b32.xlu1 %v5370_v15, %s4741_s19  ;;  %1211 = vrot.lane.b32.xlu0 %v5375_v16, %s4741_s19 }
 0x15e   : > { %4093 = vmatprep.subr.bf16.mxu1 %v1039_v61 }
 0x15f   : > { %v969_v62 = vpop.permute.xlu1 %968  ;;  %v967_v50 = vpop.permute.xlu0 %966 }
 0x160   : > { %v990_v51 = vsel %vm986_vm6, %v967_v50, %v969_v62 }
 0x161   : > { %1074 = vrot.lane.b32.xlu1 %v5426_v54, %s4740_s22  ;;  %1072 = vrot.lane.b32.xlu0 %v5435_v32, %s4740_s22 }
 0x162   : > { %4094 = vmatpush3.bf16.msra.mxu1 %v990_v51  ;;  %v4551_v51 = vld [vmem:[%s6503_s2 + $0x90] ss:$60 sps:$4 sm:$0xff]  }
 0x163   : > { %v932_v63 = vpop.permute.xlu1 %931  ;;  %v930_v0 = vpop.permute.xlu0 %929 }
 0x164   : > { %v944_v1 = vsel %vm937_vm3, %v930_v0, %v932_v63  ;;  %v4555_v0 = vld [vmem:[%s6503_s2 + $0x10c] ss:$60 sps:$4 sm:$0xff]  }
 0x165   : > { %1164 = vrot.lane.b32.xlu1 %v5370_v15, %s4742_s25  ;;  %1162 = vrot.lane.b32.xlu0 %v5375_v16, %s4742_s25 }
 0x166   : > { %4035 = vmatprep.subr.bf16.mxu0 %v944_v1  ;;  %v4566_v1 = vld [vmem:[%s6503_s2 + $0x1f0] ss:$60 sps:$4 sm:$0xff]  }
 0x167   : > { %4036 = vmatpush3.bf16.msra.mxu0 %v895_v33  ;;  %v1022_v2 = vpop.permute.xlu1 %1021  ;;  %v1020_v3 = vpop.permute.xlu0 %1019 }
 0x168   : > { %v1040_v4 = vsel %vm1035_vm5, %v1020_v3, %v1022_v2  ;;  %v4570_v2 = vld [vmem:[%s6503_s2 + $0x26c] ss:$60 sps:$4 sm:$0xff]  }
 0x169   : > { %1127 = vrot.lane.b32.xlu1 %v5458_v36, %s4739_s26  ;;  %1125 = vrot.lane.b32.xlu0 %v5464_v37, %s4739_s26 }
 0x16a   : > { %4095 = vmatprep.subr.bf16.mxu1 %v1040_v4 }
 0x16b   : > { %v973_v53 = vpop.permute.xlu1 %972  ;;  %v971_v55 = vpop.permute.xlu0 %970 }
 0x16c   : > { %v991_v6 = vsel %vm986_vm6, %v971_v55, %v973_v53 }
 0x16d   : > { %1217 = vrot.lane.b32.xlu1 %v5392_v23, %s4741_s19  ;;  %1215 = vrot.lane.b32.xlu0 %v5397_v24, %s4741_s19 }
 0x16e   : > { %4096 = vmatpush3.bf16.msra.mxu1 %v991_v6  ;;  %v4691_v6 = vld [vmem:[%s4897_s18] sm:$0xff]  }
 0x16f   : > { %v936_v40 = vpop.permute.xlu1 %935  ;;  %v934_v35 = vpop.permute.xlu0 %933 }
 0x170   : > { %v945_v41 = vsel %vm937_vm3, %v934_v35, %v936_v40  ;;  %v4557_v40 = vld [vmem:[%s6503_s2 + $0x108] ss:$60 sps:$4 sm:$0xff]  }
 0x171   : > { %1078 = vrot.lane.b32.xlu1 %v5458_v36, %s4740_s22  ;;  %1076 = vrot.lane.b32.xlu0 %v5464_v37, %s4740_s22 }
 0x172   : > { %4037 = vmatprep.subr.bf16.mxu0 %v945_v41  ;;  %v4561_v41 = vld [vmem:[%s6503_s2 + $0x184] ss:$60 sps:$4 sm:$0xff]  }
 0x173   : > { %4038 = vmatpush3.bf16.msra.mxu0 %v896_v7  ;;  %v1026_v8 = vpop.permute.xlu1 %1025  ;;  %v1024_v38 = vpop.permute.xlu0 %1023  ;;  %v4572_v7 = vld [vmem:[%s6503_s2 + $0x268] ss:$60 sps:$4 sm:$0xff]  }
 0x174   : > { %v1041_v56 = vsel %vm1035_vm5, %v1024_v38, %v1026_v8 }
 0x175   : > { %1168 = vrot.lane.b32.xlu1 %v5392_v23, %s4742_s25  ;;  %1166 = vrot.lane.b32.xlu0 %v5397_v24, %s4742_s25 }
 0x176   : > { %4097 = vmatprep.subr.bf16.mxu1 %v1041_v56  ;;  %2358 = vmatmul.mubr.bf16.vlgmr.msra.gmra.mrb[32].mxu0 %v4533_v9  ;;  %v4576_v9 = vld [vmem:[%s6503_s2 + $0x2e4] ss:$60 sps:$4 sm:$0xff]  }
 0x177   : > { %v977_v57 = vpop.permute.xlu1 %976  ;;  %v975_v12 = vpop.permute.xlu0 %974  ;;  %2365 = vmatprep.mubr.bf16.mxu0 %v4546_v39 }
 0x178   : > { %v992_v13 = vsel %vm986_vm6, %v975_v12, %v977_v57  ;;  %v4563_v12 = vld [vmem:[%s6503_s2 + $0x180] ss:$60 sps:$4 sm:$0xff]  }
 0x179   : > { %1131 = vrot.lane.b32.xlu1 %v5494_v14, %s4739_s26  ;;  %1129 = vrot.lane.b32.xlu0 %v5499_v17, %s4739_s26 }
 0x17a   : > { %4098 = vmatpush3.bf16.msra.mxu1 %v992_v13 }
 0x17b   : > { %v1030_v18 = vpop.permute.xlu1 %1029  ;;  %v1028_v42 = vpop.permute.xlu0 %1027 }
 0x17c   : > { %v1042_v20 = vsel %vm1035_vm5, %v1028_v42, %v1030_v18  ;;  %v4567_v18 = vld [vmem:[%s6503_s2 + $0x1fc] ss:$60 sps:$4 sm:$0xff]  }
 0x17d   : > { %1221 = vrot.lane.b32.xlu1 %v5426_v54, %s4741_s19  ;;  %1219 = vrot.lane.b32.xlu0 %v5435_v32, %s4741_s19 }
 0x17e   : > { %4099 = vmatprep.subr.bf16.mxu1 %v1042_v20  ;;  %2366 = vmatmul.mubr.bf16.gmra.mrb[36].mxu0 %v4548_v19  ;;  %v4578_v19 = vld [vmem:[%s6503_s2 + $0x2e0] ss:$60 sps:$4 sm:$0xff]  }
 0x17f   : > { %v981_v21 = vpop.permute.xlu1 %980  ;;  %v979_v22 = vpop.permute.xlu0 %978  ;;  %2373 = vmatprep.mubr.bf16.mxu0 %v4552_v43  ;;  %v4582_v43 = vld [vmem:[%s6503_s2 + $0x35c] ss:$60 sps:$4 sm:$0xff]  }
 0x180   : > { %v993_v25 = vsel %vm986_vm6, %v979_v22, %v981_v21 }
 0x181   : > { %1082 = vrot.lane.b32.xlu1 %v5494_v14, %s4740_s22  ;;  %1080 = vrot.lane.b32.xlu0 %v5499_v17, %s4740_s22 }
 0x182   : > { %4100 = vmatpush3.bf16.msra.mxu1 %v993_v25 }
 0x183   : > { %v1034_v26 = vpop.permute.xlu1 %1033  ;;  %v1032_v45 = vpop.permute.xlu0 %1031 }
 0x184   : > { %v1043_v30 = vsel %vm1035_vm5, %v1032_v45, %v1034_v26  ;;  %v4569_v26 = vld [vmem:[%s6503_s2 + $0x1f8] ss:$60 sps:$4 sm:$0xff]  }
 0x185   : > { %1172 = vrot.lane.b32.xlu1 %v5426_v54, %s4742_s25  ;;  %1170 = vrot.lane.b32.xlu0 %v5435_v32, %s4742_s25  ;;  %v4573_v45 = vld [vmem:[%s6503_s2 + $0x274] ss:$60 sps:$4 sm:$0xff]  }
 0x186   : > { %4101 = vmatprep.subr.bf16.mxu1 %v1043_v30  ;;  %2374 = vmatmul.mubr.bf16.gmra.mrb[40].mxu0 %v4554_v44 }
 0x187   : > { %v985_v31 = vpop.permute.xlu1 %984  ;;  %v983_v46 = vpop.permute.xlu0 %982  ;;  %2381 = vmatprep.mubr.bf16.mxu0 %v4558_v29  ;;  %v4584_v29 = vld [vmem:[%s6503_s2 + $0x358] ss:$60 sps:$4 sm:$0xff]  }
 0x188   : > { %v994_v48 = vsel %vm986_vm6, %v983_v46, %v985_v31  ;;  %v4590_v31 = vld [vmem:[%s6503_s2 + $0x24] ss:$60 sps:$4 sm:$0xff]  }
 0x189   : > { %1225 = vrot.lane.b32.xlu1 %v5458_v36, %s4741_s19  ;;  %1223 = vrot.lane.b32.xlu0 %v5464_v37, %s4741_s19 }
 0x18a   : > { %4102 = vmatpush3.bf16.msra.mxu1 %v994_v48 }
 0x18b   : > { %v1104_v49 = vpop.permute.xlu1 %1103  ;;  %v1102_v34 = vpop.permute.xlu0 %1101 }
 0x18c   : > { %v1134_v60 = vsel %vm1133_vm7, %v1102_v34, %v1104_v49 }
 0x18d   : > { %1176 = vrot.lane.b32.xlu1 %v5458_v36, %s4742_s25  ;;  %2455 = vmatmul.mubr.bf16.vlgmr.msra.gmra.mrb[32].mxu1 %v4543_v47 }
 0x18e   : > { %1174 = vrot.lane.b32.xlu0 %v5464_v37, %s4742_s25  ;;  %4151 = vmatprep.subr.bf16.mxu0 %v1134_v60 }
 0x18f   : > { %v1055_v61 = vpop.permute.xlu1 %1054  ;;  %2462 = vmatprep.mubr.bf16.mxu1 %v4549_v52  ;;  %2382 = vmatmul.mubr.bf16.gmra.mrb[44].mxu0 %v4560_v58  ;;  %v1053_v62 = vpop.permute.xlu0 %1052  ;;  %v4575_v52 = vld [vmem:[%s6503_s2 + $0x270] ss:$60 sps:$4 sm:$0xff]  }
 0x190   : > { %2389 = vmatprep.mubr.bf16.mxu0 %v4564_v59  ;;  %v1085_v50 = vsel %vm1084_vm8, %v1053_v62, %v1055_v61  ;;  %v4579_v58 = vld [vmem:[%s6503_s2 + $0x2ec] ss:$60 sps:$4 sm:$0xff]  }
 0x191   : > { %1229 = vrot.lane.b32.xlu1 %v5494_v14, %s4741_s19  ;;  %4152 = vmatpush3.bf16.msra.mxu0 %v1085_v50  ;;  %v4581_v50 = vld [vmem:[%s6503_s2 + $0x2e8] ss:$60 sps:$4 sm:$0xff]  }
 0x192   : > { %1227 = vrot.lane.b32.xlu0 %v5499_v17, %s4741_s19  ;;  %s4743_s19 = smov 115  }
 0x193   : > { %v1108_v63 = vpop.permute.xlu1 %1107  ;;  %v1106_v33 = vpop.permute.xlu0 %1105 }
 0x194   : > { %v1135_v3 = vsel %vm1133_vm7, %v1106_v33, %v1108_v63  ;;  %v4585_v63 = vld [vmem:[%s6503_s2 + $0x364] ss:$60 sps:$4 sm:$0xff]  }
 0x195   : > { %1180 = vrot.lane.b32.xlu1 %v5494_v14, %s4742_s25  ;;  %2463 = vmatmul.mubr.bf16.gmra.mrb[36].mxu1 %v4551_v51 }
 0x196   : > { %1178 = vrot.lane.b32.xlu0 %v5499_v17, %s4742_s25  ;;  %4153 = vmatprep.subr.bf16.mxu0 %v1135_v3 }
 0x197   : > { %v1059_v4 = vpop.permute.xlu1 %1058  ;;  %2470 = vmatprep.mubr.bf16.mxu1 %v4555_v0  ;;  %2390 = vmatmul.mubr.bf16.gmra.mrb[48].mxu0 %v4566_v1  ;;  %v1057_v53 = vpop.permute.xlu0 %1056 }
 0x198   : > { %2397 = vmatprep.mubr.bf16.mxu0 %v4570_v2  ;;  %v1086_v55 = vsel %vm1084_vm8, %v1057_v53, %v1059_v4  ;;  %v4587_v2 = vld [vmem:[%s6503_s2 + $0x360] ss:$60 sps:$4 sm:$0xff]   ;;  %v4599_v4 = vld [vmem:[%s6503_s2 + $0x2c] ss:$60 sps:$4 sm:$0xff]  }
 0x199   : > { %1299 = vrot.lane.b32.xlu1 %v4691_v6, %s4743_s19  ;;  %4154 = vmatpush3.bf16.msra.mxu0 %v1086_v55  ;;  %v4746_v55 = vmov 0  }
 0x19a   : > { %1297 = vrot.lane.b32.xlu0 %v5339_v5, %s4743_s19  ;;  %4475 = vset.pattern.permute.xlu1 %v4746_v55 }
 0x19b   : > { %v1112_v35 = vpop.permute.xlu1 %1111  ;;  %v1110_v8 = vpop.permute.xlu0 %1109  ;;  %4474 = vset.pattern.permute.xlu0 %v4746_v55 }
 0x19c   : > { %v1136_v38 = vsel %vm1133_vm7, %v1110_v8, %v1112_v35 }
 0x19d   : > { %1250 = vrot.lane.b32.xlu1 %v4691_v6, %s4744_s16  ;;  %2471 = vmatmul.mubr.bf16.gmra.mrb[40].mxu1 %v4557_v40 }
 0x19e   : > { %1248 = vrot.lane.b32.xlu0 %v5339_v5, %s4744_s16  ;;  %4155 = vmatprep.subr.bf16.mxu0 %v1136_v38 }
 0x19f   : > { %v1202_v39 = vpop.permute.xlu1 %1201  ;;  %2478 = vmatprep.mubr.bf16.mxu1 %v4561_v41  ;;  %2398 = vmatmul.mubr.bf16.gmra.mrb[52].mxu0 %v4572_v7  ;;  %v1200_v56 = vpop.permute.xlu0 %1199 }
 0x1a0   : > { %2405 = vmatprep.mubr.bf16.mxu0 %v4576_v9  ;;  %v1232_v57 = vsel %vm1231_vm9, %v1200_v56, %v1202_v39 }
 0x1a1   : > { %1303 = vrot.lane.b32.xlu1 %v5358_v10, %s4743_s19  ;;  %4215 = vmatprep.subr.bf16.mxu1 %v1232_v57 }
 0x1a2   : > { %1301 = vrot.lane.b32.xlu0 %v5364_v11, %s4743_s19 }
 0x1a3   : > { %v1063_v13 = vpop.permute.xlu1 %1062  ;;  %v1061_v42 = vpop.permute.xlu0 %1060 }
 0x1a4   : > { %v1087_v20 = vsel %vm1084_vm8, %v1061_v42, %v1063_v13 }
 0x1a5   : > { %1254 = vrot.lane.b32.xlu1 %v5358_v10, %s4744_s16  ;;  %2479 = vmatmul.mubr.bf16.gmra.mrb[44].mxu1 %v4563_v12 }
 0x1a6   : > { %1252 = vrot.lane.b32.xlu0 %v5364_v11, %s4744_s16  ;;  %4156 = vmatpush3.bf16.msra.mxu0 %v1087_v20 }
 0x1a7   : > { %v1153_v21 = vpop.permute.xlu1 %1152  ;;  %2486 = vmatprep.mubr.bf16.mxu1 %v4567_v18  ;;  %2406 = vmatmul.mubr.bf16.gmra.mrb[56].mxu0 %v4578_v19  ;;  %v1151_v22 = vpop.permute.xlu0 %1150 }
 0x1a8   : > { %2413 = vmatprep.mubr.bf16.mxu0 %v4582_v43  ;;  %v1183_v25 = vsel %vm1182_vm10, %v1151_v22, %v1153_v21 }
 0x1a9   : > { %1307 = vrot.lane.b32.xlu1 %v5402_v27, %s4743_s19  ;;  %4216 = vmatpush3.bf16.msra.mxu1 %v1183_v25 }
 0x1aa   : > { %1305 = vrot.lane.b32.xlu0 %v5411_v28, %s4743_s19 }
 0x1ab   : > { %v1116_v44 = vpop.permute.xlu1 %1115  ;;  %v1114_v30 = vpop.permute.xlu0 %1113 }
 0x1ac   : > { %v1137_v46 = vsel %vm1133_vm7, %v1114_v30, %v1116_v44 }
 0x1ad   : > { %1348 = vrot.lane.b32.xlu1 %v4691_v6, %s4745_s12  ;;  %2487 = vmatmul.mubr.bf16.gmra.mrb[48].mxu1 %v4569_v26 }
 0x1ae   : > { %1346 = vrot.lane.b32.xlu0 %v5339_v5, %s4745_s12  ;;  %4157 = vmatprep.subr.bf16.mxu0 %v1137_v46 }
 0x1af   : > { %v1206_v48 = vpop.permute.xlu1 %1205  ;;  %2494 = vmatprep.mubr.bf16.mxu1 %v4573_v45  ;;  %2414 = vmatmul.mubr.bf16.gmra.mrb[60].mxu0 %v4584_v29  ;;  %v1204_v47 = vpop.permute.xlu0 %1203 }
 0x1b0   : > { %2551 = vmatprep.mubr.bf16.mxu0 %v4590_v31  ;;  %v1233_v49 = vsel %vm1231_vm9, %v1204_v47, %v1206_v48 }
 0x1b1   : > { %1258 = vrot.lane.b32.xlu1 %v5402_v27, %s4744_s16  ;;  %4217 = vmatprep.subr.bf16.mxu1 %v1233_v49 }
 0x1b2   : > { %1256 = vrot.lane.b32.xlu0 %v5411_v28, %s4744_s16 }
 0x1b3   : > { %v1067_v5 = vpop.permute.xlu1 %1066  ;;  %v1065_v34 = vpop.permute.xlu0 %1064 }
 0x1b4   : > { %v1088_v59 = vsel %vm1084_vm8, %v1065_v34, %v1067_v5 }
 0x1b5   : > { %1311 = vrot.lane.b32.xlu1 %v5370_v15, %s4743_s19  ;;  %2495 = vmatmul.mubr.bf16.gmra.mrb[52].mxu1 %v4575_v52 }
 0x1b6   : > { %1309 = vrot.lane.b32.xlu0 %v5375_v16, %s4743_s19  ;;  %4158 = vmatpush3.bf16.msra.mxu0 %v1088_v59 }
 0x1b7   : > { %v1157_v60 = vpop.permute.xlu1 %1156  ;;  %2502 = vmatprep.mubr.bf16.mxu1 %v4579_v58  ;;  %v1155_v61 = vpop.permute.xlu0 %1154 }
 0x1b8   : > { %v1184_v62 = vsel %vm1182_vm10, %v1155_v61, %v1157_v60 }
 0x1b9   : > { %1352 = vrot.lane.b32.xlu1 %v5358_v10, %s4745_s12  ;;  %4218 = vmatpush3.bf16.msra.mxu1 %v1184_v62 }
 0x1ba   : > { %1350 = vrot.lane.b32.xlu0 %v5364_v11, %s4745_s12 }
 0x1bb   : > { %v1120_v51 = vpop.permute.xlu1 %1119  ;;  %v1118_v0 = vpop.permute.xlu0 %1117 }
 0x1bc   : > { %v1138_v1 = vsel %vm1133_vm7, %v1118_v0, %v1120_v51 }
 0x1bd   : > { %1262 = vrot.lane.b32.xlu1 %v5370_v15, %s4744_s16  ;;  %2503 = vmatmul.mubr.bf16.gmra.mrb[56].mxu1 %v4581_v50 }
 0x1be   : > { %1260 = vrot.lane.b32.xlu0 %v5375_v16, %s4744_s16  ;;  %4159 = vmatprep.subr.bf16.mxu0 %v1138_v1 }
 0x1bf   : > { %v1210_v10 = vpop.permute.xlu1 %1209  ;;  %2510 = vmatprep.mubr.bf16.mxu1 %v4585_v63  ;;  %v1208_v11 = vpop.permute.xlu0 %1207 }
 0x1c0   : > { %v1234_v33 = vsel %vm1231_vm9, %v1208_v11, %v1210_v10 }
 0x1c1   : > { %1315 = vrot.lane.b32.xlu1 %v5392_v23, %s4743_s19  ;;  %4219 = vmatprep.subr.bf16.mxu1 %v1234_v33 }
 0x1c2   : > { %1313 = vrot.lane.b32.xlu0 %v5397_v24, %s4743_s19 }
 0x1c3   : > { %v1071_v3 = vpop.permute.xlu1 %1070  ;;  %v1069_v53 = vpop.permute.xlu0 %1068 }
 0x1c4   : > { %v1089_v6 = vsel %vm1084_vm8, %v1069_v53, %v1071_v3 }
 0x1c5   : > { %1356 = vrot.lane.b32.xlu1 %v5402_v27, %s4745_s12  ;;  %2511 = vmatmul.mubr.bf16.gmra.mrb[60].mxu1 %v4587_v2 }
 0x1c6   : > { %1354 = vrot.lane.b32.xlu0 %v5411_v28, %s4745_s12  ;;  %4160 = vmatpush3.bf16.msra.mxu0 %v1089_v6 }
 0x1c7   : > { %v1161_v40 = vpop.permute.xlu1 %1160  ;;  %2648 = vmatprep.mubr.bf16.mxu1 %v4599_v4  ;;  %v1159_v35 = vpop.permute.xlu0 %1158 }
 0x1c8   : > { %v1185_v41 = vsel %vm1182_vm10, %v1159_v35, %v1161_v40 }
 0x1c9   : > { %1266 = vrot.lane.b32.xlu1 %v5392_v23, %s4744_s16  ;;  %4220 = vmatpush3.bf16.msra.mxu1 %v1185_v41 }
 0x1ca   : > { %1264 = vrot.lane.b32.xlu0 %v5397_v24, %s4744_s16 }
 0x1cb   : > { %v1124_v7 = vpop.permute.xlu1 %1123  ;;  %v1122_v8 = vpop.permute.xlu0 %1121 }
 0x1cc   : > { %v1139_v27 = vsel %vm1133_vm7, %v1122_v8, %v1124_v7 }
 0x1cd   : > { %1319 = vrot.lane.b32.xlu1 %v5426_v54, %s4743_s19  ;;  %4161 = vmatprep.subr.bf16.mxu0 %v1139_v27 }
 0x1ce   : > { %1317 = vrot.lane.b32.xlu0 %v5435_v32, %s4743_s19 }
 0x1cf   : > { %v1214_v28 = vpop.permute.xlu1 %1213  ;;  %v1212_v9 = vpop.permute.xlu0 %1211 }
 0x1d0   : > { %v1235_v38 = vsel %vm1231_vm9, %v1212_v9, %v1214_v28 }
 0x1d1   : > { %1360 = vrot.lane.b32.xlu1 %v5370_v15, %s4745_s12  ;;  %4221 = vmatprep.subr.bf16.mxu1 %v1235_v38  ;;  %v3911_v15 = vpop.f32.mrb[0].mxu0 }
 0x1d2   : > { %1358 = vrot.lane.b32.xlu0 %v5375_v16, %s4745_s12  ;;  %v3912_v16 = vpop.f32.mrb[1].mxu0 }
 0x1d3   : > { %v1075_v39 = vpop.permute.xlu1 %1074  ;;  %v1073_v56 = vpop.permute.xlu0 %1072  ;;  %v3913_v46 = vadd.f32 %v3912_v16, %v3911_v15 }
 0x1d4   : > { %v1090_v57 = vsel %vm1084_vm8, %v1073_v56, %v1075_v39  ;;  %v3914_v19 = vpop.f32.mrb[2].mxu0 }
 0x1d5   : > { %1270 = vrot.lane.b32.xlu1 %v5426_v54, %s4744_s16  ;;  %4162 = vmatpush3.bf16.msra.mxu0 %v1090_v57  ;;  %v3915_v43 = vpop.f32.mrb[3].mxu0 }
 0x1d6   : > { %1268 = vrot.lane.b32.xlu0 %v5435_v32, %s4744_s16  ;;  %v3917_v21 = vpop.f32.mrb[4].mxu0  ;;  %v3916_v52 = vadd.f32 %v3915_v43, %v3914_v19 }
 0x1d7   : > { %v1165_v12 = vpop.permute.xlu1 %1164  ;;  %v1163_v13 = vpop.permute.xlu0 %1162 }
 0x1d8   : > { %v1186_v18 = vsel %vm1182_vm10, %v1163_v13, %v1165_v12  ;;  %v3918_v25 = vpop.f32.mrb[5].mxu0 }
 0x1d9   : > { %1323 = vrot.lane.b32.xlu1 %v5458_v36, %s4743_s19  ;;  %4222 = vmatpush3.bf16.msra.mxu1 %v1186_v18  ;;  %v3920_v26 = vpop.f32.mrb[6].mxu0  ;;  %v3919_v62 = vadd.f32 %v3918_v25, %v3917_v21 }
 0x1da   : > { %1321 = vrot.lane.b32.xlu0 %v5464_v37, %s4743_s19  ;;  %v3921_v45 = vpop.f32.mrb[7].mxu0 }
 0x1db   : > { %v1128_v42 = vpop.permute.xlu1 %1127  ;;  %v1126_v20 = vpop.permute.xlu0 %1125  ;;  %v3922_v10 = vadd.f32 %v3921_v45, %v3920_v26 }
 0x1dc   : > { %v1140_v22 = vsel %vm1133_vm7, %v1126_v20, %v1128_v42  ;;  %v3923_v30 = vpop.f32.mrb[8].mxu0 }
 0x1dd   : > { %1364 = vrot.lane.b32.xlu1 %v5392_v23, %s4745_s12  ;;  %4163 = vmatprep.subr.bf16.mxu0 %v1140_v22  ;;  %v3924_v23 = vpop.f32.mrb[9].mxu0 }
 0x1de   : > { %1362 = vrot.lane.b32.xlu0 %v5397_v24, %s4745_s12  ;;  %v3926_v24 = vpop.f32.mrb[10].mxu0  ;;  %v3925_v2 = vadd.f32 %v3924_v23, %v3923_v30 }
 0x1df   : > { %v1218_v44 = vpop.permute.xlu1 %1217  ;;  %v1216_v29 = vpop.permute.xlu0 %1215 }
 0x1e0   : > { %v1236_v31 = vsel %vm1231_vm9, %v1216_v29, %v1218_v44  ;;  %v3927_v51 = vpop.f32.mrb[11].mxu0 }
 0x1e1   : > { %1274 = vrot.lane.b32.xlu1 %v5458_v36, %s4744_s16  ;;  %v3975_v48 = vpop.f32.mrb[0].mxu1  ;;  %4223 = vmatprep.subr.bf16.mxu1 %v1236_v31  ;;  %v3929_v63 = vpop.f32.mrb[12].mxu0  ;;  %v3928_v8 = vadd.f32 %v3927_v51, %v3926_v24 }
 0x1e2   : > { %1272 = vrot.lane.b32.xlu0 %v5464_v37, %s4744_s16  ;;  %v3976_v47 = vpop.f32.mrb[1].mxu1  ;;  %v3930_v11 = vpop.f32.mrb[13].mxu0 }
 0x1e3   : > { %v1079_v49 = vpop.permute.xlu1 %1078  ;;  %v3977_v5 = vadd.f32 %v3976_v47, %v3975_v48  ;;  %v3978_v58 = vpop.f32.mrb[2].mxu1  ;;  %v5740_v39 = vadd.f32 %v3930_v11, %v3929_v63  ;;  %v4591_v47 = vld [vmem:[%s6503_s2 + $0x9c] ss:$60 sps:$4 sm:$0xff]   ;;  %v2909_v63 = vld [vmem:[%s6504_s3 + $0x10] sm:$0xff] }
 0x1e4   : > { %v1077_v34 = vpop.permute.xlu0 %1076  ;;  %v3979_v59 = vpop.f32.mrb[3].mxu1 }
 0x1e5   : > { %v1091_v60 = vsel %vm1084_vm8, %v1077_v34, %v1079_v49  ;;  %1327 = vrot.lane.b32.xlu1 %v5494_v14, %s4743_s19  ;;  %v5724_v61 = vadd.f32 %v3977_v5, %v3913_v46  ;;  %v3980_v50 = vadd.f32 %v3979_v59, %v3978_v58  ;;  %v3932_v3 = vpop.f32.mrb[14].mxu0 }
 0x1e6   : > { %1325 = vrot.lane.b32.xlu0 %v5499_v17, %s4743_s19  ;;  %4164 = vmatpush3.bf16.msra.mxu0 %v1091_v60  ;;  %v3933_v55 = vpop.f32.mrb[15].mxu0  ;;  %s3831_s19 = sshll.u32 %s6536_s29, 6 }
 0x1e7   : > { %v1169_v0 = vpop.permute.xlu1 %1168  ;;  %v5728_v1 = vadd.f32 %v3980_v50, %v3916_v52  ;;  %v3935_v40 = vpop.f32.mrb[16].mxu0  ;;  %v5744_v56 = vadd.f32 %v3933_v55, %v3932_v3  ;;  %s6439_s20 = scalar_lea.vmem %s6509_s8, %s3831_s19 }
 0x1e8   : > { %v1167_v33 = vpop.permute.xlu0 %1166 }
 0x1e9   : > { %v1187_v4 = vsel %vm1182_vm10, %v1167_v33, %v1169_v0  ;;  %1368 = vrot.lane.b32.xlu1 %v5426_v54, %s4745_s12  ;;  %v3981_v53 = vpop.f32.mrb[4].mxu1 }
 0x1ea   : > { %1366 = vrot.lane.b32.xlu0 %v5435_v32, %s4745_s12  ;;  %4224 = vmatpush3.bf16.msra.mxu1 %v1187_v4  ;;  %v3982_v6 = vpop.f32.mrb[5].mxu1  ;;  %v3936_v32 = vpop.f32.mrb[17].mxu0 }
 0x1eb   : > { %v1132_v35 = vpop.permute.xlu1 %1131  ;;  %v3983_v41 = vadd.f32 %v3982_v6, %v3981_v53  ;;  %v3984_v7 = vpop.f32.mrb[6].mxu1  ;;  %v5746_v57 = vadd.f32 %v3936_v32, %v3935_v40  ;;  %v2910_v53 = vld [vmem:[%s6504_s3 + $0x18] sm:$0xff] }
 0x1ec   : > { %v1130_v27 = vpop.permute.xlu0 %1129  ;;  %v3985_v28 = vpop.f32.mrb[7].mxu1  ;;  %v4593_v40 = vld [vmem:[%s6503_s2 + $0x98] ss:$60 sps:$4 sm:$0xff]  }
 0x1ed   : > { %1278 = vrot.lane.b32.xlu1 %v5494_v14, %s4744_s16  ;;  %v1141_v9 = vsel %vm1133_vm7, %v1130_v27, %v1132_v35  ;;  %v5738_v54 = vadd.f32 %v3983_v41, %v3919_v62  ;;  %v3986_v38 = vadd.f32 %v3985_v28, %v3984_v7  ;;  %v3938_v12 = vpop.f32.mrb[18].mxu0  ;;  %v2911_v27 = vld [vmem:[%s6504_s3 + $0x20] sm:$0xff] }
 0x1ee   : > { %1276 = vrot.lane.b32.xlu0 %v5499_v17, %s4744_s16  ;;  %4165 = vmatprep.subr.bf16.mxu0 %v1141_v9  ;;  %v3939_v18 = vpop.f32.mrb[19].mxu0 }
 0x1ef   : > { %v1222_v13 = vpop.permute.xlu1 %1221  ;;  %v5748_v15 = vadd.f32 %v3986_v38, %v3922_v10  ;;  %v5750_v19 = vadd.f32 %v3939_v18, %v3938_v12  ;;  %v3941_v42 = vpop.f32.mrb[20].mxu0 }
 0x1f0   : > { %v1220_v16 = vpop.permute.xlu0 %1219  ;;  %v3942_v21 = vpop.f32.mrb[21].mxu0 }
 0x1f1   : > { %1372 = vrot.lane.b32.xlu1 %v5458_v36, %s4745_s12  ;;  %v1237_v43 = vsel %vm1231_vm9, %v1220_v16, %v1222_v13  ;;  %v3987_v20 = vpop.f32.mrb[8].mxu1  ;;  %v3944_v25 = vpop.f32.mrb[22].mxu0  ;;  %v4588_v36 = vld [vmem:[%s6503_s2 + $0x20] ss:$60 sps:$4 sm:$0xff]   ;;  %v5765_v48 = vadd.f32 %v3942_v21, %v3941_v42  ;;  %v2912_v13 = vld [vmem:[%s6504_s3 + $0x28] sm:$0xff]  ;;  %v2913_v42 = vld [vmem:[%s6504_s3 + $0x30] sm:$0xff] }
 0x1f2   : > { %1370 = vrot.lane.b32.xlu0 %v5464_v37, %s4745_s12  ;;  %4225 = vmatprep.subr.bf16.mxu1 %v1237_v43  ;;  %v3988_v22 = vpop.f32.mrb[9].mxu1  ;;  %v3945_v23 = vpop.f32.mrb[23].mxu0 }
 0x1f3   : > { %v1083_v26 = vpop.permute.xlu1 %1082  ;;  %v3989_v44 = vadd.f32 %v3988_v22, %v3987_v20  ;;  %v3990_v45 = vpop.f32.mrb[10].mxu1  ;;  %v5775_v24 = vadd.f32 %v3945_v23, %v3944_v25  ;;  %v2914_v22 = vld [vmem:[%s6504_s3 + $0x38] sm:$0xff] }
 0x1f4   : > { %v1081_v29 = vpop.permute.xlu0 %1080  ;;  %v3991_v30 = vpop.f32.mrb[11].mxu1 }
 0x1f5   : > { %v1092_v31 = vsel %vm1084_vm8, %v1081_v29, %v1083_v26  ;;  %1376 = vrot.lane.b32.xlu1 %v5494_v14, %s4745_s12  ;;  %v5763_v46 = vadd.f32 %v3989_v44, %v3925_v2  ;;  %v3992_v37 = vadd.f32 %v3991_v30, %v3990_v45  ;;  %v2908_v14 = vld [vmem:[%s6504_s3 + $0x8] sm:$0xff]  ;;  %v3947_v49 = vpop.f32.mrb[24].mxu0 }
 0x1f6   : > { %1374 = vrot.lane.b32.xlu0 %v5499_v17, %s4745_s12  ;;  %4166 = vmatpush3.bf16.msra.mxu0 %v1092_v31  ;;  %v3948_v58 = vpop.f32.mrb[25].mxu0  ;;  %v2907_v17 = vld [vmem:[%s6504_s3] sm:$0xff]  ;;  %v4596_v45 = vld [vmem:[%s6503_s2 + $0x110] ss:$60 sps:$4 sm:$0xff]  }
 0x1f7   : > { %v1173_v52 = vpop.permute.xlu1 %1172  ;;  %v5777_v5 = vadd.f32 %v3992_v37, %v3928_v8  ;;  %v5782_v59 = vadd.f32 %v3948_v58, %v3947_v49  ;;  %v3950_v60 = vpop.f32.mrb[26].mxu0  ;;  %v4594_v8 = vld [vmem:[%s6503_s2 + $0x114] ss:$60 sps:$4 sm:$0xff]   ;;  %v4600_v30 = vld [vmem:[%s6503_s2 + $0x18c] ss:$60 sps:$4 sm:$0xff]   ;;  %v2915_v31 = vld [vmem:[%s6504_s3 + $0x40] sm:$0xff] }
 0x1f8   : > { %v1171_v34 = vpop.permute.xlu0 %1170  ;;  %v3951_v51 = vpop.f32.mrb[27].mxu0  ;;  %v4597_v58 = vld [vmem:[%s6503_s2 + $0x28] ss:$60 sps:$4 sm:$0xff]  }
 0x1f9   : > { %v1188_v62 = vsel %vm1182_vm10, %v1171_v34, %v1173_v52  ;;  %2552 = vmatmul.mubr.bf16.vlgmr.msra.gmra.mrb[64].mxu0 %v4588_v36  ;;  %2930 = vperm.xlu1 %4475, %v2908_v14   ;;  %v3993_v50 = vpop.f32.mrb[12].mxu1  ;;  %v5788_v10 = vadd.f32 %v3951_v51, %v3950_v60  ;;  %v3953_v11 = vpop.f32.mrb[28].mxu0  ;;  %v2916_v14 = vld [vmem:[%s6504_s3 + $0x48] sm:$0xff] }
 0x1fa   : > { %4226 = vmatpush3.bf16.msra.mxu1 %v1188_v62  ;;  %2559 = vmatprep.mubr.bf16.mxu0 %v4591_v47  ;;  %v3994_v0 = vpop.f32.mrb[13].mxu1  ;;  %v3954_v7 = vpop.f32.mrb[29].mxu0 }
 0x1fb   : > { %v1226_v33 = vpop.permute.xlu1 %1225  ;;  %2925 = vperm.xlu0 %4474, %v2907_v17   ;;  %v3995_v2 = vadd.f32 %v3994_v0, %v3993_v50  ;;  %v3996_v3 = vpop.f32.mrb[14].mxu1  ;;  %v5806_v28 = vadd.f32 %v3954_v7, %v3953_v11  ;;  %v2918_v50 = vld [vmem:[%s6504_s3 + $0x58] sm:$0xff]  ;;  %v4602_v11 = vld [vmem:[%s6503_s2 + $0x188] ss:$60 sps:$4 sm:$0xff]  }
 0x1fc   : > { %v1224_v4 = vpop.permute.xlu0 %1223  ;;  %v3997_v55 = vpop.f32.mrb[15].mxu1 }
 0x1fd   : > { %v1238_v6 = vsel %vm1231_vm9, %v1224_v4, %v1226_v33  ;;  %2935 = vperm.xlu1 %4475, %v2909_v63   ;;  %v5798_v35 = vadd.f32 %v3995_v2, %v5740_v39  ;;  %v3998_v41 = vadd.f32 %v3997_v55, %v3996_v3  ;;  %v3956_v9 = vpop.f32.mrb[30].mxu0  ;;  %v4606_v2 = vld [vmem:[%s6503_s2 + $0x204] ss:$60 sps:$4 sm:$0xff]  }
 0x1fe   : > { %4227 = vmatprep.subr.bf16.mxu1 %v1238_v6  ;;  %v3957_v39 = vpop.f32.mrb[31].mxu0  ;;  %v2919_v3 = vld [vmem:[%s6504_s3 + $0x60] sm:$0xff] }
 0x1ff   : > { %v1177_v38 = vpop.permute.xlu1 %1176  ;;  %2940 = vperm.xlu0 %4474, %v2910_v53   ;;  %v5809_v32 = vadd.f32 %v3998_v41, %v5744_v56  ;;  %v5814_v18 = vadd.f32 %v3957_v39, %v3956_v9 }
 0x200   : > { %v1175_v12 = vpop.permute.xlu0 %1174 }
 0x201   : > { %v1189_v16 = vsel %vm1182_vm10, %v1175_v12, %v1177_v38  ;;  %2560 = vmatmul.mubr.bf16.gmra.mrb[68].mxu0 %v4593_v40  ;;  %2945 = vperm.xlu1 %4475, %v2911_v27   ;;  %v3999_v56 = vpop.f32.mrb[16].mxu1  ;;  %v2920_v40 = vld [vmem:[%s6504_s3 + $0x68] sm:$0xff]  ;;  %v2921_v27 = vld [vmem:[%s6504_s3 + $0x70] sm:$0xff]  ;;  %v2922_v12 = vld [vmem:[%s6504_s3 + $0x78] sm:$0xff] }
 0x202   : > { %4228 = vmatpush3.bf16.msra.mxu1 %v1189_v16  ;;  %2567 = vmatprep.mubr.bf16.mxu0 %v4594_v8  ;;  %v4000_v20 = vpop.f32.mrb[17].mxu1  ;;  %v4605_v8 = vld [vmem:[%s6503_s2 + $0xa0] ss:$60 sps:$4 sm:$0xff]  }
 0x203   : > { %v1230_v43 = vpop.permute.xlu1 %1229  ;;  %2950 = vperm.xlu0 %4474, %v2912_v13   ;;  %v4001_v25 = vadd.f32 %v4000_v20, %v3999_v56  ;;  %v4002_v26 = vpop.f32.mrb[18].mxu1  ;;  %v4608_v56 = vld [vmem:[%s6503_s2 + $0x200] ss:$60 sps:$4 sm:$0xff]  }
 0x204   : > { %v1228_v21 = vpop.permute.xlu0 %1227  ;;  %v4003_v29 = vpop.f32.mrb[19].mxu1  ;;  %v4612_v20 = vld [vmem:[%s6503_s2 + $0x27c] ss:$60 sps:$4 sm:$0xff]  }
 0x205   : > { %v1239_v44 = vsel %vm1231_vm9, %v1228_v21, %v1230_v43  ;;  %2955 = vperm.xlu1 %4475, %v2913_v42   ;;  %v5834_v36 = vadd.f32 %v4001_v25, %v5746_v57  ;;  %v4004_v37 = vadd.f32 %v4003_v29, %v4002_v26  ;;  %v4603_v57 = vld [vmem:[%s6503_s2 + $0xa4] ss:$60 sps:$4 sm:$0xff]  }
 0x206   : > { %4229 = vmatprep.subr.bf16.mxu1 %v1239_v44  ;;  %v3019_v21 = vld [vmem:[%s6505_s4] sm:$0xff] }
 0x207   : > { %v1181_v23 = vpop.permute.xlu1 %1180  ;;  %2960 = vperm.xlu0 %4474, %v2914_v22   ;;  %v5840_v49 = vadd.f32 %v4004_v37, %v5750_v19  ;;  %v2917_v19 = vld [vmem:[%s6504_s3 + $0x50] sm:$0xff] }
 0x208   : > { %v1179_v47 = vpop.permute.xlu0 %1178  ;;  %v3021_v37 = vld [vmem:[%s6505_s4 + $0x10] sm:$0xff] }
 0x209   : > { %v1190_v52 = vsel %vm1182_vm10, %v1179_v47, %v1181_v23  ;;  %2568 = vmatmul.mubr.bf16.gmra.mrb[72].mxu0 %v4596_v45  ;;  %2965 = vperm.xlu1 %4475, %v2915_v31   ;;  %v4005_v34 = vpop.f32.mrb[20].mxu1  ;;  %v3020_v45 = vld [vmem:[%s6505_s4 + $0x8] sm:$0xff]  ;;  %v4611_v31 = vld [vmem:[%s6503_s2 + $0x118] ss:$60 sps:$4 sm:$0xff]  }
 0x20a   : > { %4230 = vmatpush3.bf16.msra.mxu1 %v1190_v52  ;;  %2575 = vmatprep.mubr.bf16.mxu0 %v4600_v30  ;;  %v4006_v60 = vpop.f32.mrb[21].mxu1  ;;  %v3022_v52 = vld [vmem:[%s6505_s4 + $0x18] sm:$0xff] }
 0x20b   : > { %v1300_v17 = vpop.permute.xlu1 %1299  ;;  %2970 = vperm.xlu0 %4474, %v2916_v14   ;;  %v4007_v51 = vadd.f32 %v4006_v60, %v4005_v34  ;;  %v4008_v63 = vpop.f32.mrb[22].mxu1  ;;  %v4614_v34 = vld [vmem:[%s6503_s2 + $0x278] ss:$60 sps:$4 sm:$0xff]  }
 0x20c   : > { %v1298_v62 = vpop.permute.xlu0 %1297  ;;  %v4009_v33 = vpop.f32.mrb[23].mxu1  ;;  %v4618_v60 = vld [vmem:[%s6503_s2 + $0x2f4] ss:$60 sps:$4 sm:$0xff]  }
 0x20d   : > { %2649 = vmatmul.mubr.bf16.vlgmr.msra.gmra.mrb[64].mxu1 %v4597_v58  ;;  %v1330_v0 = vsel %vm1329_vm11, %v1298_v62, %v1300_v17  ;;  %2975 = vperm.xlu1 %4475, %v2917_v19   ;;  %v5866_v4 = vadd.f32 %v4007_v51, %v5765_v48  ;;  %v4010_v53 = vadd.f32 %v4009_v33, %v4008_v63  ;;  %v4609_v48 = vld [vmem:[%s6503_s2 + $0x11c] ss:$60 sps:$4 sm:$0xff]   ;;  %v3023_v62 = vld [vmem:[%s6505_s4 + $0x20] sm:$0xff] }
 0x20e   : > { %4279 = vmatprep.subr.bf16.mxu0 %v1330_v0  ;;  %2656 = vmatprep.mubr.bf16.mxu1 %v4603_v57 }
 0x20f   : > { %v1251_v55 = vpop.permute.xlu1 %1250  ;;  %2980 = vperm.xlu0 %4474, %v2918_v50   ;;  %v5872_v41 = vadd.f32 %v4010_v53, %v5775_v24  ;;  %v3025_v53 = vld [vmem:[%s6505_s4 + $0x30] sm:$0xff] }
 0x210   : > { %v1249_v6 = vpop.permute.xlu0 %1248 }
 0x211   : > { %v1281_v7 = vsel %vm1280_vm12, %v1249_v6, %v1251_v55  ;;  %2576 = vmatmul.mubr.bf16.gmra.mrb[76].mxu0 %v4602_v11  ;;  %2985 = vperm.xlu1 %4475, %v2919_v3   ;;  %v4011_v24 = vpop.f32.mrb[24].mxu1  ;;  %v3024_v11 = vld [vmem:[%s6505_s4 + $0x28] sm:$0xff]  ;;  %v3026_v6 = vld [vmem:[%s6505_s4 + $0x38] sm:$0xff] }
 0x212   : > { %4280 = vmatpush3.bf16.msra.mxu0 %v1281_v7  ;;  %2583 = vmatprep.mubr.bf16.mxu0 %v4606_v2  ;;  %v4012_v38 = vpop.f32.mrb[25].mxu1  ;;  %v4617_v3 = vld [vmem:[%s6503_s2 + $0x190] ss:$60 sps:$4 sm:$0xff]  }
 0x213   : > { %v1304_v9 = vpop.permute.xlu1 %1303  ;;  %2990 = vperm.xlu0 %4474, %v2920_v40   ;;  %v4013_v13 = vadd.f32 %v4012_v38, %v4011_v24  ;;  %v4014_v16 = vpop.f32.mrb[26].mxu1  ;;  %v4620_v7 = vld [vmem:[%s6503_s2 + $0x2f0] ss:$60 sps:$4 sm:$0xff]  }
 0x214   : > { %v1302_v39 = vpop.permute.xlu0 %1301  ;;  %v4015_v43 = vpop.f32.mrb[27].mxu1 }
 0x215   : > { %2657 = vmatmul.mubr.bf16.gmra.mrb[68].mxu1 %v4605_v8  ;;  %v1331_v42 = vsel %vm1329_vm11, %v1302_v39, %v1304_v9  ;;  %2995 = vperm.xlu1 %4475, %v2921_v27   ;;  %v5898_v22 = vadd.f32 %v4013_v13, %v5782_v59  ;;  %v4016_v25 = vadd.f32 %v4015_v43, %v4014_v16  ;;  %v4615_v59 = vld [vmem:[%s6503_s2 + $0x194] ss:$60 sps:$4 sm:$0xff]   ;;  %v4624_v8 = vld [vmem:[%s6503_s2 + $0x36c] ss:$60 sps:$4 sm:$0xff]  }
 0x216   : > { %4281 = vmatprep.subr.bf16.mxu0 %v1331_v42  ;;  %2664 = vmatprep.mubr.bf16.mxu1 %v4609_v48  ;;  %v3027_v48 = vld [vmem:[%s6505_s4 + $0x40] sm:$0xff]  ;;  %v3028_v9 = vld [vmem:[%s6505_s4 + $0x48] sm:$0xff]  ;;  %v3029_v13 = vld [vmem:[%s6505_s4 + $0x50] sm:$0xff] }
 0x217   : > { %v1255_v26 = vpop.permute.xlu1 %1254  ;;  %3000 = vperm.xlu0 %4474, %v2922_v12   ;;  %v5904_v29 = vadd.f32 %v4016_v25, %v5788_v10  ;;  %v4623_v39 = vld [vmem:[%s6503_s2 + $0x208] ss:$60 sps:$4 sm:$0xff]  }
 0x218   : > { %v1253_v44 = vpop.permute.xlu0 %1252  ;;  %v4627_v12 = vld [vmem:[%s6503_s2 + $0x284] ss:$60 sps:$4 sm:$0xff]  }
 0x219   : > { %v1282_v30 = vsel %vm1280_vm12, %v1253_v44, %v1255_v26  ;;  %2584 = vmatmul.mubr.bf16.gmra.mrb[80].mxu0 %v4608_v56  ;;  %3037 = vperm.xlu1 %4475, %v3019_v21   ;;  %v4017_v10 = vpop.f32.mrb[28].mxu1  ;;  %v3030_v56 = vld [vmem:[%s6505_s4 + $0x58] sm:$0xff]  ;;  %v4638_v21 = vld [vmem:[%s6503_s2 + $0x34] ss:$60 sps:$4 sm:$0xff]   ;;  %v3031_v25 = vld [vmem:[%s6505_s4 + $0x60] sm:$0xff] }
 0x21a   : > { %4282 = vmatpush3.bf16.msra.mxu0 %v1282_v30  ;;  %2591 = vmatprep.mubr.bf16.mxu0 %v4612_v20  ;;  %v4018_v47 = vpop.f32.mrb[29].mxu1  ;;  %v4626_v20 = vld [vmem:[%s6503_s2 + $0x368] ss:$60 sps:$4 sm:$0xff]  }
 0x21b   : > { %v1308_v23 = vpop.permute.xlu1 %1307  ;;  %3042 = vperm.xlu0 %4474, %v3020_v45   ;;  %v4019_v58 = vadd.f32 %v4018_v47, %v4017_v10  ;;  %v4020_v57 = vpop.f32.mrb[30].mxu1  ;;  %v3032_v45 = vld [vmem:[%s6505_s4 + $0x68] sm:$0xff]  ;;  %v3034_v47 = vld [vmem:[%s6505_s4 + $0x78] sm:$0xff] }
 0x21c   : > { %v1306_v14 = vpop.permute.xlu0 %1305  ;;  %v4021_v17 = vpop.f32.mrb[31].mxu1 }
 0x21d   : > { %2665 = vmatmul.mubr.bf16.gmra.mrb[72].mxu1 %v4611_v31  ;;  %v1332_v19 = vsel %vm1329_vm11, %v1306_v14, %v1308_v23  ;;  %3047 = vperm.xlu1 %4475, %v3021_v37   ;;  %v5930_v50 = vadd.f32 %v4019_v58, %v5806_v28  ;;  %v4022_v51 = vadd.f32 %v4021_v17, %v4020_v57  ;;  %v4621_v28 = vld [vmem:[%s6503_s2 + $0x20c] ss:$60 sps:$4 sm:$0xff]   ;;  %v4629_v31 = vld [vmem:[%s6503_s2 + $0x280] ss:$60 sps:$4 sm:$0xff]   ;;  %v3033_v37 = vld [vmem:[%s6505_s4 + $0x70] sm:$0xff] }
 0x21e   : > { %4283 = vmatprep.subr.bf16.mxu0 %v1332_v19  ;;  %2672 = vmatprep.mubr.bf16.mxu1 %v4615_v59  ;;  %v4630_v59 = vld [vmem:[%s6503_s2 + $0x2fc] ss:$60 sps:$4 sm:$0xff]   ;;  %v3149_v19 = vld [vmem:[%s6508_s7 + $0x8] sm:$0xff] }
 0x21f   : > { %v1349_v63 = vpop.permute.xlu1 %1348  ;;  %3052 = vperm.xlu0 %4474, %v3022_v52   ;;  %v5936_v33 = vadd.f32 %v4022_v51, %v5814_v18  ;;  %v3148_v52 = vld [vmem:[%s6508_s7] sm:$0xff]  ;;  %v4632_v17 = vld [vmem:[%s6503_s2 + $0x2f8] ss:$60 sps:$4 sm:$0xff]  }
 0x220   : > { %v1347_v0 = vpop.permute.xlu0 %1346 }
 0x221   : > { %2592 = vmatmul.mubr.bf16.gmra.mrb[84].mxu0 %v4614_v34  ;;  %v1379_v2 = vsel %vm1378_vm13, %v1347_v0, %v1349_v63  ;;  %3057 = vperm.xlu1 %4475, %v3023_v62   ;;  %v3150_v62 = vld [vmem:[%s6508_s7 + $0x10] sm:$0xff]  ;;  %v3151_v0 = vld [vmem:[%s6508_s7 + $0x18] sm:$0xff] }
 0x222   : > { %4368 = vmatprep.subr.bf16.mxu1 %v1379_v2  ;;  %2599 = vmatprep.mubr.bf16.mxu0 %v4618_v60  ;;  %v4633_v60 = vld [vmem:[%s6503_s2 + $0x374] ss:$60 sps:$4 sm:$0xff]  }
 0x223   : > { %4369 = vmatpush3.bf16.msra.mxu1 %v1379_v2  ;;  %v1259_v18 = vpop.permute.xlu1 %1258  ;;  %3062 = vperm.xlu0 %4474, %v3024_v11   ;;  %v3152_v2 = vld [vmem:[%s6508_s7 + $0x20] sm:$0xff] }
 0x224   : > { %v1257_v55 = vpop.permute.xlu0 %1256 }
 0x225   : > { %v1283_v40 = vsel %vm1280_vm12, %v1257_v55, %v1259_v18  ;;  %2673 = vmatmul.mubr.bf16.gmra.mrb[76].mxu1 %v4617_v3  ;;  %3067 = vperm.xlu1 %4475, %v3025_v53   ;;  %v3153_v53 = vld [vmem:[%s6508_s7 + $0x28] sm:$0xff] }
 0x226   : > { %4284 = vmatpush3.bf16.msra.mxu0 %v1283_v40  ;;  %2680 = vmatprep.mubr.bf16.mxu1 %v4621_v28  ;;  %v4635_v55 = vld [vmem:[%s6503_s2 + $0x370] ss:$60 sps:$4 sm:$0xff]  }
 0x227   : > { %v1312_v27 = vpop.permute.xlu1 %1311  ;;  %3072 = vperm.xlu0 %4474, %v3026_v6   ;;  %v4642_v6 = vld [vmem:[%s6503_s2 + $0x38] ss:$60 sps:$4 sm:$0xff]  }
 0x228   : > { %v1310_v24 = vpop.permute.xlu0 %1309  ;;  %v3154_v40 = vld [vmem:[%s6508_s7 + $0x30] sm:$0xff] }
 0x229   : > { %2600 = vmatmul.mubr.bf16.gmra.mrb[88].mxu0 %v4620_v7  ;;  %v1333_v38 = vsel %vm1329_vm11, %v1310_v24, %v1312_v27  ;;  %3077 = vperm.xlu1 %4475, %v3027_v48   ;;  %v3155_v48 = vld [vmem:[%s6508_s7 + $0x38] sm:$0xff]  ;;  %v3156_v24 = vld [vmem:[%s6508_s7 + $0x40] sm:$0xff] }
 0x22a   : > { %4285 = vmatprep.subr.bf16.mxu0 %v1333_v38  ;;  %2607 = vmatprep.mubr.bf16.mxu0 %v4624_v8 }
 0x22b   : > { %v1353_v16 = vpop.permute.xlu1 %1352  ;;  %3082 = vperm.xlu0 %4474, %v3028_v9  }
 0x22c   : > { %v1351_v42 = vpop.permute.xlu0 %1350 }
 0x22d   : > { %2681 = vmatmul.mubr.bf16.gmra.mrb[80].mxu1 %v4623_v39  ;;  %v1380_v43 = vsel %vm1378_vm13, %v1351_v42, %v1353_v16  ;;  %3087 = vperm.xlu1 %4475, %v3029_v13   ;;  %v3157_v39 = vld [vmem:[%s6508_s7 + $0x48] sm:$0xff]  ;;  %v3158_v16 = vld [vmem:[%s6508_s7 + $0x50] sm:$0xff] }
 0x22e   : > { %4370 = vmatprep.subr.bf16.mxu1 %v1380_v43  ;;  %2688 = vmatprep.mubr.bf16.mxu1 %v4627_v12 }
 0x22f   : > { %4371 = vmatpush3.bf16.msra.mxu1 %v1380_v43  ;;  %v1263_v26 = vpop.permute.xlu1 %1262  ;;  %3092 = vperm.xlu0 %4474, %v3030_v56  }
 0x230   : > { %v1261_v44 = vpop.permute.xlu0 %1260 }
 0x231   : > { %v1284_v30 = vsel %vm1280_vm12, %v1261_v44, %v1263_v26  ;;  %2608 = vmatmul.mubr.bf16.gmra.mrb[92].mxu0 %v4626_v20  ;;  %3097 = vperm.xlu1 %4475, %v3031_v25   ;;  %v3159_v25 = vld [vmem:[%s6508_s7 + $0x58] sm:$0xff] }
 0x232   : > { %4286 = vmatpush3.bf16.msra.mxu0 %v1284_v30  ;;  %2745 = vmatprep.mubr.bf16.mxu0 %v4638_v21 }
 0x233   : > { %v1316_v10 = vpop.permute.xlu1 %1315  ;;  %3102 = vperm.xlu0 %4474, %v3032_v45  }
 0x234   : > { %v1314_v23 = vpop.permute.xlu0 %1313 }
 0x235   : > { %2689 = vmatmul.mubr.bf16.gmra.mrb[84].mxu1 %v4629_v31  ;;  %v1334_v14 = vsel %vm1329_vm11, %v1314_v23, %v1316_v10  ;;  %3107 = vperm.xlu1 %4475, %v3033_v37   ;;  %v3160_v31 = vld [vmem:[%s6508_s7 + $0x60] sm:$0xff]  ;;  %v3161_v23 = vld [vmem:[%s6508_s7 + $0x68] sm:$0xff] }
 0x236   : > { %4287 = vmatprep.subr.bf16.mxu0 %v1334_v14  ;;  %2696 = vmatprep.mubr.bf16.mxu1 %v4630_v59  ;;  %v3162_v14 = vld [vmem:[%s6508_s7 + $0x70] sm:$0xff] }
 0x237   : > { %v1357_v58 = vpop.permute.xlu1 %1356  ;;  %3112 = vperm.xlu0 %4474, %v3034_v47  }
 0x238   : > { %v1355_v57 = vpop.permute.xlu0 %1354 }
 0x239   : > { %v1381_v34 = vsel %vm1378_vm13, %v1355_v57, %v1357_v58  ;;  %3166 = vperm.xlu1 %4475, %v3148_v52  }
 0x23a   : > { %4372 = vmatprep.subr.bf16.mxu1 %v1381_v34 }
 0x23b   : > { %4373 = vmatpush3.bf16.msra.mxu1 %v1381_v34  ;;  %v1267_v51 = vpop.permute.xlu1 %1266  ;;  %3171 = vperm.xlu0 %4474, %v3149_v19   ;;  %v3163_v34 = vld [vmem:[%s6508_s7 + $0x78] sm:$0xff] }
 0x23c   : > { %v1265_v63 = vpop.permute.xlu0 %1264 }
 0x23d   : > { %v1285_v11 = vsel %vm1280_vm12, %v1265_v63, %v1267_v51  ;;  %2697 = vmatmul.mubr.bf16.gmra.mrb[88].mxu1 %v4632_v17  ;;  %3176 = vperm.xlu1 %4475, %v3150_v62  }
 0x23e   : > { %4288 = vmatpush3.bf16.msra.mxu0 %v1285_v11  ;;  %2704 = vmatprep.mubr.bf16.mxu1 %v4633_v60 }
 0x23f   : > { %v1320_v3 = vpop.permute.xlu1 %1319  ;;  %3181 = vperm.xlu0 %4474, %v3151_v0  }
 0x240   : > { %v1318_v28 = vpop.permute.xlu0 %1317 }
 0x241   : > { %v1335_v18 = vsel %vm1329_vm11, %v1318_v28, %v1320_v3  ;;  %3186 = vperm.xlu1 %4475, %v3152_v2  }
 0x242   : > { %4289 = vmatprep.subr.bf16.mxu0 %v1335_v18 }
 0x243   : > { %v1361_v7 = vpop.permute.xlu1 %1360  ;;  %3191 = vperm.xlu0 %4474, %v3153_v53  }
 0x244   : > { %v1359_v8 = vpop.permute.xlu0 %1358 }
 0x245   : > { %2705 = vmatmul.mubr.bf16.gmra.mrb[92].mxu1 %v4635_v55  ;;  %v1382_v27 = vsel %vm1378_vm13, %v1359_v8, %v1361_v7  ;;  %3196 = vperm.xlu1 %4475, %v3154_v40  }
 0x246   : > { %4374 = vmatprep.subr.bf16.mxu1 %v1382_v27  ;;  %4384 = vmatprep.mubr.bf16.mxu1 %v4642_v6 }
 0x247   : > { %4375 = vmatpush3.bf16.msra.mxu1 %v1382_v27  ;;  %v1271_v9 = vpop.permute.xlu1 %1270  ;;  %3201 = vperm.xlu0 %4474, %v3155_v48  }
 0x248   : > { %v1269_v38 = vpop.permute.xlu0 %1268 }
 0x249   : > { %v1286_v12 = vsel %vm1280_vm12, %v1269_v38, %v1271_v9  ;;  %3206 = vperm.xlu1 %4475, %v3156_v24   ;;  %v4039_v13 = vpop.f32.mrb[32].mxu0  ;;  %v4636_v38 = vld [vmem:[%s6503_s2 + $0x30] ss:$60 sps:$4 sm:$0xff]  }
 0x24a   : > { %4290 = vmatpush3.bf16.msra.mxu0 %v1286_v12  ;;  %v4040_v56 = vpop.f32.mrb[33].mxu0 }
 0x24b   : > { %v1324_v42 = vpop.permute.xlu1 %1323  ;;  %3211 = vperm.xlu0 %4474, %v3157_v39   ;;  %v4041_v20 = vadd.f32 %v4040_v56, %v4039_v13  ;;  %v4042_v21 = vpop.f32.mrb[34].mxu0 }
 0x24c   : > { %v1322_v43 = vpop.permute.xlu0 %1321  ;;  %v4043_v44 = vpop.f32.mrb[35].mxu0 }
 0x24d   : > { %v1336_v26 = vsel %vm1329_vm11, %v1322_v43, %v1324_v42  ;;  %3216 = vperm.xlu1 %4475, %v3158_v16   ;;  %v6059_v45 = vadd.f32 %v4041_v20, %v5724_v61  ;;  %v4044_v30 = vadd.f32 %v4043_v44, %v4042_v21 }
 0x24e   : > { %4291 = vmatprep.subr.bf16.mxu0 %v1336_v26 }
 0x24f   : > { %v1365_v59 = vpop.permute.xlu1 %1364  ;;  %3221 = vperm.xlu0 %4474, %v3159_v25   ;;  %v6065_v10 = vadd.f32 %v4044_v30, %v5728_v1 }
 0x250   : > { %v1363_v37 = vpop.permute.xlu0 %1362 }
 0x251   : > { %v1383_v47 = vsel %vm1378_vm13, %v1363_v37, %v1365_v59  ;;  %3226 = vperm.xlu1 %4475, %v3160_v31   ;;  %v4045_v61 = vpop.f32.mrb[36].mxu0 }
 0x252   : > { %4376 = vmatprep.subr.bf16.mxu1 %v1383_v47  ;;  %v4046_v58 = vpop.f32.mrb[37].mxu0 }
 0x253   : > { %4377 = vmatpush3.bf16.msra.mxu1 %v1383_v47  ;;  %v1275_v52 = vpop.permute.xlu1 %1274  ;;  %3231 = vperm.xlu0 %4474, %v3161_v23   ;;  %v4047_v1 = vadd.f32 %v4046_v58, %v4045_v61  ;;  %v4048_v19 = vpop.f32.mrb[38].mxu0 }
 0x254   : > { %v1273_v57 = vpop.permute.xlu0 %1272  ;;  %v4049_v60 = vpop.f32.mrb[39].mxu0 }
 0x255   : > { %v1287_v17 = vsel %vm1280_vm12, %v1273_v57, %v1275_v52  ;;  %3236 = vperm.xlu1 %4475, %v3162_v14   ;;  %v6079_v62 = vadd.f32 %v4047_v1, %v5738_v54  ;;  %v4050_v51 = vadd.f32 %v4049_v60, %v4048_v19  ;;  %v4641_v14 = vld [vmem:[%s6503_s2 + $0xa8] ss:$60 sps:$4 sm:$0xff]   ;;  %v3147_v52 = vld [vmem:[%s579_s13] sm:$0xf] }
 0x256   : > { %4292 = vmatpush3.bf16.msra.mxu0 %v1287_v17  ;;  %v4644_v57 = vld [vmem:[%s6503_s2 + $0x124] ss:$60 sps:$4 sm:$0xff]  }
 0x257   : > { %v1328_v63 = vpop.permute.xlu1 %1327  ;;  %3241 = vperm.xlu0 %4474, %v3163_v34   ;;  %v6082_v11 = vadd.f32 %v4050_v51, %v5748_v15  ;;  %v4647_v17 = vld [vmem:[%s6503_s2 + $0x128] ss:$60 sps:$4 sm:$0xff]   ;;  %v3311_v51 = vsel %vm3309_vm14, %v3147_v52, 0 }
 0x258   : > { %v1326_v0 = vpop.permute.xlu0 %1325 }
 0x259   : > { %v1337_v2 = vsel %vm1329_vm11, %v1326_v0, %v1328_v63  ;;  %v4051_v3 = vpop.f32.mrb[40].mxu0 }
 0x25a   : > { %4293 = vmatprep.subr.bf16.mxu0 %v1337_v2  ;;  %v4052_v53 = vpop.f32.mrb[41].mxu0 }
 0x25b   : > { %v1369_v28 = vpop.permute.xlu1 %1368  ;;  %v4053_v55 = vadd.f32 %v4052_v53, %v4051_v3  ;;  %v4054_v6 = vpop.f32.mrb[42].mxu0 }
 0x25c   : > { %v1367_v18 = vpop.permute.xlu0 %1366  ;;  %v4055_v40 = vpop.f32.mrb[43].mxu0 }
 0x25d   : > { %v1384_v54 = vsel %vm1378_vm13, %v1367_v18, %v1369_v28  ;;  %v6088_v7 = vadd.f32 %v4053_v55, %v5763_v46  ;;  %v4056_v15 = vadd.f32 %v4055_v40, %v4054_v6  ;;  %v4639_v46 = vld [vmem:[%s6503_s2 + $0xac] ss:$60 sps:$4 sm:$0xff]  }
 0x25e   : > { %4378 = vmatprep.subr.bf16.mxu1 %v1384_v54 }
 0x25f   : > { %4379 = vmatpush3.bf16.msra.mxu1 %v1384_v54  ;;  %v1279_v8 = vpop.permute.xlu1 %1278  ;;  %v6094_v24 = vadd.f32 %v4056_v15, %v5777_v5  ;;  %v4646_v54 = vld [vmem:[%s6503_s2 + $0x120] ss:$60 sps:$4 sm:$0xff]  }
 0x260   : > { %v1277_v48 = vpop.permute.xlu0 %1276  ;;  %v4103_v27 = vpop.f32.mrb[32].mxu1 }
 0x261   : > { %v1288_v9 = vsel %vm1280_vm12, %v1277_v48, %v1279_v8  ;;  %v4104_v39 = vpop.f32.mrb[33].mxu1 }
 0x262   : > { %4294 = vmatpush3.bf16.msra.mxu0 %v1288_v9  ;;  %v4105_v12 = vadd.f32 %v4104_v39, %v4103_v27  ;;  %v4106_v13 = vpop.f32.mrb[34].mxu1  ;;  %v4057_v16 = vpop.f32.mrb[44].mxu0 }
 0x263   : > { %v1373_v42 = vpop.permute.xlu1 %1372  ;;  %v4107_v56 = vpop.f32.mrb[35].mxu1 }
 0x264   : > { %v1371_v5 = vpop.permute.xlu0 %1370  ;;  %v6105_v43 = vadd.f32 %v4105_v12, %v6059_v45  ;;  %v4108_v20 = vadd.f32 %v4107_v56, %v4106_v13  ;;  %v4058_v21 = vpop.f32.mrb[45].mxu0 }
 0x265   : > { %2746 = vmatmul.mubr.bf16.vlgmr.msra.gmra.mrb[96].mxu0 %v4636_v38  ;;  %v1385_v25 = vsel %vm1378_vm13, %v1371_v5, %v1373_v42  ;;  %v4059_v26 = vadd.f32 %v4058_v21, %v4057_v16  ;;  %v4060_v44 = vpop.f32.mrb[46].mxu0 }
 0x266   : > { %4380 = vmatprep.subr.bf16.mxu1 %v1385_v25  ;;  %2753 = vmatprep.mubr.bf16.mxu0 %v4639_v46  ;;  %v6112_v30 = vadd.f32 %v4108_v20, %v6065_v10  ;;  %v4061_v31 = vpop.f32.mrb[47].mxu0 }
 0x267   : > { %4381 = vmatpush3.bf16.msra.mxu1 %v1385_v25  ;;  %v1377_v45 = vpop.permute.xlu1 %1376  ;;  %v6115_v59 = vadd.f32 %v4059_v26, %v5798_v35  ;;  %v4062_v37 = vadd.f32 %v4061_v31, %v4060_v44  ;;  %v4643_v35 = vld [vmem:[%s6503_s2 + $0xb0] ss:$60 sps:$4 sm:$0xff]  }
 0x268   : > { %v1375_v23 = vpop.permute.xlu0 %1374  ;;  %v4109_v47 = vpop.f32.mrb[36].mxu1  ;;  %v4653_v25 = vld [vmem:[%s6503_s2 + $0x290] ss:$60 sps:$4 sm:$0xff]  }
 0x269   : > { %v1386_v61 = vsel %vm1378_vm13, %v1375_v23, %v1377_v45  ;;  %v4110_v58 = vpop.f32.mrb[37].mxu1  ;;  %v6122_v10 = vadd.f32 %v4062_v37, %v5809_v32 }
 0x26a   : > { %4382 = vmatprep.subr.bf16.mxu1 %v1386_v61  ;;  %v4111_v1 = vadd.f32 %v4110_v58, %v4109_v47  ;;  %v4112_v19 = vpop.f32.mrb[38].mxu1  ;;  %v4063_v34 = vpop.f32.mrb[48].mxu0 }
 0x26b   : > { %4383 = vmatpush3.bf16.msra.mxu1 %v1386_v61  ;;  %v4113_v60 = vpop.f32.mrb[39].mxu1  ;;  %v4064_v32 = vpop.f32.mrb[49].mxu0 }
 0x26c   : > { %4418 = vmatprep.subr.msk.bf16.mxu1 %vm3309_vm14, %v3147_v52  ;;  %v6134_v63 = vadd.f32 %v4111_v1, %v6079_v62  ;;  %v4114_v0 = vadd.f32 %v4113_v60, %v4112_v19  ;;  %v4065_v2 = vadd.f32 %v4064_v32, %v4063_v34  ;;  %v4066_v3 = vpop.f32.mrb[50].mxu0  ;;  %v4658_v34 = vld [vmem:[%s6503_s2 + $0x380] ss:$60 sps:$4 sm:$0xff]  }
 0x26d   : > { %2754 = vmatmul.mubr.bf16.gmra.mrb[100].mxu0 %v4641_v14  ;;  %v4067_v28 = vpop.f32.mrb[51].mxu0 }
 0x26e   : > { %4385 = vmatmul.mubr.bf16.vlgmr.msra.gmra.mrb[96].mxu1 %v4643_v35  ;;  %2761 = vmatprep.mubr.bf16.mxu0 %v4644_v57  ;;  %v6137_v53 = vadd.f32 %v4114_v0, %v6082_v11  ;;  %v6140_v18 = vadd.f32 %v4065_v2, %v5834_v36  ;;  %v4068_v55 = vadd.f32 %v4067_v28, %v4066_v3  ;;  %v4648_v11 = vld [vmem:[%s6503_s2 + $0x1a0] ss:$60 sps:$4 sm:$0xff]  }
 0x26f   : > { %4388 = vmatprep.mubr.bf16.mxu1 %v4647_v17  ;;  %4401 = vmatpush3.bf16.msra.mxu1 %v3311_v51  ;;  %v4649_v36 = vld [vmem:[%s6503_s2 + $0x19c] ss:$60 sps:$4 sm:$0xff]  }
 0x270   : > { %v4115_v6 = vpop.f32.mrb[40].mxu1  ;;  %v6143_v62 = vadd.f32 %v4068_v55, %v5840_v49  ;;  %v4652_v49 = vld [vmem:[%s6503_s2 + $0x218] ss:$60 sps:$4 sm:$0xff]  }
 0x271   : > { %v4116_v40 = vpop.f32.mrb[41].mxu1 }
 0x272   : > { %v4117_v15 = vadd.f32 %v4116_v40, %v4115_v6  ;;  %v4118_v8 = vpop.f32.mrb[42].mxu1  ;;  %v4069_v48 = vpop.f32.mrb[52].mxu0 }
 0x273   : > { %v4119_v27 = vpop.f32.mrb[43].mxu1  ;;  %v4070_v9 = vpop.f32.mrb[53].mxu0 }
 0x274   : > { %v6158_v38 = vadd.f32 %v4117_v15, %v6088_v7  ;;  %v4120_v39 = vadd.f32 %v4119_v27, %v4118_v8  ;;  %v4071_v46 = vadd.f32 %v4070_v9, %v4069_v48  ;;  %v4072_v12 = vpop.f32.mrb[54].mxu0  ;;  %v4651_v7 = vld [vmem:[%s6503_s2 + $0x198] ss:$60 sps:$4 sm:$0xff]   ;;  %v4663_v8 = vld [vmem:[%s6507_s6 + $0x8] sm:$0xff]  }
 0x275   : > { %2762 = vmatmul.mubr.bf16.gmra.mrb[104].mxu0 %v4646_v54  ;;  %v4073_v13 = vpop.f32.mrb[55].mxu0 }
 0x276   : > { %4389 = vmatmul.mubr.bf16.gmra.mrb[100].mxu1 %v4648_v11  ;;  %2769 = vmatprep.mubr.bf16.mxu0 %v4649_v36  ;;  %v6161_v16 = vadd.f32 %v4120_v39, %v6094_v24  ;;  %v2400_v42 = vadd.f32 %v4071_v46, %v5866_v4  ;;  %v4074_v56 = vadd.f32 %v4073_v13, %v4072_v12  ;;  %v4654_v24 = vld [vmem:[%s6503_s2 + $0x214] ss:$60 sps:$4 sm:$0xff]   ;;  %v4666_v12 = vld [vmem:[%s6503_s2 + $0x300] ss:$60 sps:$4 sm:$0xff]  }
 0x277   : > { %4392 = vmatprep.mubr.bf16.mxu1 %v4652_v49  ;;  %v4667_v49 = vld [vmem:[%s6507_s6 + $0x10] sm:$0xff]  }
 0x278   : > { %v4121_v5 = vpop.f32.mrb[44].mxu1  ;;  %v6165_v20 = vadd.f32 %v4074_v56, %v5872_v41  ;;  %v4657_v41 = vld [vmem:[%s6503_s2 + $0x308] ss:$60 sps:$4 sm:$0xff]   ;;  %v4669_v56 = vld [vmem:[%s6503_s2 + $0x37c] ss:$60 sps:$4 sm:$0xff]  }
 0x279   : > { %v4122_v21 = vpop.f32.mrb[45].mxu1 }
 0x27a   : > { %v4123_v4 = vadd.f32 %v4122_v21, %v4121_v5  ;;  %v4124_v26 = vpop.f32.mrb[46].mxu1  ;;  %v4075_v44 = vpop.f32.mrb[56].mxu0 }
 0x27b   : > { %v4125_v31 = vpop.f32.mrb[47].mxu1  ;;  %v4076_v45 = vpop.f32.mrb[57].mxu0 }
 0x27c   : > { %v6180_v37 = vadd.f32 %v4123_v4, %v6115_v59  ;;  %v4126_v23 = vadd.f32 %v4125_v31, %v4124_v26  ;;  %v4077_v47 = vadd.f32 %v4076_v45, %v4075_v44  ;;  %v4078_v61 = vpop.f32.mrb[58].mxu0  ;;  %v4656_v59 = vld [vmem:[%s6503_s2 + $0x210] ss:$60 sps:$4 sm:$0xff]   ;;  %v4671_v44 = vld [vmem:[%s6503_s2 + $0x378] ss:$60 sps:$4 sm:$0xff]  }
 0x27d   : > { %2770 = vmatmul.mubr.bf16.gmra.mrb[108].mxu0 %v4651_v7  ;;  %v4079_v14 = vpop.f32.mrb[59].mxu0  ;;  %v4673_v31 = vld [vmem:[%s6507_s6 + $0x28] sm:$0xff]  }
 0x27e   : > { %4393 = vmatmul.mubr.bf16.gmra.mrb[104].mxu1 %v4653_v25  ;;  %2777 = vmatprep.mubr.bf16.mxu0 %v4654_v24  ;;  %v6183_v52 = vadd.f32 %v4126_v23, %v6122_v10  ;;  %v2408_v58 = vadd.f32 %v4077_v47, %v5898_v22  ;;  %v4080_v35 = vadd.f32 %v4079_v14, %v4078_v61  ;;  %v4659_v10 = vld [vmem:[%s6503_s2 + $0x28c] ss:$60 sps:$4 sm:$0xff]   ;;  %v4674_v47 = vld [vmem:[%s6507_s6 + $0x30] sm:$0xff]  }
 0x27f   : > { %4396 = vmatprep.mubr.bf16.mxu1 %v4657_v41 }
 0x280   : > { %v4127_v57 = vpop.f32.mrb[48].mxu1  ;;  %v2411_v1 = vadd.f32 %v4080_v35, %v5904_v29  ;;  %v4662_v29 = vld [vmem:[%s6507_s6] sm:$0xff]  }
 0x281   : > { %v4128_v19 = vpop.f32.mrb[49].mxu1 }
 0x282   : > { %v4129_v17 = vadd.f32 %v4128_v19, %v4127_v57  ;;  %v4130_v22 = vpop.f32.mrb[50].mxu1  ;;  %v4081_v60 = vpop.f32.mrb[60].mxu0  ;;  %v4675_v57 = vld [vmem:[%s6507_s6 + $0x38] sm:$0xff]  }
 0x283   : > { %v4131_v32 = vpop.f32.mrb[51].mxu1  ;;  %v4082_v51 = vpop.f32.mrb[61].mxu0 }
 0x284   : > { %v6200_v0 = vadd.f32 %v4129_v17, %v6140_v18  ;;  %v4132_v2 = vadd.f32 %v4131_v32, %v4130_v22  ;;  %v4083_v3 = vadd.f32 %v4082_v51, %v4081_v60  ;;  %v4084_v28 = vpop.f32.mrb[62].mxu0  ;;  %v4661_v18 = vld [vmem:[%s6503_s2 + $0x288] ss:$60 sps:$4 sm:$0xff]  }
 0x285   : > { %2778 = vmatmul.mubr.bf16.gmra.mrb[112].mxu0 %v4656_v59  ;;  %v4085_v55 = vpop.f32.mrb[63].mxu0 }
 0x286   : > { %4397 = vmatmul.mubr.bf16.gmra.mrb[108].mxu1 %v4658_v34  ;;  %2785 = vmatprep.mubr.bf16.mxu0 %v4659_v10  ;;  %v6203_v6 = vadd.f32 %v4132_v2, %v6143_v62  ;;  %v2416_v54 = vadd.f32 %v4083_v3, %v5930_v50  ;;  %v4086_v40 = vadd.f32 %v4085_v55, %v4084_v28  ;;  %v4664_v62 = vld [vmem:[%s6503_s2 + $0x304] ss:$60 sps:$4 sm:$0xff]  }
 0x287   : > { %4402 = vmatprep.mubr.msk.bf16.mxu1 %vm3284_vm15, %v4662_v29 }
 0x288   : > { %v4133_v11 = vpop.f32.mrb[52].mxu1  ;;  %v2419_v36 = vadd.f32 %v4086_v40, %v5936_v33 }
 0x289   : > { %v4134_v15 = vpop.f32.mrb[53].mxu1 }
 0x28a   : > { %v4135_v50 = vadd.f32 %v4134_v15, %v4133_v11  ;;  %v4136_v48 = vpop.f32.mrb[54].mxu1 }
 0x28b   : > { %v4137_v33 = vpop.f32.mrb[55].mxu1 }
 0x28c   : > { %v6220_v27 = vadd.f32 %v4135_v50, %v2400_v42  ;;  %v4138_v9 = vadd.f32 %v4137_v33, %v4136_v48  ;;  %v4668_v42 = vld [vmem:[%s6507_s6 + $0x18] sm:$0xff]  }
 0x28d   : > { %2786 = vmatmul.mubr.bf16.gmra.mrb[116].mxu0 %v4661_v18 }
 0x28e   : > { %4403 = vmatmul.mubr.msk.bf16.vlgmr.msra.gmra.mrb[112].mxu1 %vm3284_vm15, %v4663_v8  ;;  %2793 = vmatprep.mubr.bf16.mxu0 %v4664_v62  ;;  %v6224_v39 = vadd.f32 %v4138_v9, %v6165_v20  ;;  %v4672_v20 = vld [vmem:[%s6507_s6 + $0x20] sm:$0xff]   ;;  %v6268_v8 = vpop.permute.xlu1 %2930 }
 0x28f   : > { %4406 = vmatprep.mubr.msk.bf16.mxu1 %vm3284_vm15, %v4667_v49 }
 0x290   : > { %v4139_v46 = vpop.f32.mrb[56].mxu1 }
 0x291   : > { %v4140_v13 = vpop.f32.mrb[57].mxu1 }
 0x292   : > { %v4141_v5 = vadd.f32 %v4140_v13, %v4139_v46  ;;  %v4142_v7 = vpop.f32.mrb[58].mxu1 }
 0x293   : > { %v4143_v21 = vpop.f32.mrb[59].mxu1 }
 0x294   : > { %v6239_v25 = vadd.f32 %v4141_v5, %v2408_v58  ;;  %v4144_v24 = vadd.f32 %v4143_v21, %v4142_v7 }
 0x295   : > { %2794 = vmatmul.mubr.bf16.gmra.mrb[120].mxu0 %v4666_v12  ;;  %v6274_v12 = vpop.permute.xlu0 %2925 }
 0x296   : > { %4407 = vmatmul.mubr.msk.bf16.gmra.mrb[116].mxu1 %vm3284_vm15, %v4668_v42  ;;  %2801 = vmatprep.mubr.bf16.mxu0 %v4669_v56  ;;  %v6242_v4 = vadd.f32 %v4144_v24, %v2411_v1  ;;  %v6276_v42 = vpop.permute.xlu1 %2935 }
 0x297   : > { %4410 = vmatprep.mubr.msk.bf16.mxu1 %vm3284_vm15, %v4672_v20 }
 0x298   : > { %v4145_v26 = vpop.f32.mrb[60].mxu1 }
 0x299   : > { %v4146_v41 = vpop.f32.mrb[61].mxu1 }
 0x29a   : > { %v4147_v45 = vadd.f32 %v4146_v41, %v4145_v26  ;;  %v4148_v23 = vpop.f32.mrb[62].mxu1 }
 0x29b   : > { %v4149_v61 = vpop.f32.mrb[63].mxu1 }
 0x29c   : > { %v6254_v14 = vadd.f32 %v4147_v45, %v2416_v54  ;;  %v4150_v58 = vadd.f32 %v4149_v61, %v4148_v23  ;;  %v6284_v23 = vpop.permute.xlu1 %2945 }
 0x29d   : > { %2802 = vmatmul.mubr.bf16.gmra.mrb[124].mxu0 %v4671_v44 }
 0x29e   : > { %4411 = vmatmul.mubr.msk.bf16.gmra.mrb[120].mxu1 %vm3284_vm15, %v4673_v31  ;;  %v6257_v35 = vadd.f32 %v4150_v58, %v2419_v36  ;;  %v6282_v31 = vpop.permute.xlu0 %2940 }
 0x29f   : > { %4414 = vmatprep.mubr.msk.bf16.mxu1 %vm3284_vm15, %v4674_v47 }
 0x2a6   : > { %4415 = vmatmul.mubr.msk.bf16.gmra.mrb[124].mxu1 %vm3284_vm15, %v4675_v57 }
 0x2cc   : > { %v4167_v1 = vpop.f32.mrb[64].mxu0 }
 0x2cd   : > { %v4168_v59 = vpop.f32.mrb[65].mxu0 }
 0x2ce   : > { %v4169_v19 = vadd.f32 %v4168_v59, %v4167_v1  ;;  %v4170_v34 = vpop.f32.mrb[66].mxu0 }
 0x2cf   : > { %v4171_v10 = vpop.f32.mrb[67].mxu0 }
 0x2d0   : > { %v2554_v17 = vadd.f32 %v4169_v19, %v6105_v43  ;;  %v4172_v22 = vadd.f32 %v4171_v10, %v4170_v34 }
 0x2d2   : > { %v2557_v60 = vadd.f32 %v4172_v22, %v6112_v30 }
 0x2d4   : > { %v4173_v29 = vpop.f32.mrb[68].mxu0 }
 0x2d5   : > { %v4174_v32 = vpop.f32.mrb[69].mxu0 }
 0x2d6   : > { %v4175_v51 = vadd.f32 %v4174_v32, %v4173_v29  ;;  %v4176_v2 = vpop.f32.mrb[70].mxu0 }
 0x2d7   : > { %v4177_v3 = vpop.f32.mrb[71].mxu0 }
 0x2d8   : > { %v2562_v28 = vadd.f32 %v4175_v51, %v6134_v63  ;;  %v4178_v55 = vadd.f32 %v4177_v3, %v4176_v2 }
 0x2da   : > { %v2565_v54 = vadd.f32 %v4178_v55, %v6137_v53 }
 0x2dc   : > { %v4179_v40 = vpop.f32.mrb[72].mxu0 }
 0x2dd   : > { %v4180_v11 = vpop.f32.mrb[73].mxu0 }
 0x2de   : > { %v4181_v36 = vadd.f32 %v4180_v11, %v4179_v40  ;;  %v4182_v18 = vpop.f32.mrb[74].mxu0 }
 0x2df   : > { %v4183_v15 = vpop.f32.mrb[75].mxu0 }
 0x2e0   : > { %v2570_v43 = vadd.f32 %v4181_v36, %v6158_v38  ;;  %v4184_v30 = vadd.f32 %v4183_v15, %v4182_v18  ;;  %v4231_v62 = vpop.f32.mrb[64].mxu1 }
 0x2e1   : > { %v4232_v50 = vpop.f32.mrb[65].mxu1 }
 0x2e2   : > { %v2573_v48 = vadd.f32 %v4184_v30, %v6161_v16  ;;  %v4233_v49 = vadd.f32 %v4232_v50, %v4231_v62  ;;  %v4234_v33 = vpop.f32.mrb[66].mxu1 }
 0x2e3   : > { %v4235_v63 = vpop.f32.mrb[67].mxu1 }
 0x2e4   : > { %v6272_v9 = vadd.f32 %v4233_v49, %v2554_v17  ;;  %v4236_v53 = vadd.f32 %v4235_v63, %v4234_v33  ;;  %v4185_v46 = vpop.f32.mrb[76].mxu0  ;;  %v6291_v17 = vpop.permute.xlu0 %2950 }
 0x2e5   : > { %v4186_v13 = vpop.f32.mrb[77].mxu0 }
 0x2e6   : > { %v6278_v56 = vadd.f32 %v4236_v53, %v2557_v60  ;;  %v4187_v38 = vadd.f32 %v4186_v13, %v4185_v46  ;;  %v4188_v5 = vpop.f32.mrb[78].mxu0  ;;  %v6293_v60 = vpop.permute.xlu1 %2955 }
 0x2e7   : > { %v4189_v7 = vpop.f32.mrb[79].mxu0 }
 0x2e8   : > { %v2578_v20 = vadd.f32 %v4187_v38, %v6180_v37  ;;  %v4190_v16 = vadd.f32 %v4189_v7, %v4188_v5  ;;  %v4237_v21 = vpop.f32.mrb[68].mxu1  ;;  %v6300_v36 = vpop.permute.xlu0 %2960 }
 0x2e9   : > { %v4238_v24 = vpop.f32.mrb[69].mxu1 }
 0x2ea   : > { %v2581_v26 = vadd.f32 %v4190_v16, %v6183_v52  ;;  %v4239_v44 = vadd.f32 %v4238_v24, %v4237_v21  ;;  %v4240_v41 = vpop.f32.mrb[70].mxu1  ;;  %v6302_v15 = vpop.permute.xlu1 %2965 }
 0x2eb   : > { %v4241_v45 = vpop.f32.mrb[71].mxu1 }
 0x2ec   : > { %v6286_v47 = vadd.f32 %v4239_v44, %v2562_v28  ;;  %v4242_v61 = vadd.f32 %v4241_v45, %v4240_v41  ;;  %v4191_v58 = vpop.f32.mrb[80].mxu0  ;;  %v6308_v13 = vpop.permute.xlu0 %2970 }
 0x2ed   : > { %v4192_v57 = vpop.f32.mrb[81].mxu0 }
 0x2ee   : > { %v6288_v1 = vadd.f32 %v4242_v61, %v2565_v54  ;;  %v4193_v37 = vadd.f32 %v4192_v57, %v4191_v58  ;;  %v4194_v59 = vpop.f32.mrb[82].mxu0  ;;  %v6310_v5 = vpop.permute.xlu1 %2975 }
 0x2ef   : > { %v4195_v19 = vpop.f32.mrb[83].mxu0 }
 0x2f0   : > { %v2586_v34 = vadd.f32 %v4193_v37, %v6200_v0  ;;  %v4196_v52 = vadd.f32 %v4195_v19, %v4194_v59  ;;  %v4243_v10 = vpop.f32.mrb[72].mxu1  ;;  %v6316_v58 = vpop.permute.xlu0 %2980 }
 0x2f1   : > { %v4244_v22 = vpop.f32.mrb[73].mxu1 }
 0x2f2   : > { %v2589_v29 = vadd.f32 %v4196_v52, %v6203_v6  ;;  %v4245_v32 = vadd.f32 %v4244_v22, %v4243_v10  ;;  %v4246_v51 = vpop.f32.mrb[74].mxu1  ;;  %v6318_v37 = vpop.permute.xlu1 %2985 }
 0x2f3   : > { %v4247_v2 = vpop.f32.mrb[75].mxu1 }
 0x2f4   : > { %v6296_v3 = vadd.f32 %v4245_v32, %v2570_v43  ;;  %v4248_v28 = vadd.f32 %v4247_v2, %v4246_v51  ;;  %v4197_v55 = vpop.f32.mrb[84].mxu0 }
 0x2f5   : > { %v4198_v54 = vpop.f32.mrb[85].mxu0 }
 0x2f6   : > { %v6298_v40 = vadd.f32 %v4248_v28, %v2573_v48  ;;  %v4199_v0 = vadd.f32 %v4198_v54, %v4197_v55  ;;  %v4200_v11 = vpop.f32.mrb[86].mxu0  ;;  %v6325_v28 = vpop.permute.xlu0 %2990 }
 0x2f7   : > { %v4201_v18 = vpop.f32.mrb[87].mxu0  ;;  %v6327_v54 = vpop.permute.xlu1 %2995 }
 0x2f8   : > { %v2594_v30 = vadd.f32 %v4199_v0, %v6220_v27  ;;  %v4202_v6 = vadd.f32 %v4201_v18, %v4200_v11  ;;  %v4249_v62 = vpop.f32.mrb[76].mxu1  ;;  %6511 = vst [vmem:[#allocation4_spill] sm:$0xff] %v6327_v54 }
 0x2f9   : > { %v4250_v50 = vpop.f32.mrb[77].mxu1 }
 0x2fa   : > { %v2597_v43 = vadd.f32 %v4202_v6, %v6224_v39  ;;  %v4251_v49 = vadd.f32 %v4250_v50, %v4249_v62  ;;  %v4252_v33 = vpop.f32.mrb[78].mxu1  ;;  %v6334_v50 = vpop.permute.xlu0 %3000 }
 0x2fb   : > { %v4253_v63 = vpop.f32.mrb[79].mxu1  ;;  %6512 = vst [vmem:[#allocation5_spill] sm:$0xff] %v6334_v50 }
 0x2fc   : > { %v6306_v53 = vadd.f32 %v4251_v49, %v2578_v20  ;;  %v4254_v48 = vadd.f32 %v4253_v63, %v4252_v33  ;;  %v4203_v46 = vpop.f32.mrb[88].mxu0 }
 0x2fd   : > { %v4204_v38 = vpop.f32.mrb[89].mxu0 }
 0x2fe   : > { %v6312_v7 = vadd.f32 %v4254_v48, %v2581_v26  ;;  %v4205_v27 = vadd.f32 %v4204_v38, %v4203_v46  ;;  %v4206_v16 = vpop.f32.mrb[90].mxu0 }
 0x2ff   : > { %v4207_v21 = vpop.f32.mrb[91].mxu0 }
 0x300   : > { %v2602_v24 = vadd.f32 %v4205_v27, %v6239_v25  ;;  %v4208_v39 = vadd.f32 %v4207_v21, %v4206_v16  ;;  %v4255_v44 = vpop.f32.mrb[80].mxu1  ;;  %v6340_v27 = vpop.permute.xlu0 %3042 }
 0x301   : > { %v4256_v41 = vpop.f32.mrb[81].mxu1 }
 0x302   : > { %v2605_v20 = vadd.f32 %v4208_v39, %v6242_v4  ;;  %v4257_v45 = vadd.f32 %v4256_v41, %v4255_v44  ;;  %v4258_v61 = vpop.f32.mrb[82].mxu1 }
 0x303   : > { %v4259_v57 = vpop.f32.mrb[83].mxu1 }
 0x304   : > { %v6320_v59 = vadd.f32 %v4257_v45, %v2586_v34  ;;  %v4260_v26 = vadd.f32 %v4259_v57, %v4258_v61  ;;  %v4209_v19 = vpop.f32.mrb[92].mxu0  ;;  %v6346_v41 = vpop.permute.xlu0 %3052 }
 0x305   : > { %v4210_v52 = vpop.f32.mrb[93].mxu0 }
 0x306   : > { %v6322_v10 = vadd.f32 %v4260_v26, %v2589_v29  ;;  %v4211_v25 = vadd.f32 %v4210_v52, %v4209_v19  ;;  %v4212_v22 = vpop.f32.mrb[94].mxu0 }
 0x307   : > { %v4213_v32 = vpop.f32.mrb[95].mxu0 }
 0x308   : > { %v2610_v51 = vadd.f32 %v4211_v25, %v6254_v14  ;;  %v4214_v4 = vadd.f32 %v4213_v32, %v4212_v22  ;;  %v4261_v2 = vpop.f32.mrb[84].mxu1  ;;  %v6336_v14 = vpop.permute.xlu1 %3037 }
 0x309   : > { %v4262_v55 = vpop.f32.mrb[85].mxu1  ;;  %v6354_v19 = vpop.permute.xlu0 %3062 }
 0x30a   : > { %v2613_v34 = vadd.f32 %v4214_v4, %v6257_v35  ;;  %v4263_v0 = vadd.f32 %v4262_v55, %v4261_v2  ;;  %v4264_v11 = vpop.f32.mrb[86].mxu1 }
 0x30b   : > { %v4265_v18 = vpop.f32.mrb[87].mxu1 }
 0x30c   : > { %v6330_v6 = vadd.f32 %v4263_v0, %v2594_v30  ;;  %v4266_v29 = vadd.f32 %v4265_v18, %v4264_v11  ;;  %v6342_v16 = vpop.permute.xlu1 %3047 }
 0x30e   : > { %v6332_v62 = vadd.f32 %v4266_v29, %v2597_v43 }
 0x310   : > { %v4267_v49 = vpop.f32.mrb[88].mxu1  ;;  %v6348_v61 = vpop.permute.xlu1 %3057 }
 0x311   : > { %v4268_v33 = vpop.f32.mrb[89].mxu1 }
 0x312   : > { %v4269_v63 = vadd.f32 %v4268_v33, %v4267_v49  ;;  %v4270_v48 = vpop.f32.mrb[90].mxu1 }
 0x313   : > { %v4271_v46 = vpop.f32.mrb[91].mxu1 }
 0x314   : > { %v6338_v38 = vadd.f32 %v4269_v63, %v2602_v24  ;;  %v4272_v35 = vadd.f32 %v4271_v46, %v4270_v48  ;;  %v6356_v52 = vpop.permute.xlu1 %3067 }
 0x316   : > { %v6344_v30 = vadd.f32 %v4272_v35, %v2605_v20  ;;  %v6358_v20 = vpop.permute.xlu0 %3072 }
 0x318   : > { %v4273_v43 = vpop.f32.mrb[92].mxu1  ;;  %v6360_v25 = vpop.permute.xlu1 %3077 }
 0x319   : > { %v4274_v21 = vpop.f32.mrb[93].mxu1 }
 0x31a   : > { %v4275_v39 = vadd.f32 %v4274_v21, %v4273_v43  ;;  %v4276_v44 = vpop.f32.mrb[94].mxu1  ;;  %v6362_v22 = vpop.permute.xlu0 %3082 }
 0x31b   : > { %v4277_v45 = vpop.f32.mrb[95].mxu1  ;;  %6515 = vst [vmem:[#allocation8_spill] sm:$0xff] %v6362_v22 }
 0x31c   : > { %v6350_v57 = vadd.f32 %v4275_v39, %v2610_v51  ;;  %v4278_v24 = vadd.f32 %v4277_v45, %v4276_v44  ;;  %v6364_v32 = vpop.permute.xlu1 %3087 }
 0x31e   : > { %6513 = vst [vmem:[#allocation6_spill] sm:$0xff] %v6350_v57  ;;  %v6352_v26 = vadd.f32 %v4278_v24, %v2613_v34  ;;  %v6366_v4 = vpop.permute.xlu0 %3092 }
 0x320   : > { %6514 = vst [vmem:[#allocation7_spill] sm:$0xff] %v6352_v26  ;;  %v6368_v2 = vpop.permute.xlu1 %3097 }
 0x321   : > { %6516 = vst [vmem:[#allocation9_spill] sm:$0xff] %v6368_v2 }
 0x322   : > { %v6370_v55 = vpop.permute.xlu0 %3102 }
 0x323   : > { %6517 = vst [vmem:[#allocation10_spill] sm:$0xff] %v6370_v55 }
 0x324   : > { %v6372_v0 = vpop.permute.xlu1 %3107 }
 0x325   : > { %6518 = vst [vmem:[#allocation11_spill] sm:$0xff] %v6372_v0 }
 0x326   : > { %v6376_v48 = vpop.permute.xlu0 %3112 }
 0x327   : > { %6519 = vst [vmem:[#allocation12_spill] sm:$0xff] %v6376_v48 }
 0x328   : > { %v6378_v46 = vpop.permute.xlu1 %3166 }
 0x32a   : > { %v6385_v48 = vpop.permute.xlu0 %3171 }
 0x338   : > { %v4295_v51 = vpop.f32.mrb[96].mxu0 }
 0x339   : > { %v4296_v34 = vpop.f32.mrb[97].mxu0 }
 0x33a   : > { %v4297_v11 = vadd.f32 %v4296_v34, %v4295_v51  ;;  %v4298_v18 = vpop.f32.mrb[98].mxu0 }
 0x33b   : > { %v4299_v29 = vpop.f32.mrb[99].mxu0 }
 0x33c   : > { %v4300_v49 = vadd.f32 %v4299_v29, %v4298_v18  ;;  %v2748_v33 = vadd.f32 %v4297_v11, %v6272_v9 }
 0x33e   : > { %v2751_v63 = vadd.f32 %v4300_v49, %v6278_v56 }
 0x340   : > { %v4301_v35 = vpop.f32.mrb[100].mxu0 }
 0x341   : > { %v4302_v43 = vpop.f32.mrb[101].mxu0  ;;  %v4386_v21 = vpop.f32.mrb[96].mxu1 }
 0x342   : > { %v4303_v39 = vadd.f32 %v4302_v43, %v4301_v35  ;;  %v4304_v44 = vpop.f32.mrb[102].mxu0  ;;  %v2844_v45 = vpop.f32.mrb[97].mxu1 }
 0x343   : > { %v2845_v24 = vadd.f32 %v2844_v45, %v2748_v33  ;;  %v4305_v55 = vpop.f32.mrb[103].mxu0  ;;  %v4387_v51 = vpop.f32.mrb[98].mxu1 }
 0x344   : > { %v2756_v34 = vadd.f32 %v4303_v39, %v6286_v47  ;;  %v4306_v18 = vadd.f32 %v4305_v55, %v4304_v44  ;;  %v2847_v29 = vpop.f32.mrb[99].mxu1  ;;  %v3177_v43 = vpop.permute.xlu1 %3176 }
 0x345   : > { %v6382_v9 = vmul.f32 %v6274_v12, %v2845_v24  ;;  %v2848_v56 = vadd.f32 %v2847_v29, %v2751_v63 }
 0x346   : > { %v2853_v11 = vadd.f32 %v4386_v21, %v2756_v34  ;;  %v2759_v49 = vadd.f32 %v4306_v18, %v6288_v1  ;;  %v3182_v18 = vpop.permute.xlu0 %3181 }
 0x347   : > { %v6388_v35 = vmul.f32 %v6268_v8, %v2848_v56 }
 0x348   : > { %v2856_v33 = vadd.f32 %v4387_v51, %v2759_v49  ;;  %v4307_v45 = vpop.f32.mrb[104].mxu0  ;;  %v6392_v8 = vpop.permute.xlu1 %3186 }
 0x349   : > { %v4308_v2 = vpop.f32.mrb[105].mxu0  ;;  %v4390_v50 = vpop.f32.mrb[100].mxu1 }
 0x34a   : > { %v4309_v47 = vadd.f32 %v4308_v2, %v4307_v45  ;;  %v4310_v55 = vpop.f32.mrb[106].mxu0  ;;  %v2860_v39 = vpop.f32.mrb[101].mxu1 }
 0x34b   : > { %v4311_v44 = vpop.f32.mrb[107].mxu0  ;;  %v4391_v12 = vpop.f32.mrb[102].mxu1 }
 0x34c   : > { %v4312_v24 = vadd.f32 %v4311_v44, %v4310_v55  ;;  %v2764_v63 = vadd.f32 %v4309_v47, %v6296_v3  ;;  %v2863_v21 = vpop.f32.mrb[103].mxu1 }
 0x34e   : > { %v2861_v1 = vadd.f32 %v2860_v39, %v2764_v63  ;;  %v2767_v34 = vadd.f32 %v4312_v24, %v6298_v40 }
 0x350   : > { %v6395_v51 = vmul.f32 %v6284_v23, %v2861_v1  ;;  %v2864_v29 = vadd.f32 %v2863_v21, %v2767_v34  ;;  %v4313_v56 = vpop.f32.mrb[108].mxu0  ;;  %v6402_v1 = vpop.permute.xlu0 %3191 }
 0x351   : > { %v4314_v2 = vpop.f32.mrb[109].mxu0  ;;  %v4394_v49 = vpop.f32.mrb[104].mxu1 }
 0x352   : > { %v6398_v45 = vmul.f32 %v6291_v17, %v2864_v29  ;;  %v4315_v55 = vadd.f32 %v4314_v2, %v4313_v56  ;;  %v4316_v44 = vpop.f32.mrb[110].mxu0  ;;  %v2876_v3 = vpop.f32.mrb[105].mxu1 }
 0x353   : > { %v4317_v47 = vpop.f32.mrb[111].mxu0  ;;  %v4395_v39 = vpop.f32.mrb[106].mxu1 }
 0x354   : > { %v2772_v40 = vadd.f32 %v4315_v55, %v6306_v53  ;;  %v4318_v24 = vadd.f32 %v4317_v47, %v4316_v44  ;;  %v2879_v63 = vpop.f32.mrb[107].mxu1  ;;  %v3197_v21 = vpop.permute.xlu1 %3196 }
 0x355   : > { %v3202_v47 = vpop.permute.xlu0 %3201 }
 0x356   : > { %v2869_v0 = vadd.f32 %v4390_v50, %v2772_v40  ;;  %v2775_v23 = vadd.f32 %v4318_v24, %v6312_v7  ;;  %v3005_v7 = vmul.f32 %v6276_v42, %v2853_v11  ;;  %v3006_v40 = vmul.f32 %v6282_v31, %v2856_v33 }
 0x357   : > { %v3115_v31 = vadd.f32 %v6336_v14, %v6382_v9 }
 0x358   : > { %v2872_v34 = vadd.f32 %v4391_v12, %v2775_v23  ;;  %v4319_v54 = vpop.f32.mrb[112].mxu0 }
 0x359   : > { %v4320_v26 = vpop.f32.mrb[113].mxu0  ;;  %v6404_v17 = vpop.f32.mrb[108].mxu1 }
 0x35a   : > { %v4321_v29 = vadd.f32 %v4320_v26, %v4319_v54  ;;  %v4322_v56 = vpop.f32.mrb[114].mxu0  ;;  %v6406_v2 = vpop.f32.mrb[109].mxu1 }
 0x35b   : > { %v4323_v22 = vpop.f32.mrb[115].mxu0  ;;  %v6408_v57 = vpop.f32.mrb[110].mxu1 }
 0x35c   : > { %v2780_v53 = vadd.f32 %v4321_v29, %v6320_v59  ;;  %v4324_v50 = vadd.f32 %v4323_v22, %v4322_v56  ;;  %v6411_v55 = vpop.f32.mrb[111].mxu1  ;;  %v6416_v54 = vpop.permute.xlu1 %3206  ;;  %v3117_v56 = vadd.f32 %v6342_v16, %v3005_v7 }
 0x35e   : > { %v2877_v44 = vadd.f32 %v2876_v3, %v2780_v53  ;;  %v2783_v12 = vadd.f32 %v4324_v50, %v6322_v10 }
 0x360   : > { %v2880_v26 = vadd.f32 %v2879_v63, %v2783_v12  ;;  %v4325_v24 = vpop.f32.mrb[116].mxu0  ;;  %v6419_v23 = vmul.f32 %v6302_v15, %v2877_v44  ;;  %v3118_v15 = vadd.f32 %v6346_v41, %v3006_v40  ;;  %v3009_v41 = vmul.f32 %v6293_v60, %v2869_v0 }
 0x361   : > { %v4326_v59 = vpop.f32.mrb[117].mxu0  ;;  %v4404_v22 = vpop.f32.mrb[112].mxu1 }
 0x362   : > { %v4327_v29 = vadd.f32 %v4326_v59, %v4325_v24  ;;  %v3356_v42 = vadd.f32 %v4404_v22, %v3177_v43  ;;  %v4328_v11 = vpop.f32.mrb[118].mxu0  ;;  %v3347_v3 = vpop.f32.mrb[113].mxu1  ;;  %v6423_v10 = vmul.f32 %v6308_v13, %v2880_v26  ;;  %v3116_v13 = vadd.f32 %v6340_v27, %v6388_v35 }
 0x363   : > { %v3348_v33 = vadd.f32 %v3347_v3, %v6378_v46  ;;  %v4329_v63 = vpop.f32.mrb[119].mxu0  ;;  %v4405_v53 = vpop.f32.mrb[114].mxu1  ;;  %v3010_v27 = vmul.f32 %v6300_v36, %v2872_v34  ;;  %v3121_v0 = vadd.f32 %v6356_v52, %v3009_v41  ;;  %v6520_v41 = vld [vmem:[#allocation6_spill] sm:$0xff] }
 0x364   : > { %v2788_v50 = vadd.f32 %v4327_v29, %v6330_v6  ;;  %v3412_v44 = vadd.f32 %v3356_v42, %v3117_v56  ;;  %v4330_v16 = vadd.f32 %v4329_v63, %v4328_v11  ;;  %v3359_v43 = vadd.f32 %v4405_v53, %v3182_v18  ;;  %v3350_v7 = vpop.f32.mrb[115].mxu1  ;;  %v6441_v6 = vpop.permute.xlu0 %3211 }
 0x365   : > { %v3410_v12 = vadd.f32 %v3348_v33, %v3115_v31  ;;  %v3351_v26 = vadd.f32 %v3350_v7, %v6385_v48  ;;  %v3217_v35 = vpop.permute.xlu1 %3216  ;;  %v3119_v42 = vadd.f32 %v6348_v61, %v6395_v51 }
 0x366   : > { %v2885_v14 = vadd.f32 %v4394_v49, %v2788_v50  ;;  %v2791_v46 = vadd.f32 %v4330_v16, %v6332_v62  ;;  %v3413_v9 = vadd.f32 %v3359_v43, %v3118_v15 }
 0x367   : > { %v3411_v18 = vadd.f32 %v3351_v26, %v3116_v13 }
 0x368   : > { %v2888_v48 = vadd.f32 %v4395_v39, %v2791_v46  ;;  %v3856_v49 = vpack.c.bf16 %v3413_v9, %v3412_v44  ;;  %v4331_v40 = vpop.f32.mrb[120].mxu0  ;;  %v3122_v39 = vadd.f32 %v6358_v20, %v3010_v27  ;;  %v3013_v20 = vmul.f32 %v6310_v5, %v2885_v14  ;;  %v3222_v50 = vpop.permute.xlu0 %3221 }
 0x369   : > { %v3851_v62 = vpack.c.bf16 %v3411_v18, %v3410_v12  ;;  %v4332_v24 = vpop.f32.mrb[121].mxu0  ;;  %v4408_v59 = vpop.f32.mrb[116].mxu1 }
 0x36a   : > { %3888 = vst [vmem:[%s6439_s20 + $0x8] sm:$0xff] %v3856_v49   ;;  %v4333_v60 = vadd.f32 %v4332_v24, %v4331_v40  ;;  %v3372_v22 = vadd.f32 %v4408_v59, %v3197_v21  ;;  %v4334_v29 = vpop.f32.mrb[122].mxu0  ;;  %v3363_v56 = vpop.f32.mrb[117].mxu1  ;;  %v3120_v21 = vadd.f32 %v6354_v19, %v6398_v45  ;;  %v3014_v44 = vmul.f32 %v6316_v58, %v2888_v48 }
 0x36b   : > { %3852 = vst [vmem:[%s6439_s20] sm:$0xff] %v3851_v62   ;;  %v3364_v36 = vadd.f32 %v3363_v56, %v6392_v8  ;;  %v4335_v34 = vpop.f32.mrb[123].mxu0  ;;  %v4409_v11 = vpop.f32.mrb[118].mxu1  ;;  %v3125_v12 = vadd.f32 %v6364_v32, %v3013_v20 }
 0x36c   : > { %v2796_v3 = vadd.f32 %v4333_v60, %v6338_v38  ;;  %v3416_v31 = vadd.f32 %v3372_v22, %v3121_v0  ;;  %v4336_v33 = vadd.f32 %v4335_v34, %v4334_v29  ;;  %v3375_v63 = vadd.f32 %v4409_v11, %v3202_v47  ;;  %v3366_v15 = vpop.f32.mrb[119].mxu1  ;;  %v3227_v47 = vpop.permute.xlu1 %3226  ;;  %v6523_v22 = vld [vmem:[#allocation4_spill] sm:$0xff]  ;;  %v6524_v34 = vld [vmem:[#allocation11_spill] sm:$0xff]  ;;  %v6525_v11 = vld [vmem:[#allocation5_spill] sm:$0xff] }
 0x36d   : > { %v3414_v52 = vadd.f32 %v3364_v36, %v3119_v42  ;;  %v3367_v53 = vadd.f32 %v3366_v15, %v6402_v1  ;;  %v3232_v49 = vpop.permute.xlu0 %3231 }
 0x36e   : > { %v2893_v61 = vadd.f32 %v6406_v2, %v2796_v3  ;;  %v2799_v8 = vadd.f32 %v4336_v33, %v6344_v30  ;;  %v3417_v51 = vadd.f32 %v3375_v63, %v3122_v39 }
 0x36f   : > { %v3415_v38 = vadd.f32 %v3367_v53, %v3120_v21 }
 0x370   : > { %v2896_v16 = vadd.f32 %v6411_v55, %v2799_v8  ;;  %v3866_v43 = vpack.c.bf16 %v3417_v51, %v3416_v31  ;;  %v4337_v19 = vpop.f32.mrb[124].mxu0  ;;  %v3015_v45 = vmul.f32 %v6318_v37, %v2893_v61  ;;  %v3123_v55 = vadd.f32 %v6360_v25, %v6419_v23  ;;  %v6522_v23 = vld [vmem:[#allocation7_spill] sm:$0xff]  ;;  %v3237_v56 = vpop.permute.xlu1 %3236  ;;  %v6526_v31 = vld [vmem:[#allocation9_spill] sm:$0xff]  ;;  %v6528_v51 = vld [vmem:[#allocation10_spill] sm:$0xff] }
 0x371   : > { %v3861_v1 = vpack.c.bf16 %v3415_v38, %v3414_v52  ;;  %v4338_v7 = vpop.f32.mrb[125].mxu0  ;;  %v4412_v2 = vpop.f32.mrb[120].mxu1  ;;  %v3126_v37 = vadd.f32 %v6366_v4, %v3014_v44  ;;  %v6527_v52 = vld [vmem:[#allocation12_spill] sm:$0xff] }
 0x372   : > { %3890 = vst [vmem:[%s6439_s20 + $0x18] sm:$0xff] %v3866_v43   ;;  %v4339_v30 = vadd.f32 %v4338_v7, %v4337_v19  ;;  %v3388_v5 = vadd.f32 %v4412_v2, %v3217_v35  ;;  %v4340_v13 = vpop.f32.mrb[126].mxu0  ;;  %v3379_v26 = vpop.f32.mrb[121].mxu1  ;;  %v3016_v58 = vmul.f32 %v6325_v28, %v2896_v16  ;;  %v6521_v28 = vld [vmem:[#allocation8_spill] sm:$0xff]  ;;  %v3127_v33 = vadd.f32 %v6526_v31, %v3015_v45 }
 0x373   : > { %3889 = vst [vmem:[%s6439_s20 + $0x10] sm:$0xff] %v3861_v1   ;;  %v3380_v14 = vadd.f32 %v3379_v26, %v6416_v54  ;;  %v4341_v46 = vpop.f32.mrb[127].mxu0  ;;  %v4413_v9 = vpop.f32.mrb[122].mxu1  ;;  %v3124_v62 = vadd.f32 %v6521_v28, %v6423_v10 }
 0x374   : > { %v2804_v18 = vadd.f32 %v4339_v30, %v6520_v41  ;;  %v3420_v27 = vadd.f32 %v3388_v5, %v3125_v12  ;;  %v4342_v48 = vadd.f32 %v4341_v46, %v4340_v13  ;;  %v3391_v32 = vadd.f32 %v4413_v9, %v3222_v50  ;;  %v3382_v35 = vpop.f32.mrb[123].mxu1  ;;  %v3242_v3 = vpop.permute.xlu0 %3241 }
 0x375   : > { %v3418_v40 = vadd.f32 %v3380_v14, %v3123_v55  ;;  %v3383_v25 = vadd.f32 %v3382_v35, %v6441_v6  ;;  %v3128_v20 = vadd.f32 %v6528_v51, %v3016_v58 }
 0x376   : > { %v2901_v54 = vadd.f32 %v6404_v17, %v2804_v18  ;;  %v2807_v4 = vadd.f32 %v4342_v48, %v6522_v23  ;;  %v3421_v24 = vadd.f32 %v3391_v32, %v3126_v37 }
 0x377   : > { %v3419_v59 = vadd.f32 %v3383_v25, %v3124_v62 }
 0x378   : > { %v2904_v60 = vadd.f32 %v6408_v57, %v2807_v4  ;;  %v3876_v0 = vpack.c.bf16 %v3421_v24, %v3420_v27  ;;  %v3017_v29 = vmul.f32 %v6523_v22, %v2901_v54 }
 0x379   : > { %v3871_v42 = vpack.c.bf16 %v3419_v59, %v3418_v40  ;;  %v4416_v36 = vpop.f32.mrb[124].mxu1 }
 0x37a   : > { %3892 = vst [vmem:[%s6439_s20 + $0x28] sm:$0xff] %v3876_v0   ;;  %v3129_v10 = vadd.f32 %v6524_v34, %v3017_v29  ;;  %v3404_v39 = vadd.f32 %v4416_v36, %v3237_v56  ;;  %v3395_v6 = vpop.f32.mrb[125].mxu1  ;;  %v3018_v17 = vmul.f32 %v6525_v11, %v2904_v60 }
 0x37b   : > { %3891 = vst [vmem:[%s6439_s20 + $0x20] sm:$0xff] %v3871_v42   ;;  %v3396_v57 = vadd.f32 %v3395_v6, %v3227_v47  ;;  %v4417_v63 = vpop.f32.mrb[126].mxu1 }
 0x37c   : > { %v3424_v15 = vadd.f32 %v3404_v39, %v3129_v10  ;;  %v3130_v21 = vadd.f32 %v6527_v52, %v3018_v17  ;;  %v3407_v53 = vadd.f32 %v4417_v63, %v3242_v3  ;;  %v3398_v61 = vpop.f32.mrb[127].mxu1 }
 0x37d   : > { %v3422_v8 = vadd.f32 %v3396_v57, %v3127_v33  ;;  %v3399_v50 = vadd.f32 %v3398_v61, %v3232_v49 }
 0x37e   : > { %v3425_v38 = vadd.f32 %v3407_v53, %v3130_v21 }
 0x37f   : > { %v3423_v44 = vadd.f32 %v3399_v50, %v3128_v20 }
 0x380   : > { %v3886_v16 = vpack.c.bf16 %v3425_v38, %v3424_v15 }
 0x381   : > { %v3881_v43 = vpack.c.bf16 %v3423_v44, %v3422_v8 }
 0x382   : > { %3894 = vst [vmem:[%s6439_s20 + $0x38] sm:$0xff] %v3886_v16  }
 0x383   : > { %3893 = vst [vmem:[%s6439_s20 + $0x30] sm:$0xff] %v3881_v43  }
 0x384 PF: > { %s18_s9 = sadd.s32 1, %s4730_s9   ;;  %s6529_s27 = smov %s4718_s28 }
 0x385   : > { %p15_p10 = scmp.ge.s32.totalorder %s18_s9, 4   ;;  %s6530_s28 = smov %s4831_s14 }
 0x386   : > { %s6531_s29 = smov %s4726_s30  ;;  %s6532_s30 = smov %s6534_s10 }
 0x387   :  { %17 = sbr.rel (!%p15_p10) target bundleno = 3 (0x3), region = 180 }

</bundles_post_ra>
